<compile_context>
chip_gen: v5e
topology: v5e:2x2
jax: 0.10.0
libtpu: 0.0.40
codegen_flags: <defaults>
</compile_context>

<pallas_src>
import jax
import jax.numpy as jnp
from jax import lax
from jax.experimental import pallas as pl
from jax.experimental.pallas import tpu as pltpu

EPS = 1e-5
ROW_CHUNK = 64   # sublane chunk; keeps per-chunk live vregs comfortably < 64
LANE_W = 128     # gamma/beta packed 128 channels per sublane row


def make_cat_bn_kernel(channel_sizes, eps=EPS, chunk=ROW_CHUNK):
    """Kernel: fused channel-concat + training-mode BatchNorm over (C, H*W)."""
    offsets = []
    off = 0
    for c in channel_sizes:
        offsets.append(off)
        off += c
    n_in = len(channel_sizes)
    n_gamma_rows = pl.cdiv(off, LANE_W)   # sublane rows holding gamma in gb

    # Every chunk must stay inside one 128-lane window of the packed gamma/beta
    # array and stay sublane-aligned (true for DenseNet sizes 512 + 12*32).
    for c, base in zip(channel_sizes, offsets):
        for r0 in range(0, c, chunk):
            rows = min(chunk, c - r0)
            assert (base + r0) % 8 == 0 and rows % 8 == 0
            assert ((base + r0) % LANE_W) + rows <= LANE_W

    def kernel(*refs):
        x_refs = refs[:n_in]
        gb_ref = refs[n_in]          # (2*C/128, 128): gamma rows then beta rows
        o_ref = refs[n_in + 1]       # (C, H*W)
        inv_r = 1.0 / o_ref.shape[1]  # 1 / (N*H*W), static

        def lane_to_col(win, rows, p):
            # win: (1, 128) lane-major slice.  Returns (rows, 1) column with
            # col[i] = win[0, p + i].  Masked select + lane reduction; rides
            # otherwise-idle VPU/XLU slots, avoids any awkward transpose.
            lane = lax.broadcasted_iota(jnp.int32, (rows, LANE_W), 1)
            sub = lax.broadcasted_iota(jnp.int32, (rows, LANE_W), 0)
            sel = jnp.where(lane == sub + p, win, 0.0)
            return jnp.sum(sel, axis=1, keepdims=True)

        for x_ref, ci, base in zip(x_refs, channel_sizes, offsets):
            for r0 in range(0, ci, chunk):
                rows = min(chunk, ci - r0)
                c0 = base + r0                 # global channel offset (static)
                w = c0 // LANE_W               # packed gamma row index
                p = c0 % LANE_W                # lane offset inside that row

                x = x_ref[r0:r0 + rows, :].astype(jnp.float32)   # (rows, 49)
                # One-pass stats along the lane (spatial) axis.
                s = jnp.sum(x, axis=1, keepdims=True)            # (rows, 1)
                ss = jnp.sum(x * x, axis=1, keepdims=True)       # (rows, 1)
                mean = s * inv_r
                # Clamp: E[x^2] - E[x]^2 can go slightly negative in f32.
                var = jnp.maximum(ss * inv_r - mean * mean, 0.0)

                # Lane-major gamma/beta window -> per-channel (rows,1) columns.
                g_col = lane_to_col(gb_ref[w:w + 1, :], rows, p)
                b_col = lane_to_col(
                    gb_ref[n_gamma_rows + w:n_gamma_rows + w + 1, :], rows, p)

                scale = g_col * lax.rsqrt(var + eps)
                shift = b_col - mean * scale
                # Folded affine: one mul + add per element ("fused cat" write).
                o_ref[c0:c0 + rows, :] = (x * scale + shift).astype(o_ref.dtype)

    return kernel


def cat_batchnorm(inputs_nchw, gamma, beta, eps=EPS):
    """inputs_nchw: list of (1, Ci, H, W); concat on channel dim + BN (training stats)."""
    N, _, H, W = inputs_nchw[0].shape
    assert N == 1  # (Ci, H*W) view relies on batch dim == 1
    channel_sizes = tuple(int(x.shape[1]) for x in inputs_nchw)
    C = sum(channel_sizes)
    R = N * H * W
    assert C % LANE_W == 0

    # Contiguous row-major reshapes only; no transposes, no concat on the XLA side.
    mats = [x.reshape(c, R) for x, c in zip(inputs_nchw, channel_sizes)]
    # Pack gamma/beta lane-major: rows [0, C/128) = gamma, rows [C/128, 2C/128) = beta.
    gb = jnp.concatenate(
        [gamma.reshape(-1).astype(jnp.float32),
         beta.reshape(-1).astype(jnp.float32)]).reshape(2 * C // LANE_W, LANE_W)

    vmem = pltpu.MemorySpace.VMEM
    out2d = pl.pallas_call(
        make_cat_bn_kernel(channel_sizes, eps=eps),
        out_shape=jax.ShapeDtypeStruct((C, R), inputs_nchw[0].dtype),
        in_specs=[pl.BlockSpec(memory_space=vmem) for _ in range(len(mats) + 1)],
        out_specs=pl.BlockSpec(memory_space=vmem),
    )(*mats, gb)

    return out2d.reshape(N, C, H, W)


if __name__ == "__main__":
    key = jax.random.PRNGKey(0)
    keys = jax.random.split(key, 15)

    # Shapes from the module: one (1,512,7,7) + twelve (1,32,7,7) -> 896 channels.
    shapes = [(1, 512, 7, 7)] + [(1, 32, 7, 7)] * 12
    inputs = [jax.random.normal(k, s, dtype=jnp.float32)
              for k, s in zip(keys[:13], shapes)]

    C_total = sum(s[1] for s in shapes)  # 896
    # Non-trivial affine params so the gamma/beta packing path is actually exercised.
    gamma = 0.5 + jax.random.uniform(keys[13], (C_total,), dtype=jnp.float32)
    beta = 0.1 * jax.random.normal(keys[14], (C_total,), dtype=jnp.float32)

    out = cat_batchnorm(inputs, gamma, beta)
    out = jax.block_until_ready(out)

    # Plain-JAX reference: training-mode BN over the concatenated tensor.
    x_ref = jnp.concatenate(inputs, axis=1)
    mean = jnp.mean(x_ref, axis=(0, 2, 3), keepdims=True)
    var = jnp.mean((x_ref - mean) ** 2, axis=(0, 2, 3), keepdims=True)
    ref = ((x_ref - mean) / jnp.sqrt(var + EPS)
           * gamma.reshape(1, -1, 1, 1) + beta.reshape(1, -1, 1, 1))

    assert out.shape == (1, C_total, 7, 7), out.shape
    err = float(jnp.max(jnp.abs(out - ref)))
    assert err < 1e-4, err
    print("KERNEL_OK")
</pallas_src>

<mosaic_0001>
module attributes {stable_mosaic.version = 11 : i64} {
  func.func @kernel(%arg0: memref<512x49xf32, #tpu.memory_space<vmem>>, %arg1: memref<32x49xf32, #tpu.memory_space<vmem>>, %arg2: memref<32x49xf32, #tpu.memory_space<vmem>>, %arg3: memref<32x49xf32, #tpu.memory_space<vmem>>, %arg4: memref<32x49xf32, #tpu.memory_space<vmem>>, %arg5: memref<32x49xf32, #tpu.memory_space<vmem>>, %arg6: memref<32x49xf32, #tpu.memory_space<vmem>>, %arg7: memref<32x49xf32, #tpu.memory_space<vmem>>, %arg8: memref<32x49xf32, #tpu.memory_space<vmem>>, %arg9: memref<32x49xf32, #tpu.memory_space<vmem>>, %arg10: memref<32x49xf32, #tpu.memory_space<vmem>>, %arg11: memref<32x49xf32, #tpu.memory_space<vmem>>, %arg12: memref<32x49xf32, #tpu.memory_space<vmem>>, %arg13: memref<14x128xf32, #tpu.memory_space<vmem>>, %arg14: memref<896x49xf32, #tpu.memory_space<vmem>>) attributes {dimension_semantics = [], scalar_prefetch = 0 : i64, scratch_operands = 0 : i64, tpu.core_type = #tpu.core_type<tc>} {
    %c0 = arith.constant 0 : index
    %c0_0 = arith.constant 0 : index
    %0 = vector.load %arg0[%c0, %c0_0] : memref<512x49xf32, #tpu.memory_space<vmem>>, vector<64x49xf32>
    %cst = arith.constant dense<0.000000e+00> : vector<64xf32>
    %1 = vector.multi_reduction <add>, %0, %cst [1] : vector<64x49xf32> to vector<64xf32>
    %2 = vector.shape_cast %1 : vector<64xf32> to vector<64x1xf32>
    %3 = arith.mulf %0, %0 : vector<64x49xf32>
    %cst_1 = arith.constant dense<0.000000e+00> : vector<64xf32>
    %4 = vector.multi_reduction <add>, %3, %cst_1 [1] : vector<64x49xf32> to vector<64xf32>
    %5 = vector.shape_cast %4 : vector<64xf32> to vector<64x1xf32>
    %cst_2 = arith.constant 0.0204081628 : f32
    %6 = vector.broadcast %cst_2 : f32 to vector<64x1xf32>
    %7 = arith.mulf %2, %6 : vector<64x1xf32>
    %cst_3 = arith.constant 0.0204081628 : f32
    %8 = vector.broadcast %cst_3 : f32 to vector<64x1xf32>
    %9 = arith.mulf %5, %8 : vector<64x1xf32>
    %10 = arith.mulf %7, %7 : vector<64x1xf32>
    %11 = arith.subf %9, %10 : vector<64x1xf32>
    %cst_4 = arith.constant 0.000000e+00 : f32
    %12 = vector.broadcast %cst_4 : f32 to vector<64x1xf32>
    %13 = arith.maximumf %11, %12 : vector<64x1xf32>
    %c0_5 = arith.constant 0 : index
    %c0_6 = arith.constant 0 : index
    %14 = vector.load %arg13[%c0_5, %c0_6] : memref<14x128xf32, #tpu.memory_space<vmem>>, vector<1x128xf32>
    %15 = tpu.iota {dimensions = array<i32: 1>} : vector<64x128xi32>
    %16 = tpu.iota {dimensions = array<i32: 0>} : vector<64x128xi32>
    %c0_i32 = arith.constant 0 : i32
    %17 = vector.broadcast %c0_i32 : i32 to vector<64x128xi32>
    %18 = arith.addi %16, %17 : vector<64x128xi32>
    %19 = arith.cmpi eq, %15, %18 : vector<64x128xi32>
    %cst_7 = arith.constant 0.000000e+00 : f32
    %20 = vector.shape_cast %14 : vector<1x128xf32> to vector<1x128xf32>
    %21 = vector.broadcast %20 : vector<1x128xf32> to vector<64x128xf32>
    %22 = vector.broadcast %cst_7 : f32 to vector<64x128xf32>
    %23 = arith.select %19, %21, %22 : vector<64x128xi1>, vector<64x128xf32>
    %cst_8 = arith.constant dense<0.000000e+00> : vector<64xf32>
    %24 = vector.multi_reduction <add>, %23, %cst_8 [1] : vector<64x128xf32> to vector<64xf32>
    %25 = vector.shape_cast %24 : vector<64xf32> to vector<64x1xf32>
    %c7 = arith.constant 7 : index
    %c0_9 = arith.constant 0 : index
    %26 = vector.load %arg13[%c7, %c0_9] : memref<14x128xf32, #tpu.memory_space<vmem>>, vector<1x128xf32>
    %27 = tpu.iota {dimensions = array<i32: 1>} : vector<64x128xi32>
    %28 = tpu.iota {dimensions = array<i32: 0>} : vector<64x128xi32>
    %c0_i32_10 = arith.constant 0 : i32
    %29 = vector.broadcast %c0_i32_10 : i32 to vector<64x128xi32>
    %30 = arith.addi %28, %29 : vector<64x128xi32>
    %31 = arith.cmpi eq, %27, %30 : vector<64x128xi32>
    %cst_11 = arith.constant 0.000000e+00 : f32
    %32 = vector.shape_cast %26 : vector<1x128xf32> to vector<1x128xf32>
    %33 = vector.broadcast %32 : vector<1x128xf32> to vector<64x128xf32>
    %34 = vector.broadcast %cst_11 : f32 to vector<64x128xf32>
    %35 = arith.select %31, %33, %34 : vector<64x128xi1>, vector<64x128xf32>
    %cst_12 = arith.constant dense<0.000000e+00> : vector<64xf32>
    %36 = vector.multi_reduction <add>, %35, %cst_12 [1] : vector<64x128xf32> to vector<64xf32>
    %37 = vector.shape_cast %36 : vector<64xf32> to vector<64x1xf32>
    %cst_13 = arith.constant 9.99999974E-6 : f32
    %38 = vector.broadcast %cst_13 : f32 to vector<64x1xf32>
    %39 = arith.addf %13, %38 : vector<64x1xf32>
    %40 = math.rsqrt %39 : vector<64x1xf32>
    %41 = arith.mulf %25, %40 : vector<64x1xf32>
    %42 = arith.mulf %7, %41 : vector<64x1xf32>
    %43 = arith.subf %37, %42 : vector<64x1xf32>
    %44 = vector.broadcast %41 : vector<64x1xf32> to vector<64x49xf32>
    %45 = arith.mulf %0, %44 : vector<64x49xf32>
    %46 = vector.broadcast %43 : vector<64x1xf32> to vector<64x49xf32>
    %47 = arith.addf %45, %46 : vector<64x49xf32>
    %c0_14 = arith.constant 0 : index
    %c0_15 = arith.constant 0 : index
    %48 = vector.load %arg14[%c0_14, %c0_15] : memref<896x49xf32, #tpu.memory_space<vmem>>, vector<64x49xf32>
    tpu.vector_store %arg14[%c0_14, %c0_15], %47 {strides = array<i32>} : memref<896x49xf32, #tpu.memory_space<vmem>>, vector<64x49xf32>,
    %c64 = arith.constant 64 : index
    %c0_16 = arith.constant 0 : index
    %49 = vector.load %arg0[%c64, %c0_16] : memref<512x49xf32, #tpu.memory_space<vmem>>, vector<64x49xf32>
    %cst_17 = arith.constant dense<0.000000e+00> : vector<64xf32>
    %50 = vector.multi_reduction <add>, %49, %cst_17 [1] : vector<64x49xf32> to vector<64xf32>
    %51 = vector.shape_cast %50 : vector<64xf32> to vector<64x1xf32>
    %52 = arith.mulf %49, %49 : vector<64x49xf32>
    %cst_18 = arith.constant dense<0.000000e+00> : vector<64xf32>
    %53 = vector.multi_reduction <add>, %52, %cst_18 [1] : vector<64x49xf32> to vector<64xf32>
    %54 = vector.shape_cast %53 : vector<64xf32> to vector<64x1xf32>
    %cst_19 = arith.constant 0.0204081628 : f32
    %55 = vector.broadcast %cst_19 : f32 to vector<64x1xf32>
    %56 = arith.mulf %51, %55 : vector<64x1xf32>
    %cst_20 = arith.constant 0.0204081628 : f32
    %57 = vector.broadcast %cst_20 : f32 to vector<64x1xf32>
    %58 = arith.mulf %54, %57 : vector<64x1xf32>
    %59 = arith.mulf %56, %56 : vector<64x1xf32>
    %60 = arith.subf %58, %59 : vector<64x1xf32>
    %cst_21 = arith.constant 0.000000e+00 : f32
    %61 = vector.broadcast %cst_21 : f32 to vector<64x1xf32>
    %62 = arith.maximumf %60, %61 : vector<64x1xf32>
    %c0_22 = arith.constant 0 : index
    %c0_23 = arith.constant 0 : index
    %63 = vector.load %arg13[%c0_22, %c0_23] : memref<14x128xf32, #tpu.memory_space<vmem>>, vector<1x128xf32>
    %64 = tpu.iota {dimensions = array<i32: 1>} : vector<64x128xi32>
    %65 = tpu.iota {dimensions = array<i32: 0>} : vector<64x128xi32>
    %c64_i32 = arith.constant 64 : i32
    %66 = vector.broadcast %c64_i32 : i32 to vector<64x128xi32>
    %67 = arith.addi %65, %66 : vector<64x128xi32>
    %68 = arith.cmpi eq, %64, %67 : vector<64x128xi32>
    %cst_24 = arith.constant 0.000000e+00 : f32
    %69 = vector.shape_cast %63 : vector<1x128xf32> to vector<1x128xf32>
    %70 = vector.broadcast %69 : vector<1x128xf32> to vector<64x128xf32>
    %71 = vector.broadcast %cst_24 : f32 to vector<64x128xf32>
    %72 = arith.select %68, %70, %71 : vector<64x128xi1>, vector<64x128xf32>
    %cst_25 = arith.constant dense<0.000000e+00> : vector<64xf32>
    %73 = vector.multi_reduction <add>, %72, %cst_25 [1] : vector<64x128xf32> to vector<64xf32>
    %74 = vector.shape_cast %73 : vector<64xf32> to vector<64x1xf32>
    %c7_26 = arith.constant 7 : index
    %c0_27 = arith.constant 0 : index
    %75 = vector.load %arg13[%c7_26, %c0_27] : memref<14x128xf32, #tpu.memory_space<vmem>>, vector<1x128xf32>
    %76 = tpu.iota {dimensions = array<i32: 1>} : vector<64x128xi32>
    %77 = tpu.iota {dimensions = array<i32: 0>} : vector<64x128xi32>
    %c64_i32_28 = arith.constant 64 : i32
    %78 = vector.broadcast %c64_i32_28 : i32 to vector<64x128xi32>
    %79 = arith.addi %77, %78 : vector<64x128xi32>
    %80 = arith.cmpi eq, %76, %79 : vector<64x128xi32>
    %cst_29 = arith.constant 0.000000e+00 : f32
    %81 = vector.shape_cast %75 : vector<1x128xf32> to vector<1x128xf32>
    %82 = vector.broadcast %81 : vector<1x128xf32> to vector<64x128xf32>
    %83 = vector.broadcast %cst_29 : f32 to vector<64x128xf32>
    %84 = arith.select %80, %82, %83 : vector<64x128xi1>, vector<64x128xf32>
    %cst_30 = arith.constant dense<0.000000e+00> : vector<64xf32>
    %85 = vector.multi_reduction <add>, %84, %cst_30 [1] : vector<64x128xf32> to vector<64xf32>
    %86 = vector.shape_cast %85 : vector<64xf32> to vector<64x1xf32>
    %cst_31 = arith.constant 9.99999974E-6 : f32
    %87 = vector.broadcast %cst_31 : f32 to vector<64x1xf32>
    %88 = arith.addf %62, %87 : vector<64x1xf32>
    %89 = math.rsqrt %88 : vector<64x1xf32>
    %90 = arith.mulf %74, %89 : vector<64x1xf32>
    %91 = arith.mulf %56, %90 : vector<64x1xf32>
    %92 = arith.subf %86, %91 : vector<64x1xf32>
    %93 = vector.broadcast %90 : vector<64x1xf32> to vector<64x49xf32>
    %94 = arith.mulf %49, %93 : vector<64x49xf32>
    %95 = vector.broadcast %92 : vector<64x1xf32> to vector<64x49xf32>
    %96 = arith.addf %94, %95 : vector<64x49xf32>
    %c64_32 = arith.constant 64 : index
    %c0_33 = arith.constant 0 : index
    %97 = vector.load %arg14[%c64_32, %c0_33] : memref<896x49xf32, #tpu.memory_space<vmem>>, vector<64x49xf32>
    tpu.vector_store %arg14[%c64_32, %c0_33], %96 {strides = array<i32>} : memref<896x49xf32, #tpu.memory_space<vmem>>, vector<64x49xf32>,
    %c128 = arith.constant 128 : index
    %c0_34 = arith.constant 0 : index
    %98 = vector.load %arg0[%c128, %c0_34] : memref<512x49xf32, #tpu.memory_space<vmem>>, vector<64x49xf32>
    %cst_35 = arith.constant dense<0.000000e+00> : vector<64xf32>
    %99 = vector.multi_reduction <add>, %98, %cst_35 [1] : vector<64x49xf32> to vector<64xf32>
    %100 = vector.shape_cast %99 : vector<64xf32> to vector<64x1xf32>
    %101 = arith.mulf %98, %98 : vector<64x49xf32>
    %cst_36 = arith.constant dense<0.000000e+00> : vector<64xf32>
    %102 = vector.multi_reduction <add>, %101, %cst_36 [1] : vector<64x49xf32> to vector<64xf32>
    %103 = vector.shape_cast %102 : vector<64xf32> to vector<64x1xf32>
    %cst_37 = arith.constant 0.0204081628 : f32
    %104 = vector.broadcast %cst_37 : f32 to vector<64x1xf32>
    %105 = arith.mulf %100, %104 : vector<64x1xf32>
    %cst_38 = arith.constant 0.0204081628 : f32
    %106 = vector.broadcast %cst_38 : f32 to vector<64x1xf32>
    %107 = arith.mulf %103, %106 : vector<64x1xf32>
    %108 = arith.mulf %105, %105 : vector<64x1xf32>
    %109 = arith.subf %107, %108 : vector<64x1xf32>
    %cst_39 = arith.constant 0.000000e+00 : f32
    %110 = vector.broadcast %cst_39 : f32 to vector<64x1xf32>
    %111 = arith.maximumf %109, %110 : vector<64x1xf32>
    %c1 = arith.constant 1 : index
    %c0_40 = arith.constant 0 : index
    %112 = vector.load %arg13[%c1, %c0_40] : memref<14x128xf32, #tpu.memory_space<vmem>>, vector<1x128xf32>
    %113 = tpu.iota {dimensions = array<i32: 1>} : vector<64x128xi32>
    %114 = tpu.iota {dimensions = array<i32: 0>} : vector<64x128xi32>
    %c0_i32_41 = arith.constant 0 : i32
    %115 = vector.broadcast %c0_i32_41 : i32 to vector<64x128xi32>
    %116 = arith.addi %114, %115 : vector<64x128xi32>
    %117 = arith.cmpi eq, %113, %116 : vector<64x128xi32>
    %cst_42 = arith.constant 0.000000e+00 : f32
    %118 = vector.shape_cast %112 : vector<1x128xf32> to vector<1x128xf32>
    %119 = vector.broadcast %118 : vector<1x128xf32> to vector<64x128xf32>
    %120 = vector.broadcast %cst_42 : f32 to vector<64x128xf32>
    %121 = arith.select %117, %119, %120 : vector<64x128xi1>, vector<64x128xf32>
    %cst_43 = arith.constant dense<0.000000e+00> : vector<64xf32>
    %122 = vector.multi_reduction <add>, %121, %cst_43 [1] : vector<64x128xf32> to vector<64xf32>
    %123 = vector.shape_cast %122 : vector<64xf32> to vector<64x1xf32>
    %c8 = arith.constant 8 : index
    %c0_44 = arith.constant 0 : index
    %124 = vector.load %arg13[%c8, %c0_44] : memref<14x128xf32, #tpu.memory_space<vmem>>, vector<1x128xf32>
    %125 = tpu.iota {dimensions = array<i32: 1>} : vector<64x128xi32>
    %126 = tpu.iota {dimensions = array<i32: 0>} : vector<64x128xi32>
    %c0_i32_45 = arith.constant 0 : i32
    %127 = vector.broadcast %c0_i32_45 : i32 to vector<64x128xi32>
    %128 = arith.addi %126, %127 : vector<64x128xi32>
    %129 = arith.cmpi eq, %125, %128 : vector<64x128xi32>
    %cst_46 = arith.constant 0.000000e+00 : f32
    %130 = vector.shape_cast %124 : vector<1x128xf32> to vector<1x128xf32>
    %131 = vector.broadcast %130 : vector<1x128xf32> to vector<64x128xf32>
    %132 = vector.broadcast %cst_46 : f32 to vector<64x128xf32>
    %133 = arith.select %129, %131, %132 : vector<64x128xi1>, vector<64x128xf32>
    %cst_47 = arith.constant dense<0.000000e+00> : vector<64xf32>
    %134 = vector.multi_reduction <add>, %133, %cst_47 [1] : vector<64x128xf32> to vector<64xf32>
    %135 = vector.shape_cast %134 : vector<64xf32> to vector<64x1xf32>
    %cst_48 = arith.constant 9.99999974E-6 : f32
    %136 = vector.broadcast %cst_48 : f32 to vector<64x1xf32>
    %137 = arith.addf %111, %136 : vector<64x1xf32>
    %138 = math.rsqrt %137 : vector<64x1xf32>
    %139 = arith.mulf %123, %138 : vector<64x1xf32>
    %140 = arith.mulf %105, %139 : vector<64x1xf32>
    %141 = arith.subf %135, %140 : vector<64x1xf32>
    %142 = vector.broadcast %139 : vector<64x1xf32> to vector<64x49xf32>
    %143 = arith.mulf %98, %142 : vector<64x49xf32>
    %144 = vector.broadcast %141 : vector<64x1xf32> to vector<64x49xf32>
    %145 = arith.addf %143, %144 : vector<64x49xf32>
    %c128_49 = arith.constant 128 : index
    %c0_50 = arith.constant 0 : index
    %146 = vector.load %arg14[%c128_49, %c0_50] : memref<896x49xf32, #tpu.memory_space<vmem>>, vector<64x49xf32>
    tpu.vector_store %arg14[%c128_49, %c0_50], %145 {strides = array<i32>} : memref<896x49xf32, #tpu.memory_space<vmem>>, vector<64x49xf32>,
    %c192 = arith.constant 192 : index
    %c0_51 = arith.constant 0 : index
    %147 = vector.load %arg0[%c192, %c0_51] : memref<512x49xf32, #tpu.memory_space<vmem>>, vector<64x49xf32>
    %cst_52 = arith.constant dense<0.000000e+00> : vector<64xf32>
    %148 = vector.multi_reduction <add>, %147, %cst_52 [1] : vector<64x49xf32> to vector<64xf32>
    %149 = vector.shape_cast %148 : vector<64xf32> to vector<64x1xf32>
    %150 = arith.mulf %147, %147 : vector<64x49xf32>
    %cst_53 = arith.constant dense<0.000000e+00> : vector<64xf32>
    %151 = vector.multi_reduction <add>, %150, %cst_53 [1] : vector<64x49xf32> to vector<64xf32>
    %152 = vector.shape_cast %151 : vector<64xf32> to vector<64x1xf32>
    %cst_54 = arith.constant 0.0204081628 : f32
    %153 = vector.broadcast %cst_54 : f32 to vector<64x1xf32>
    %154 = arith.mulf %149, %153 : vector<64x1xf32>
    %cst_55 = arith.constant 0.0204081628 : f32
    %155 = vector.broadcast %cst_55 : f32 to vector<64x1xf32>
    %156 = arith.mulf %152, %155 : vector<64x1xf32>
    %157 = arith.mulf %154, %154 : vector<64x1xf32>
    %158 = arith.subf %156, %157 : vector<64x1xf32>
    %cst_56 = arith.constant 0.000000e+00 : f32
    %159 = vector.broadcast %cst_56 : f32 to vector<64x1xf32>
    %160 = arith.maximumf %158, %159 : vector<64x1xf32>
    %c1_57 = arith.constant 1 : index
    %c0_58 = arith.constant 0 : index
    %161 = vector.load %arg13[%c1_57, %c0_58] : memref<14x128xf32, #tpu.memory_space<vmem>>, vector<1x128xf32>
    %162 = tpu.iota {dimensions = array<i32: 1>} : vector<64x128xi32>
    %163 = tpu.iota {dimensions = array<i32: 0>} : vector<64x128xi32>
    %c64_i32_59 = arith.constant 64 : i32
    %164 = vector.broadcast %c64_i32_59 : i32 to vector<64x128xi32>
    %165 = arith.addi %163, %164 : vector<64x128xi32>
    %166 = arith.cmpi eq, %162, %165 : vector<64x128xi32>
    %cst_60 = arith.constant 0.000000e+00 : f32
    %167 = vector.shape_cast %161 : vector<1x128xf32> to vector<1x128xf32>
    %168 = vector.broadcast %167 : vector<1x128xf32> to vector<64x128xf32>
    %169 = vector.broadcast %cst_60 : f32 to vector<64x128xf32>
    %170 = arith.select %166, %168, %169 : vector<64x128xi1>, vector<64x128xf32>
    %cst_61 = arith.constant dense<0.000000e+00> : vector<64xf32>
    %171 = vector.multi_reduction <add>, %170, %cst_61 [1] : vector<64x128xf32> to vector<64xf32>
    %172 = vector.shape_cast %171 : vector<64xf32> to vector<64x1xf32>
    %c8_62 = arith.constant 8 : index
    %c0_63 = arith.constant 0 : index
    %173 = vector.load %arg13[%c8_62, %c0_63] : memref<14x128xf32, #tpu.memory_space<vmem>>, vector<1x128xf32>
    %174 = tpu.iota {dimensions = array<i32: 1>} : vector<64x128xi32>
    %175 = tpu.iota {dimensions = array<i32: 0>} : vector<64x128xi32>
    %c64_i32_64 = arith.constant 64 : i32
    %176 = vector.broadcast %c64_i32_64 : i32 to vector<64x128xi32>
    %177 = arith.addi %175, %176 : vector<64x128xi32>
    %178 = arith.cmpi eq, %174, %177 : vector<64x128xi32>
    %cst_65 = arith.constant 0.000000e+00 : f32
    %179 = vector.shape_cast %173 : vector<1x128xf32> to vector<1x128xf32>
    %180 = vector.broadcast %179 : vector<1x128xf32> to vector<64x128xf32>
    %181 = vector.broadcast %cst_65 : f32 to vector<64x128xf32>
    %182 = arith.select %178, %180, %181 : vector<64x128xi1>, vector<64x128xf32>
    %cst_66 = arith.constant dense<0.000000e+00> : vector<64xf32>
    %183 = vector.multi_reduction <add>, %182, %cst_66 [1] : vector<64x128xf32> to vector<64xf32>
    %184 = vector.shape_cast %183 : vector<64xf32> to vector<64x1xf32>
    %cst_67 = arith.constant 9.99999974E-6 : f32
    %185 = vector.broadcast %cst_67 : f32 to vector<64x1xf32>
    %186 = arith.addf %160, %185 : vector<64x1xf32>
    %187 = math.rsqrt %186 : vector<64x1xf32>
    %188 = arith.mulf %172, %187 : vector<64x1xf32>
    %189 = arith.mulf %154, %188 : vector<64x1xf32>
    %190 = arith.subf %184, %189 : vector<64x1xf32>
    %191 = vector.broadcast %188 : vector<64x1xf32> to vector<64x49xf32>
    %192 = arith.mulf %147, %191 : vector<64x49xf32>
    %193 = vector.broadcast %190 : vector<64x1xf32> to vector<64x49xf32>
    %194 = arith.addf %192, %193 : vector<64x49xf32>
    %c192_68 = arith.constant 192 : index
    %c0_69 = arith.constant 0 : index
    %195 = vector.load %arg14[%c192_68, %c0_69] : memref<896x49xf32, #tpu.memory_space<vmem>>, vector<64x49xf32>
    tpu.vector_store %arg14[%c192_68, %c0_69], %194 {strides = array<i32>} : memref<896x49xf32, #tpu.memory_space<vmem>>, vector<64x49xf32>,
    %c256 = arith.constant 256 : index
    %c0_70 = arith.constant 0 : index
    %196 = vector.load %arg0[%c256, %c0_70] : memref<512x49xf32, #tpu.memory_space<vmem>>, vector<64x49xf32>
    %cst_71 = arith.constant dense<0.000000e+00> : vector<64xf32>
    %197 = vector.multi_reduction <add>, %196, %cst_71 [1] : vector<64x49xf32> to vector<64xf32>
    %198 = vector.shape_cast %197 : vector<64xf32> to vector<64x1xf32>
    %199 = arith.mulf %196, %196 : vector<64x49xf32>
    %cst_72 = arith.constant dense<0.000000e+00> : vector<64xf32>
    %200 = vector.multi_reduction <add>, %199, %cst_72 [1] : vector<64x49xf32> to vector<64xf32>
    %201 = vector.shape_cast %200 : vector<64xf32> to vector<64x1xf32>
    %cst_73 = arith.constant 0.0204081628 : f32
    %202 = vector.broadcast %cst_73 : f32 to vector<64x1xf32>
    %203 = arith.mulf %198, %202 : vector<64x1xf32>
    %cst_74 = arith.constant 0.0204081628 : f32
    %204 = vector.broadcast %cst_74 : f32 to vector<64x1xf32>
    %205 = arith.mulf %201, %204 : vector<64x1xf32>
    %206 = arith.mulf %203, %203 : vector<64x1xf32>
    %207 = arith.subf %205, %206 : vector<64x1xf32>
    %cst_75 = arith.constant 0.000000e+00 : f32
    %208 = vector.broadcast %cst_75 : f32 to vector<64x1xf32>
    %209 = arith.maximumf %207, %208 : vector<64x1xf32>
    %c2 = arith.constant 2 : index
    %c0_76 = arith.constant 0 : index
    %210 = vector.load %arg13[%c2, %c0_76] : memref<14x128xf32, #tpu.memory_space<vmem>>, vector<1x128xf32>
    %211 = tpu.iota {dimensions = array<i32: 1>} : vector<64x128xi32>
    %212 = tpu.iota {dimensions = array<i32: 0>} : vector<64x128xi32>
    %c0_i32_77 = arith.constant 0 : i32
    %213 = vector.broadcast %c0_i32_77 : i32 to vector<64x128xi32>
    %214 = arith.addi %212, %213 : vector<64x128xi32>
    %215 = arith.cmpi eq, %211, %214 : vector<64x128xi32>
    %cst_78 = arith.constant 0.000000e+00 : f32
    %216 = vector.shape_cast %210 : vector<1x128xf32> to vector<1x128xf32>
    %217 = vector.broadcast %216 : vector<1x128xf32> to vector<64x128xf32>
    %218 = vector.broadcast %cst_78 : f32 to vector<64x128xf32>
    %219 = arith.select %215, %217, %218 : vector<64x128xi1>, vector<64x128xf32>
    %cst_79 = arith.constant dense<0.000000e+00> : vector<64xf32>
    %220 = vector.multi_reduction <add>, %219, %cst_79 [1] : vector<64x128xf32> to vector<64xf32>
    %221 = vector.shape_cast %220 : vector<64xf32> to vector<64x1xf32>
    %c9 = arith.constant 9 : index
    %c0_80 = arith.constant 0 : index
    %222 = vector.load %arg13[%c9, %c0_80] : memref<14x128xf32, #tpu.memory_space<vmem>>, vector<1x128xf32>
    %223 = tpu.iota {dimensions = array<i32: 1>} : vector<64x128xi32>
    %224 = tpu.iota {dimensions = array<i32: 0>} : vector<64x128xi32>
    %c0_i32_81 = arith.constant 0 : i32
    %225 = vector.broadcast %c0_i32_81 : i32 to vector<64x128xi32>
    %226 = arith.addi %224, %225 : vector<64x128xi32>
    %227 = arith.cmpi eq, %223, %226 : vector<64x128xi32>
    %cst_82 = arith.constant 0.000000e+00 : f32
    %228 = vector.shape_cast %222 : vector<1x128xf32> to vector<1x128xf32>
    %229 = vector.broadcast %228 : vector<1x128xf32> to vector<64x128xf32>
    %230 = vector.broadcast %cst_82 : f32 to vector<64x128xf32>
    %231 = arith.select %227, %229, %230 : vector<64x128xi1>, vector<64x128xf32>
    %cst_83 = arith.constant dense<0.000000e+00> : vector<64xf32>
    %232 = vector.multi_reduction <add>, %231, %cst_83 [1] : vector<64x128xf32> to vector<64xf32>
    %233 = vector.shape_cast %232 : vector<64xf32> to vector<64x1xf32>
    %cst_84 = arith.constant 9.99999974E-6 : f32
    %234 = vector.broadcast %cst_84 : f32 to vector<64x1xf32>
    %235 = arith.addf %209, %234 : vector<64x1xf32>
    %236 = math.rsqrt %235 : vector<64x1xf32>
    %237 = arith.mulf %221, %236 : vector<64x1xf32>
    %238 = arith.mulf %203, %237 : vector<64x1xf32>
    %239 = arith.subf %233, %238 : vector<64x1xf32>
    %240 = vector.broadcast %237 : vector<64x1xf32> to vector<64x49xf32>
    %241 = arith.mulf %196, %240 : vector<64x49xf32>
    %242 = vector.broadcast %239 : vector<64x1xf32> to vector<64x49xf32>
    %243 = arith.addf %241, %242 : vector<64x49xf32>
    %c256_85 = arith.constant 256 : index
    %c0_86 = arith.constant 0 : index
    %244 = vector.load %arg14[%c256_85, %c0_86] : memref<896x49xf32, #tpu.memory_space<vmem>>, vector<64x49xf32>
    tpu.vector_store %arg14[%c256_85, %c0_86], %243 {strides = array<i32>} : memref<896x49xf32, #tpu.memory_space<vmem>>, vector<64x49xf32>,
    %c320 = arith.constant 320 : index
    %c0_87 = arith.constant 0 : index
    %245 = vector.load %arg0[%c320, %c0_87] : memref<512x49xf32, #tpu.memory_space<vmem>>, vector<64x49xf32>
    %cst_88 = arith.constant dense<0.000000e+00> : vector<64xf32>
    %246 = vector.multi_reduction <add>, %245, %cst_88 [1] : vector<64x49xf32> to vector<64xf32>
    %247 = vector.shape_cast %246 : vector<64xf32> to vector<64x1xf32>
    %248 = arith.mulf %245, %245 : vector<64x49xf32>
    %cst_89 = arith.constant dense<0.000000e+00> : vector<64xf32>
    %249 = vector.multi_reduction <add>, %248, %cst_89 [1] : vector<64x49xf32> to vector<64xf32>
    %250 = vector.shape_cast %249 : vector<64xf32> to vector<64x1xf32>
    %cst_90 = arith.constant 0.0204081628 : f32
    %251 = vector.broadcast %cst_90 : f32 to vector<64x1xf32>
    %252 = arith.mulf %247, %251 : vector<64x1xf32>
    %cst_91 = arith.constant 0.0204081628 : f32
    %253 = vector.broadcast %cst_91 : f32 to vector<64x1xf32>
    %254 = arith.mulf %250, %253 : vector<64x1xf32>
    %255 = arith.mulf %252, %252 : vector<64x1xf32>
    %256 = arith.subf %254, %255 : vector<64x1xf32>
    %cst_92 = arith.constant 0.000000e+00 : f32
    %257 = vector.broadcast %cst_92 : f32 to vector<64x1xf32>
    %258 = arith.maximumf %256, %257 : vector<64x1xf32>
    %c2_93 = arith.constant 2 : index
    %c0_94 = arith.constant 0 : index
    %259 = vector.load %arg13[%c2_93, %c0_94] : memref<14x128xf32, #tpu.memory_space<vmem>>, vector<1x128xf32>
    %260 = tpu.iota {dimensions = array<i32: 1>} : vector<64x128xi32>
    %261 = tpu.iota {dimensions = array<i32: 0>} : vector<64x128xi32>
    %c64_i32_95 = arith.constant 64 : i32
    %262 = vector.broadcast %c64_i32_95 : i32 to vector<64x128xi32>
    %263 = arith.addi %261, %262 : vector<64x128xi32>
    %264 = arith.cmpi eq, %260, %263 : vector<64x128xi32>
    %cst_96 = arith.constant 0.000000e+00 : f32
    %265 = vector.shape_cast %259 : vector<1x128xf32> to vector<1x128xf32>
    %266 = vector.broadcast %265 : vector<1x128xf32> to vector<64x128xf32>
    %267 = vector.broadcast %cst_96 : f32 to vector<64x128xf32>
    %268 = arith.select %264, %266, %267 : vector<64x128xi1>, vector<64x128xf32>
    %cst_97 = arith.constant dense<0.000000e+00> : vector<64xf32>
    %269 = vector.multi_reduction <add>, %268, %cst_97 [1] : vector<64x128xf32> to vector<64xf32>
    %270 = vector.shape_cast %269 : vector<64xf32> to vector<64x1xf32>
    %c9_98 = arith.constant 9 : index
    %c0_99 = arith.constant 0 : index
    %271 = vector.load %arg13[%c9_98, %c0_99] : memref<14x128xf32, #tpu.memory_space<vmem>>, vector<1x128xf32>
    %272 = tpu.iota {dimensions = array<i32: 1>} : vector<64x128xi32>
    %273 = tpu.iota {dimensions = array<i32: 0>} : vector<64x128xi32>
    %c64_i32_100 = arith.constant 64 : i32
    %274 = vector.broadcast %c64_i32_100 : i32 to vector<64x128xi32>
    %275 = arith.addi %273, %274 : vector<64x128xi32>
    %276 = arith.cmpi eq, %272, %275 : vector<64x128xi32>
    %cst_101 = arith.constant 0.000000e+00 : f32
    %277 = vector.shape_cast %271 : vector<1x128xf32> to vector<1x128xf32>
    %278 = vector.broadcast %277 : vector<1x128xf32> to vector<64x128xf32>
    %279 = vector.broadcast %cst_101 : f32 to vector<64x128xf32>
    %280 = arith.select %276, %278, %279 : vector<64x128xi1>, vector<64x128xf32>
    %cst_102 = arith.constant dense<0.000000e+00> : vector<64xf32>
    %281 = vector.multi_reduction <add>, %280, %cst_102 [1] : vector<64x128xf32> to vector<64xf32>
    %282 = vector.shape_cast %281 : vector<64xf32> to vector<64x1xf32>
    %cst_103 = arith.constant 9.99999974E-6 : f32
    %283 = vector.broadcast %cst_103 : f32 to vector<64x1xf32>
    %284 = arith.addf %258, %283 : vector<64x1xf32>
    %285 = math.rsqrt %284 : vector<64x1xf32>
    %286 = arith.mulf %270, %285 : vector<64x1xf32>
    %287 = arith.mulf %252, %286 : vector<64x1xf32>
    %288 = arith.subf %282, %287 : vector<64x1xf32>
    %289 = vector.broadcast %286 : vector<64x1xf32> to vector<64x49xf32>
    %290 = arith.mulf %245, %289 : vector<64x49xf32>
    %291 = vector.broadcast %288 : vector<64x1xf32> to vector<64x49xf32>
    %292 = arith.addf %290, %291 : vector<64x49xf32>
    %c320_104 = arith.constant 320 : index
    %c0_105 = arith.constant 0 : index
    %293 = vector.load %arg14[%c320_104, %c0_105] : memref<896x49xf32, #tpu.memory_space<vmem>>, vector<64x49xf32>
    tpu.vector_store %arg14[%c320_104, %c0_105], %292 {strides = array<i32>} : memref<896x49xf32, #tpu.memory_space<vmem>>, vector<64x49xf32>,
    %c384 = arith.constant 384 : index
    %c0_106 = arith.constant 0 : index
    %294 = vector.load %arg0[%c384, %c0_106] : memref<512x49xf32, #tpu.memory_space<vmem>>, vector<64x49xf32>
    %cst_107 = arith.constant dense<0.000000e+00> : vector<64xf32>
    %295 = vector.multi_reduction <add>, %294, %cst_107 [1] : vector<64x49xf32> to vector<64xf32>
    %296 = vector.shape_cast %295 : vector<64xf32> to vector<64x1xf32>
    %297 = arith.mulf %294, %294 : vector<64x49xf32>
    %cst_108 = arith.constant dense<0.000000e+00> : vector<64xf32>
    %298 = vector.multi_reduction <add>, %297, %cst_108 [1] : vector<64x49xf32> to vector<64xf32>
    %299 = vector.shape_cast %298 : vector<64xf32> to vector<64x1xf32>
    %cst_109 = arith.constant 0.0204081628 : f32
    %300 = vector.broadcast %cst_109 : f32 to vector<64x1xf32>
    %301 = arith.mulf %296, %300 : vector<64x1xf32>
    %cst_110 = arith.constant 0.0204081628 : f32
    %302 = vector.broadcast %cst_110 : f32 to vector<64x1xf32>
    %303 = arith.mulf %299, %302 : vector<64x1xf32>
    %304 = arith.mulf %301, %301 : vector<64x1xf32>
    %305 = arith.subf %303, %304 : vector<64x1xf32>
    %cst_111 = arith.constant 0.000000e+00 : f32
    %306 = vector.broadcast %cst_111 : f32 to vector<64x1xf32>
    %307 = arith.maximumf %305, %306 : vector<64x1xf32>
    %c3 = arith.constant 3 : index
    %c0_112 = arith.constant 0 : index
    %308 = vector.load %arg13[%c3, %c0_112] : memref<14x128xf32, #tpu.memory_space<vmem>>, vector<1x128xf32>
    %309 = tpu.iota {dimensions = array<i32: 1>} : vector<64x128xi32>
    %310 = tpu.iota {dimensions = array<i32: 0>} : vector<64x128xi32>
    %c0_i32_113 = arith.constant 0 : i32
    %311 = vector.broadcast %c0_i32_113 : i32 to vector<64x128xi32>
    %312 = arith.addi %310, %311 : vector<64x128xi32>
    %313 = arith.cmpi eq, %309, %312 : vector<64x128xi32>
    %cst_114 = arith.constant 0.000000e+00 : f32
    %314 = vector.shape_cast %308 : vector<1x128xf32> to vector<1x128xf32>
    %315 = vector.broadcast %314 : vector<1x128xf32> to vector<64x128xf32>
    %316 = vector.broadcast %cst_114 : f32 to vector<64x128xf32>
    %317 = arith.select %313, %315, %316 : vector<64x128xi1>, vector<64x128xf32>
    %cst_115 = arith.constant dense<0.000000e+00> : vector<64xf32>
    %318 = vector.multi_reduction <add>, %317, %cst_115 [1] : vector<64x128xf32> to vector<64xf32>
    %319 = vector.shape_cast %318 : vector<64xf32> to vector<64x1xf32>
    %c10 = arith.constant 10 : index
    %c0_116 = arith.constant 0 : index
    %320 = vector.load %arg13[%c10, %c0_116] : memref<14x128xf32, #tpu.memory_space<vmem>>, vector<1x128xf32>
    %321 = tpu.iota {dimensions = array<i32: 1>} : vector<64x128xi32>
    %322 = tpu.iota {dimensions = array<i32: 0>} : vector<64x128xi32>
    %c0_i32_117 = arith.constant 0 : i32
    %323 = vector.broadcast %c0_i32_117 : i32 to vector<64x128xi32>
    %324 = arith.addi %322, %323 : vector<64x128xi32>
    %325 = arith.cmpi eq, %321, %324 : vector<64x128xi32>
    %cst_118 = arith.constant 0.000000e+00 : f32
    %326 = vector.shape_cast %320 : vector<1x128xf32> to vector<1x128xf32>
    %327 = vector.broadcast %326 : vector<1x128xf32> to vector<64x128xf32>
    %328 = vector.broadcast %cst_118 : f32 to vector<64x128xf32>
    %329 = arith.select %325, %327, %328 : vector<64x128xi1>, vector<64x128xf32>
    %cst_119 = arith.constant dense<0.000000e+00> : vector<64xf32>
    %330 = vector.multi_reduction <add>, %329, %cst_119 [1] : vector<64x128xf32> to vector<64xf32>
    %331 = vector.shape_cast %330 : vector<64xf32> to vector<64x1xf32>
    %cst_120 = arith.constant 9.99999974E-6 : f32
    %332 = vector.broadcast %cst_120 : f32 to vector<64x1xf32>
    %333 = arith.addf %307, %332 : vector<64x1xf32>
    %334 = math.rsqrt %333 : vector<64x1xf32>
    %335 = arith.mulf %319, %334 : vector<64x1xf32>
    %336 = arith.mulf %301, %335 : vector<64x1xf32>
    %337 = arith.subf %331, %336 : vector<64x1xf32>
    %338 = vector.broadcast %335 : vector<64x1xf32> to vector<64x49xf32>
    %339 = arith.mulf %294, %338 : vector<64x49xf32>
    %340 = vector.broadcast %337 : vector<64x1xf32> to vector<64x49xf32>
    %341 = arith.addf %339, %340 : vector<64x49xf32>
    %c384_121 = arith.constant 384 : index
    %c0_122 = arith.constant 0 : index
    %342 = vector.load %arg14[%c384_121, %c0_122] : memref<896x49xf32, #tpu.memory_space<vmem>>, vector<64x49xf32>
    tpu.vector_store %arg14[%c384_121, %c0_122], %341 {strides = array<i32>} : memref<896x49xf32, #tpu.memory_space<vmem>>, vector<64x49xf32>,
    %c448 = arith.constant 448 : index
    %c0_123 = arith.constant 0 : index
    %343 = vector.load %arg0[%c448, %c0_123] : memref<512x49xf32, #tpu.memory_space<vmem>>, vector<64x49xf32>
    %cst_124 = arith.constant dense<0.000000e+00> : vector<64xf32>
    %344 = vector.multi_reduction <add>, %343, %cst_124 [1] : vector<64x49xf32> to vector<64xf32>
    %345 = vector.shape_cast %344 : vector<64xf32> to vector<64x1xf32>
    %346 = arith.mulf %343, %343 : vector<64x49xf32>
    %cst_125 = arith.constant dense<0.000000e+00> : vector<64xf32>
    %347 = vector.multi_reduction <add>, %346, %cst_125 [1] : vector<64x49xf32> to vector<64xf32>
    %348 = vector.shape_cast %347 : vector<64xf32> to vector<64x1xf32>
    %cst_126 = arith.constant 0.0204081628 : f32
    %349 = vector.broadcast %cst_126 : f32 to vector<64x1xf32>
    %350 = arith.mulf %345, %349 : vector<64x1xf32>
    %cst_127 = arith.constant 0.0204081628 : f32
    %351 = vector.broadcast %cst_127 : f32 to vector<64x1xf32>
    %352 = arith.mulf %348, %351 : vector<64x1xf32>
    %353 = arith.mulf %350, %350 : vector<64x1xf32>
    %354 = arith.subf %352, %353 : vector<64x1xf32>
    %cst_128 = arith.constant 0.000000e+00 : f32
    %355 = vector.broadcast %cst_128 : f32 to vector<64x1xf32>
    %356 = arith.maximumf %354, %355 : vector<64x1xf32>
    %c3_129 = arith.constant 3 : index
    %c0_130 = arith.constant 0 : index
    %357 = vector.load %arg13[%c3_129, %c0_130] : memref<14x128xf32, #tpu.memory_space<vmem>>, vector<1x128xf32>
    %358 = tpu.iota {dimensions = array<i32: 1>} : vector<64x128xi32>
    %359 = tpu.iota {dimensions = array<i32: 0>} : vector<64x128xi32>
    %c64_i32_131 = arith.constant 64 : i32
    %360 = vector.broadcast %c64_i32_131 : i32 to vector<64x128xi32>
    %361 = arith.addi %359, %360 : vector<64x128xi32>
    %362 = arith.cmpi eq, %358, %361 : vector<64x128xi32>
    %cst_132 = arith.constant 0.000000e+00 : f32
    %363 = vector.shape_cast %357 : vector<1x128xf32> to vector<1x128xf32>
    %364 = vector.broadcast %363 : vector<1x128xf32> to vector<64x128xf32>
    %365 = vector.broadcast %cst_132 : f32 to vector<64x128xf32>
    %366 = arith.select %362, %364, %365 : vector<64x128xi1>, vector<64x128xf32>
    %cst_133 = arith.constant dense<0.000000e+00> : vector<64xf32>
    %367 = vector.multi_reduction <add>, %366, %cst_133 [1] : vector<64x128xf32> to vector<64xf32>
    %368 = vector.shape_cast %367 : vector<64xf32> to vector<64x1xf32>
    %c10_134 = arith.constant 10 : index
    %c0_135 = arith.constant 0 : index
    %369 = vector.load %arg13[%c10_134, %c0_135] : memref<14x128xf32, #tpu.memory_space<vmem>>, vector<1x128xf32>
    %370 = tpu.iota {dimensions = array<i32: 1>} : vector<64x128xi32>
    %371 = tpu.iota {dimensions = array<i32: 0>} : vector<64x128xi32>
    %c64_i32_136 = arith.constant 64 : i32
    %372 = vector.broadcast %c64_i32_136 : i32 to vector<64x128xi32>
    %373 = arith.addi %371, %372 : vector<64x128xi32>
    %374 = arith.cmpi eq, %370, %373 : vector<64x128xi32>
    %cst_137 = arith.constant 0.000000e+00 : f32
    %375 = vector.shape_cast %369 : vector<1x128xf32> to vector<1x128xf32>
    %376 = vector.broadcast %375 : vector<1x128xf32> to vector<64x128xf32>
    %377 = vector.broadcast %cst_137 : f32 to vector<64x128xf32>
    %378 = arith.select %374, %376, %377 : vector<64x128xi1>, vector<64x128xf32>
    %cst_138 = arith.constant dense<0.000000e+00> : vector<64xf32>
    %379 = vector.multi_reduction <add>, %378, %cst_138 [1] : vector<64x128xf32> to vector<64xf32>
    %380 = vector.shape_cast %379 : vector<64xf32> to vector<64x1xf32>
    %cst_139 = arith.constant 9.99999974E-6 : f32
    %381 = vector.broadcast %cst_139 : f32 to vector<64x1xf32>
    %382 = arith.addf %356, %381 : vector<64x1xf32>
    %383 = math.rsqrt %382 : vector<64x1xf32>
    %384 = arith.mulf %368, %383 : vector<64x1xf32>
    %385 = arith.mulf %350, %384 : vector<64x1xf32>
    %386 = arith.subf %380, %385 : vector<64x1xf32>
    %387 = vector.broadcast %384 : vector<64x1xf32> to vector<64x49xf32>
    %388 = arith.mulf %343, %387 : vector<64x49xf32>
    %389 = vector.broadcast %386 : vector<64x1xf32> to vector<64x49xf32>
    %390 = arith.addf %388, %389 : vector<64x49xf32>
    %c448_140 = arith.constant 448 : index
    %c0_141 = arith.constant 0 : index
    %391 = vector.load %arg14[%c448_140, %c0_141] : memref<896x49xf32, #tpu.memory_space<vmem>>, vector<64x49xf32>
    tpu.vector_store %arg14[%c448_140, %c0_141], %390 {strides = array<i32>} : memref<896x49xf32, #tpu.memory_space<vmem>>, vector<64x49xf32>,
    %c0_142 = arith.constant 0 : index
    %c0_143 = arith.constant 0 : index
    %392 = vector.load %arg1[%c0_142, %c0_143] : memref<32x49xf32, #tpu.memory_space<vmem>>, vector<32x49xf32>
    %cst_144 = arith.constant dense<0.000000e+00> : vector<32xf32>
    %393 = vector.multi_reduction <add>, %392, %cst_144 [1] : vector<32x49xf32> to vector<32xf32>
    %394 = vector.shape_cast %393 : vector<32xf32> to vector<32x1xf32>
    %395 = arith.mulf %392, %392 : vector<32x49xf32>
    %cst_145 = arith.constant dense<0.000000e+00> : vector<32xf32>
    %396 = vector.multi_reduction <add>, %395, %cst_145 [1] : vector<32x49xf32> to vector<32xf32>
    %397 = vector.shape_cast %396 : vector<32xf32> to vector<32x1xf32>
    %cst_146 = arith.constant 0.0204081628 : f32
    %398 = vector.broadcast %cst_146 : f32 to vector<32x1xf32>
    %399 = arith.mulf %394, %398 : vector<32x1xf32>
    %cst_147 = arith.constant 0.0204081628 : f32
    %400 = vector.broadcast %cst_147 : f32 to vector<32x1xf32>
    %401 = arith.mulf %397, %400 : vector<32x1xf32>
    %402 = arith.mulf %399, %399 : vector<32x1xf32>
    %403 = arith.subf %401, %402 : vector<32x1xf32>
    %cst_148 = arith.constant 0.000000e+00 : f32
    %404 = vector.broadcast %cst_148 : f32 to vector<32x1xf32>
    %405 = arith.maximumf %403, %404 : vector<32x1xf32>
    %c4 = arith.constant 4 : index
    %c0_149 = arith.constant 0 : index
    %406 = vector.load %arg13[%c4, %c0_149] : memref<14x128xf32, #tpu.memory_space<vmem>>, vector<1x128xf32>
    %407 = tpu.iota {dimensions = array<i32: 1>} : vector<32x128xi32>
    %408 = tpu.iota {dimensions = array<i32: 0>} : vector<32x128xi32>
    %c0_i32_150 = arith.constant 0 : i32
    %409 = vector.broadcast %c0_i32_150 : i32 to vector<32x128xi32>
    %410 = arith.addi %408, %409 : vector<32x128xi32>
    %411 = arith.cmpi eq, %407, %410 : vector<32x128xi32>
    %cst_151 = arith.constant 0.000000e+00 : f32
    %412 = vector.shape_cast %406 : vector<1x128xf32> to vector<1x128xf32>
    %413 = vector.broadcast %412 : vector<1x128xf32> to vector<32x128xf32>
    %414 = vector.broadcast %cst_151 : f32 to vector<32x128xf32>
    %415 = arith.select %411, %413, %414 : vector<32x128xi1>, vector<32x128xf32>
    %cst_152 = arith.constant dense<0.000000e+00> : vector<32xf32>
    %416 = vector.multi_reduction <add>, %415, %cst_152 [1] : vector<32x128xf32> to vector<32xf32>
    %417 = vector.shape_cast %416 : vector<32xf32> to vector<32x1xf32>
    %c11 = arith.constant 11 : index
    %c0_153 = arith.constant 0 : index
    %418 = vector.load %arg13[%c11, %c0_153] : memref<14x128xf32, #tpu.memory_space<vmem>>, vector<1x128xf32>
    %419 = tpu.iota {dimensions = array<i32: 1>} : vector<32x128xi32>
    %420 = tpu.iota {dimensions = array<i32: 0>} : vector<32x128xi32>
    %c0_i32_154 = arith.constant 0 : i32
    %421 = vector.broadcast %c0_i32_154 : i32 to vector<32x128xi32>
    %422 = arith.addi %420, %421 : vector<32x128xi32>
    %423 = arith.cmpi eq, %419, %422 : vector<32x128xi32>
    %cst_155 = arith.constant 0.000000e+00 : f32
    %424 = vector.shape_cast %418 : vector<1x128xf32> to vector<1x128xf32>
    %425 = vector.broadcast %424 : vector<1x128xf32> to vector<32x128xf32>
    %426 = vector.broadcast %cst_155 : f32 to vector<32x128xf32>
    %427 = arith.select %423, %425, %426 : vector<32x128xi1>, vector<32x128xf32>
    %cst_156 = arith.constant dense<0.000000e+00> : vector<32xf32>
    %428 = vector.multi_reduction <add>, %427, %cst_156 [1] : vector<32x128xf32> to vector<32xf32>
    %429 = vector.shape_cast %428 : vector<32xf32> to vector<32x1xf32>
    %cst_157 = arith.constant 9.99999974E-6 : f32
    %430 = vector.broadcast %cst_157 : f32 to vector<32x1xf32>
    %431 = arith.addf %405, %430 : vector<32x1xf32>
    %432 = math.rsqrt %431 : vector<32x1xf32>
    %433 = arith.mulf %417, %432 : vector<32x1xf32>
    %434 = arith.mulf %399, %433 : vector<32x1xf32>
    %435 = arith.subf %429, %434 : vector<32x1xf32>
    %436 = vector.broadcast %433 : vector<32x1xf32> to vector<32x49xf32>
    %437 = arith.mulf %392, %436 : vector<32x49xf32>
    %438 = vector.broadcast %435 : vector<32x1xf32> to vector<32x49xf32>
    %439 = arith.addf %437, %438 : vector<32x49xf32>
    %c512 = arith.constant 512 : index
    %c0_158 = arith.constant 0 : index
    %440 = vector.load %arg14[%c512, %c0_158] : memref<896x49xf32, #tpu.memory_space<vmem>>, vector<32x49xf32>
    tpu.vector_store %arg14[%c512, %c0_158], %439 {strides = array<i32>} : memref<896x49xf32, #tpu.memory_space<vmem>>, vector<32x49xf32>,
    %c0_159 = arith.constant 0 : index
    %c0_160 = arith.constant 0 : index
    %441 = vector.load %arg2[%c0_159, %c0_160] : memref<32x49xf32, #tpu.memory_space<vmem>>, vector<32x49xf32>
    %cst_161 = arith.constant dense<0.000000e+00> : vector<32xf32>
    %442 = vector.multi_reduction <add>, %441, %cst_161 [1] : vector<32x49xf32> to vector<32xf32>
    %443 = vector.shape_cast %442 : vector<32xf32> to vector<32x1xf32>
    %444 = arith.mulf %441, %441 : vector<32x49xf32>
    %cst_162 = arith.constant dense<0.000000e+00> : vector<32xf32>
    %445 = vector.multi_reduction <add>, %444, %cst_162 [1] : vector<32x49xf32> to vector<32xf32>
    %446 = vector.shape_cast %445 : vector<32xf32> to vector<32x1xf32>
    %cst_163 = arith.constant 0.0204081628 : f32
    %447 = vector.broadcast %cst_163 : f32 to vector<32x1xf32>
    %448 = arith.mulf %443, %447 : vector<32x1xf32>
    %cst_164 = arith.constant 0.0204081628 : f32
    %449 = vector.broadcast %cst_164 : f32 to vector<32x1xf32>
    %450 = arith.mulf %446, %449 : vector<32x1xf32>
    %451 = arith.mulf %448, %448 : vector<32x1xf32>
    %452 = arith.subf %450, %451 : vector<32x1xf32>
    %cst_165 = arith.constant 0.000000e+00 : f32
    %453 = vector.broadcast %cst_165 : f32 to vector<32x1xf32>
    %454 = arith.maximumf %452, %453 : vector<32x1xf32>
    %c4_166 = arith.constant 4 : index
    %c0_167 = arith.constant 0 : index
    %455 = vector.load %arg13[%c4_166, %c0_167] : memref<14x128xf32, #tpu.memory_space<vmem>>, vector<1x128xf32>
    %456 = tpu.iota {dimensions = array<i32: 1>} : vector<32x128xi32>
    %457 = tpu.iota {dimensions = array<i32: 0>} : vector<32x128xi32>
    %c32_i32 = arith.constant 32 : i32
    %458 = vector.broadcast %c32_i32 : i32 to vector<32x128xi32>
    %459 = arith.addi %457, %458 : vector<32x128xi32>
    %460 = arith.cmpi eq, %456, %459 : vector<32x128xi32>
    %cst_168 = arith.constant 0.000000e+00 : f32
    %461 = vector.shape_cast %455 : vector<1x128xf32> to vector<1x128xf32>
    %462 = vector.broadcast %461 : vector<1x128xf32> to vector<32x128xf32>
    %463 = vector.broadcast %cst_168 : f32 to vector<32x128xf32>
    %464 = arith.select %460, %462, %463 : vector<32x128xi1>, vector<32x128xf32>
    %cst_169 = arith.constant dense<0.000000e+00> : vector<32xf32>
    %465 = vector.multi_reduction <add>, %464, %cst_169 [1] : vector<32x128xf32> to vector<32xf32>
    %466 = vector.shape_cast %465 : vector<32xf32> to vector<32x1xf32>
    %c11_170 = arith.constant 11 : index
    %c0_171 = arith.constant 0 : index
    %467 = vector.load %arg13[%c11_170, %c0_171] : memref<14x128xf32, #tpu.memory_space<vmem>>, vector<1x128xf32>
    %468 = tpu.iota {dimensions = array<i32: 1>} : vector<32x128xi32>
    %469 = tpu.iota {dimensions = array<i32: 0>} : vector<32x128xi32>
    %c32_i32_172 = arith.constant 32 : i32
    %470 = vector.broadcast %c32_i32_172 : i32 to vector<32x128xi32>
    %471 = arith.addi %469, %470 : vector<32x128xi32>
    %472 = arith.cmpi eq, %468, %471 : vector<32x128xi32>
    %cst_173 = arith.constant 0.000000e+00 : f32
    %473 = vector.shape_cast %467 : vector<1x128xf32> to vector<1x128xf32>
    %474 = vector.broadcast %473 : vector<1x128xf32> to vector<32x128xf32>
    %475 = vector.broadcast %cst_173 : f32 to vector<32x128xf32>
    %476 = arith.select %472, %474, %475 : vector<32x128xi1>, vector<32x128xf32>
    %cst_174 = arith.constant dense<0.000000e+00> : vector<32xf32>
    %477 = vector.multi_reduction <add>, %476, %cst_174 [1] : vector<32x128xf32> to vector<32xf32>
    %478 = vector.shape_cast %477 : vector<32xf32> to vector<32x1xf32>
    %cst_175 = arith.constant 9.99999974E-6 : f32
    %479 = vector.broadcast %cst_175 : f32 to vector<32x1xf32>
    %480 = arith.addf %454, %479 : vector<32x1xf32>
    %481 = math.rsqrt %480 : vector<32x1xf32>
    %482 = arith.mulf %466, %481 : vector<32x1xf32>
    %483 = arith.mulf %448, %482 : vector<32x1xf32>
    %484 = arith.subf %478, %483 : vector<32x1xf32>
    %485 = vector.broadcast %482 : vector<32x1xf32> to vector<32x49xf32>
    %486 = arith.mulf %441, %485 : vector<32x49xf32>
    %487 = vector.broadcast %484 : vector<32x1xf32> to vector<32x49xf32>
    %488 = arith.addf %486, %487 : vector<32x49xf32>
    %c544 = arith.constant 544 : index
    %c0_176 = arith.constant 0 : index
    %489 = vector.load %arg14[%c544, %c0_176] : memref<896x49xf32, #tpu.memory_space<vmem>>, vector<32x49xf32>
    tpu.vector_store %arg14[%c544, %c0_176], %488 {strides = array<i32>} : memref<896x49xf32, #tpu.memory_space<vmem>>, vector<32x49xf32>,
    %c0_177 = arith.constant 0 : index
    %c0_178 = arith.constant 0 : index
    %490 = vector.load %arg3[%c0_177, %c0_178] : memref<32x49xf32, #tpu.memory_space<vmem>>, vector<32x49xf32>
    %cst_179 = arith.constant dense<0.000000e+00> : vector<32xf32>
    %491 = vector.multi_reduction <add>, %490, %cst_179 [1] : vector<32x49xf32> to vector<32xf32>
    %492 = vector.shape_cast %491 : vector<32xf32> to vector<32x1xf32>
    %493 = arith.mulf %490, %490 : vector<32x49xf32>
    %cst_180 = arith.constant dense<0.000000e+00> : vector<32xf32>
    %494 = vector.multi_reduction <add>, %493, %cst_180 [1] : vector<32x49xf32> to vector<32xf32>
    %495 = vector.shape_cast %494 : vector<32xf32> to vector<32x1xf32>
    %cst_181 = arith.constant 0.0204081628 : f32
    %496 = vector.broadcast %cst_181 : f32 to vector<32x1xf32>
    %497 = arith.mulf %492, %496 : vector<32x1xf32>
    %cst_182 = arith.constant 0.0204081628 : f32
    %498 = vector.broadcast %cst_182 : f32 to vector<32x1xf32>
    %499 = arith.mulf %495, %498 : vector<32x1xf32>
    %500 = arith.mulf %497, %497 : vector<32x1xf32>
    %501 = arith.subf %499, %500 : vector<32x1xf32>
    %cst_183 = arith.constant 0.000000e+00 : f32
    %502 = vector.broadcast %cst_183 : f32 to vector<32x1xf32>
    %503 = arith.maximumf %501, %502 : vector<32x1xf32>
    %c4_184 = arith.constant 4 : index
    %c0_185 = arith.constant 0 : index
    %504 = vector.load %arg13[%c4_184, %c0_185] : memref<14x128xf32, #tpu.memory_space<vmem>>, vector<1x128xf32>
    %505 = tpu.iota {dimensions = array<i32: 1>} : vector<32x128xi32>
    %506 = tpu.iota {dimensions = array<i32: 0>} : vector<32x128xi32>
    %c64_i32_186 = arith.constant 64 : i32
    %507 = vector.broadcast %c64_i32_186 : i32 to vector<32x128xi32>
    %508 = arith.addi %506, %507 : vector<32x128xi32>
    %509 = arith.cmpi eq, %505, %508 : vector<32x128xi32>
    %cst_187 = arith.constant 0.000000e+00 : f32
    %510 = vector.shape_cast %504 : vector<1x128xf32> to vector<1x128xf32>
    %511 = vector.broadcast %510 : vector<1x128xf32> to vector<32x128xf32>
    %512 = vector.broadcast %cst_187 : f32 to vector<32x128xf32>
    %513 = arith.select %509, %511, %512 : vector<32x128xi1>, vector<32x128xf32>
    %cst_188 = arith.constant dense<0.000000e+00> : vector<32xf32>
    %514 = vector.multi_reduction <add>, %513, %cst_188 [1] : vector<32x128xf32> to vector<32xf32>
    %515 = vector.shape_cast %514 : vector<32xf32> to vector<32x1xf32>
    %c11_189 = arith.constant 11 : index
    %c0_190 = arith.constant 0 : index
    %516 = vector.load %arg13[%c11_189, %c0_190] : memref<14x128xf32, #tpu.memory_space<vmem>>, vector<1x128xf32>
    %517 = tpu.iota {dimensions = array<i32: 1>} : vector<32x128xi32>
    %518 = tpu.iota {dimensions = array<i32: 0>} : vector<32x128xi32>
    %c64_i32_191 = arith.constant 64 : i32
    %519 = vector.broadcast %c64_i32_191 : i32 to vector<32x128xi32>
    %520 = arith.addi %518, %519 : vector<32x128xi32>
    %521 = arith.cmpi eq, %517, %520 : vector<32x128xi32>
    %cst_192 = arith.constant 0.000000e+00 : f32
    %522 = vector.shape_cast %516 : vector<1x128xf32> to vector<1x128xf32>
    %523 = vector.broadcast %522 : vector<1x128xf32> to vector<32x128xf32>
    %524 = vector.broadcast %cst_192 : f32 to vector<32x128xf32>
    %525 = arith.select %521, %523, %524 : vector<32x128xi1>, vector<32x128xf32>
    %cst_193 = arith.constant dense<0.000000e+00> : vector<32xf32>
    %526 = vector.multi_reduction <add>, %525, %cst_193 [1] : vector<32x128xf32> to vector<32xf32>
    %527 = vector.shape_cast %526 : vector<32xf32> to vector<32x1xf32>
    %cst_194 = arith.constant 9.99999974E-6 : f32
    %528 = vector.broadcast %cst_194 : f32 to vector<32x1xf32>
    %529 = arith.addf %503, %528 : vector<32x1xf32>
    %530 = math.rsqrt %529 : vector<32x1xf32>
    %531 = arith.mulf %515, %530 : vector<32x1xf32>
    %532 = arith.mulf %497, %531 : vector<32x1xf32>
    %533 = arith.subf %527, %532 : vector<32x1xf32>
    %534 = vector.broadcast %531 : vector<32x1xf32> to vector<32x49xf32>
    %535 = arith.mulf %490, %534 : vector<32x49xf32>
    %536 = vector.broadcast %533 : vector<32x1xf32> to vector<32x49xf32>
    %537 = arith.addf %535, %536 : vector<32x49xf32>
    %c576 = arith.constant 576 : index
    %c0_195 = arith.constant 0 : index
    %538 = vector.load %arg14[%c576, %c0_195] : memref<896x49xf32, #tpu.memory_space<vmem>>, vector<32x49xf32>
    tpu.vector_store %arg14[%c576, %c0_195], %537 {strides = array<i32>} : memref<896x49xf32, #tpu.memory_space<vmem>>, vector<32x49xf32>,
    %c0_196 = arith.constant 0 : index
    %c0_197 = arith.constant 0 : index
    %539 = vector.load %arg4[%c0_196, %c0_197] : memref<32x49xf32, #tpu.memory_space<vmem>>, vector<32x49xf32>
    %cst_198 = arith.constant dense<0.000000e+00> : vector<32xf32>
    %540 = vector.multi_reduction <add>, %539, %cst_198 [1] : vector<32x49xf32> to vector<32xf32>
    %541 = vector.shape_cast %540 : vector<32xf32> to vector<32x1xf32>
    %542 = arith.mulf %539, %539 : vector<32x49xf32>
    %cst_199 = arith.constant dense<0.000000e+00> : vector<32xf32>
    %543 = vector.multi_reduction <add>, %542, %cst_199 [1] : vector<32x49xf32> to vector<32xf32>
    %544 = vector.shape_cast %543 : vector<32xf32> to vector<32x1xf32>
    %cst_200 = arith.constant 0.0204081628 : f32
    %545 = vector.broadcast %cst_200 : f32 to vector<32x1xf32>
    %546 = arith.mulf %541, %545 : vector<32x1xf32>
    %cst_201 = arith.constant 0.0204081628 : f32
    %547 = vector.broadcast %cst_201 : f32 to vector<32x1xf32>
    %548 = arith.mulf %544, %547 : vector<32x1xf32>
    %549 = arith.mulf %546, %546 : vector<32x1xf32>
    %550 = arith.subf %548, %549 : vector<32x1xf32>
    %cst_202 = arith.constant 0.000000e+00 : f32
    %551 = vector.broadcast %cst_202 : f32 to vector<32x1xf32>
    %552 = arith.maximumf %550, %551 : vector<32x1xf32>
    %c4_203 = arith.constant 4 : index
    %c0_204 = arith.constant 0 : index
    %553 = vector.load %arg13[%c4_203, %c0_204] : memref<14x128xf32, #tpu.memory_space<vmem>>, vector<1x128xf32>
    %554 = tpu.iota {dimensions = array<i32: 1>} : vector<32x128xi32>
    %555 = tpu.iota {dimensions = array<i32: 0>} : vector<32x128xi32>
    %c96_i32 = arith.constant 96 : i32
    %556 = vector.broadcast %c96_i32 : i32 to vector<32x128xi32>
    %557 = arith.addi %555, %556 : vector<32x128xi32>
    %558 = arith.cmpi eq, %554, %557 : vector<32x128xi32>
    %cst_205 = arith.constant 0.000000e+00 : f32
    %559 = vector.shape_cast %553 : vector<1x128xf32> to vector<1x128xf32>
    %560 = vector.broadcast %559 : vector<1x128xf32> to vector<32x128xf32>
    %561 = vector.broadcast %cst_205 : f32 to vector<32x128xf32>
    %562 = arith.select %558, %560, %561 : vector<32x128xi1>, vector<32x128xf32>
    %cst_206 = arith.constant dense<0.000000e+00> : vector<32xf32>
    %563 = vector.multi_reduction <add>, %562, %cst_206 [1] : vector<32x128xf32> to vector<32xf32>
    %564 = vector.shape_cast %563 : vector<32xf32> to vector<32x1xf32>
    %c11_207 = arith.constant 11 : index
    %c0_208 = arith.constant 0 : index
    %565 = vector.load %arg13[%c11_207, %c0_208] : memref<14x128xf32, #tpu.memory_space<vmem>>, vector<1x128xf32>
    %566 = tpu.iota {dimensions = array<i32: 1>} : vector<32x128xi32>
    %567 = tpu.iota {dimensions = array<i32: 0>} : vector<32x128xi32>
    %c96_i32_209 = arith.constant 96 : i32
    %568 = vector.broadcast %c96_i32_209 : i32 to vector<32x128xi32>
    %569 = arith.addi %567, %568 : vector<32x128xi32>
    %570 = arith.cmpi eq, %566, %569 : vector<32x128xi32>
    %cst_210 = arith.constant 0.000000e+00 : f32
    %571 = vector.shape_cast %565 : vector<1x128xf32> to vector<1x128xf32>
    %572 = vector.broadcast %571 : vector<1x128xf32> to vector<32x128xf32>
    %573 = vector.broadcast %cst_210 : f32 to vector<32x128xf32>
    %574 = arith.select %570, %572, %573 : vector<32x128xi1>, vector<32x128xf32>
    %cst_211 = arith.constant dense<0.000000e+00> : vector<32xf32>
    %575 = vector.multi_reduction <add>, %574, %cst_211 [1] : vector<32x128xf32> to vector<32xf32>
    %576 = vector.shape_cast %575 : vector<32xf32> to vector<32x1xf32>
    %cst_212 = arith.constant 9.99999974E-6 : f32
    %577 = vector.broadcast %cst_212 : f32 to vector<32x1xf32>
    %578 = arith.addf %552, %577 : vector<32x1xf32>
    %579 = math.rsqrt %578 : vector<32x1xf32>
    %580 = arith.mulf %564, %579 : vector<32x1xf32>
    %581 = arith.mulf %546, %580 : vector<32x1xf32>
    %582 = arith.subf %576, %581 : vector<32x1xf32>
    %583 = vector.broadcast %580 : vector<32x1xf32> to vector<32x49xf32>
    %584 = arith.mulf %539, %583 : vector<32x49xf32>
    %585 = vector.broadcast %582 : vector<32x1xf32> to vector<32x49xf32>
    %586 = arith.addf %584, %585 : vector<32x49xf32>
    %c608 = arith.constant 608 : index
    %c0_213 = arith.constant 0 : index
    %587 = vector.load %arg14[%c608, %c0_213] : memref<896x49xf32, #tpu.memory_space<vmem>>, vector<32x49xf32>
    tpu.vector_store %arg14[%c608, %c0_213], %586 {strides = array<i32>} : memref<896x49xf32, #tpu.memory_space<vmem>>, vector<32x49xf32>,
    %c0_214 = arith.constant 0 : index
    %c0_215 = arith.constant 0 : index
    %588 = vector.load %arg5[%c0_214, %c0_215] : memref<32x49xf32, #tpu.memory_space<vmem>>, vector<32x49xf32>
    %cst_216 = arith.constant dense<0.000000e+00> : vector<32xf32>
    %589 = vector.multi_reduction <add>, %588, %cst_216 [1] : vector<32x49xf32> to vector<32xf32>
    %590 = vector.shape_cast %589 : vector<32xf32> to vector<32x1xf32>
    %591 = arith.mulf %588, %588 : vector<32x49xf32>
    %cst_217 = arith.constant dense<0.000000e+00> : vector<32xf32>
    %592 = vector.multi_reduction <add>, %591, %cst_217 [1] : vector<32x49xf32> to vector<32xf32>
    %593 = vector.shape_cast %592 : vector<32xf32> to vector<32x1xf32>
    %cst_218 = arith.constant 0.0204081628 : f32
    %594 = vector.broadcast %cst_218 : f32 to vector<32x1xf32>
    %595 = arith.mulf %590, %594 : vector<32x1xf32>
    %cst_219 = arith.constant 0.0204081628 : f32
    %596 = vector.broadcast %cst_219 : f32 to vector<32x1xf32>
    %597 = arith.mulf %593, %596 : vector<32x1xf32>
    %598 = arith.mulf %595, %595 : vector<32x1xf32>
    %599 = arith.subf %597, %598 : vector<32x1xf32>
    %cst_220 = arith.constant 0.000000e+00 : f32
    %600 = vector.broadcast %cst_220 : f32 to vector<32x1xf32>
    %601 = arith.maximumf %599, %600 : vector<32x1xf32>
    %c5 = arith.constant 5 : index
    %c0_221 = arith.constant 0 : index
    %602 = vector.load %arg13[%c5, %c0_221] : memref<14x128xf32, #tpu.memory_space<vmem>>, vector<1x128xf32>
    %603 = tpu.iota {dimensions = array<i32: 1>} : vector<32x128xi32>
    %604 = tpu.iota {dimensions = array<i32: 0>} : vector<32x128xi32>
    %c0_i32_222 = arith.constant 0 : i32
    %605 = vector.broadcast %c0_i32_222 : i32 to vector<32x128xi32>
    %606 = arith.addi %604, %605 : vector<32x128xi32>
    %607 = arith.cmpi eq, %603, %606 : vector<32x128xi32>
    %cst_223 = arith.constant 0.000000e+00 : f32
    %608 = vector.shape_cast %602 : vector<1x128xf32> to vector<1x128xf32>
    %609 = vector.broadcast %608 : vector<1x128xf32> to vector<32x128xf32>
    %610 = vector.broadcast %cst_223 : f32 to vector<32x128xf32>
    %611 = arith.select %607, %609, %610 : vector<32x128xi1>, vector<32x128xf32>
    %cst_224 = arith.constant dense<0.000000e+00> : vector<32xf32>
    %612 = vector.multi_reduction <add>, %611, %cst_224 [1] : vector<32x128xf32> to vector<32xf32>
    %613 = vector.shape_cast %612 : vector<32xf32> to vector<32x1xf32>
    %c12 = arith.constant 12 : index
    %c0_225 = arith.constant 0 : index
    %614 = vector.load %arg13[%c12, %c0_225] : memref<14x128xf32, #tpu.memory_space<vmem>>, vector<1x128xf32>
    %615 = tpu.iota {dimensions = array<i32: 1>} : vector<32x128xi32>
    %616 = tpu.iota {dimensions = array<i32: 0>} : vector<32x128xi32>
    %c0_i32_226 = arith.constant 0 : i32
    %617 = vector.broadcast %c0_i32_226 : i32 to vector<32x128xi32>
    %618 = arith.addi %616, %617 : vector<32x128xi32>
    %619 = arith.cmpi eq, %615, %618 : vector<32x128xi32>
    %cst_227 = arith.constant 0.000000e+00 : f32
    %620 = vector.shape_cast %614 : vector<1x128xf32> to vector<1x128xf32>
    %621 = vector.broadcast %620 : vector<1x128xf32> to vector<32x128xf32>
    %622 = vector.broadcast %cst_227 : f32 to vector<32x128xf32>
    %623 = arith.select %619, %621, %622 : vector<32x128xi1>, vector<32x128xf32>
    %cst_228 = arith.constant dense<0.000000e+00> : vector<32xf32>
    %624 = vector.multi_reduction <add>, %623, %cst_228 [1] : vector<32x128xf32> to vector<32xf32>
    %625 = vector.shape_cast %624 : vector<32xf32> to vector<32x1xf32>
    %cst_229 = arith.constant 9.99999974E-6 : f32
    %626 = vector.broadcast %cst_229 : f32 to vector<32x1xf32>
    %627 = arith.addf %601, %626 : vector<32x1xf32>
    %628 = math.rsqrt %627 : vector<32x1xf32>
    %629 = arith.mulf %613, %628 : vector<32x1xf32>
    %630 = arith.mulf %595, %629 : vector<32x1xf32>
    %631 = arith.subf %625, %630 : vector<32x1xf32>
    %632 = vector.broadcast %629 : vector<32x1xf32> to vector<32x49xf32>
    %633 = arith.mulf %588, %632 : vector<32x49xf32>
    %634 = vector.broadcast %631 : vector<32x1xf32> to vector<32x49xf32>
    %635 = arith.addf %633, %634 : vector<32x49xf32>
    %c640 = arith.constant 640 : index
    %c0_230 = arith.constant 0 : index
    %636 = vector.load %arg14[%c640, %c0_230] : memref<896x49xf32, #tpu.memory_space<vmem>>, vector<32x49xf32>
    tpu.vector_store %arg14[%c640, %c0_230], %635 {strides = array<i32>} : memref<896x49xf32, #tpu.memory_space<vmem>>, vector<32x49xf32>,
    %c0_231 = arith.constant 0 : index
    %c0_232 = arith.constant 0 : index
    %637 = vector.load %arg6[%c0_231, %c0_232] : memref<32x49xf32, #tpu.memory_space<vmem>>, vector<32x49xf32>
    %cst_233 = arith.constant dense<0.000000e+00> : vector<32xf32>
    %638 = vector.multi_reduction <add>, %637, %cst_233 [1] : vector<32x49xf32> to vector<32xf32>
    %639 = vector.shape_cast %638 : vector<32xf32> to vector<32x1xf32>
    %640 = arith.mulf %637, %637 : vector<32x49xf32>
    %cst_234 = arith.constant dense<0.000000e+00> : vector<32xf32>
    %641 = vector.multi_reduction <add>, %640, %cst_234 [1] : vector<32x49xf32> to vector<32xf32>
    %642 = vector.shape_cast %641 : vector<32xf32> to vector<32x1xf32>
    %cst_235 = arith.constant 0.0204081628 : f32
    %643 = vector.broadcast %cst_235 : f32 to vector<32x1xf32>
    %644 = arith.mulf %639, %643 : vector<32x1xf32>
    %cst_236 = arith.constant 0.0204081628 : f32
    %645 = vector.broadcast %cst_236 : f32 to vector<32x1xf32>
    %646 = arith.mulf %642, %645 : vector<32x1xf32>
    %647 = arith.mulf %644, %644 : vector<32x1xf32>
    %648 = arith.subf %646, %647 : vector<32x1xf32>
    %cst_237 = arith.constant 0.000000e+00 : f32
    %649 = vector.broadcast %cst_237 : f32 to vector<32x1xf32>
    %650 = arith.maximumf %648, %649 : vector<32x1xf32>
    %c5_238 = arith.constant 5 : index
    %c0_239 = arith.constant 0 : index
    %651 = vector.load %arg13[%c5_238, %c0_239] : memref<14x128xf32, #tpu.memory_space<vmem>>, vector<1x128xf32>
    %652 = tpu.iota {dimensions = array<i32: 1>} : vector<32x128xi32>
    %653 = tpu.iota {dimensions = array<i32: 0>} : vector<32x128xi32>
    %c32_i32_240 = arith.constant 32 : i32
    %654 = vector.broadcast %c32_i32_240 : i32 to vector<32x128xi32>
    %655 = arith.addi %653, %654 : vector<32x128xi32>
    %656 = arith.cmpi eq, %652, %655 : vector<32x128xi32>
    %cst_241 = arith.constant 0.000000e+00 : f32
    %657 = vector.shape_cast %651 : vector<1x128xf32> to vector<1x128xf32>
    %658 = vector.broadcast %657 : vector<1x128xf32> to vector<32x128xf32>
    %659 = vector.broadcast %cst_241 : f32 to vector<32x128xf32>
    %660 = arith.select %656, %658, %659 : vector<32x128xi1>, vector<32x128xf32>
    %cst_242 = arith.constant dense<0.000000e+00> : vector<32xf32>
    %661 = vector.multi_reduction <add>, %660, %cst_242 [1] : vector<32x128xf32> to vector<32xf32>
    %662 = vector.shape_cast %661 : vector<32xf32> to vector<32x1xf32>
    %c12_243 = arith.constant 12 : index
    %c0_244 = arith.constant 0 : index
    %663 = vector.load %arg13[%c12_243, %c0_244] : memref<14x128xf32, #tpu.memory_space<vmem>>, vector<1x128xf32>
    %664 = tpu.iota {dimensions = array<i32: 1>} : vector<32x128xi32>
    %665 = tpu.iota {dimensions = array<i32: 0>} : vector<32x128xi32>
    %c32_i32_245 = arith.constant 32 : i32
    %666 = vector.broadcast %c32_i32_245 : i32 to vector<32x128xi32>
    %667 = arith.addi %665, %666 : vector<32x128xi32>
    %668 = arith.cmpi eq, %664, %667 : vector<32x128xi32>
    %cst_246 = arith.constant 0.000000e+00 : f32
    %669 = vector.shape_cast %663 : vector<1x128xf32> to vector<1x128xf32>
    %670 = vector.broadcast %669 : vector<1x128xf32> to vector<32x128xf32>
    %671 = vector.broadcast %cst_246 : f32 to vector<32x128xf32>
    %672 = arith.select %668, %670, %671 : vector<32x128xi1>, vector<32x128xf32>
    %cst_247 = arith.constant dense<0.000000e+00> : vector<32xf32>
    %673 = vector.multi_reduction <add>, %672, %cst_247 [1] : vector<32x128xf32> to vector<32xf32>
    %674 = vector.shape_cast %673 : vector<32xf32> to vector<32x1xf32>
    %cst_248 = arith.constant 9.99999974E-6 : f32
    %675 = vector.broadcast %cst_248 : f32 to vector<32x1xf32>
    %676 = arith.addf %650, %675 : vector<32x1xf32>
    %677 = math.rsqrt %676 : vector<32x1xf32>
    %678 = arith.mulf %662, %677 : vector<32x1xf32>
    %679 = arith.mulf %644, %678 : vector<32x1xf32>
    %680 = arith.subf %674, %679 : vector<32x1xf32>
    %681 = vector.broadcast %678 : vector<32x1xf32> to vector<32x49xf32>
    %682 = arith.mulf %637, %681 : vector<32x49xf32>
    %683 = vector.broadcast %680 : vector<32x1xf32> to vector<32x49xf32>
    %684 = arith.addf %682, %683 : vector<32x49xf32>
    %c672 = arith.constant 672 : index
    %c0_249 = arith.constant 0 : index
    %685 = vector.load %arg14[%c672, %c0_249] : memref<896x49xf32, #tpu.memory_space<vmem>>, vector<32x49xf32>
    tpu.vector_store %arg14[%c672, %c0_249], %684 {strides = array<i32>} : memref<896x49xf32, #tpu.memory_space<vmem>>, vector<32x49xf32>,
    %c0_250 = arith.constant 0 : index
    %c0_251 = arith.constant 0 : index
    %686 = vector.load %arg7[%c0_250, %c0_251] : memref<32x49xf32, #tpu.memory_space<vmem>>, vector<32x49xf32>
    %cst_252 = arith.constant dense<0.000000e+00> : vector<32xf32>
    %687 = vector.multi_reduction <add>, %686, %cst_252 [1] : vector<32x49xf32> to vector<32xf32>
    %688 = vector.shape_cast %687 : vector<32xf32> to vector<32x1xf32>
    %689 = arith.mulf %686, %686 : vector<32x49xf32>
    %cst_253 = arith.constant dense<0.000000e+00> : vector<32xf32>
    %690 = vector.multi_reduction <add>, %689, %cst_253 [1] : vector<32x49xf32> to vector<32xf32>
    %691 = vector.shape_cast %690 : vector<32xf32> to vector<32x1xf32>
    %cst_254 = arith.constant 0.0204081628 : f32
    %692 = vector.broadcast %cst_254 : f32 to vector<32x1xf32>
    %693 = arith.mulf %688, %692 : vector<32x1xf32>
    %cst_255 = arith.constant 0.0204081628 : f32
    %694 = vector.broadcast %cst_255 : f32 to vector<32x1xf32>
    %695 = arith.mulf %691, %694 : vector<32x1xf32>
    %696 = arith.mulf %693, %693 : vector<32x1xf32>
    %697 = arith.subf %695, %696 : vector<32x1xf32>
    %cst_256 = arith.constant 0.000000e+00 : f32
    %698 = vector.broadcast %cst_256 : f32 to vector<32x1xf32>
    %699 = arith.maximumf %697, %698 : vector<32x1xf32>
    %c5_257 = arith.constant 5 : index
    %c0_258 = arith.constant 0 : index
    %700 = vector.load %arg13[%c5_257, %c0_258] : memref<14x128xf32, #tpu.memory_space<vmem>>, vector<1x128xf32>
    %701 = tpu.iota {dimensions = array<i32: 1>} : vector<32x128xi32>
    %702 = tpu.iota {dimensions = array<i32: 0>} : vector<32x128xi32>
    %c64_i32_259 = arith.constant 64 : i32
    %703 = vector.broadcast %c64_i32_259 : i32 to vector<32x128xi32>
    %704 = arith.addi %702, %703 : vector<32x128xi32>
    %705 = arith.cmpi eq, %701, %704 : vector<32x128xi32>
    %cst_260 = arith.constant 0.000000e+00 : f32
    %706 = vector.shape_cast %700 : vector<1x128xf32> to vector<1x128xf32>
    %707 = vector.broadcast %706 : vector<1x128xf32> to vector<32x128xf32>
    %708 = vector.broadcast %cst_260 : f32 to vector<32x128xf32>
    %709 = arith.select %705, %707, %708 : vector<32x128xi1>, vector<32x128xf32>
    %cst_261 = arith.constant dense<0.000000e+00> : vector<32xf32>
    %710 = vector.multi_reduction <add>, %709, %cst_261 [1] : vector<32x128xf32> to vector<32xf32>
    %711 = vector.shape_cast %710 : vector<32xf32> to vector<32x1xf32>
    %c12_262 = arith.constant 12 : index
    %c0_263 = arith.constant 0 : index
    %712 = vector.load %arg13[%c12_262, %c0_263] : memref<14x128xf32, #tpu.memory_space<vmem>>, vector<1x128xf32>
    %713 = tpu.iota {dimensions = array<i32: 1>} : vector<32x128xi32>
    %714 = tpu.iota {dimensions = array<i32: 0>} : vector<32x128xi32>
    %c64_i32_264 = arith.constant 64 : i32
    %715 = vector.broadcast %c64_i32_264 : i32 to vector<32x128xi32>
    %716 = arith.addi %714, %715 : vector<32x128xi32>
    %717 = arith.cmpi eq, %713, %716 : vector<32x128xi32>
    %cst_265 = arith.constant 0.000000e+00 : f32
    %718 = vector.shape_cast %712 : vector<1x128xf32> to vector<1x128xf32>
    %719 = vector.broadcast %718 : vector<1x128xf32> to vector<32x128xf32>
    %720 = vector.broadcast %cst_265 : f32 to vector<32x128xf32>
    %721 = arith.select %717, %719, %720 : vector<32x128xi1>, vector<32x128xf32>
    %cst_266 = arith.constant dense<0.000000e+00> : vector<32xf32>
    %722 = vector.multi_reduction <add>, %721, %cst_266 [1] : vector<32x128xf32> to vector<32xf32>
    %723 = vector.shape_cast %722 : vector<32xf32> to vector<32x1xf32>
    %cst_267 = arith.constant 9.99999974E-6 : f32
    %724 = vector.broadcast %cst_267 : f32 to vector<32x1xf32>
    %725 = arith.addf %699, %724 : vector<32x1xf32>
    %726 = math.rsqrt %725 : vector<32x1xf32>
    %727 = arith.mulf %711, %726 : vector<32x1xf32>
    %728 = arith.mulf %693, %727 : vector<32x1xf32>
    %729 = arith.subf %723, %728 : vector<32x1xf32>
    %730 = vector.broadcast %727 : vector<32x1xf32> to vector<32x49xf32>
    %731 = arith.mulf %686, %730 : vector<32x49xf32>
    %732 = vector.broadcast %729 : vector<32x1xf32> to vector<32x49xf32>
    %733 = arith.addf %731, %732 : vector<32x49xf32>
    %c704 = arith.constant 704 : index
    %c0_268 = arith.constant 0 : index
    %734 = vector.load %arg14[%c704, %c0_268] : memref<896x49xf32, #tpu.memory_space<vmem>>, vector<32x49xf32>
    tpu.vector_store %arg14[%c704, %c0_268], %733 {strides = array<i32>} : memref<896x49xf32, #tpu.memory_space<vmem>>, vector<32x49xf32>,
    %c0_269 = arith.constant 0 : index
    %c0_270 = arith.constant 0 : index
    %735 = vector.load %arg8[%c0_269, %c0_270] : memref<32x49xf32, #tpu.memory_space<vmem>>, vector<32x49xf32>
    %cst_271 = arith.constant dense<0.000000e+00> : vector<32xf32>
    %736 = vector.multi_reduction <add>, %735, %cst_271 [1] : vector<32x49xf32> to vector<32xf32>
    %737 = vector.shape_cast %736 : vector<32xf32> to vector<32x1xf32>
    %738 = arith.mulf %735, %735 : vector<32x49xf32>
    %cst_272 = arith.constant dense<0.000000e+00> : vector<32xf32>
    %739 = vector.multi_reduction <add>, %738, %cst_272 [1] : vector<32x49xf32> to vector<32xf32>
    %740 = vector.shape_cast %739 : vector<32xf32> to vector<32x1xf32>
    %cst_273 = arith.constant 0.0204081628 : f32
    %741 = vector.broadcast %cst_273 : f32 to vector<32x1xf32>
    %742 = arith.mulf %737, %741 : vector<32x1xf32>
    %cst_274 = arith.constant 0.0204081628 : f32
    %743 = vector.broadcast %cst_274 : f32 to vector<32x1xf32>
    %744 = arith.mulf %740, %743 : vector<32x1xf32>
    %745 = arith.mulf %742, %742 : vector<32x1xf32>
    %746 = arith.subf %744, %745 : vector<32x1xf32>
    %cst_275 = arith.constant 0.000000e+00 : f32
    %747 = vector.broadcast %cst_275 : f32 to vector<32x1xf32>
    %748 = arith.maximumf %746, %747 : vector<32x1xf32>
    %c5_276 = arith.constant 5 : index
    %c0_277 = arith.constant 0 : index
    %749 = vector.load %arg13[%c5_276, %c0_277] : memref<14x128xf32, #tpu.memory_space<vmem>>, vector<1x128xf32>
    %750 = tpu.iota {dimensions = array<i32: 1>} : vector<32x128xi32>
    %751 = tpu.iota {dimensions = array<i32: 0>} : vector<32x128xi32>
    %c96_i32_278 = arith.constant 96 : i32
    %752 = vector.broadcast %c96_i32_278 : i32 to vector<32x128xi32>
    %753 = arith.addi %751, %752 : vector<32x128xi32>
    %754 = arith.cmpi eq, %750, %753 : vector<32x128xi32>
    %cst_279 = arith.constant 0.000000e+00 : f32
    %755 = vector.shape_cast %749 : vector<1x128xf32> to vector<1x128xf32>
    %756 = vector.broadcast %755 : vector<1x128xf32> to vector<32x128xf32>
    %757 = vector.broadcast %cst_279 : f32 to vector<32x128xf32>
    %758 = arith.select %754, %756, %757 : vector<32x128xi1>, vector<32x128xf32>
    %cst_280 = arith.constant dense<0.000000e+00> : vector<32xf32>
    %759 = vector.multi_reduction <add>, %758, %cst_280 [1] : vector<32x128xf32> to vector<32xf32>
    %760 = vector.shape_cast %759 : vector<32xf32> to vector<32x1xf32>
    %c12_281 = arith.constant 12 : index
    %c0_282 = arith.constant 0 : index
    %761 = vector.load %arg13[%c12_281, %c0_282] : memref<14x128xf32, #tpu.memory_space<vmem>>, vector<1x128xf32>
    %762 = tpu.iota {dimensions = array<i32: 1>} : vector<32x128xi32>
    %763 = tpu.iota {dimensions = array<i32: 0>} : vector<32x128xi32>
    %c96_i32_283 = arith.constant 96 : i32
    %764 = vector.broadcast %c96_i32_283 : i32 to vector<32x128xi32>
    %765 = arith.addi %763, %764 : vector<32x128xi32>
    %766 = arith.cmpi eq, %762, %765 : vector<32x128xi32>
    %cst_284 = arith.constant 0.000000e+00 : f32
    %767 = vector.shape_cast %761 : vector<1x128xf32> to vector<1x128xf32>
    %768 = vector.broadcast %767 : vector<1x128xf32> to vector<32x128xf32>
    %769 = vector.broadcast %cst_284 : f32 to vector<32x128xf32>
    %770 = arith.select %766, %768, %769 : vector<32x128xi1>, vector<32x128xf32>
    %cst_285 = arith.constant dense<0.000000e+00> : vector<32xf32>
    %771 = vector.multi_reduction <add>, %770, %cst_285 [1] : vector<32x128xf32> to vector<32xf32>
    %772 = vector.shape_cast %771 : vector<32xf32> to vector<32x1xf32>
    %cst_286 = arith.constant 9.99999974E-6 : f32
    %773 = vector.broadcast %cst_286 : f32 to vector<32x1xf32>
    %774 = arith.addf %748, %773 : vector<32x1xf32>
    %775 = math.rsqrt %774 : vector<32x1xf32>
    %776 = arith.mulf %760, %775 : vector<32x1xf32>
    %777 = arith.mulf %742, %776 : vector<32x1xf32>
    %778 = arith.subf %772, %777 : vector<32x1xf32>
    %779 = vector.broadcast %776 : vector<32x1xf32> to vector<32x49xf32>
    %780 = arith.mulf %735, %779 : vector<32x49xf32>
    %781 = vector.broadcast %778 : vector<32x1xf32> to vector<32x49xf32>
    %782 = arith.addf %780, %781 : vector<32x49xf32>
    %c736 = arith.constant 736 : index
    %c0_287 = arith.constant 0 : index
    %783 = vector.load %arg14[%c736, %c0_287] : memref<896x49xf32, #tpu.memory_space<vmem>>, vector<32x49xf32>
    tpu.vector_store %arg14[%c736, %c0_287], %782 {strides = array<i32>} : memref<896x49xf32, #tpu.memory_space<vmem>>, vector<32x49xf32>,
    %c0_288 = arith.constant 0 : index
    %c0_289 = arith.constant 0 : index
    %784 = vector.load %arg9[%c0_288, %c0_289] : memref<32x49xf32, #tpu.memory_space<vmem>>, vector<32x49xf32>
    %cst_290 = arith.constant dense<0.000000e+00> : vector<32xf32>
    %785 = vector.multi_reduction <add>, %784, %cst_290 [1] : vector<32x49xf32> to vector<32xf32>
    %786 = vector.shape_cast %785 : vector<32xf32> to vector<32x1xf32>
    %787 = arith.mulf %784, %784 : vector<32x49xf32>
    %cst_291 = arith.constant dense<0.000000e+00> : vector<32xf32>
    %788 = vector.multi_reduction <add>, %787, %cst_291 [1] : vector<32x49xf32> to vector<32xf32>
    %789 = vector.shape_cast %788 : vector<32xf32> to vector<32x1xf32>
    %cst_292 = arith.constant 0.0204081628 : f32
    %790 = vector.broadcast %cst_292 : f32 to vector<32x1xf32>
    %791 = arith.mulf %786, %790 : vector<32x1xf32>
    %cst_293 = arith.constant 0.0204081628 : f32
    %792 = vector.broadcast %cst_293 : f32 to vector<32x1xf32>
    %793 = arith.mulf %789, %792 : vector<32x1xf32>
    %794 = arith.mulf %791, %791 : vector<32x1xf32>
    %795 = arith.subf %793, %794 : vector<32x1xf32>
    %cst_294 = arith.constant 0.000000e+00 : f32
    %796 = vector.broadcast %cst_294 : f32 to vector<32x1xf32>
    %797 = arith.maximumf %795, %796 : vector<32x1xf32>
    %c6 = arith.constant 6 : index
    %c0_295 = arith.constant 0 : index
    %798 = vector.load %arg13[%c6, %c0_295] : memref<14x128xf32, #tpu.memory_space<vmem>>, vector<1x128xf32>
    %799 = tpu.iota {dimensions = array<i32: 1>} : vector<32x128xi32>
    %800 = tpu.iota {dimensions = array<i32: 0>} : vector<32x128xi32>
    %c0_i32_296 = arith.constant 0 : i32
    %801 = vector.broadcast %c0_i32_296 : i32 to vector<32x128xi32>
    %802 = arith.addi %800, %801 : vector<32x128xi32>
    %803 = arith.cmpi eq, %799, %802 : vector<32x128xi32>
    %cst_297 = arith.constant 0.000000e+00 : f32
    %804 = vector.shape_cast %798 : vector<1x128xf32> to vector<1x128xf32>
    %805 = vector.broadcast %804 : vector<1x128xf32> to vector<32x128xf32>
    %806 = vector.broadcast %cst_297 : f32 to vector<32x128xf32>
    %807 = arith.select %803, %805, %806 : vector<32x128xi1>, vector<32x128xf32>
    %cst_298 = arith.constant dense<0.000000e+00> : vector<32xf32>
    %808 = vector.multi_reduction <add>, %807, %cst_298 [1] : vector<32x128xf32> to vector<32xf32>
    %809 = vector.shape_cast %808 : vector<32xf32> to vector<32x1xf32>
    %c13 = arith.constant 13 : index
    %c0_299 = arith.constant 0 : index
    %810 = vector.load %arg13[%c13, %c0_299] : memref<14x128xf32, #tpu.memory_space<vmem>>, vector<1x128xf32>
    %811 = tpu.iota {dimensions = array<i32: 1>} : vector<32x128xi32>
    %812 = tpu.iota {dimensions = array<i32: 0>} : vector<32x128xi32>
    %c0_i32_300 = arith.constant 0 : i32
    %813 = vector.broadcast %c0_i32_300 : i32 to vector<32x128xi32>
    %814 = arith.addi %812, %813 : vector<32x128xi32>
    %815 = arith.cmpi eq, %811, %814 : vector<32x128xi32>
    %cst_301 = arith.constant 0.000000e+00 : f32
    %816 = vector.shape_cast %810 : vector<1x128xf32> to vector<1x128xf32>
    %817 = vector.broadcast %816 : vector<1x128xf32> to vector<32x128xf32>
    %818 = vector.broadcast %cst_301 : f32 to vector<32x128xf32>
    %819 = arith.select %815, %817, %818 : vector<32x128xi1>, vector<32x128xf32>
    %cst_302 = arith.constant dense<0.000000e+00> : vector<32xf32>
    %820 = vector.multi_reduction <add>, %819, %cst_302 [1] : vector<32x128xf32> to vector<32xf32>
    %821 = vector.shape_cast %820 : vector<32xf32> to vector<32x1xf32>
    %cst_303 = arith.constant 9.99999974E-6 : f32
    %822 = vector.broadcast %cst_303 : f32 to vector<32x1xf32>
    %823 = arith.addf %797, %822 : vector<32x1xf32>
    %824 = math.rsqrt %823 : vector<32x1xf32>
    %825 = arith.mulf %809, %824 : vector<32x1xf32>
    %826 = arith.mulf %791, %825 : vector<32x1xf32>
    %827 = arith.subf %821, %826 : vector<32x1xf32>
    %828 = vector.broadcast %825 : vector<32x1xf32> to vector<32x49xf32>
    %829 = arith.mulf %784, %828 : vector<32x49xf32>
    %830 = vector.broadcast %827 : vector<32x1xf32> to vector<32x49xf32>
    %831 = arith.addf %829, %830 : vector<32x49xf32>
    %c768 = arith.constant 768 : index
    %c0_304 = arith.constant 0 : index
    %832 = vector.load %arg14[%c768, %c0_304] : memref<896x49xf32, #tpu.memory_space<vmem>>, vector<32x49xf32>
    tpu.vector_store %arg14[%c768, %c0_304], %831 {strides = array<i32>} : memref<896x49xf32, #tpu.memory_space<vmem>>, vector<32x49xf32>,
    %c0_305 = arith.constant 0 : index
    %c0_306 = arith.constant 0 : index
    %833 = vector.load %arg10[%c0_305, %c0_306] : memref<32x49xf32, #tpu.memory_space<vmem>>, vector<32x49xf32>
    %cst_307 = arith.constant dense<0.000000e+00> : vector<32xf32>
    %834 = vector.multi_reduction <add>, %833, %cst_307 [1] : vector<32x49xf32> to vector<32xf32>
    %835 = vector.shape_cast %834 : vector<32xf32> to vector<32x1xf32>
    %836 = arith.mulf %833, %833 : vector<32x49xf32>
    %cst_308 = arith.constant dense<0.000000e+00> : vector<32xf32>
    %837 = vector.multi_reduction <add>, %836, %cst_308 [1] : vector<32x49xf32> to vector<32xf32>
    %838 = vector.shape_cast %837 : vector<32xf32> to vector<32x1xf32>
    %cst_309 = arith.constant 0.0204081628 : f32
    %839 = vector.broadcast %cst_309 : f32 to vector<32x1xf32>
    %840 = arith.mulf %835, %839 : vector<32x1xf32>
    %cst_310 = arith.constant 0.0204081628 : f32
    %841 = vector.broadcast %cst_310 : f32 to vector<32x1xf32>
    %842 = arith.mulf %838, %841 : vector<32x1xf32>
    %843 = arith.mulf %840, %840 : vector<32x1xf32>
    %844 = arith.subf %842, %843 : vector<32x1xf32>
    %cst_311 = arith.constant 0.000000e+00 : f32
    %845 = vector.broadcast %cst_311 : f32 to vector<32x1xf32>
    %846 = arith.maximumf %844, %845 : vector<32x1xf32>
    %c6_312 = arith.constant 6 : index
    %c0_313 = arith.constant 0 : index
    %847 = vector.load %arg13[%c6_312, %c0_313] : memref<14x128xf32, #tpu.memory_space<vmem>>, vector<1x128xf32>
    %848 = tpu.iota {dimensions = array<i32: 1>} : vector<32x128xi32>
    %849 = tpu.iota {dimensions = array<i32: 0>} : vector<32x128xi32>
    %c32_i32_314 = arith.constant 32 : i32
    %850 = vector.broadcast %c32_i32_314 : i32 to vector<32x128xi32>
    %851 = arith.addi %849, %850 : vector<32x128xi32>
    %852 = arith.cmpi eq, %848, %851 : vector<32x128xi32>
    %cst_315 = arith.constant 0.000000e+00 : f32
    %853 = vector.shape_cast %847 : vector<1x128xf32> to vector<1x128xf32>
    %854 = vector.broadcast %853 : vector<1x128xf32> to vector<32x128xf32>
    %855 = vector.broadcast %cst_315 : f32 to vector<32x128xf32>
    %856 = arith.select %852, %854, %855 : vector<32x128xi1>, vector<32x128xf32>
    %cst_316 = arith.constant dense<0.000000e+00> : vector<32xf32>
    %857 = vector.multi_reduction <add>, %856, %cst_316 [1] : vector<32x128xf32> to vector<32xf32>
    %858 = vector.shape_cast %857 : vector<32xf32> to vector<32x1xf32>
    %c13_317 = arith.constant 13 : index
    %c0_318 = arith.constant 0 : index
    %859 = vector.load %arg13[%c13_317, %c0_318] : memref<14x128xf32, #tpu.memory_space<vmem>>, vector<1x128xf32>
    %860 = tpu.iota {dimensions = array<i32: 1>} : vector<32x128xi32>
    %861 = tpu.iota {dimensions = array<i32: 0>} : vector<32x128xi32>
    %c32_i32_319 = arith.constant 32 : i32
    %862 = vector.broadcast %c32_i32_319 : i32 to vector<32x128xi32>
    %863 = arith.addi %861, %862 : vector<32x128xi32>
    %864 = arith.cmpi eq, %860, %863 : vector<32x128xi32>
    %cst_320 = arith.constant 0.000000e+00 : f32
    %865 = vector.shape_cast %859 : vector<1x128xf32> to vector<1x128xf32>
    %866 = vector.broadcast %865 : vector<1x128xf32> to vector<32x128xf32>
    %867 = vector.broadcast %cst_320 : f32 to vector<32x128xf32>
    %868 = arith.select %864, %866, %867 : vector<32x128xi1>, vector<32x128xf32>
    %cst_321 = arith.constant dense<0.000000e+00> : vector<32xf32>
    %869 = vector.multi_reduction <add>, %868, %cst_321 [1] : vector<32x128xf32> to vector<32xf32>
    %870 = vector.shape_cast %869 : vector<32xf32> to vector<32x1xf32>
    %cst_322 = arith.constant 9.99999974E-6 : f32
    %871 = vector.broadcast %cst_322 : f32 to vector<32x1xf32>
    %872 = arith.addf %846, %871 : vector<32x1xf32>
    %873 = math.rsqrt %872 : vector<32x1xf32>
    %874 = arith.mulf %858, %873 : vector<32x1xf32>
    %875 = arith.mulf %840, %874 : vector<32x1xf32>
    %876 = arith.subf %870, %875 : vector<32x1xf32>
    %877 = vector.broadcast %874 : vector<32x1xf32> to vector<32x49xf32>
    %878 = arith.mulf %833, %877 : vector<32x49xf32>
    %879 = vector.broadcast %876 : vector<32x1xf32> to vector<32x49xf32>
    %880 = arith.addf %878, %879 : vector<32x49xf32>
    %c800 = arith.constant 800 : index
    %c0_323 = arith.constant 0 : index
    %881 = vector.load %arg14[%c800, %c0_323] : memref<896x49xf32, #tpu.memory_space<vmem>>, vector<32x49xf32>
    tpu.vector_store %arg14[%c800, %c0_323], %880 {strides = array<i32>} : memref<896x49xf32, #tpu.memory_space<vmem>>, vector<32x49xf32>,
    %c0_324 = arith.constant 0 : index
    %c0_325 = arith.constant 0 : index
    %882 = vector.load %arg11[%c0_324, %c0_325] : memref<32x49xf32, #tpu.memory_space<vmem>>, vector<32x49xf32>
    %cst_326 = arith.constant dense<0.000000e+00> : vector<32xf32>
    %883 = vector.multi_reduction <add>, %882, %cst_326 [1] : vector<32x49xf32> to vector<32xf32>
    %884 = vector.shape_cast %883 : vector<32xf32> to vector<32x1xf32>
    %885 = arith.mulf %882, %882 : vector<32x49xf32>
    %cst_327 = arith.constant dense<0.000000e+00> : vector<32xf32>
    %886 = vector.multi_reduction <add>, %885, %cst_327 [1] : vector<32x49xf32> to vector<32xf32>
    %887 = vector.shape_cast %886 : vector<32xf32> to vector<32x1xf32>
    %cst_328 = arith.constant 0.0204081628 : f32
    %888 = vector.broadcast %cst_328 : f32 to vector<32x1xf32>
    %889 = arith.mulf %884, %888 : vector<32x1xf32>
    %cst_329 = arith.constant 0.0204081628 : f32
    %890 = vector.broadcast %cst_329 : f32 to vector<32x1xf32>
    %891 = arith.mulf %887, %890 : vector<32x1xf32>
    %892 = arith.mulf %889, %889 : vector<32x1xf32>
    %893 = arith.subf %891, %892 : vector<32x1xf32>
    %cst_330 = arith.constant 0.000000e+00 : f32
    %894 = vector.broadcast %cst_330 : f32 to vector<32x1xf32>
    %895 = arith.maximumf %893, %894 : vector<32x1xf32>
    %c6_331 = arith.constant 6 : index
    %c0_332 = arith.constant 0 : index
    %896 = vector.load %arg13[%c6_331, %c0_332] : memref<14x128xf32, #tpu.memory_space<vmem>>, vector<1x128xf32>
    %897 = tpu.iota {dimensions = array<i32: 1>} : vector<32x128xi32>
    %898 = tpu.iota {dimensions = array<i32: 0>} : vector<32x128xi32>
    %c64_i32_333 = arith.constant 64 : i32
    %899 = vector.broadcast %c64_i32_333 : i32 to vector<32x128xi32>
    %900 = arith.addi %898, %899 : vector<32x128xi32>
    %901 = arith.cmpi eq, %897, %900 : vector<32x128xi32>
    %cst_334 = arith.constant 0.000000e+00 : f32
    %902 = vector.shape_cast %896 : vector<1x128xf32> to vector<1x128xf32>
    %903 = vector.broadcast %902 : vector<1x128xf32> to vector<32x128xf32>
    %904 = vector.broadcast %cst_334 : f32 to vector<32x128xf32>
    %905 = arith.select %901, %903, %904 : vector<32x128xi1>, vector<32x128xf32>
    %cst_335 = arith.constant dense<0.000000e+00> : vector<32xf32>
    %906 = vector.multi_reduction <add>, %905, %cst_335 [1] : vector<32x128xf32> to vector<32xf32>
    %907 = vector.shape_cast %906 : vector<32xf32> to vector<32x1xf32>
    %c13_336 = arith.constant 13 : index
    %c0_337 = arith.constant 0 : index
    %908 = vector.load %arg13[%c13_336, %c0_337] : memref<14x128xf32, #tpu.memory_space<vmem>>, vector<1x128xf32>
    %909 = tpu.iota {dimensions = array<i32: 1>} : vector<32x128xi32>
    %910 = tpu.iota {dimensions = array<i32: 0>} : vector<32x128xi32>
    %c64_i32_338 = arith.constant 64 : i32
    %911 = vector.broadcast %c64_i32_338 : i32 to vector<32x128xi32>
    %912 = arith.addi %910, %911 : vector<32x128xi32>
    %913 = arith.cmpi eq, %909, %912 : vector<32x128xi32>
    %cst_339 = arith.constant 0.000000e+00 : f32
    %914 = vector.shape_cast %908 : vector<1x128xf32> to vector<1x128xf32>
    %915 = vector.broadcast %914 : vector<1x128xf32> to vector<32x128xf32>
    %916 = vector.broadcast %cst_339 : f32 to vector<32x128xf32>
    %917 = arith.select %913, %915, %916 : vector<32x128xi1>, vector<32x128xf32>
    %cst_340 = arith.constant dense<0.000000e+00> : vector<32xf32>
    %918 = vector.multi_reduction <add>, %917, %cst_340 [1] : vector<32x128xf32> to vector<32xf32>
    %919 = vector.shape_cast %918 : vector<32xf32> to vector<32x1xf32>
    %cst_341 = arith.constant 9.99999974E-6 : f32
    %920 = vector.broadcast %cst_341 : f32 to vector<32x1xf32>
    %921 = arith.addf %895, %920 : vector<32x1xf32>
    %922 = math.rsqrt %921 : vector<32x1xf32>
    %923 = arith.mulf %907, %922 : vector<32x1xf32>
    %924 = arith.mulf %889, %923 : vector<32x1xf32>
    %925 = arith.subf %919, %924 : vector<32x1xf32>
    %926 = vector.broadcast %923 : vector<32x1xf32> to vector<32x49xf32>
    %927 = arith.mulf %882, %926 : vector<32x49xf32>
    %928 = vector.broadcast %925 : vector<32x1xf32> to vector<32x49xf32>
    %929 = arith.addf %927, %928 : vector<32x49xf32>
    %c832 = arith.constant 832 : index
    %c0_342 = arith.constant 0 : index
    %930 = vector.load %arg14[%c832, %c0_342] : memref<896x49xf32, #tpu.memory_space<vmem>>, vector<32x49xf32>
    tpu.vector_store %arg14[%c832, %c0_342], %929 {strides = array<i32>} : memref<896x49xf32, #tpu.memory_space<vmem>>, vector<32x49xf32>,
    %c0_343 = arith.constant 0 : index
    %c0_344 = arith.constant 0 : index
    %931 = vector.load %arg12[%c0_343, %c0_344] : memref<32x49xf32, #tpu.memory_space<vmem>>, vector<32x49xf32>
    %cst_345 = arith.constant dense<0.000000e+00> : vector<32xf32>
    %932 = vector.multi_reduction <add>, %931, %cst_345 [1] : vector<32x49xf32> to vector<32xf32>
    %933 = vector.shape_cast %932 : vector<32xf32> to vector<32x1xf32>
    %934 = arith.mulf %931, %931 : vector<32x49xf32>
    %cst_346 = arith.constant dense<0.000000e+00> : vector<32xf32>
    %935 = vector.multi_reduction <add>, %934, %cst_346 [1] : vector<32x49xf32> to vector<32xf32>
    %936 = vector.shape_cast %935 : vector<32xf32> to vector<32x1xf32>
    %cst_347 = arith.constant 0.0204081628 : f32
    %937 = vector.broadcast %cst_347 : f32 to vector<32x1xf32>
    %938 = arith.mulf %933, %937 : vector<32x1xf32>
    %cst_348 = arith.constant 0.0204081628 : f32
    %939 = vector.broadcast %cst_348 : f32 to vector<32x1xf32>
    %940 = arith.mulf %936, %939 : vector<32x1xf32>
    %941 = arith.mulf %938, %938 : vector<32x1xf32>
    %942 = arith.subf %940, %941 : vector<32x1xf32>
    %cst_349 = arith.constant 0.000000e+00 : f32
    %943 = vector.broadcast %cst_349 : f32 to vector<32x1xf32>
    %944 = arith.maximumf %942, %943 : vector<32x1xf32>
    %c6_350 = arith.constant 6 : index
    %c0_351 = arith.constant 0 : index
    %945 = vector.load %arg13[%c6_350, %c0_351] : memref<14x128xf32, #tpu.memory_space<vmem>>, vector<1x128xf32>
    %946 = tpu.iota {dimensions = array<i32: 1>} : vector<32x128xi32>
    %947 = tpu.iota {dimensions = array<i32: 0>} : vector<32x128xi32>
    %c96_i32_352 = arith.constant 96 : i32
    %948 = vector.broadcast %c96_i32_352 : i32 to vector<32x128xi32>
    %949 = arith.addi %947, %948 : vector<32x128xi32>
    %950 = arith.cmpi eq, %946, %949 : vector<32x128xi32>
    %cst_353 = arith.constant 0.000000e+00 : f32
    %951 = vector.shape_cast %945 : vector<1x128xf32> to vector<1x128xf32>
    %952 = vector.broadcast %951 : vector<1x128xf32> to vector<32x128xf32>
    %953 = vector.broadcast %cst_353 : f32 to vector<32x128xf32>
    %954 = arith.select %950, %952, %953 : vector<32x128xi1>, vector<32x128xf32>
    %cst_354 = arith.constant dense<0.000000e+00> : vector<32xf32>
    %955 = vector.multi_reduction <add>, %954, %cst_354 [1] : vector<32x128xf32> to vector<32xf32>
    %956 = vector.shape_cast %955 : vector<32xf32> to vector<32x1xf32>
    %c13_355 = arith.constant 13 : index
    %c0_356 = arith.constant 0 : index
    %957 = vector.load %arg13[%c13_355, %c0_356] : memref<14x128xf32, #tpu.memory_space<vmem>>, vector<1x128xf32>
    %958 = tpu.iota {dimensions = array<i32: 1>} : vector<32x128xi32>
    %959 = tpu.iota {dimensions = array<i32: 0>} : vector<32x128xi32>
    %c96_i32_357 = arith.constant 96 : i32
    %960 = vector.broadcast %c96_i32_357 : i32 to vector<32x128xi32>
    %961 = arith.addi %959, %960 : vector<32x128xi32>
    %962 = arith.cmpi eq, %958, %961 : vector<32x128xi32>
    %cst_358 = arith.constant 0.000000e+00 : f32
    %963 = vector.shape_cast %957 : vector<1x128xf32> to vector<1x128xf32>
    %964 = vector.broadcast %963 : vector<1x128xf32> to vector<32x128xf32>
    %965 = vector.broadcast %cst_358 : f32 to vector<32x128xf32>
    %966 = arith.select %962, %964, %965 : vector<32x128xi1>, vector<32x128xf32>
    %cst_359 = arith.constant dense<0.000000e+00> : vector<32xf32>
    %967 = vector.multi_reduction <add>, %966, %cst_359 [1] : vector<32x128xf32> to vector<32xf32>
    %968 = vector.shape_cast %967 : vector<32xf32> to vector<32x1xf32>
    %cst_360 = arith.constant 9.99999974E-6 : f32
    %969 = vector.broadcast %cst_360 : f32 to vector<32x1xf32>
    %970 = arith.addf %944, %969 : vector<32x1xf32>
    %971 = math.rsqrt %970 : vector<32x1xf32>
    %972 = arith.mulf %956, %971 : vector<32x1xf32>
    %973 = arith.mulf %938, %972 : vector<32x1xf32>
    %974 = arith.subf %968, %973 : vector<32x1xf32>
    %975 = vector.broadcast %972 : vector<32x1xf32> to vector<32x49xf32>
    %976 = arith.mulf %931, %975 : vector<32x49xf32>
    %977 = vector.broadcast %974 : vector<32x1xf32> to vector<32x49xf32>
    %978 = arith.addf %976, %977 : vector<32x49xf32>
    %c864 = arith.constant 864 : index
    %c0_361 = arith.constant 0 : index
    %979 = vector.load %arg14[%c864, %c0_361] : memref<896x49xf32, #tpu.memory_space<vmem>>, vector<32x49xf32>
    tpu.vector_store %arg14[%c864, %c0_361], %978 {strides = array<i32>} : memref<896x49xf32, #tpu.memory_space<vmem>>, vector<32x49xf32>,
    return
  }
}

</mosaic_0001>

<bundles_post_ra>
// kernel: tpu_custom_call.1
= control target key start
LH: loop header
LB: loop body
LE: loop exit
PB: predicated region body
PF: predicated region fallthrough
CT: control target
= control target key end

     0   :  { %vm9560_vm0 = vcmask 400384   ;;  %v153_v24 = vlaneseq  ;;  %v9668_v36 = vmov 0  ;;  %v9672_v44 = vmov 0  ;;  %s9545_s0 = inlined_call_operand.vmem [shape: f32[512,49], index: 0, kind: input, shape index: {}]   ;;  %s9546_s13 = inlined_call_operand.vmem [shape: f32[14,128], index: 13, kind: input, shape index: {}]   ;;  %s9547_s14 = inlined_call_operand.vmem [shape: f32[896,49], index: 14, kind: output, shape index: {}]   ;;  %s9548_s1 = inlined_call_operand.vmem [shape: f32[32,49], index: 1, kind: input, shape index: {}]   ;;  %s9549_s2 = inlined_call_operand.vmem [shape: f32[32,49], index: 2, kind: input, shape index: {}]   ;;  %s9550_s3 = inlined_call_operand.vmem [shape: f32[32,49], index: 3, kind: input, shape index: {}]   ;;  %s9551_s4 = inlined_call_operand.vmem [shape: f32[32,49], index: 4, kind: input, shape index: {}]   ;;  %s9552_s5 = inlined_call_operand.vmem [shape: f32[32,49], index: 5, kind: input, shape index: {}]   ;;  %s9553_s6 = inlined_call_operand.vmem [shape: f32[32,49], index: 6, kind: input, shape index: {}]   ;;  %s9554_s7 = inlined_call_operand.vmem [shape: f32[32,49], index: 7, kind: input, shape index: {}]   ;;  %s9555_s8 = inlined_call_operand.vmem [shape: f32[32,49], index: 8, kind: input, shape index: {}]   ;;  %s9556_s9 = inlined_call_operand.vmem [shape: f32[32,49], index: 9, kind: input, shape index: {}]   ;;  %s9557_s10 = inlined_call_operand.vmem [shape: f32[32,49], index: 10, kind: input, shape index: {}]   ;;  %s9558_s11 = inlined_call_operand.vmem [shape: f32[32,49], index: 11, kind: input, shape index: {}]   ;;  %s9559_s12 = inlined_call_operand.vmem [shape: f32[32,49], index: 12, kind: input, shape index: {}]  }
   0x1   :  { %v4659_v0 = vld [vmem:[%s9545_s0 + $0x20] sm:$0xff]  ;;  %v4664_v1 = vld [vmem:[%s9545_s0 + $0x10] sm:$0xff]  ;;  %v4680_v6 = vld [vmem:[%s9545_s0 + $0x28] sm:$0xff]  ;;  %v9674_v45 = vmov 0  ;;  %v9677_v46 = vmov 0  ;;  %v9679_v53 = vmov 0 }
   0x2   :  { %v4669_v2 = vld [vmem:[%s9545_s0] sm:$0xff]  ;;  %v68_v3 = vsel %vm9560_vm0, %v4659_v0, 0.0  ;;  %v62_v4 = vsel %vm9560_vm0, %v4664_v1, 0.0  ;;  %v4685_v7 = vld [vmem:[%s9545_s0 + $0x18] sm:$0xff]  ;;  %v4690_v8 = vld [vmem:[%s9545_s0 + $0x8] sm:$0xff]  ;;  %v71_v9 = vsel %vm9560_vm0, %v4680_v6, 0.0  ;;  %v82_v18 = vmul.f32 %v4664_v1, %v4664_v1 }
   0x3   :  { %v56_v5 = vsel %vm9560_vm0, %v4669_v2, 0.0  ;;  %69 = vadd.xlane.f32.xlu2 %v68_v3  ;;  %63 = vadd.xlane.f32.xlu1 %v62_v4  ;;  %v65_v10 = vsel %vm9560_vm0, %v4685_v7, 0.0  ;;  %v59_v11 = vsel %vm9560_vm0, %v4690_v8, 0.0  ;;  %v4701_v12 = vld [vmem:[%s9545_s0 + $0x38] sm:$0xff]  ;;  %v80_v13 = vmul.f32 %v4669_v2, %v4669_v2  ;;  %v4708_v14 = vld [vmem:[%s9545_s0 + $0x30] sm:$0xff] }
   0x4   :  { %57 = vadd.xlane.f32.xlu0 %v56_v5  ;;  %v77_v15 = vsel %vm9560_vm0, %v4701_v12, 0.0  ;;  %v74_v17 = vsel %vm9560_vm0, %v4708_v14, 0.0  ;;  %v83_v19 = vmul.f32 %v4685_v7, %v4685_v7  ;;  %v81_v20 = vmul.f32 %v4690_v8, %v4690_v8  ;;  %v4213_v34 = vld [vmem:[%s9546_s13] ss:$0 sm:$0xff]  ;;  %v4214_v59 = vld [vmem:[%s9546_s13 + $0x7] ss:$0 sm:$0xff] }
   0x5   :  { %v88_v16 = vsel %vm9560_vm0, %v80_v13, 0.0  ;;  %v94_v21 = vsel %vm9560_vm0, %v82_v18, 0.0  ;;  %v85_v25 = vmul.f32 %v4680_v6, %v4680_v6  ;;  %v86_v26 = vmul.f32 %v4708_v14, %v4708_v14  ;;  %v359_v5 = vld [vmem:[%s9545_s0 + $0x40] sm:$0xff]  ;;  %v361_v13 = vld [vmem:[%s9545_s0 + $0x50] sm:$0xff] }
   0x6   :  { %v97_v22 = vsel %vm9560_vm0, %v83_v19, 0.0  ;;  %v91_v23 = vsel %vm9560_vm0, %v81_v20, 0.0  ;;  %v84_v27 = vmul.f32 %v4659_v0, %v4659_v0  ;;  %v4730_v28 = vshrl.u32 %v153_v24, 7  ;;  %v364_v20 = vld [vmem:[%s9545_s0 + $0x68] sm:$0xff] }
   0x7   :  { %v103_v29 = vsel %vm9560_vm0, %v85_v25, 0.0  ;;  %v106_v30 = vsel %vm9560_vm0, %v86_v26, 0.0  ;;  %v4735_v32 = vand.u32 127, %v153_v24  ;;  %v87_v37 = vmul.f32 %v4701_v12, %v4701_v12 }
   0x8   :  { %9663 = vst [vmem:[#allocation2_spill] sm:$0xff] %v4730_v28  ;;  %v100_v31 = vsel %vm9560_vm0, %v84_v27, 0.0  ;;  %v4738_v33 = vadd.s32 8, %v4730_v28  ;;  %v4763_v41 = vadd.s32 24, %v4730_v28  ;;  %v4766_v42 = vadd.s32 32, %v4730_v28 }
   0x9   :  { %9664 = vst [vmem:[#allocation3_spill] sm:$0xff] %v4735_v32  ;;  %vm4745_vm1 = vcmp.eq.s32.totalorder %v4735_v32, %v4730_v28  ;;  %v109_v40 = vsel %vm9560_vm0, %v87_v37, 0.0  ;;  %v4769_v43 = vadd.s32 16, %v4730_v28  ;;  %v4796_v50 = vadd.s32 48, %v4730_v28 }
   0xa   :  { %9665 = vst [vmem:[#allocation4_spill] sm:$0xff] %v4738_v33  ;;  %vm4751_vm2 = vcmp.eq.s32.totalorder %v4735_v32, %v4738_v33  ;;  %v173_v38 = vsel %vm4745_vm1, %v4213_v34, 0.0  ;;  %vm4773_vm3 = vcmp.eq.s32.totalorder %v4735_v32, %v4763_v41  ;;  %vm4779_vm4 = vcmp.eq.s32.totalorder %v4735_v32, %v4766_v42 }
   0xb   :  { %72 = vadd.xlane.f32.xlu2 %v71_v9  ;;  %66 = vadd.xlane.f32.xlu1 %v65_v10  ;;  %v9669_v36 = vsel %vm4751_vm2, 4294967295, %v9668_v36  ;;  %v174_v39 = vsel %vm4751_vm2, %v4213_v34, 0.0  ;;  %9670 = vst [vmem:[#allocation5_spill] sm:$0xff] %v4763_v41  ;;  %v9673_v44 = vsel %vm4773_vm3, 4294967295, %v9672_v44  ;;  %v9675_v45 = vsel %vm4779_vm4, 4294967295, %v9674_v45 }
   0xc   :  { %60 = vadd.xlane.f32.xlu0 %v59_v11  ;;  %9671 = vst [vmem:[#allocation6_spill] sm:$0xff] %v4769_v43  ;;  %vm4785_vm5 = vcmp.eq.s32.totalorder %v4735_v32, %v4769_v43  ;;  %v176_v47 = vsel %vm4773_vm3, %v4213_v34, 0.0  ;;  %v177_v48 = vsel %vm4779_vm4, %v4213_v34, 0.0  ;;  %v4799_v51 = vadd.s32 56, %v4730_v28 }
   0xd   :  { %9676 = vst [vmem:[#allocation7_spill] sm:$0xff] %v9675_v45  ;;  %v9678_v46 = vsel %vm4785_vm5, 4294967295, %v9677_v46  ;;  %v175_v49 = vsel %vm4785_vm5, %v4213_v34, 0.0  ;;  %v4802_v52 = vadd.s32 40, %v4730_v28  ;;  %vm4806_vm6 = vcmp.eq.s32.totalorder %v4735_v32, %v4796_v50 }
   0xe   :  { %v9680_v53 = vsel %vm4806_vm6, 4294967295, %v9679_v53  ;;  %vm4812_vm7 = vcmp.eq.s32.totalorder %v4735_v32, %v4799_v51  ;;  %v9681_v54 = vmov 0  ;;  %v9684_v55 = vmov 0 }
   0xf   :  { %v9682_v54 = vsel %vm4812_vm7, 4294967295, %v9681_v54  ;;  %vm4818_vm8 = vcmp.eq.s32.totalorder %v4735_v32, %v4802_v52  ;;  %v179_v56 = vsel %vm4806_vm6, %v4213_v34, 0.0  ;;  %v180_v57 = vsel %vm4812_vm7, %v4213_v34, 0.0 }
  0x10   :  { %9683 = vst [vmem:[#allocation8_spill] sm:$0xff] %v9682_v54  ;;  %v9685_v55 = vsel %vm4818_vm8, 4294967295, %v9684_v55  ;;  %v178_v58 = vsel %vm4818_vm8, %v4213_v34, 0.0  ;;  %v200_v60 = vsel %vm4751_vm2, %v4214_v59, 0.0  ;;  %v201_v61 = vsel %vm4785_vm5, %v4214_v59, 0.0 }
  0x11   :  { %v199_v62 = vsel %vm4745_vm1, %v4214_v59, 0.0  ;;  %v203_v63 = vsel %vm4779_vm4, %v4214_v59, 0.0  ;;  %v204_v3 = vsel %vm4818_vm8, %v4214_v59, 0.0  ;;  %v202_v4 = vsel %vm4773_vm3, %v4214_v59, 0.0 }
  0x12   :  { %v206_v9 = vsel %vm4812_vm7, %v4214_v59, 0.0  ;;  %v367_v10 = vsel %vm9560_vm0, %v359_v5, 0.0  ;;  %v205_v11 = vsel %vm4806_vm6, %v4214_v59, 0.0  ;;  %v391_v26 = vmul.f32 %v359_v5, %v359_v5 }
  0x13   :  { %78 = vadd.xlane.f32.xlu1 %v77_v15  ;;  %89 = vadd.xlane.f32.xlu2 %v88_v16  ;;  %v362_v15 = vld [vmem:[%s9545_s0 + $0x58] sm:$0xff]  ;;  %v360_v16 = vld [vmem:[%s9545_s0 + $0x48] sm:$0xff]  ;;  %v464_v5 = vadd.s32 64, %v4730_v28 }
  0x14   :  { %75 = vadd.xlane.f32.xlu0 %v74_v17  ;;  %v373_v17 = vsel %vm9560_vm0, %v361_v13, 0.0  ;;  %v376_v18 = vsel %vm9560_vm0, %v362_v15, 0.0  ;;  %v370_v19 = vsel %vm9560_vm0, %v360_v16, 0.0  ;;  %v392_v27 = vmul.f32 %v360_v16, %v360_v16 }
  0x15   :  { %v394_v37 = vmul.f32 %v362_v15, %v362_v15  ;;  %vm4908_vm11 = vcmp.eq.s32.totalorder %v4735_v32, %v464_v5  ;;  %v9692_v16 = vmov 0 }
  0x16   :  { %v9693_v16 = vsel %vm4908_vm11, 4294967295, %v9692_v16 }
  0x17   :  { %9694 = vst [vmem:[#allocation11_spill] sm:$0xff] %v9693_v16 }
  0x1b   :  { %95 = vadd.xlane.f32.xlu1 %v94_v21  ;;  %98 = vadd.xlane.f32.xlu2 %v97_v22  ;;  %v365_v21 = vld [vmem:[%s9545_s0 + $0x70] sm:$0xff]  ;;  %v363_v22 = vld [vmem:[%s9545_s0 + $0x60] sm:$0xff] }
  0x1c   :  { %92 = vadd.xlane.f32.xlu0 %v91_v23  ;;  %v382_v23 = vsel %vm9560_vm0, %v364_v20, 0.0  ;;  %v385_v24 = vsel %vm9560_vm0, %v365_v21, 0.0  ;;  %v379_v25 = vsel %vm9560_vm0, %v363_v22, 0.0 }
  0x23   :  { %104 = vadd.xlane.f32.xlu1 %v103_v29  ;;  %107 = vadd.xlane.f32.xlu2 %v106_v30  ;;  %v366_v29 = vld [vmem:[%s9545_s0 + $0x78] sm:$0xff]  ;;  %v399_v30 = vsel %vm9560_vm0, %v391_v26, 0.0  ;;  %v9698_v26 = vmov 0 }
  0x24   :  { %101 = vadd.xlane.f32.xlu0 %v100_v31  ;;  %v402_v31 = vsel %vm9560_vm0, %v392_v27, 0.0  ;;  %v388_v34 = vsel %vm9560_vm0, %v366_v29, 0.0  ;;  %v9701_v27 = vmov 0 }
  0x2b   :  { %181 = vadd.xlane.f32.xlu1 %v173_v38  ;;  %183 = vadd.xlane.f32.xlu2 %v174_v39  ;;  %v395_v38 = vmul.f32 %v363_v22, %v363_v22  ;;  %v393_v39 = vmul.f32 %v361_v13, %v361_v13  ;;  %v469_v22 = vadd.s32 64, %v4802_v52 }
  0x2c   :  { %110 = vadd.xlane.f32.xlu0 %v109_v40  ;;  %v408_v40 = vsel %vm9560_vm0, %v394_v37, 0.0 }
  0x2d   :  { %vm4932_vm13 = vcmp.eq.s32.totalorder %v4735_v32, %v469_v22 }
  0x2e   :  { %v9699_v26 = vsel %vm4932_vm13, 4294967295, %v9698_v26 }
  0x2f   :  { %9700 = vst [vmem:[#allocation13_spill] sm:$0xff] %v9699_v26 }
  0x33   :  { %187 = vadd.xlane.f32.xlu1 %v176_v47  ;;  %189 = vadd.xlane.f32.xlu2 %v177_v48  ;;  %v411_v47 = vsel %vm9560_vm0, %v395_v38, 0.0  ;;  %v405_v48 = vsel %vm9560_vm0, %v393_v39, 0.0 }
  0x34   :  { %185 = vadd.xlane.f32.xlu0 %v175_v49  ;;  %v397_v49 = vmul.f32 %v365_v21, %v365_v21  ;;  %v468_v21 = vadd.s32 64, %v4766_v42 }
  0x36   :  { %vm4927_vm12 = vcmp.eq.s32.totalorder %v4735_v32, %v468_v21 }
  0x3b   :  { %193 = vadd.xlane.f32.xlu1 %v179_v56  ;;  %195 = vadd.xlane.f32.xlu2 %v180_v57  ;;  %v398_v56 = vmul.f32 %v366_v29, %v366_v29  ;;  %v396_v57 = vmul.f32 %v364_v20, %v364_v20 }
  0x3c   :  { %191 = vadd.xlane.f32.xlu0 %v178_v58 }
  0x43   :  { %209 = vadd.xlane.f32.xlu1 %v200_v60  ;;  %211 = vadd.xlane.f32.xlu2 %v201_v61  ;;  %v417_v61 = vsel %vm9560_vm0, %v397_v49, 0.0 }
  0x44   :  { %207 = vadd.xlane.f32.xlu0 %v199_v62  ;;  %v420_v62 = vsel %vm9560_vm0, %v398_v56, 0.0 }
  0x4b   :  { %215 = vadd.xlane.f32.xlu1 %v203_v63  ;;  %217 = vadd.xlane.f32.xlu2 %v204_v3  ;;  %v414_v63 = vsel %vm9560_vm0, %v396_v57, 0.0  ;;  %v465_v3 = vadd.s32 64, %v4738_v33 }
  0x4c   :  { %213 = vadd.xlane.f32.xlu0 %v202_v4  ;;  %v466_v4 = vadd.s32 64, %v4769_v43 }
  0x4d   :  { %vm4898_vm9 = vcmp.eq.s32.totalorder %v4735_v32, %v465_v3 }
  0x4e   :  { %vm4903_vm10 = vcmp.eq.s32.totalorder %v4735_v32, %v466_v4 }
  0x53   :  { %221 = vadd.xlane.f32.xlu1 %v206_v9  ;;  %368 = vadd.xlane.f32.xlu2 %v367_v10  ;;  %v4895_v9 = vld [vmem:[%s9546_s13] ss:$0 sm:$0xff]  ;;  %v9686_v10 = vmov 0 }
  0x54   :  { %219 = vadd.xlane.f32.xlu0 %v205_v11  ;;  %v9687_v10 = vsel %vm4898_vm9, 4294967295, %v9686_v10  ;;  %v9689_v11 = vmov 0  ;;  %v481_v20 = vsel %vm4908_vm11, %v4895_v9, 0.0  ;;  %v486_v37 = vsel %vm4932_vm13, %v4895_v9, 0.0 }
  0x55   :  { %9688 = vst [vmem:[#allocation9_spill] sm:$0xff] %v9687_v10  ;;  %v9690_v11 = vsel %vm4903_vm10, 4294967295, %v9689_v11 }
  0x56   :  { %9691 = vst [vmem:[#allocation10_spill] sm:$0xff] %v9690_v11 }
  0x5b   :  { %374 = vadd.xlane.f32.xlu1 %v373_v17  ;;  %377 = vadd.xlane.f32.xlu2 %v376_v18  ;;  %v482_v18 = vsel %vm4898_vm9, %v4895_v9, 0.0 }
  0x5c   :  { %371 = vadd.xlane.f32.xlu0 %v370_v19  ;;  %v483_v19 = vsel %vm4903_vm10, %v4895_v9, 0.0 }
  0x63   :  { %383 = vadd.xlane.f32.xlu1 %v382_v23  ;;  %386 = vadd.xlane.f32.xlu2 %v385_v24  ;;  %v467_v23 = vadd.s32 64, %v4763_v41 }
  0x64   :  { %380 = vadd.xlane.f32.xlu0 %v379_v25  ;;  %v9695_v25 = vmov 0 }
  0x65   :  { %v9696_v25 = vsel %vm4927_vm12, 4294967295, %v9695_v25  ;;  %vm4939_vm14 = vcmp.eq.s32.totalorder %v4735_v32, %v467_v23 }
  0x66   :  { %9697 = vst [vmem:[#allocation12_spill] sm:$0xff] %v9696_v25  ;;  %v9702_v27 = vsel %vm4939_vm14, 4294967295, %v9701_v27  ;;  %v484_v39 = vsel %vm4939_vm14, %v4895_v9, 0.0 }
  0x67   :  { %9703 = vst [vmem:[#allocation14_spill] sm:$0xff] %v9702_v27 }
  0x6b   :  { %400 = vadd.xlane.f32.xlu1 %v399_v30  ;;  %403 = vadd.xlane.f32.xlu2 %v402_v31 }
  0x6c   :  { %389 = vadd.xlane.f32.xlu0 %v388_v34  ;;  %v485_v34 = vsel %vm4927_vm12, %v4895_v9, 0.0 }
  0x73   :  { %409 = vadd.xlane.f32.xlu1 %v408_v40  ;;  %412 = vadd.xlane.f32.xlu2 %v411_v47  ;;  %v471_v40 = vadd.s32 64, %v4799_v51  ;;  %v9704_v51 = vmov 0 }
  0x74   :  { %406 = vadd.xlane.f32.xlu0 %v405_v48  ;;  %v470_v48 = vadd.s32 64, %v4796_v50 }
  0x75   :  { %vm4970_vm15 = vcmp.eq.s32.totalorder %v4735_v32, %v471_v40 }
  0x76   :  { %v4884_v58 = vpop.xlane.xlu2 %69  ;;  %v64_v59 = vpop.xlane.xlu1 %63  ;;  %v9705_v51 = vsel %vm4970_vm15, 4294967295, %v9704_v51  ;;  %vm4977_vm0 = vcmp.eq.s32.totalorder %v4735_v32, %v470_v48 }
  0x77   :  { %v58_v60 = vpop.xlane.xlu0 %57  ;;  %v4955_v47 = vmul.f32 0.020408163, %v64_v59  ;;  %9706 = vst [vmem:[#allocation15_spill] sm:$0xff] %v9705_v51  ;;  %v487_v23 = vsel %vm4977_vm0, %v4895_v9, 0.0 }
  0x78   :  { %v4924_v24 = vmul.f32 0.020408163, %v58_v60  ;;  %v4965_v60 = vld [vmem:[%s9546_s13 + $0x7] ss:$0 sm:$0xff] }
  0x79   :  { %v130_v50 = vmul.f32 %v4955_v47, %v4955_v47 }
  0x7a   :  { %v128_v29 = vmul.f32 %v4924_v24, %v4924_v24 }
  0x7b   :  { %418 = vadd.xlane.f32.xlu1 %v417_v61  ;;  %421 = vadd.xlane.f32.xlu2 %v420_v62 }
  0x7c   :  { %415 = vadd.xlane.f32.xlu0 %v414_v63  ;;  %v9707_v63 = vmov 0 }
  0x7d   :  { %v9708_v63 = vsel %vm4977_vm0, 4294967295, %v9707_v63 }
  0x7e   :  { %v73_v13 = vpop.xlane.xlu2 %72  ;;  %v67_v15 = vpop.xlane.xlu1 %66  ;;  %9709 = vst [vmem:[#allocation16_spill] sm:$0xff] %v9708_v63 }
  0x7f   :  { %v61_v17 = vpop.xlane.xlu0 %60  ;;  %v4958_v49 = vmul.f32 0.020408163, %v67_v15 }
  0x80   :  { %v4960_v57 = vmul.f32 0.020408163, %v61_v17 }
  0x81   :  { %v131_v3 = vmul.f32 %v4958_v49, %v4958_v49 }
  0x82   :  { %v129_v17 = vmul.f32 %v4960_v57, %v4960_v57 }
  0x83   :  { %491 = vadd.xlane.f32.xlu1 %v482_v18  ;;  %493 = vadd.xlane.f32.xlu2 %v483_v19  ;;  %v488_v19 = vsel %vm4970_vm15, %v4895_v9, 0.0 }
  0x84   :  { %489 = vadd.xlane.f32.xlu0 %v481_v20  ;;  %v507_v20 = vsel %vm4908_vm11, %v4965_v60, 0.0 }
  0x86   :  { %v4936_v42 = vpop.xlane.xlu1 %78  ;;  %v90_v52 = vpop.xlane.xlu2 %89 }
  0x87   :  { %v120_v30 = vmul.f32 0.020408163, %v90_v52  ;;  %v76_v31 = vpop.xlane.xlu0 %75  ;;  %v4996_v52 = vmul.f32 0.020408163, %v4884_v58 }
  0x89   :  { %v136_v38 = vsub.f32 %v120_v30, %v128_v29  ;;  %v4998_v29 = vmul.f32 0.020408163, %v73_v13  ;;  %v132_v58 = vmul.f32 %v4996_v52, %v4996_v52 }
  0x8b   :  { %v144_v56 = vmax.f32 %v136_v38, 0.0  ;;  %497 = vadd.xlane.f32.xlu1 %v485_v34  ;;  %499 = vadd.xlane.f32.xlu2 %v486_v37  ;;  %v5000_v34 = vmul.f32 0.020408163, %v76_v31  ;;  %v133_v9 = vmul.f32 %v4998_v29, %v4998_v29 }
  0x8c   :  { %495 = vadd.xlane.f32.xlu0 %v484_v39 }
  0x8d   :  { %v4967_v61 = vadd.f32 1e-05, %v144_v56 }
  0x8e   :  { %v96_v59 = vpop.xlane.xlu1 %95  ;;  %v99_v62 = vpop.xlane.xlu2 %98 }
  0x8f   :  { %4253 = vrsqrt.f32 %v4967_v61  ;;  %v122_v4 = vmul.f32 0.020408163, %v96_v59  ;;  %v123_v5 = vmul.f32 0.020408163, %v99_v62  ;;  %v93_v15 = vpop.xlane.xlu0 %92  ;;  %v509_v59 = vsel %vm4903_vm10, %v4965_v60, 0.0 }
  0x90   :  { %v121_v18 = vmul.f32 0.020408163, %v93_v15  ;;  %v134_v62 = vmul.f32 %v5000_v34, %v5000_v34 }
  0x91   :  { %v138_v21 = vsub.f32 %v122_v4, %v130_v50  ;;  %v139_v22 = vsub.f32 %v123_v5, %v131_v3 }
  0x92   :  { %v137_v30 = vsub.f32 %v121_v18, %v129_v17  ;;  %v510_v18 = vsel %vm4939_vm14, %v4965_v60, 0.0 }
  0x93   :  { %v146_v37 = vmax.f32 %v138_v21, 0.0  ;;  %v147_v38 = vmax.f32 %v139_v22, 0.0  ;;  %503 = vadd.xlane.f32.xlu1 %v488_v19  ;;  %515 = vadd.xlane.f32.xlu2 %v507_v20  ;;  %v508_v21 = vsel %vm4898_vm9, %v4965_v60, 0.0 }
  0x94   :  { %v145_v39 = vmax.f32 %v137_v30, 0.0  ;;  %501 = vadd.xlane.f32.xlu0 %v487_v23 }
  0x95   :  { %v5002_v40 = vpop.eup %4253  ;;  %v5004_v48 = vadd.f32 1e-05, %v146_v37  ;;  %v5006_v56 = vadd.f32 1e-05, %v147_v38 }
  0x96   :  { %v5012_v13 = vadd.f32 1e-05, %v145_v39  ;;  %v105_v31 = vpop.xlane.xlu1 %104  ;;  %v108_v50 = vpop.xlane.xlu2 %107  ;;  %v232_v15 = vmul.f32 %v5002_v40, %v4967_v61  ;;  %vm238_vm10 = vweird.f32 %v5002_v40 }
  0x97   :  { %4255 = vrsqrt.f32 %v5004_v48  ;;  %v125_v3 = vmul.f32 0.020408163, %v105_v31  ;;  %v126_v4 = vmul.f32 0.020408163, %v108_v50  ;;  %v102_v5 = vpop.xlane.xlu0 %101  ;;  %v5034_v31 = vmul.f32 0.020408163, %v4936_v42 }
  0x98   :  { %4257 = vrsqrt.f32 %v5006_v56  ;;  %v124_v17 = vmul.f32 0.020408163, %v102_v5  ;;  %v233_v38 = vmul.f32 %v5002_v40, %v232_v15  ;;  %v512_v15 = vsel %vm4932_vm13, %v4965_v60, 0.0 }
  0x99   :  { %4259 = vrsqrt.f32 %v5012_v13  ;;  %v141_v19 = vsub.f32 %v125_v3, %v133_v9  ;;  %v142_v20 = vsub.f32 %v126_v4, %v134_v62  ;;  %vm9710_vm13 = vcmask 400384  }
  0x9a   :  { %v140_v22 = vsub.f32 %v124_v17, %v132_v58  ;;  %v513_v17 = vsel %vm4977_vm0, %v4965_v60, 0.0  ;;  %vm9711_vm0 = vmmov %vm9710_vm13  ;;  %vm247_vm14 = vweird.f32 %v5012_v13 }
  0x9b   :  { %v149_v23 = vmax.f32 %v141_v19, 0.0  ;;  %v150_v30 = vmax.f32 %v142_v20, 0.0  ;;  %519 = vadd.xlane.f32.xlu1 %v509_v59  ;;  %521 = vadd.xlane.f32.xlu2 %v510_v18  ;;  %v234_v19 = vmul.f32 0.5, %v233_v38  ;;  %v511_v20 = vsel %vm4927_vm12, %v4965_v60, 0.0  ;;  %v5075_v38 = vld [vmem:[%s9545_s0 + $0x80] sm:$0xff] }
  0x9c   :  { %v148_v37 = vmax.f32 %v140_v22, 0.0  ;;  %517 = vadd.xlane.f32.xlu0 %v508_v21  ;;  %v135_v21 = vmul.f32 %v5034_v31, %v5034_v31 }
  0x9d   :  { %v5031_v39 = vpop.eup %4255  ;;  %v5036_v9 = vadd.f32 1e-05, %v149_v23  ;;  %v5038_v50 = vadd.f32 1e-05, %v150_v30  ;;  %v235_v43 = vsub.f32 1.5, %v234_v19 }
  0x9e   :  { %v5040_v62 = vpop.eup %4257  ;;  %v252_v58 = vmul.f32 %v5031_v39, %v5004_v48  ;;  %v5044_v59 = vadd.f32 1e-05, %v148_v37  ;;  %v5046_v3 = vpop.xlane.xlu1 %181 }
  0x9f   :  { %v5048_v4 = vpop.xlane.xlu2 %183  ;;  %v5050_v5 = vpop.eup %4259  ;;  %4261 = vrsqrt.f32 %v5036_v9  ;;  %v262_v22 = vmul.f32 %v5040_v62, %v5006_v56  ;;  %v236_v63 = vmul.f32 %v5002_v40, %v235_v43 }
  0xa0   :  { %v111_v42 = vpop.xlane.xlu0 %110  ;;  %v242_v18 = vmul.f32 %v5050_v5, %v5012_v13  ;;  %4263 = vrsqrt.f32 %v5038_v50  ;;  %v253_v37 = vmul.f32 %v5031_v39, %v252_v58 }
  0xa1   :  { %4265 = vrsqrt.f32 %v5044_v59  ;;  %v127_v23 = vmul.f32 0.020408163, %v111_v42  ;;  %v5080_v42 = vld [vmem:[%s9545_s0 + $0x88] sm:$0xff] }
  0xa2   :  { %v243_v30 = vmul.f32 %v5050_v5, %v242_v18  ;;  %v254_v32 = vmul.f32 0.5, %v253_v37 }
  0xa3   :  { %v143_v28 = vsub.f32 %v127_v23, %v135_v21  ;;  %525 = vadd.xlane.f32.xlu1 %v512_v15  ;;  %527 = vadd.xlane.f32.xlu2 %v513_v17  ;;  %v263_v15 = vmul.f32 %v5040_v62, %v262_v22  ;;  %v678_v22 = vsel %vm9711_vm0, %v5080_v42, 0.0  ;;  %vm258_vm0 = vweird.f32 %v5031_v39 }
  0xa4   :  { %v244_v41 = vmul.f32 0.5, %v243_v30  ;;  %523 = vadd.xlane.f32.xlu0 %v511_v20  ;;  %v255_v19 = vsub.f32 1.5, %v254_v32  ;;  %v675_v20 = vsel %vm9710_vm13, %v5075_v38, 0.0  ;;  %vm237_vm13 = vweird.f32 %v4967_v61  ;;  %v5120_v61 = vld [vmem:[%s9545_s0 + $0x98] sm:$0xff] }
  0xa5   :  { %v5082_v18 = vpop.eup %4261  ;;  %v151_v58 = vmax.f32 %v143_v28, 0.0  ;;  %vm5122_vm12 = vmor %vm237_vm13, %vm238_vm10  ;;  %vm9716_vm10 = vweird.f32 %v5050_v5  ;;  %vm9719_vm13 = vcmask 400384  }
  0xa6   :  { %v5085_v17 = vpop.eup %4263  ;;  %v245_v21 = vsub.f32 1.5, %v244_v41  ;;  %v5087_v23 = vpop.xlane.xlu1 %187  ;;  %v282_v37 = vmul.f32 %v5082_v18, %v5036_v9  ;;  %v514_v41 = vsel %vm4970_vm15, %v4965_v60, 0.0  ;;  %v256_v43 = vmul.f32 %v5031_v39, %v255_v19 }
  0xa7   :  { %v5089_v33 = vpop.xlane.xlu2 %189  ;;  %v5093_v30 = vpop.eup %4265  ;;  %v5097_v26 = vadd.f32 1e-05, %v151_v58  ;;  %v264_v58 = vmul.f32 0.5, %v263_v15  ;;  %v292_v51 = vmul.f32 %v5085_v17, %v5038_v50  ;;  %vm257_vm15 = vweird.f32 %v5004_v48  ;;  %v5141_v48 = vld [vmem:[%s9545_s0 + $0x90] sm:$0xff] }
  0xa8   :  { %v186_v28 = vpop.xlane.xlu0 %185  ;;  %v272_v32 = vmul.f32 %v5093_v30, %v5044_v59  ;;  %v246_v60 = vmul.f32 %v5050_v5, %v245_v21  ;;  %v283_v15 = vmul.f32 %v5082_v18, %v282_v37  ;;  %vm5129_vm9 = vmor %vm257_vm15, %vm258_vm0  ;;  %v240_v13 = vsel %vm5122_vm12, %v5002_v40, %v236_v63 }
  0xa9   :  { %4267 = vrsqrt.f32 %v5097_v26  ;;  %vm5148_vm15 = vmor %vm247_vm14, %vm9716_vm10  ;;  %v260_v25 = vsel %vm5129_vm9, %v5031_v39, %v256_v43  ;;  %v293_v40 = vmul.f32 %v5085_v17, %v292_v51  ;;  %vm267_vm12 = vweird.f32 %v5006_v56  ;;  %v5180_v51 = vld [vmem:[%s9545_s0 + $0xb0] sm:$0xff] }
  0xaa   :  { %v273_v11 = vmul.f32 %v5093_v30, %v272_v32  ;;  %v5136_v32 = vld [vmem:[%s9545_s0 + $0xa0] sm:$0xff]  ;;  %v284_v37 = vmul.f32 0.5, %v283_v15  ;;  %vm9720_vm14 = vmmov %vm9719_vm13  ;;  %v311_v39 = vmul.f32 %v240_v13, %v5046_v3  ;;  %vm268_vm9 = vweird.f32 %v5040_v62  ;;  %v5188_v3 = vld [vmem:[%s9545_s0 + $0xb8] sm:$0xff] }
  0xab   :  { %676 = vadd.xlane.f32.xlu1 %v675_v20  ;;  %679 = vadd.xlane.f32.xlu2 %v678_v22  ;;  %v265_v20 = vsub.f32 1.5, %v264_v58  ;;  %v684_v22 = vsel %vm9719_vm13, %v5120_v61, 0.0  ;;  %vm9721_vm0 = vmmov %vm9719_vm13  ;;  %vm288_vm10 = vweird.f32 %v5082_v18 }
  0xac   :  { %v274_v21 = vmul.f32 0.5, %v273_v11  ;;  %529 = vadd.xlane.f32.xlu0 %v514_v41  ;;  %v250_v41 = vsel %vm5148_vm15, %v5050_v5, %v246_v60  ;;  %v285_v15 = vsub.f32 1.5, %v284_v37  ;;  %v687_v5 = vsel %vm9720_vm14, %v5136_v32, 0.0  ;;  %vm5195_vm13 = vmor %vm267_vm12, %vm268_vm9 }
  0xad   :  { %v681_v60 = vsel %vm9721_vm0, %v5141_v48, 0.0  ;;  %v266_v19 = vmul.f32 %v5040_v62, %v265_v20  ;;  %v313_v11 = vmul.f32 %v260_v25, %v186_v28  ;;  %v294_v37 = vmul.f32 0.5, %v293_v40  ;;  %vm9726_vm12 = vmmov %vm9721_vm0  ;;  %v5227_v25 = vld [vmem:[%s9545_s0 + $0xa8] sm:$0xff] }
  0xae   :  { %v275_v27 = vsub.f32 1.5, %v274_v21  ;;  %v5160_v63 = vpop.xlane.xlu1 %193  ;;  %v312_v21 = vmul.f32 %v250_v41, %v5048_v4  ;;  %v286_v45 = vmul.f32 %v5082_v18, %v285_v15  ;;  %vm287_vm14 = vweird.f32 %v5036_v9 }
  0xaf   :  { %v5163_v10 = vpop.xlane.xlu2 %195  ;;  %v5165_v58 = vpop.eup %4267  ;;  %v693_v28 = vsel %vm9721_vm0, %v5180_v51, 0.0  ;;  %vm277_vm15 = vweird.f32 %v5044_v59  ;;  %vm5206_vm11 = vmor %vm287_vm14, %vm288_vm10  ;;  %v696_v9 = vsel %vm9726_vm12, %v5188_v3, 0.0  ;;  %vm9727_vm9 = vweird.f32 %v5093_v30 }
  0xb0   :  { %v192_v16 = vpop.xlane.xlu0 %191  ;;  %v302_v43 = vmul.f32 %v5165_v58, %v5097_v26  ;;  %v276_v13 = vmul.f32 %v5093_v30, %v275_v27  ;;  %v335_v27 = vmul.f32 %v311_v39, %v4669_v2  ;;  %vm5217_vm0 = vmor %vm277_vm15, %vm9727_vm9  ;;  %v321_v59 = vmul.f32 %v313_v11, %v4955_v47 }
  0xb1   :  { %v319_v41 = vmul.f32 %v311_v39, %v4924_v24  ;;  %v295_v40 = vsub.f32 1.5, %v294_v37  ;;  %v336_v47 = vmul.f32 %v312_v21, %v4690_v8  ;;  %v337_v24 = vmul.f32 %v313_v11, %v4664_v1  ;;  %vm9730_vm15 = vmmov %vm9726_vm12 }
  0xb2   :  { %v303_v54 = vmul.f32 %v5165_v58, %v302_v43  ;;  %vm298_vm10 = vweird.f32 %v5085_v17  ;;  %vm9731_vm14 = vmmov %vm9726_vm12  ;;  %vm307_vm9 = vweird.f32 %v5097_v26 }
  0xb3   :  { %685 = vadd.xlane.f32.xlu1 %v684_v22  ;;  %688 = vadd.xlane.f32.xlu2 %v687_v5  ;;  %v270_v22 = vsel %vm5195_vm13, %v5040_v62, %v266_v19  ;;  %v280_v62 = vsel %vm5217_vm0, %v5093_v30, %v276_v13  ;;  %v290_v5 = vsel %vm5206_vm11, %v5082_v18, %v286_v45  ;;  %v690_v13 = vsel %vm9730_vm15, %v5227_v25, 0.0  ;;  %vm9734_vm0 = vmmov %vm9731_vm14 }
  0xb4   :  { %v304_v20 = vmul.f32 0.5, %v303_v54  ;;  %682 = vadd.xlane.f32.xlu0 %v681_v60  ;;  %v320_v54 = vmul.f32 %v312_v21, %v4960_v57  ;;  %v314_v4 = vmul.f32 %v270_v22, %v5087_v23  ;;  %v315_v37 = vmul.f32 %v280_v62, %v5089_v33 }
  0xb5   :  { %v316_v45 = vmul.f32 %v290_v5, %v192_v16  ;;  %v296_v8 = vmul.f32 %v5085_v17, %v295_v40  ;;  %vm308_vm11 = vweird.f32 %v5165_v58  ;;  %vm297_vm13 = vweird.f32 %v5038_v50 }
  0xb6   :  { %v305_v15 = vsub.f32 1.5, %v304_v20  ;;  %v210_v57 = vpop.xlane.xlu1 %209  ;;  %vm5252_vm12 = vmor %vm297_vm13, %vm298_vm10  ;;  %v700_v16 = vmul.f32 %v5080_v42, %v5080_v42  ;;  %v701_v50 = vmul.f32 %v5141_v48, %v5141_v48  ;;  %v323_v26 = vmul.f32 %v315_v37, %v4996_v52 }
  0xb7   :  { %v212_v60 = vpop.xlane.xlu2 %211  ;;  %v328_v39 = vsub.f32 %v210_v57, %v320_v54  ;;  %vm5265_vm15 = vmor %vm307_vm9, %vm308_vm11  ;;  %v324_v11 = vmul.f32 %v316_v45, %v4998_v29  ;;  %v300_v42 = vsel %vm5252_vm12, %v5085_v17, %v296_v8  ;;  %v339_v22 = vmul.f32 %v315_v37, %v4659_v0 }
  0xb8   :  { %v329_v43 = vsub.f32 %v212_v60, %v321_v59  ;;  %v208_v19 = vpop.xlane.xlu0 %207  ;;  %v306_v1 = vmul.f32 %v5165_v58, %v305_v15  ;;  %vm9737_vm10 = vmmov %vm9734_vm0  ;;  %v340_v52 = vmul.f32 %v316_v45, %v4680_v6  ;;  %v317_v0 = vmul.f32 %v300_v42, %v5160_v63 }
  0xb9   :  { %v327_v30 = vsub.f32 %v208_v19, %v319_v41  ;;  %v344_v18 = vadd.f32 %v336_v47, %v328_v39  ;;  %vm9738_vm11 = vmmov %vm9734_vm0  ;;  %v703_v6 = vmul.f32 %v5136_v32, %v5136_v32  ;;  %v702_v63 = vmul.f32 %v5120_v61, %v5120_v61 }
  0xba   :  { %v345_v20 = vadd.f32 %v337_v24, %v329_v43  ;;  %v310_v48 = vsel %vm5265_vm15, %v5165_v58, %v306_v1  ;;  %v710_v17 = vsel %vm9738_vm11, %v700_v16, 0.0  ;;  %vm9739_vm13 = vmmov %vm9734_vm0  ;;  %v325_v60 = vmul.f32 %v317_v0, %v5000_v34 }
  0xbb   :  { %v343_v21 = vadd.f32 %v335_v27, %v327_v30  ;;  %352 = vst.msk [vmem:[%s9547_s14 + $0x8] sm:$0xff] %vm9731_vm14, %v344_v18  ;;  %694 = vadd.xlane.f32.xlu1 %v693_v28  ;;  %697 = vadd.xlane.f32.xlu2 %v696_v9  ;;  %v699_v28 = vmul.f32 %v5075_v38, %v5075_v38  ;;  %v713_v41 = vsel %vm9739_vm13, %v701_v50, 0.0  ;;  %vm9740_vm14 = vmmov %vm9734_vm0 }
  0xbc   :  { %353 = vst.msk [vmem:[%s9547_s14 + $0x10] sm:$0xff] %vm9734_vm0, %v345_v20  ;;  %691 = vadd.xlane.f32.xlu0 %v690_v13  ;;  %v322_v9 = vmul.f32 %v314_v4, %v4958_v49  ;;  %v338_v38 = vmul.f32 %v314_v4, %v4685_v7  ;;  %v318_v58 = vmul.f32 %v310_v48, %v5163_v10  ;;  %vm9741_vm12 = vmmov %vm9734_vm0 }
  0xbd   :  { %351 = vst.msk [vmem:[%s9547_s14] sm:$0xff] %vm9737_vm10, %v343_v21  ;;  %v707_v49 = vsel %vm9740_vm14, %v699_v28, 0.0  ;;  %vm9742_vm9 = vmmov %vm9734_vm0  ;;  %v704_v7 = vmul.f32 %v5227_v25, %v5227_v25  ;;  %v341_v25 = vmul.f32 %v317_v0, %v4708_v14  ;;  %v5330_v14 = vld [vmem:[%s9546_s13 + $0x1] ss:$0 sm:$0xff]  ;;  %v705_v34 = vmul.f32 %v5180_v51, %v5180_v51 }
  0xbe   :  { %v216_v27 = vpop.xlane.xlu1 %215  ;;  %v326_v10 = vmul.f32 %v318_v58, %v5034_v31  ;;  %v342_v47 = vmul.f32 %v318_v58, %v4701_v12  ;;  %vm9743_vm15 = vmmov %vm9734_vm0  ;;  %v706_v12 = vmul.f32 %v5188_v3, %v5188_v3  ;;  %v773_v18 = vsel %vm4745_vm1, %v5330_v14, 0.0 }
  0xbf   :  { %v218_v56 = vpop.xlane.xlu2 %217  ;;  %v331_v29 = vsub.f32 %v216_v27, %v323_v26  ;;  %v719_v43 = vsel %vm9743_vm15, %v703_v6, 0.0  ;;  %vm9744_vm10 = vmmov %vm9734_vm0  ;;  %v775_v51 = vsel %vm4785_vm5, %v5330_v14, 0.0  ;;  %v776_v21 = vsel %vm4773_vm3, %v5330_v14, 0.0 }
  0xc0   :  { %v332_v2 = vsub.f32 %v218_v56, %v324_v11  ;;  %v214_v54 = vpop.xlane.xlu0 %213  ;;  %v722_v19 = vsel %vm9744_vm10, %v704_v7, 0.0  ;;  %vm9745_vm11 = vmmov %vm9734_vm0  ;;  %v774_v33 = vsel %vm4751_vm2, %v5330_v14, 0.0  ;;  %v778_v56 = vsel %vm4818_vm8, %v5330_v14, 0.0 }
  0xc1   :  { %v330_v59 = vsub.f32 %v214_v54, %v322_v9  ;;  %v347_v62 = vadd.f32 %v339_v22, %v331_v29  ;;  %v716_v31 = vsel %vm9745_vm11, %v702_v63, 0.0  ;;  %vm9746_vm13 = vmmov %vm9734_vm0  ;;  %v779_v9 = vsel %vm4806_vm6, %v5330_v14, 0.0  ;;  %v9750_v29 = vld [vmem:[#allocation7_spill] sm:$0xff] }
  0xc2   :  { %v348_v40 = vadd.f32 %v340_v52, %v332_v2  ;;  %vm9747_vm14 = vmmov %vm9734_vm0  ;;  %v777_v2 = vsel %vm4779_vm4, %v5330_v14, 0.0 }
  0xc3   :  { %v346_v15 = vadd.f32 %v338_v38, %v330_v59  ;;  %355 = vst.msk [vmem:[%s9547_s14 + $0x20] sm:$0xff] %vm9741_vm12, %v347_v62  ;;  %711 = vadd.xlane.f32.xlu1 %v710_v17  ;;  %714 = vadd.xlane.f32.xlu2 %v713_v41  ;;  %vm9748_vm12 = vmmov %vm9734_vm0  ;;  %v5370_v38 = vld [vmem:[%s9546_s13 + $0x8] ss:$0 sm:$0xff] }
  0xc4   :  { %356 = vst.msk [vmem:[%s9547_s14 + $0x28] sm:$0xff] %vm9742_vm9, %v348_v40  ;;  %708 = vadd.xlane.f32.xlu0 %v707_v49  ;;  %v728_v45 = vsel %vm9748_vm12, %v706_v12, 0.0  ;;  %vm9749_vm9 = vmmov %vm9734_vm0  ;;  %v799_v6 = vsel %vm4745_vm1, %v5370_v38, 0.0 }
  0xc5   :  { %354 = vst.msk [vmem:[%s9547_s14 + $0x18] sm:$0xff] %vm9734_vm0, %v346_v15  ;;  %v725_v20 = vsel %vm9749_vm9, %v705_v34, 0.0  ;;  %vm9756_vm12 = vmmov %vm9749_vm9 }
  0xc6   :  { %v222_v5 = vpop.xlane.xlu1 %221 }
  0xc7   :  { %v369_v57 = vpop.xlane.xlu2 %368  ;;  %v334_v32 = vsub.f32 %v222_v5, %v326_v10 }
  0xc8   :  { %v220_v24 = vpop.xlane.xlu0 %219  ;;  %v5348_v16 = vmul.f32 0.020408163, %v369_v57 }
  0xc9   :  { %v333_v39 = vsub.f32 %v220_v24, %v325_v60  ;;  %v350_v4 = vadd.f32 %v342_v47, %v334_v32  ;;  %v800_v47 = vsel %vm4751_vm2, %v5370_v38, 0.0 }
  0xca   :  { %v439_v11 = vmul.f32 %v5348_v16, %v5348_v16 }
  0xcb   :  { %v349_v30 = vadd.f32 %v341_v25, %v333_v39  ;;  %358 = vst.msk [vmem:[%s9547_s14 + $0x38] sm:$0xff] %vm9746_vm13, %v350_v4  ;;  %720 = vadd.xlane.f32.xlu1 %v719_v43  ;;  %723 = vadd.xlane.f32.xlu2 %v722_v19  ;;  %v780_v39 = vsel %vm4812_vm7, %v5330_v14, 0.0  ;;  %v802_v14 = vsel %vm4773_vm3, %v5370_v38, 0.0  ;;  %vm9754_vm13 = vmmov %vm9749_vm9 }
  0xcc   :  { %717 = vadd.xlane.f32.xlu0 %v716_v31 }
  0xcd   :  { %357 = vst.msk [vmem:[%s9547_s14 + $0x30] sm:$0xff] %vm9747_vm14, %v349_v30  ;;  %vm9755_vm14 = vmmov %vm9749_vm9 }
  0xce   :  { %v375_v61 = vpop.xlane.xlu1 %374 }
  0xcf   :  { %v378_v13 = vpop.xlane.xlu2 %377  ;;  %v5374_v58 = vmul.f32 0.020408163, %v375_v61 }
  0xd0   :  { %v372_v37 = vpop.xlane.xlu0 %371  ;;  %v5365_v54 = vmul.f32 0.020408163, %v378_v13 }
  0xd1   :  { %v5350_v50 = vmul.f32 0.020408163, %v372_v37  ;;  %v441_v57 = vmul.f32 %v5374_v58, %v5374_v58 }
  0xd2   :  { %v442_v49 = vmul.f32 %v5365_v54, %v5365_v54 }
  0xd3   :  { %729 = vadd.xlane.f32.xlu1 %v728_v45  ;;  %781 = vadd.xlane.f32.xlu2 %v773_v18  ;;  %v440_v28 = vmul.f32 %v5350_v50, %v5350_v50 }
  0xd4   :  { %726 = vadd.xlane.f32.xlu0 %v725_v20 }
  0xd6   :  { %v384_v3 = vpop.xlane.xlu1 %383 }
  0xd7   :  { %v387_v8 = vpop.xlane.xlu2 %386  ;;  %v5401_v12 = vmul.f32 0.020408163, %v384_v3 }
  0xd8   :  { %v381_v1 = vpop.xlane.xlu0 %380  ;;  %v5397_v43 = vmul.f32 0.020408163, %v387_v8 }
  0xd9   :  { %v5372_v59 = vmul.f32 0.020408163, %v381_v1 }
  0xda   :  { %v445_v18 = vmul.f32 %v5397_v43, %v5397_v43 }
  0xdb   :  { %785 = vadd.xlane.f32.xlu1 %v775_v51  ;;  %787 = vadd.xlane.f32.xlu2 %v776_v21  ;;  %v443_v7 = vmul.f32 %v5372_v59, %v5372_v59  ;;  %v803_v51 = vsel %vm4779_vm4, %v5370_v38, 0.0 }
  0xdc   :  { %783 = vadd.xlane.f32.xlu0 %v774_v33 }
  0xde   :  { %v401_v23 = vpop.xlane.xlu1 %400 }
  0xdf   :  { %v404_v26 = vpop.xlane.xlu2 %403  ;;  %v431_v42 = vmul.f32 0.020408163, %v401_v23 }
  0xe0   :  { %v432_v48 = vmul.f32 0.020408163, %v404_v26  ;;  %v390_v27 = vpop.xlane.xlu0 %389 }
  0xe1   :  { %v447_v22 = vsub.f32 %v431_v42, %v439_v11  ;;  %v5399_v4 = vmul.f32 0.020408163, %v390_v27  ;;  %v444_v11 = vmul.f32 %v5401_v12, %v5401_v12 }
  0xe2   :  { %v448_v52 = vsub.f32 %v432_v48, %v440_v28 }
  0xe3   :  { %v455_v17 = vmax.f32 %v447_v22, 0.0  ;;  %791 = vadd.xlane.f32.xlu1 %v778_v56  ;;  %793 = vadd.xlane.f32.xlu2 %v779_v9  ;;  %v446_v21 = vmul.f32 %v5399_v4, %v5399_v4  ;;  %v801_v56 = vsel %vm4785_vm5, %v5370_v38, 0.0 }
  0xe4   :  { %v456_v41 = vmax.f32 %v448_v52, 0.0  ;;  %789 = vadd.xlane.f32.xlu0 %v777_v2 }
  0xe5   :  { %v5376_v62 = vadd.f32 1e-05, %v455_v17 }
  0xe6   :  { %v5378_v40 = vadd.f32 1e-05, %v456_v41  ;;  %v410_v0 = vpop.xlane.xlu1 %409 }
  0xe7   :  { %v413_v15 = vpop.xlane.xlu2 %412  ;;  %4269 = vrsqrt.f32 %v5376_v62  ;;  %v434_v10 = vmul.f32 0.020408163, %v410_v0  ;;  %vm545_vm15 = vweird.f32 %v5376_v62 }
  0xe8   :  { %v435_v63 = vmul.f32 0.020408163, %v413_v15  ;;  %v407_v5 = vpop.xlane.xlu0 %406  ;;  %4271 = vrsqrt.f32 %v5378_v40  ;;  %vm555_vm11 = vweird.f32 %v5378_v40 }
  0xe9   :  { %v433_v60 = vmul.f32 0.020408163, %v407_v5  ;;  %v450_v32 = vsub.f32 %v434_v10, %v442_v49 }
  0xea   :  { %v451_v24 = vsub.f32 %v435_v63, %v443_v7 }
  0xeb   :  { %v449_v19 = vsub.f32 %v433_v60, %v441_v57  ;;  %v458_v31 = vmax.f32 %v450_v32, 0.0  ;;  %807 = vadd.xlane.f32.xlu1 %v799_v6  ;;  %809 = vadd.xlane.f32.xlu2 %v800_v47 }
  0xec   :  { %v459_v30 = vmax.f32 %v451_v24, 0.0  ;;  %795 = vadd.xlane.f32.xlu0 %v780_v39  ;;  %v805_v24 = vsel %vm4806_vm6, %v5370_v38, 0.0 }
  0xed   :  { %v457_v34 = vmax.f32 %v449_v19, 0.0  ;;  %v5403_v61 = vpop.eup %4269  ;;  %v5405_v13 = vadd.f32 1e-05, %v458_v31  ;;  %v806_v31 = vsel %vm4812_vm7, %v5370_v38, 0.0 }
  0xee   :  { %v5407_v37 = vadd.f32 1e-05, %v459_v30  ;;  %v5412_v45 = vpop.eup %4271  ;;  %v540_v20 = vmul.f32 %v5403_v61, %v5376_v62  ;;  %v419_v8 = vpop.xlane.xlu1 %418  ;;  %vm546_vm0 = vweird.f32 %v5403_v61 }
  0xef   :  { %v5418_v3 = vadd.f32 1e-05, %v457_v34  ;;  %v422_v1 = vpop.xlane.xlu2 %421  ;;  %4273 = vrsqrt.f32 %v5405_v13  ;;  %v437_v33 = vmul.f32 0.020408163, %v419_v8  ;;  %v550_v28 = vmul.f32 %v5412_v45, %v5378_v40  ;;  %vm5493_vm10 = vmor %vm545_vm15, %vm546_vm0 }
  0xf0   :  { %v438_v23 = vmul.f32 0.020408163, %v422_v1  ;;  %v416_v26 = vpop.xlane.xlu0 %415  ;;  %4275 = vrsqrt.f32 %v5407_v37  ;;  %v541_v22 = vmul.f32 %v5403_v61, %v540_v20  ;;  %v804_v34 = vsel %vm4818_vm8, %v5370_v38, 0.0  ;;  %v5479_v38 = vld [vmem:[%s9545_s0 + $0xc8] sm:$0xff] }
  0xf1   :  { %v436_v42 = vmul.f32 0.020408163, %v416_v26  ;;  %4277 = vrsqrt.f32 %v5418_v3  ;;  %v453_v48 = vsub.f32 %v437_v33, %v445_v18  ;;  %v551_v41 = vmul.f32 %v5412_v45, %v550_v28  ;;  %v5489_v33 = vld [vmem:[%s9545_s0 + $0xc0] sm:$0xff] }
  0xf2   :  { %v454_v27 = vsub.f32 %v438_v23, %v446_v21  ;;  %v542_v49 = vmul.f32 0.5, %v541_v22  ;;  %v5484_v21 = vld [vmem:[%s9545_s0 + $0xd0] sm:$0xff]  ;;  %vm556_vm9 = vweird.f32 %v5412_v45 }
  0xf3   :  { %v452_v9 = vsub.f32 %v436_v42, %v444_v11  ;;  %v461_v52 = vmax.f32 %v453_v48, 0.0  ;;  %813 = vadd.xlane.f32.xlu1 %v802_v14  ;;  %815 = vadd.xlane.f32.xlu2 %v803_v51  ;;  %v552_v19 = vmul.f32 0.5, %v551_v41  ;;  %v967_v41 = vsel %vm9756_vm12, %v5489_v33, 0.0 }
  0xf4   :  { %v462_v2 = vmax.f32 %v454_v27, 0.0  ;;  %811 = vadd.xlane.f32.xlu0 %v801_v56  ;;  %v543_v60 = vsub.f32 1.5, %v542_v49 }
  0xf5   :  { %v460_v17 = vmax.f32 %v452_v9, 0.0  ;;  %v5437_v0 = vpop.eup %4273  ;;  %v5439_v15 = vadd.f32 1e-05, %v461_v52  ;;  %v553_v8 = vsub.f32 1.5, %v552_v19  ;;  %v5529_v19 = vld [vmem:[%s9545_s0 + $0xe0] sm:$0xff] }
  0xf6   :  { %v5441_v6 = vadd.f32 1e-05, %v462_v2  ;;  %v5443_v7 = vpop.eup %4275  ;;  %v570_v10 = vmul.f32 %v5437_v0, %v5405_v13  ;;  %v5449_v5 = vpop.xlane.xlu1 %491  ;;  %v544_v18 = vmul.f32 %v5403_v61, %v543_v60  ;;  %v970_v2 = vsel %vm9754_vm13, %v5479_v38, 0.0 }
  0xf7   :  { %v5447_v63 = vadd.f32 1e-05, %v460_v17  ;;  %v5451_v57 = vpop.xlane.xlu2 %493  ;;  %v5453_v47 = vpop.eup %4277  ;;  %4279 = vrsqrt.f32 %v5439_v15  ;;  %v580_v30 = vmul.f32 %v5443_v7, %v5407_v37  ;;  %v973_v17 = vsel %vm9755_vm14, %v5484_v21, 0.0 }
  0xf8   :  { %v490_v32 = vpop.xlane.xlu0 %489  ;;  %v560_v39 = vmul.f32 %v5453_v47, %v5418_v3  ;;  %4281 = vrsqrt.f32 %v5441_v6  ;;  %v571_v20 = vmul.f32 %v5437_v0, %v570_v10  ;;  %v548_v48 = vsel %vm5493_vm10, %v5403_v61, %v544_v18  ;;  %vm5537_vm10 = vmor %vm555_vm11, %vm556_vm9 }
  0xf9   :  { %4283 = vrsqrt.f32 %v5447_v63  ;;  %v581_v26 = vmul.f32 %v5443_v7, %v580_v30  ;;  %v554_v49 = vmul.f32 %v5412_v45, %v553_v8  ;;  %vm576_vm0 = vweird.f32 %v5437_v0 }
  0xfa   :  { %v561_v14 = vmul.f32 %v5453_v47, %v560_v39  ;;  %v572_v51 = vmul.f32 0.5, %v571_v20  ;;  %v619_v60 = vmul.f32 %v548_v48, %v490_v32  ;;  %vm566_vm15 = vweird.f32 %v5453_v47  ;;  %v5629_v20 = vld [vmem:[%s9545_s0 + $0xf8] sm:$0xff] }
  0xfb   :  { %819 = vadd.xlane.f32.xlu1 %v805_v24  ;;  %821 = vadd.xlane.f32.xlu2 %v806_v31  ;;  %v582_v24 = vmul.f32 0.5, %v581_v26  ;;  %vm575_vm13 = vweird.f32 %v5405_v13  ;;  %vm565_vm14 = vweird.f32 %v5418_v3  ;;  %vm9761_vm11 = vcmask 400384   ;;  %v5554_v13 = vld [vmem:[%s9545_s0 + $0xe8] sm:$0xff]  ;;  %v5570_v26 = vld [vmem:[%s9545_s0 + $0xd8] sm:$0xff] }
  0xfc   :  { %v562_v1 = vmul.f32 0.5, %v561_v14  ;;  %817 = vadd.xlane.f32.xlu0 %v804_v34  ;;  %v573_v9 = vsub.f32 1.5, %v572_v51  ;;  %vm5545_vm12 = vmor %vm575_vm13, %vm576_vm0  ;;  %v979_v40 = vsel %vm9761_vm11, %v5529_v19, 0.0  ;;  %v558_v3 = vsel %vm5537_vm10, %v5412_v45, %v554_v49 }
  0xfd   :  { %v5491_v23 = vpop.eup %4279  ;;  %vm5561_vm9 = vmor %vm565_vm14, %vm566_vm15  ;;  %v627_v62 = vmul.f32 %v619_v60, %v5348_v16  ;;  %v4477_v16 = vld [vmem:[%s9545_s0 + $0x40] sm:$0xff]  ;;  %vm585_vm0 = vweird.f32 %v5407_v37  ;;  %v620_v49 = vmul.f32 %v558_v3, %v5449_v5  ;;  %vm586_vm10 = vweird.f32 %v5443_v7 }
  0xfe   :  { %v5498_v11 = vpop.eup %4281  ;;  %v600_v28 = vmul.f32 %v5491_v23, %v5439_v15  ;;  %v563_v42 = vsub.f32 1.5, %v562_v1  ;;  %v5505_v27 = vpop.xlane.xlu1 %497  ;;  %v574_v34 = vmul.f32 %v5437_v0, %v573_v9  ;;  %v583_v1 = vsub.f32 1.5, %v582_v24  ;;  %vm9764_vm15 = vmmov %vm9761_vm11 }
  0xff   :  { %v5507_v56 = vpop.xlane.xlu2 %499  ;;  %v5509_v22 = vpop.eup %4283  ;;  %v610_v10 = vmul.f32 %v5498_v11, %v5441_v6  ;;  %vm606_vm13 = vweird.f32 %v5491_v23  ;;  %vm9765_vm14 = vmmov %vm9761_vm11  ;;  %v991_v37 = vmul.f32 %v5489_v33, %v5489_v33  ;;  %v5634_v33 = vld [vmem:[%s9545_s0 + $0xf0] sm:$0xff] }
 0x100   :  { %v496_v52 = vpop.xlane.xlu0 %495  ;;  %v590_v61 = vmul.f32 %v5509_v22, %v5447_v63  ;;  %v601_v39 = vmul.f32 %v5491_v23, %v600_v28  ;;  %v564_v31 = vmul.f32 %v5453_v47, %v563_v42  ;;  %v578_v42 = vsel %vm5545_vm12, %v5437_v0, %v574_v34  ;;  %vm5598_vm11 = vmor %vm585_vm0, %vm586_vm10 }
 0x101   :  { %v611_v51 = vmul.f32 %v5498_v11, %v610_v10  ;;  %v976_v0 = vsel %vm9765_vm14, %v5570_v26, 0.0  ;;  %v622_v24 = vmul.f32 %v578_v42, %v496_v52  ;;  %vm596_vm12 = vweird.f32 %v5509_v22  ;;  %v4478_v52 = vld [vmem:[%s9545_s0 + $0x48] sm:$0xff] }
 0x102   :  { %v591_v30 = vmul.f32 %v5509_v22, %v590_v61  ;;  %v602_v14 = vmul.f32 0.5, %v601_v39  ;;  %v568_v45 = vsel %vm5561_vm9, %v5453_v47, %v564_v31  ;;  %v982_v47 = vsel %vm9764_vm15, %v5554_v13, 0.0  ;;  %vm9768_vm9 = vmmov %vm9765_vm14 }
 0x103   :  { %971 = vadd.xlane.f32.xlu1 %v970_v2  ;;  %974 = vadd.xlane.f32.xlu2 %v973_v17  ;;  %v643_v17 = vmul.f32 %v4477_v16, %v619_v60  ;;  %v621_v10 = vmul.f32 %v568_v45, %v5451_v57  ;;  %v584_v60 = vmul.f32 %v5443_v7, %v583_v1  ;;  %vm605_vm15 = vweird.f32 %v5439_v15  ;;  %v4479_v1 = vld [vmem:[%s9545_s0 + $0x50] sm:$0xff]  ;;  %vm9773_vm10 = vmmov %vm9768_vm9 }
 0x104   :  { %v592_v18 = vmul.f32 0.5, %v591_v30  ;;  %968 = vadd.xlane.f32.xlu0 %v967_v41  ;;  %v603_v2 = vsub.f32 1.5, %v602_v14  ;;  %v612_v30 = vmul.f32 0.5, %v611_v51  ;;  %vm595_vm14 = vweird.f32 %v5447_v63  ;;  %vm5610_vm6 = vmor %vm605_vm15, %vm606_vm13 }
 0x105   :  { %v644_v32 = vmul.f32 %v4478_v52, %v620_v49  ;;  %vm5619_vm0 = vmor %vm595_vm14, %vm596_vm12  ;;  %v629_v63 = vmul.f32 %v621_v10, %v5374_v58  ;;  %v630_v14 = vmul.f32 %v622_v24, %v5365_v54  ;;  %v645_v51 = vmul.f32 %v4479_v1, %v621_v10 }
 0x106   :  { %v593_v28 = vsub.f32 1.5, %v592_v18  ;;  %v5578_v48 = vpop.xlane.xlu1 %503  ;;  %v604_v5 = vmul.f32 %v5491_v23, %v603_v2  ;;  %v628_v18 = vmul.f32 %v620_v49, %v5350_v50  ;;  %v613_v58 = vsub.f32 1.5, %v612_v30  ;;  %v4481_v30 = vld [vmem:[%s9545_s0 + $0x68] sm:$0xff] }
 0x107   :  { %v516_v9 = vpop.xlane.xlu2 %515  ;;  %vm616_vm12 = vweird.f32 %v5498_v11 }
 0x108   :  { %v635_v41 = vsub.f32 %v516_v9, %v627_v62  ;;  %v502_v61 = vpop.xlane.xlu0 %501  ;;  %v594_v31 = vmul.f32 %v5509_v22, %v593_v28  ;;  %v608_v50 = vsel %vm5610_vm6, %v5491_v23, %v604_v5  ;;  %v988_v9 = vsel %vm9773_vm10, %v5629_v20, 0.0  ;;  %vm9774_vm6 = vmmov %vm9768_vm9 }
 0x109   :  { %v999_v23 = vsel %vm9774_vm6, %v991_v37, 0.0  ;;  %vm9775_vm13 = vmmov %vm9774_vm6 }
 0x10a   :  { %v651_v39 = vadd.f32 %v643_v17, %v635_v41  ;;  %v598_v54 = vsel %vm5619_vm0, %v5509_v22, %v594_v31  ;;  %v985_v2 = vsel %vm9775_vm13, %v5634_v33, 0.0  ;;  %v625_v17 = vmul.f32 %v608_v50, %v502_v61  ;;  %vm9777_vm15 = vmmov %vm9774_vm6  ;;  %v9799_v61 = vld [vmem:[#allocation10_spill] sm:$0xff] }
 0x10b   :  { %980 = vadd.xlane.f32.xlu1 %v979_v40  ;;  %983 = vadd.xlane.f32.xlu2 %v982_v47  ;;  %v588_v40 = vsel %vm5598_vm11, %v5443_v7, %v584_v60  ;;  %v4480_v7 = vld [vmem:[%s9545_s0 + $0x58] sm:$0xff]  ;;  %v624_v16 = vmul.f32 %v598_v54, %v5507_v56  ;;  %vm9776_vm11 = vmmov %vm9774_vm6  ;;  %v994_v56 = vmul.f32 %v5570_v26, %v5570_v26 }
 0x10c   :  { %659 = vst.msk [vmem:[%s9547_s14 + $0x40] sm:$0xff] %vm9768_vm9, %v651_v39  ;;  %977 = vadd.xlane.f32.xlu0 %v976_v0  ;;  %v646_v62 = vmul.f32 %v4480_v7, %v622_v24  ;;  %v623_v49 = vmul.f32 %v588_v40, %v5505_v27  ;;  %v614_v0 = vmul.f32 %v5498_v11, %v613_v58  ;;  %vm615_vm9 = vweird.f32 %v5441_v6  ;;  %vm9780_vm0 = vmmov %vm9774_vm6 }
 0x10d   :  { %v993_v27 = vmul.f32 %v5484_v21, %v5484_v21  ;;  %vm5673_vm14 = vmor %vm615_vm9, %vm616_vm12  ;;  %v632_v6 = vmul.f32 %v624_v16, %v5401_v12  ;;  %v633_v60 = vmul.f32 %v625_v17, %v5397_v43  ;;  %v992_v24 = vmul.f32 %v5479_v38, %v5479_v38  ;;  %v4482_v43 = vld [vmem:[%s9545_s0 + $0x70] sm:$0xff] }
 0x10e   :  { %v520_v3 = vpop.xlane.xlu1 %519  ;;  %v618_v21 = vsel %vm5673_vm14, %v5498_v11, %v614_v0  ;;  %v631_v31 = vmul.f32 %v623_v49, %v5372_v59  ;;  %v648_v5 = vmul.f32 %v4481_v30, %v624_v16  ;;  %v649_v12 = vmul.f32 %v4482_v43, %v625_v17  ;;  %v4483_v11 = vld [vmem:[%s9545_s0 + $0x60] sm:$0xff]  ;;  %vm9781_vm10 = vmmov %vm9780_vm0  ;;  %v9792_v16 = vld [vmem:[#allocation9_spill] sm:$0xff] }
 0x10f   :  { %v522_v8 = vpop.xlane.xlu2 %521  ;;  %v637_v45 = vsub.f32 %v520_v3, %v629_v63  ;;  %v647_v37 = vmul.f32 %v4483_v11, %v623_v49  ;;  %v1005_v59 = vsel %vm9781_vm10, %v993_v27, 0.0  ;;  %vm9782_vm6 = vmmov %vm9780_vm0  ;;  %v996_v54 = vmul.f32 %v5554_v13, %v5554_v13  ;;  %v4484_v13 = vld [vmem:[%s9545_s0 + $0x78] sm:$0xff]  ;;  %v9797_v27 = vld [vmem:[#allocation12_spill] sm:$0xff] }
 0x110   :  { %v638_v28 = vsub.f32 %v522_v8, %v630_v14  ;;  %v518_v22 = vpop.xlane.xlu0 %517  ;;  %vm9783_vm13 = vmmov %vm9780_vm0  ;;  %v995_v58 = vmul.f32 %v5529_v19, %v5529_v19  ;;  %v998_v19 = vmul.f32 %v5629_v20, %v5629_v20 }
 0x111   :  { %v636_v42 = vsub.f32 %v518_v22, %v628_v18  ;;  %v653_v41 = vadd.f32 %v645_v51, %v637_v45  ;;  %v1002_v14 = vsel %vm9783_vm13, %v992_v24, 0.0  ;;  %v626_v18 = vmul.f32 %v618_v21, %v5578_v48  ;;  %vm9784_vm12 = vmmov %vm9780_vm0 }
 0x112   :  { %v654_v47 = vadd.f32 %v646_v62, %v638_v28  ;;  %v997_v48 = vmul.f32 %v5634_v33, %v5634_v33  ;;  %vm9786_vm9 = vmmov %vm9780_vm0  ;;  %v1011_v45 = vsel %vm9780_vm0, %v995_v58, 0.0  ;;  %vm9793_vm13 = vnez %v9792_v16 }
 0x113   :  { %v652_v10 = vadd.f32 %v644_v32, %v636_v42  ;;  %661 = vst.msk [vmem:[%s9547_s14 + $0x50] sm:$0xff] %vm9776_vm11, %v653_v41  ;;  %989 = vadd.xlane.f32.xlu1 %v988_v9  ;;  %1000 = vadd.xlane.f32.xlu2 %v999_v23  ;;  %v1008_v32 = vsel %vm9782_vm6, %v994_v56, 0.0  ;;  %vm9785_vm11 = vmmov %vm9780_vm0  ;;  %v634_v8 = vmul.f32 %v626_v18, %v5399_v4  ;;  %v4219_v4 = vld [vmem:[%s9546_s13 + $0x1] ss:$0 sm:$0xff]  ;;  %v9790_v23 = vld [vmem:[#allocation11_spill] sm:$0xff] }
 0x114   :  { %662 = vst.msk [vmem:[%s9547_s14 + $0x58] sm:$0xff] %vm9777_vm15, %v654_v47  ;;  %986 = vadd.xlane.f32.xlu0 %v985_v2  ;;  %v650_v51 = vmul.f32 %v4484_v13, %v626_v18  ;;  %vm9787_vm15 = vmmov %vm9780_vm0  ;;  %vm9791_vm6 = vnez %v9790_v23  ;;  %v1066_v17 = vsel %vm9793_vm13, %v4219_v4, 0.0 }
 0x115   :  { %660 = vst.msk [vmem:[%s9547_s14 + $0x48] sm:$0xff] %vm9780_vm0, %v652_v10  ;;  %v1014_v33 = vsel %vm9787_vm15, %v996_v54, 0.0  ;;  %vm9788_vm14 = vmmov %vm9780_vm0  ;;  %v1065_v2 = vsel %vm9791_vm6, %v4219_v4, 0.0  ;;  %v9795_v10 = vld [vmem:[#allocation14_spill] sm:$0xff]  ;;  %vm9800_vm15 = vnez %v9799_v61 }
 0x116   :  { %v526_v26 = vpop.xlane.xlu1 %525  ;;  %v1017_v62 = vsel %vm9788_vm14, %v997_v48, 0.0  ;;  %vm9789_vm10 = vmmov %vm9780_vm0 }
 0x117   :  { %v528_v39 = vpop.xlane.xlu2 %527  ;;  %v640_v34 = vsub.f32 %v526_v26, %v632_v6  ;;  %v1067_v6 = vsel %vm9800_vm15, %v4219_v4, 0.0 }
 0x118   :  { %v641_v38 = vsub.f32 %v528_v39, %v633_v60  ;;  %v524_v57 = vpop.xlane.xlu0 %523 }
 0x119   :  { %v639_v52 = vsub.f32 %v524_v57, %v631_v31  ;;  %v656_v15 = vadd.f32 %v648_v5, %v640_v34  ;;  %v9801_v57 = vld [vmem:[#allocation16_spill] sm:$0xff] }
 0x11a   :  { %v657_v63 = vadd.f32 %v649_v12, %v641_v38  ;;  %vm9802_vm14 = vnez %v9801_v57 }
 0x11b   :  { %v655_v40 = vadd.f32 %v647_v37, %v639_v52  ;;  %664 = vst.msk [vmem:[%s9547_s14 + $0x68] sm:$0xff] %vm9784_vm12, %v656_v15  ;;  %1006 = vadd.xlane.f32.xlu1 %v1005_v59  ;;  %1009 = vadd.xlane.f32.xlu2 %v1008_v32  ;;  %vm9794_vm12 = vmmov %vm9780_vm0  ;;  %v1071_v11 = vsel %vm9802_vm14, %v4219_v4, 0.0  ;;  %v9803_v37 = vld [vmem:[#allocation15_spill] sm:$0xff]  ;;  %v9805_v15 = vld [vmem:[#allocation13_spill] sm:$0xff] }
 0x11c   :  { %665 = vst.msk [vmem:[%s9547_s14 + $0x70] sm:$0xff] %vm9785_vm11, %v657_v63  ;;  %1003 = vadd.xlane.f32.xlu0 %v1002_v14  ;;  %v1020_v41 = vsel %vm9794_vm12, %v998_v19, 0.0  ;;  %vm9796_vm11 = vnez %v9795_v10  ;;  %vm9804_vm0 = vnez %v9803_v37  ;;  %v5946_v37 = vld [vmem:[%s9545_s0 + $0x128] sm:$0xff] }
 0x11d   :  { %663 = vst.msk [vmem:[%s9547_s14 + $0x60] sm:$0xff] %vm9786_vm9, %v655_v40  ;;  %v1068_v20 = vsel %vm9796_vm11, %v4219_v4, 0.0  ;;  %vm9798_vm9 = vnez %v9797_v27  ;;  %v1072_v52 = vsel %vm9804_vm0, %v4219_v4, 0.0  ;;  %v5770_v40 = vld [vmem:[%s9546_s13 + $0x8] ss:$0 sm:$0xff]  ;;  %v4485_v27 = vld [vmem:[%s9545_s0 + $0x80] sm:$0xff] }
 0x11e   :  { %v677_v50 = vpop.xlane.xlu1 %676  ;;  %v1069_v56 = vsel %vm9798_vm9, %v4219_v4, 0.0 }
 0x11f   :  { %v680_v3 = vpop.xlane.xlu2 %679  ;;  %v5751_v21 = vmul.f32 0.020408163, %v677_v50 }
 0x120   :  { %v530_v1 = vpop.xlane.xlu0 %529  ;;  %v5747_v60 = vmul.f32 0.020408163, %v680_v3 }
 0x121   :  { %v642_v7 = vsub.f32 %v530_v1, %v634_v8  ;;  %v747_v34 = vmul.f32 %v5751_v21, %v5751_v21 }
 0x122   :  { %v748_v31 = vmul.f32 %v5747_v60, %v5747_v60 }
 0x123   :  { %v658_v28 = vadd.f32 %v650_v51, %v642_v7  ;;  %1015 = vadd.xlane.f32.xlu1 %v1014_v33  ;;  %1018 = vadd.xlane.f32.xlu2 %v1017_v62  ;;  %v1092_v62 = vsel %vm9793_vm13, %v5770_v40, 0.0 }
 0x124   :  { %1012 = vadd.xlane.f32.xlu0 %v1011_v45 }
 0x125   :  { %666 = vst.msk [vmem:[%s9547_s14 + $0x78] sm:$0xff] %vm9789_vm10, %v658_v28  ;;  %vm9806_vm10 = vnez %v9805_v15 }
 0x126   :  { %v686_v22 = vpop.xlane.xlu1 %685  ;;  %v1070_v63 = vsel %vm9806_vm10, %v4219_v4, 0.0 }
 0x127   :  { %v689_v42 = vpop.xlane.xlu2 %688  ;;  %v5774_v50 = vmul.f32 0.020408163, %v686_v22 }
 0x128   :  { %v683_v9 = vpop.xlane.xlu0 %682  ;;  %v5765_v14 = vmul.f32 0.020408163, %v689_v42 }
 0x129   :  { %v5749_v24 = vmul.f32 0.020408163, %v683_v9  ;;  %v750_v22 = vmul.f32 %v5774_v50, %v5774_v50  ;;  %v1093_v9 = vsel %vm9800_vm15, %v5770_v40, 0.0  ;;  %vm9820_vm15 = vcmask 400384  }
 0x12a   :  { %v751_v13 = vmul.f32 %v5765_v14, %v5765_v14 }
 0x12b   :  { %1073 = vadd.xlane.f32.xlu1 %v1065_v2  ;;  %1075 = vadd.xlane.f32.xlu2 %v1066_v17  ;;  %v749_v30 = vmul.f32 %v5749_v24, %v5749_v24 }
 0x12c   :  { %1021 = vadd.xlane.f32.xlu0 %v1020_v41  ;;  %v1091_v41 = vsel %vm9791_vm6, %v5770_v40, 0.0 }
 0x12e   :  { %v695_v47 = vpop.xlane.xlu1 %694 }
 0x12f   :  { %v698_v49 = vpop.xlane.xlu2 %697 }
 0x130   :  { %v692_v0 = vpop.xlane.xlu0 %691 }
 0x131   :  { %v5772_v54 = vmul.f32 0.020408163, %v692_v0 }
 0x133   :  { %1079 = vadd.xlane.f32.xlu1 %v1068_v20  ;;  %1081 = vadd.xlane.f32.xlu2 %v1069_v56  ;;  %v752_v45 = vmul.f32 %v5772_v54, %v5772_v54  ;;  %v5800_v20 = vmul.f32 0.020408163, %v695_v47  ;;  %v5802_v56 = vmul.f32 0.020408163, %v698_v49 }
 0x134   :  { %1077 = vadd.xlane.f32.xlu0 %v1067_v6 }
 0x136   :  { %v712_v26 = vpop.xlane.xlu1 %711 }
 0x137   :  { %v715_v39 = vpop.xlane.xlu2 %714  ;;  %v740_v5 = vmul.f32 0.020408163, %v712_v26 }
 0x138   :  { %v741_v43 = vmul.f32 0.020408163, %v715_v39  ;;  %v709_v12 = vpop.xlane.xlu0 %708 }
 0x139   :  { %v739_v38 = vmul.f32 0.020408163, %v709_v12  ;;  %v756_v59 = vsub.f32 %v740_v5, %v748_v31 }
 0x13a   :  { %v757_v32 = vsub.f32 %v741_v43, %v749_v30 }
 0x13b   :  { %v755_v18 = vsub.f32 %v739_v38, %v747_v34  ;;  %v764_v48 = vmax.f32 %v756_v59, 0.0  ;;  %1085 = vadd.xlane.f32.xlu1 %v1071_v11  ;;  %1087 = vadd.xlane.f32.xlu2 %v1072_v52  ;;  %v1095_v38 = vsel %vm9798_vm9, %v5770_v40, 0.0  ;;  %v1096_v11 = vsel %vm9806_vm10, %v5770_v40, 0.0 }
 0x13c   :  { %v765_v58 = vmax.f32 %v757_v32, 0.0  ;;  %1083 = vadd.xlane.f32.xlu0 %v1070_v63  ;;  %v753_v59 = vmul.f32 %v5800_v20, %v5800_v20  ;;  %v754_v32 = vmul.f32 %v5802_v56, %v5802_v56 }
 0x13d   :  { %v763_v3 = vmax.f32 %v755_v18, 0.0  ;;  %v5776_v8 = vadd.f32 1e-05, %v764_v48 }
 0x13e   :  { %v5778_v1 = vadd.f32 1e-05, %v765_v58  ;;  %v721_v7 = vpop.xlane.xlu1 %720 }
 0x13f   :  { %v5782_v51 = vadd.f32 1e-05, %v763_v3  ;;  %v724_v33 = vpop.xlane.xlu2 %723  ;;  %4285 = vrsqrt.f32 %v5776_v8  ;;  %v743_v28 = vmul.f32 0.020408163, %v721_v7  ;;  %v1094_v7 = vsel %vm9796_vm11, %v5770_v40, 0.0 }
 0x140   :  { %v744_v4 = vmul.f32 0.020408163, %v724_v33  ;;  %v718_v19 = vpop.xlane.xlu0 %717  ;;  %4287 = vrsqrt.f32 %v5778_v1 }
 0x141   :  { %v742_v42 = vmul.f32 0.020408163, %v718_v19  ;;  %4289 = vrsqrt.f32 %v5782_v51  ;;  %v759_v2 = vsub.f32 %v743_v28, %v751_v13 }
 0x142   :  { %v760_v17 = vsub.f32 %v744_v4, %v752_v45 }
 0x143   :  { %v758_v0 = vsub.f32 %v742_v42, %v750_v22  ;;  %v767_v6 = vmax.f32 %v759_v2, 0.0  ;;  %1101 = vadd.xlane.f32.xlu1 %v1092_v62  ;;  %1103 = vadd.xlane.f32.xlu2 %v1093_v9 }
 0x144   :  { %v768_v26 = vmax.f32 %v760_v17, 0.0  ;;  %1099 = vadd.xlane.f32.xlu0 %v1091_v41  ;;  %v5850_v17 = vld [vmem:[%s9545_s0 + $0x100] sm:$0xff] }
 0x145   :  { %v766_v39 = vmax.f32 %v758_v0, 0.0  ;;  %v5804_v31 = vpop.eup %4285  ;;  %v5806_v30 = vadd.f32 1e-05, %v767_v6 }
 0x146   :  { %v5808_v5 = vadd.f32 1e-05, %v768_v26  ;;  %v5810_v43 = vpop.eup %4287  ;;  %v842_v47 = vmul.f32 %v5804_v31, %v5776_v8  ;;  %v730_v49 = vpop.xlane.xlu1 %729 }
 0x147   :  { %v5814_v12 = vadd.f32 1e-05, %v766_v39  ;;  %v5816_v34 = vpop.xlane.xlu2 %781  ;;  %v5824_v52 = vpop.eup %4289  ;;  %4291 = vrsqrt.f32 %v5806_v30  ;;  %v746_v63 = vmul.f32 0.020408163, %v730_v49  ;;  %v852_v48 = vmul.f32 %v5810_v43, %v5778_v1 }
 0x148   :  { %v727_v18 = vpop.xlane.xlu0 %726  ;;  %v832_v58 = vmul.f32 %v5824_v52, %v5782_v51  ;;  %4293 = vrsqrt.f32 %v5808_v5  ;;  %v843_v45 = vmul.f32 %v5804_v31, %v842_v47  ;;  %vm838_vm9 = vweird.f32 %v5824_v52 }
 0x149   :  { %v745_v3 = vmul.f32 0.020408163, %v727_v18  ;;  %4295 = vrsqrt.f32 %v5814_v12  ;;  %v762_v13 = vsub.f32 %v746_v63, %v754_v32  ;;  %v853_v22 = vmul.f32 %v5810_v43, %v852_v48 }
 0x14a   :  { %v833_v33 = vmul.f32 %v5824_v52, %v832_v58  ;;  %v844_v42 = vmul.f32 0.5, %v843_v45  ;;  %v1259_v18 = vsel %vm9794_vm12, %v5850_v17, 0.0  ;;  %vm837_vm12 = vweird.f32 %v5782_v51  ;;  %v5898_v51 = vld [vmem:[%s9545_s0 + $0x118] sm:$0xff] }
 0x14b   :  { %v761_v62 = vsub.f32 %v745_v3, %v753_v59  ;;  %v770_v28 = vmax.f32 %v762_v13, 0.0  ;;  %1107 = vadd.xlane.f32.xlu1 %v1095_v38  ;;  %1109 = vadd.xlane.f32.xlu2 %v1096_v11  ;;  %v1098_v59 = vsel %vm9804_vm0, %v5770_v40, 0.0  ;;  %v854_v63 = vmul.f32 0.5, %v853_v22  ;;  %vm5890_vm10 = vmor %vm837_vm12, %vm838_vm9 }
 0x14c   :  { %v834_v4 = vmul.f32 0.5, %v833_v33  ;;  %1105 = vadd.xlane.f32.xlu0 %v1094_v7  ;;  %v845_v49 = vsub.f32 1.5, %v844_v42  ;;  %v1097_v3 = vsel %vm9802_vm14, %v5770_v40, 0.0  ;;  %vm848_vm0 = vweird.f32 %v5804_v31 }
 0x14d   :  { %v769_v19 = vmax.f32 %v761_v62, 0.0  ;;  %v5843_v9 = vpop.eup %4291  ;;  %v5845_v2 = vadd.f32 1e-05, %v770_v28  ;;  %v5888_v62 = vld [vmem:[%s9545_s0 + $0x110] sm:$0xff]  ;;  %v855_v40 = vsub.f32 1.5, %v854_v63  ;;  %vm847_vm14 = vweird.f32 %v5776_v8 }
 0x14e   :  { %v5852_v41 = vpop.eup %4293  ;;  %v872_v0 = vmul.f32 %v5843_v9, %v5806_v30  ;;  %v835_v6 = vsub.f32 1.5, %v834_v4  ;;  %v5858_v39 = vpop.xlane.xlu1 %785  ;;  %v846_v7 = vmul.f32 %v5804_v31, %v845_v49  ;;  %vm5913_vm12 = vmor %vm847_vm14, %vm848_vm0  ;;  %vm9811_vm14 = vcmask 400384  }
 0x14f   :  { %v5856_v26 = vadd.f32 1e-05, %v769_v19  ;;  %v5860_v47 = vpop.xlane.xlu2 %787  ;;  %v5862_v38 = vpop.eup %4295  ;;  %4297 = vrsqrt.f32 %v5845_v2  ;;  %v882_v48 = vmul.f32 %v5852_v41, %v5808_v5  ;;  %v5903_v19 = vld [vmem:[%s9545_s0 + $0x108] sm:$0xff]  ;;  %vm9812_vm0 = vmmov %vm9811_vm14  ;;  %vm867_vm9 = vweird.f32 %v5814_v12 }
 0x150   :  { %v784_v11 = vpop.xlane.xlu0 %783  ;;  %v862_v32 = vmul.f32 %v5862_v38, %v5814_v12  ;;  %v836_v58 = vmul.f32 %v5824_v52, %v835_v6  ;;  %v873_v33 = vmul.f32 %v5843_v9, %v872_v0  ;;  %vm9817_vm13 = vweird.f32 %v5862_v38 }
 0x151   :  { %4299 = vrsqrt.f32 %v5856_v26  ;;  %v883_v0 = vmul.f32 %v5852_v41, %v882_v48  ;;  %v1265_v48 = vsel %vm9811_vm14, %v5888_v62, 0.0  ;;  %vm5970_vm11 = vmor %vm867_vm9, %vm9817_vm13  ;;  %vm877_vm14 = vweird.f32 %v5806_v30 }
 0x152   :  { %v863_v13 = vmul.f32 %v5862_v38, %v862_v32  ;;  %v874_v4 = vmul.f32 0.5, %v873_v33  ;;  %v840_v42 = vsel %vm5890_vm10, %v5824_v52, %v836_v58  ;;  %v850_v52 = vsel %vm5913_vm12, %v5804_v31, %v846_v7  ;;  %vm9813_vm10 = vmmov %vm9812_vm0 }
 0x153   :  { %1113 = vadd.xlane.f32.xlu1 %v1098_v59  ;;  %1260 = vadd.xlane.f32.xlu2 %v1259_v18  ;;  %v1262_v33 = vsel %vm9813_vm10, %v5903_v19, 0.0  ;;  %v856_v31 = vmul.f32 %v5810_v43, %v855_v40  ;;  %vm858_vm12 = vweird.f32 %v5810_v43  ;;  %v911_v45 = vmul.f32 %v840_v42, %v5816_v34  ;;  %v5951_v40 = vld [vmem:[%s9545_s0 + $0x130] sm:$0xff] }
 0x154   :  { %v864_v28 = vmul.f32 0.5, %v863_v13  ;;  %1111 = vadd.xlane.f32.xlu0 %v1097_v3  ;;  %v875_v18 = vsub.f32 1.5, %v874_v4  ;;  %v1268_v13 = vsel %vm9812_vm0, %v5898_v51, 0.0  ;;  %v884_v4 = vmul.f32 0.5, %v883_v0 }
 0x155   :  { %v5905_v22 = vpop.eup %4297  ;;  %vm9814_vm0 = vweird.f32 %v5778_v1  ;;  %v1274_v1 = vsel %vm9820_vm15, %v5946_v37, 0.0  ;;  %vm9823_vm13 = vweird.f32 %v5843_v9  ;;  %v919_v30 = vmul.f32 %v911_v45, %v5751_v21 }
 0x156   :  { %v902_v49 = vmul.f32 %v5905_v22, %v5845_v2  ;;  %v865_v59 = vsub.f32 1.5, %v864_v28  ;;  %v5925_v32 = vpop.xlane.xlu1 %791  ;;  %v912_v28 = vmul.f32 %v850_v52, %v784_v11  ;;  %v876_v11 = vmul.f32 %v5843_v9, %v875_v18  ;;  %vm5963_vm10 = vmor %vm9814_vm0, %vm858_vm12 }
 0x157   :  { %v5918_v6 = vpop.eup %4299  ;;  %v5927_v63 = vpop.xlane.xlu2 %793  ;;  %vm9821_vm12 = vmmov %vm9820_vm15  ;;  %v935_v57 = vmul.f32 %v4485_v27, %v911_v45  ;;  %vm888_vm15 = vweird.f32 %v5852_v41 }
 0x158   :  { %v892_v58 = vmul.f32 %v5918_v6, %v5856_v26  ;;  %v790_v3 = vpop.xlane.xlu0 %789  ;;  %v903_v7 = vmul.f32 %v5905_v22, %v902_v49  ;;  %v5956_v49 = vld [vmem:[%s9545_s0 + $0x120] sm:$0xff]  ;;  %v866_v34 = vmul.f32 %v5862_v38, %v865_v59  ;;  %v1277_v18 = vsel %vm9821_vm12, %v5951_v40, 0.0  ;;  %vm9822_vm0 = vmmov %vm9821_vm12 }
 0x159   :  { %v1271_v12 = vsel %vm9822_vm0, %v5956_v49, 0.0  ;;  %vm5986_vm9 = vmor %vm877_vm14, %vm9823_vm13  ;;  %vm898_vm14 = vweird.f32 %v5918_v6  ;;  %vm897_vm0 = vweird.f32 %v5856_v26  ;;  %vm9828_vm13 = vcmask 400384  }
 0x15a   :  { %v893_v8 = vmul.f32 %v5918_v6, %v892_v58  ;;  %v904_v42 = vmul.f32 0.5, %v903_v7  ;;  %v860_v58 = vsel %vm5963_vm10, %v5810_v43, %v856_v31  ;;  %v870_v7 = vsel %vm5970_vm11, %v5862_v38, %v866_v34  ;;  %vm9831_vm6 = vmmov %vm9828_vm13 }
 0x15b   :  { %1266 = vadd.xlane.f32.xlu1 %v1265_v48  ;;  %1269 = vadd.xlane.f32.xlu2 %v1268_v13  ;;  %v885_v48 = vsub.f32 1.5, %v884_v4  ;;  %v880_v43 = vsel %vm5986_vm9, %v5843_v9, %v876_v11  ;;  %vm887_vm11 = vweird.f32 %v5808_v5  ;;  %v914_v9 = vmul.f32 %v870_v7, %v5860_v47  ;;  %vm6022_vm9 = vmor %vm897_vm0, %vm898_vm14  ;;  %v4487_v47 = vld [vmem:[%s9545_s0 + $0x90] sm:$0xff] }
 0x15c   :  { %v894_v52 = vmul.f32 0.5, %v893_v8  ;;  %1263 = vadd.xlane.f32.xlu0 %v1262_v33  ;;  %v920_v33 = vmul.f32 %v912_v28, %v5747_v60  ;;  %v905_v0 = vsub.f32 1.5, %v904_v42  ;;  %v4486_v60 = vld [vmem:[%s9545_s0 + $0x88] sm:$0xff]  ;;  %v915_v11 = vmul.f32 %v880_v43, %v790_v3  ;;  %vm6013_vm12 = vmor %vm887_vm11, %vm888_vm15 }
 0x15d   :  { %v936_v21 = vmul.f32 %v4486_v60, %v912_v28  ;;  %v886_v42 = vmul.f32 %v5852_v41, %v885_v48  ;;  %vm908_vm10 = vweird.f32 %v5905_v22  ;;  %vm907_vm11 = vweird.f32 %v5845_v2  ;;  %vm9834_vm14 = vmmov %vm9831_vm6 }
 0x15e   :  { %v895_v8 = vsub.f32 1.5, %v894_v52  ;;  %v808_v31 = vpop.xlane.xlu1 %807  ;;  %v913_v52 = vmul.f32 %v860_v58, %v5858_v39  ;;  %v906_v13 = vmul.f32 %v5905_v22, %v905_v0  ;;  %v1283_v5 = vmul.f32 %v5850_v17, %v5850_v17  ;;  %vm6038_vm15 = vmor %vm907_vm11, %vm908_vm10  ;;  %v1258_v17 = vld [vmem:[%s9545_s0 + $0x138] sm:$0xff] }
 0x15f   :  { %v810_v4 = vpop.xlane.xlu2 %809  ;;  %v927_v59 = vsub.f32 %v808_v31, %v919_v30  ;;  %v1284_v26 = vmul.f32 %v5903_v19, %v5903_v19  ;;  %v923_v2 = vmul.f32 %v915_v11, %v5765_v14  ;;  %v890_v19 = vsel %vm6013_vm12, %v5852_v41, %v886_v42  ;;  %v4488_v30 = vld [vmem:[%s9545_s0 + $0x98] sm:$0xff]  ;;  %v4489_v41 = vld [vmem:[%s9545_s0 + $0xa0] sm:$0xff]  ;;  %vm9835_vm10 = vmmov %vm9831_vm6 }
 0x160   :  { %v928_v38 = vsub.f32 %v810_v4, %v920_v33  ;;  %v796_v34 = vpop.xlane.xlu0 %795  ;;  %v896_v28 = vmul.f32 %v5918_v6, %v895_v8  ;;  %v937_v3 = vmul.f32 %v4487_v47, %v913_v52  ;;  %v910_v58 = vsel %vm6038_vm15, %v5905_v22, %v906_v13  ;;  %vm9836_vm12 = vmmov %vm9831_vm6 }
 0x161   :  { %v943_v27 = vadd.f32 %v935_v57, %v927_v59  ;;  %v921_v14 = vmul.f32 %v913_v52, %v5749_v24  ;;  %v938_v33 = vmul.f32 %v4488_v30, %v914_v9  ;;  %v939_v7 = vmul.f32 %v4489_v41, %v915_v11  ;;  %vm9837_vm0 = vmmov %vm9831_vm6 }
 0x162   :  { %v944_v45 = vadd.f32 %v936_v21, %v928_v38  ;;  %v1291_v22 = vsel %vm9831_vm6, %v1283_v5, 0.0  ;;  %v1294_v4 = vsel %vm9834_vm14, %v1284_v26, 0.0  ;;  %v1280_v24 = vsel %vm9835_vm10, %v1258_v17, 0.0  ;;  %vm9840_vm11 = vmmov %vm9837_vm0 }
 0x163   :  { %951 = vst.msk [vmem:[%s9547_s14 + $0x80] sm:$0xff] %vm9828_vm13, %v943_v27  ;;  %1275 = vadd.xlane.f32.xlu1 %v1274_v1  ;;  %1278 = vadd.xlane.f32.xlu2 %v1277_v18  ;;  %v922_v18 = vmul.f32 %v914_v9, %v5774_v50  ;;  %v918_v60 = vmul.f32 %v910_v58, %v796_v34  ;;  %vm9838_vm13 = vmmov %vm9837_vm0 }
 0x164   :  { %952 = vst.msk [vmem:[%s9547_s14 + $0x88] sm:$0xff] %vm9831_vm6, %v944_v45  ;;  %1272 = vadd.xlane.f32.xlu0 %v1271_v12  ;;  %v900_v12 = vsel %vm6022_vm9, %v5918_v6, %v896_v28  ;;  %v916_v38 = vmul.f32 %v890_v19, %v5925_v32  ;;  %v1287_v32 = vmul.f32 %v5956_v49, %v5956_v49  ;;  %v4491_v28 = vld [vmem:[%s9545_s0 + $0xb8] sm:$0xff]  ;;  %vm9839_vm9 = vmmov %vm9837_vm0 }
 0x165   :  { %v917_v0 = vmul.f32 %v900_v12, %v5927_v63  ;;  %v1286_v63 = vmul.f32 %v5898_v51, %v5898_v51  ;;  %v926_v9 = vmul.f32 %v918_v60, %v5802_v56  ;;  %v1285_v11 = vmul.f32 %v5888_v62, %v5888_v62  ;;  %v4490_v51 = vld [vmem:[%s9545_s0 + $0xb0] sm:$0xff]  ;;  %v4492_v62 = vld [vmem:[%s9545_s0 + $0xa8] sm:$0xff]  ;;  %vm9841_vm15 = vmmov %vm9837_vm0 }
 0x166   :  { %v814_v48 = vpop.xlane.xlu1 %813  ;;  %v924_v42 = vmul.f32 %v916_v38, %v5772_v54  ;;  %v942_v13 = vmul.f32 %v4491_v28, %v918_v60  ;;  %v940_v57 = vmul.f32 %v4492_v62, %v916_v38  ;;  %v1303_v26 = vsel %vm9840_vm11, %v1287_v32, 0.0  ;;  %vm9842_vm6 = vmmov %vm9837_vm0 }
 0x167   :  { %v816_v50 = vpop.xlane.xlu2 %815  ;;  %v930_v8 = vsub.f32 %v814_v48, %v922_v18  ;;  %v925_v34 = vmul.f32 %v917_v0, %v5800_v20  ;;  %v941_v49 = vmul.f32 %v4490_v51, %v917_v0  ;;  %v1300_v54 = vsel %vm9839_vm9, %v1286_v63, 0.0  ;;  %vm9843_vm14 = vmmov %vm9837_vm0 }
 0x168   :  { %v931_v6 = vsub.f32 %v816_v50, %v923_v2  ;;  %v812_v43 = vpop.xlane.xlu0 %811  ;;  %v1297_v1 = vsel %vm9841_vm15, %v1285_v11, 0.0  ;;  %v1289_v2 = vmul.f32 %v5951_v40, %v5951_v40  ;;  %v1290_v19 = vmul.f32 %v1258_v17, %v1258_v17  ;;  %vm9844_vm10 = vmmov %vm9837_vm0  ;;  %v4221_v40 = vld [vmem:[%s9546_s13 + $0x2] ss:$0 sm:$0xff] }
 0x169   :  { %v929_v31 = vsub.f32 %v812_v43, %v921_v14  ;;  %v946_v21 = vadd.f32 %v938_v33, %v930_v8  ;;  %v1288_v12 = vmul.f32 %v5946_v37, %v5946_v37  ;;  %v1358_v37 = vsel %vm4751_vm2, %v4221_v40, 0.0  ;;  %vm9848_vm15 = vmmov %vm9837_vm0 }
 0x16a   :  { %v947_v59 = vadd.f32 %v939_v7, %v931_v6  ;;  %v1312_v30 = vsel %vm9837_vm0, %v1290_v19, 0.0  ;;  %v1359_v8 = vsel %vm4785_vm5, %v4221_v40, 0.0  ;;  %v1357_v6 = vsel %vm4745_vm1, %v4221_v40, 0.0 }
 0x16b   :  { %v945_v52 = vadd.f32 %v937_v3, %v929_v31  ;;  %954 = vst.msk [vmem:[%s9547_s14 + $0x98] sm:$0xff] %vm9836_vm12, %v946_v21  ;;  %1292 = vadd.xlane.f32.xlu1 %v1291_v22  ;;  %1295 = vadd.xlane.f32.xlu2 %v1294_v4  ;;  %vm9845_vm12 = vmmov %vm9837_vm0  ;;  %v1361_v60 = vsel %vm4779_vm4, %v4221_v40, 0.0  ;;  %v1362_v21 = vsel %vm4818_vm8, %v4221_v40, 0.0  ;;  %v1360_v38 = vsel %vm4773_vm3, %v4221_v40, 0.0 }
 0x16c   :  { %955 = vst.msk [vmem:[%s9547_s14 + $0xa0] sm:$0xff] %vm9837_vm0, %v947_v59  ;;  %1281 = vadd.xlane.f32.xlu0 %v1280_v24  ;;  %v1309_v14 = vsel %vm9845_vm12, %v1289_v2, 0.0  ;;  %vm9847_vm9 = vnez %v9680_v53  ;;  %v7141_v53 = vld [vmem:[%s9545_s0 + $0x1f0] sm:$0xff] }
 0x16d   :  { %953 = vst.msk [vmem:[%s9547_s14 + $0x90] sm:$0xff] %vm9838_vm13, %v945_v52  ;;  %vm9846_vm13 = vmmov %vm9837_vm0 }
 0x16e   :  { %v820_v27 = vpop.xlane.xlu1 %819  ;;  %v1306_v33 = vsel %vm9846_vm13, %v1288_v12, 0.0 }
 0x16f   :  { %v822_v45 = vpop.xlane.xlu2 %821  ;;  %v933_v20 = vsub.f32 %v820_v27, %v925_v34 }
 0x170   :  { %v934_v39 = vsub.f32 %v822_v45, %v926_v9  ;;  %v818_v56 = vpop.xlane.xlu0 %817  ;;  %v6150_v9 = vld [vmem:[%s9546_s13 + $0x9] ss:$0 sm:$0xff] }
 0x171   :  { %v932_v5 = vsub.f32 %v818_v56, %v924_v42  ;;  %v949_v47 = vadd.f32 %v941_v49, %v933_v20  ;;  %v1364_v56 = vsel %vm4812_vm7, %v4221_v40, 0.0  ;;  %v1383_v62 = vsel %vm4745_vm1, %v6150_v9, 0.0 }
 0x172   :  { %v950_v3 = vadd.f32 %v942_v13, %v934_v39 }
 0x173   :  { %v948_v18 = vadd.f32 %v940_v57, %v932_v5  ;;  %957 = vst.msk [vmem:[%s9547_s14 + $0xb0] sm:$0xff] %vm9842_vm6, %v949_v47  ;;  %1301 = vadd.xlane.f32.xlu1 %v1300_v54  ;;  %1304 = vadd.xlane.f32.xlu2 %v1303_v26  ;;  %v1363_v54 = vsel %vm9847_vm9, %v4221_v40, 0.0  ;;  %v1385_v40 = vsel %vm4785_vm5, %v6150_v9, 0.0  ;;  %vm9849_vm6 = vmmov %vm9837_vm0 }
 0x174   :  { %958 = vst.msk [vmem:[%s9547_s14 + $0xb8] sm:$0xff] %vm9843_vm14, %v950_v3  ;;  %1298 = vadd.xlane.f32.xlu0 %v1297_v1 }
 0x175   :  { %956 = vst.msk [vmem:[%s9547_s14 + $0xa8] sm:$0xff] %vm9844_vm10, %v948_v18 }
 0x176   :  { %v972_v58 = vpop.xlane.xlu1 %971 }
 0x177   :  { %v975_v48 = vpop.xlane.xlu2 %974  ;;  %v6145_v34 = vmul.f32 0.020408163, %v972_v58 }
 0x178   :  { %v969_v50 = vpop.xlane.xlu0 %968  ;;  %v6141_v52 = vmul.f32 0.020408163, %v975_v48 }
 0x179   :  { %v6129_v43 = vmul.f32 0.020408163, %v969_v50  ;;  %v1040_v20 = vmul.f32 %v6145_v34, %v6145_v34 }
 0x17a   :  { %v1041_v27 = vmul.f32 %v6141_v52, %v6141_v52 }
 0x17b   :  { %1310 = vadd.xlane.f32.xlu1 %v1309_v14  ;;  %1313 = vadd.xlane.f32.xlu2 %v1312_v30  ;;  %v1039_v4 = vmul.f32 %v6129_v43, %v6129_v43 }
 0x17c   :  { %1307 = vadd.xlane.f32.xlu0 %v1306_v33 }
 0x17e   :  { %v981_v17 = vpop.xlane.xlu1 %980 }
 0x17f   :  { %v984_v41 = vpop.xlane.xlu2 %983  ;;  %v6172_v2 = vmul.f32 0.020408163, %v981_v17  ;;  %v1386_v17 = vsel %vm4773_vm3, %v6150_v9, 0.0 }
 0x180   :  { %v978_v7 = vpop.xlane.xlu0 %977  ;;  %v6168_v26 = vmul.f32 0.020408163, %v984_v41 }
 0x181   :  { %v6143_v63 = vmul.f32 0.020408163, %v978_v7 }
 0x182   :  { %v1044_v50 = vmul.f32 %v6168_v26, %v6168_v26 }
 0x183   :  { %1367 = vadd.xlane.f32.xlu1 %v1358_v37  ;;  %1369 = vadd.xlane.f32.xlu2 %v1359_v8  ;;  %v1042_v51 = vmul.f32 %v6143_v63, %v6143_v63 }
 0x184   :  { %1365 = vadd.xlane.f32.xlu0 %v1357_v6  ;;  %v1043_v6 = vmul.f32 %v6172_v2, %v6172_v2 }
 0x186   :  { %v6131_v31 = vpop.xlane.xlu1 %989 }
 0x187   :  { %v1001_v22 = vpop.xlane.xlu2 %1000 }
 0x188   :  { %v1031_v24 = vmul.f32 0.020408163, %v1001_v22  ;;  %v987_v0 = vpop.xlane.xlu0 %986 }
 0x189   :  { %v6170_v3 = vmul.f32 0.020408163, %v987_v0 }
 0x18a   :  { %v1047_v59 = vsub.f32 %v1031_v24, %v1039_v4 }
 0x18b   :  { %1373 = vadd.xlane.f32.xlu1 %v1361_v60  ;;  %1375 = vadd.xlane.f32.xlu2 %v1362_v21  ;;  %v1045_v41 = vmul.f32 %v6170_v3, %v6170_v3  ;;  %v1384_v60 = vsel %vm4751_vm2, %v6150_v9, 0.0 }
 0x18c   :  { %v1055_v32 = vmax.f32 %v1047_v59, 0.0  ;;  %1371 = vadd.xlane.f32.xlu0 %v1360_v38 }
 0x18e   :  { %v6152_v11 = vadd.f32 1e-05, %v1055_v32  ;;  %v1007_v45 = vpop.xlane.xlu1 %1006 }
 0x18f   :  { %v1010_v42 = vpop.xlane.xlu2 %1009  ;;  %v1033_v49 = vmul.f32 0.020408163, %v1007_v45 }
 0x190   :  { %4301 = vrsqrt.f32 %v6152_v11  ;;  %v1034_v28 = vmul.f32 0.020408163, %v1010_v42  ;;  %v1004_v13 = vpop.xlane.xlu0 %1003  ;;  %v6206_v42 = vmul.f32 0.020408163, %v6131_v31  ;;  %vm1129_vm11 = vweird.f32 %v6152_v11 }
 0x191   :  { %v1032_v39 = vmul.f32 0.020408163, %v1004_v13  ;;  %v1049_v57 = vsub.f32 %v1033_v49, %v1041_v27 }
 0x192   :  { %v1050_v5 = vsub.f32 %v1034_v28, %v1042_v51 }
 0x193   :  { %v1048_v47 = vsub.f32 %v1032_v39, %v1040_v20  ;;  %v1057_v1 = vmax.f32 %v1049_v57, 0.0  ;;  %1379 = vadd.xlane.f32.xlu1 %v1364_v56  ;;  %1391 = vadd.xlane.f32.xlu2 %v1383_v62  ;;  %v1388_v57 = vsel %vm4818_vm8, %v6150_v9, 0.0 }
 0x194   :  { %v1058_v18 = vmax.f32 %v1050_v5, 0.0  ;;  %1377 = vadd.xlane.f32.xlu0 %v1363_v54  ;;  %v1389_v5 = vsel %vm9847_vm9, %v6150_v9, 0.0 }
 0x195   :  { %v1056_v19 = vmax.f32 %v1048_v47, 0.0  ;;  %v6176_v58 = vadd.f32 1e-05, %v1057_v1  ;;  %v1387_v1 = vsel %vm4779_vm4, %v6150_v9, 0.0 }
 0x196   :  { %v6174_v12 = vpop.eup %4301  ;;  %v6178_v48 = vadd.f32 1e-05, %v1058_v18  ;;  %v1016_v30 = vpop.xlane.xlu1 %1015  ;;  %v1046_v18 = vmul.f32 %v6206_v42, %v6206_v42 }
 0x197   :  { %v6182_v14 = vadd.f32 1e-05, %v1056_v19  ;;  %v1019_v33 = vpop.xlane.xlu2 %1018  ;;  %4303 = vrsqrt.f32 %v6176_v58  ;;  %v1036_v7 = vmul.f32 0.020408163, %v1016_v30  ;;  %v1124_v22 = vmul.f32 %v6174_v12, %v6152_v11 }
 0x198   :  { %v1037_v37 = vmul.f32 0.020408163, %v1019_v33  ;;  %v1013_v8 = vpop.xlane.xlu0 %1012  ;;  %4305 = vrsqrt.f32 %v6178_v48  ;;  %vm1130_vm14 = vweird.f32 %v6174_v12  ;;  %vm1149_vm13 = vweird.f32 %v6176_v58 }
 0x199   :  { %v1035_v4 = vmul.f32 0.020408163, %v1013_v8  ;;  %4307 = vrsqrt.f32 %v6182_v14  ;;  %v1052_v24 = vsub.f32 %v1036_v7, %v1044_v50  ;;  %v1125_v27 = vmul.f32 %v6174_v12, %v1124_v22  ;;  %v6252_v8 = vld [vmem:[%s9545_s0 + $0x148] sm:$0xff]  ;;  %vm6291_vm0 = vmor %vm1129_vm11, %vm1130_vm14 }
 0x19a   :  { %v1053_v0 = vsub.f32 %v1037_v37, %v1045_v41  ;;  %v6247_v37 = vld [vmem:[%s9545_s0 + $0x140] sm:$0xff]  ;;  %vm1159_vm14 = vweird.f32 %v6178_v48 }
 0x19b   :  { %v1051_v21 = vsub.f32 %v1035_v4, %v1043_v6  ;;  %v1060_v59 = vmax.f32 %v1052_v24, 0.0  ;;  %1395 = vadd.xlane.f32.xlu1 %v1385_v40  ;;  %1397 = vadd.xlane.f32.xlu2 %v1386_v17  ;;  %v1126_v47 = vmul.f32 0.5, %v1125_v27 }
 0x19c   :  { %v1061_v38 = vmax.f32 %v1053_v0, 0.0  ;;  %1393 = vadd.xlane.f32.xlu0 %v1384_v60 }
 0x19d   :  { %v1059_v32 = vmax.f32 %v1051_v21, 0.0  ;;  %v6203_v45 = vpop.eup %4303  ;;  %v6208_v51 = vadd.f32 1e-05, %v1060_v59  ;;  %v1127_v17 = vsub.f32 1.5, %v1126_v47  ;;  %v1390_v47 = vsel %vm4812_vm7, %v6150_v9, 0.0 }
 0x19e   :  { %v6210_v49 = vadd.f32 1e-05, %v1061_v38  ;;  %v6212_v28 = vpop.eup %4305  ;;  %v1144_v13 = vmul.f32 %v6203_v45, %v6176_v58  ;;  %v6218_v39 = vpop.xlane.xlu1 %1073  ;;  %vm1150_vm12 = vweird.f32 %v6203_v45  ;;  %v6310_v58 = vld [vmem:[%s9545_s0 + $0x160] sm:$0xff] }
 0x19f   :  { %v6216_v20 = vadd.f32 1e-05, %v1059_v32  ;;  %v6220_v56 = vpop.xlane.xlu2 %1075  ;;  %v6222_v62 = vpop.eup %4307  ;;  %4309 = vrsqrt.f32 %v6208_v51  ;;  %v1154_v19 = vmul.f32 %v6212_v28, %v6178_v48 }
 0x1a0   :  { %v1022_v31 = vpop.xlane.xlu0 %1021  ;;  %v1134_v54 = vmul.f32 %v6222_v62, %v6182_v14  ;;  %4311 = vrsqrt.f32 %v6210_v49  ;;  %v1145_v33 = vmul.f32 %v6203_v45, %v1144_v13  ;;  %vm1140_vm10 = vweird.f32 %v6222_v62 }
 0x1a1   :  { %4313 = vrsqrt.f32 %v6216_v20  ;;  %v1038_v50 = vmul.f32 0.020408163, %v1022_v31  ;;  %v1155_v4 = vmul.f32 %v6212_v28, %v1154_v19  ;;  %v1551_v31 = vsel %vm9848_vm15, %v6247_v37, 0.0 }
 0x1a2   :  { %v1135_v30 = vmul.f32 %v6222_v62, %v1134_v54  ;;  %v1146_v7 = vmul.f32 0.5, %v1145_v33  ;;  %v1128_v54 = vmul.f32 %v6174_v12, %v1127_v17  ;;  %vm1139_vm15 = vweird.f32 %v6182_v14 }
 0x1a3   :  { %v1054_v40 = vsub.f32 %v1038_v50, %v1046_v18  ;;  %1401 = vadd.xlane.f32.xlu1 %v1388_v57  ;;  %1403 = vadd.xlane.f32.xlu2 %v1389_v5  ;;  %v1554_v57 = vsel %vm9849_vm6, %v6252_v8, 0.0  ;;  %vm6303_vm6 = vmor %vm1149_vm13, %vm1150_vm12  ;;  %vm1160_vm13 = vweird.f32 %v6212_v28 }
 0x1a4   :  { %v1136_v41 = vmul.f32 0.5, %v1135_v30  ;;  %1399 = vadd.xlane.f32.xlu0 %v1387_v1  ;;  %v1147_v59 = vsub.f32 1.5, %v1146_v7  ;;  %v1156_v1 = vmul.f32 0.5, %v1155_v4  ;;  %v1132_v14 = vsel %vm6291_vm0, %v6174_v12, %v1128_v54  ;;  %vm6322_vm11 = vmor %vm1139_vm15, %vm1140_vm10  ;;  %v4493_v7 = vld [vmem:[%s9545_s0 + $0xc0] sm:$0xff] }
 0x1a5   :  { %v6254_v6 = vpop.eup %4309  ;;  %v1062_v22 = vmax.f32 %v1054_v40, 0.0  ;;  %v6300_v40 = vld [vmem:[%s9545_s0 + $0x158] sm:$0xff]  ;;  %vm9856_vm10 = vcmask 400384  }
 0x1a6   :  { %v6257_v24 = vpop.eup %4311  ;;  %v1137_v0 = vsub.f32 1.5, %v1136_v41  ;;  %v6260_v60 = vpop.xlane.xlu1 %1079  ;;  %v1174_v32 = vmul.f32 %v6254_v6, %v6208_v51  ;;  %v1148_v30 = vmul.f32 %v6203_v45, %v1147_v59  ;;  %v6315_v41 = vld [vmem:[%s9545_s0 + $0x150] sm:$0xff]  ;;  %vm9857_vm12 = vmmov %vm9856_vm10  ;;  %vm1180_vm15 = vweird.f32 %v6254_v6 }
 0x1a7   :  { %v6262_v21 = vpop.xlane.xlu2 %1081  ;;  %v6264_v38 = vpop.eup %4313  ;;  %v6268_v27 = vadd.f32 1e-05, %v1062_v22  ;;  %v1184_v18 = vmul.f32 %v6257_v24, %v6210_v49  ;;  %v1157_v22 = vsub.f32 1.5, %v1156_v1  ;;  %v1560_v1 = vsel %vm9856_vm10, %v6300_v40, 0.0  ;;  %vm9858_vm0 = vmmov %vm9856_vm10 }
 0x1a8   :  { %v1078_v13 = vpop.xlane.xlu0 %1077  ;;  %v1164_v5 = vmul.f32 %v6264_v38, %v6216_v20  ;;  %v1138_v19 = vmul.f32 %v6222_v62, %v1137_v0  ;;  %v1175_v33 = vmul.f32 %v6254_v6, %v1174_v32  ;;  %v1152_v32 = vsel %vm6303_vm6, %v6203_v45, %v1148_v30 }
 0x1a9   :  { %4315 = vrsqrt.f32 %v6268_v27  ;;  %v1203_v45 = vmul.f32 %v1132_v14, %v6218_v39  ;;  %v1158_v30 = vmul.f32 %v6212_v28, %v1157_v22  ;;  %vm1170_vm6 = vweird.f32 %v6264_v38 }
 0x1aa   :  { %v1165_v50 = vmul.f32 %v6264_v38, %v1164_v5  ;;  %v1176_v4 = vmul.f32 0.5, %v1175_v33  ;;  %v1142_v0 = vsel %vm6322_vm11, %v6222_v62, %v1138_v19  ;;  %v1563_v62 = vsel %vm9857_vm12, %v6310_v58, 0.0  ;;  %v6357_v33 = vld [vmem:[%s9545_s0 + $0x170] sm:$0xff]  ;;  %vm6369_vm11 = vmor %vm1159_vm14, %vm1160_vm13 }
 0x1ab   :  { %1552 = vadd.xlane.f32.xlu1 %v1551_v31  ;;  %1555 = vadd.xlane.f32.xlu2 %v1554_v57  ;;  %v1185_v31 = vmul.f32 %v6257_v24, %v1184_v18  ;;  %v1557_v19 = vsel %vm9858_vm0, %v6315_v41, 0.0  ;;  %v1205_v9 = vmul.f32 %v1152_v32, %v1078_v13  ;;  %vm1169_vm10 = vweird.f32 %v6216_v20 }
 0x1ac   :  { %v1166_v17 = vmul.f32 0.5, %v1165_v50  ;;  %1405 = vadd.xlane.f32.xlu0 %v1390_v47  ;;  %v1177_v54 = vsub.f32 1.5, %v1176_v4  ;;  %v1204_v50 = vmul.f32 %v1142_v0, %v6220_v56  ;;  %v6365_v56 = vld [vmem:[%s9545_s0 + $0x178] sm:$0xff]  ;;  %vm1179_vm12 = vweird.f32 %v6208_v51  ;;  %vm6392_vm13 = vmor %vm1169_vm10, %vm1170_vm6 }
 0x1ad   :  { %v1227_v22 = vmul.f32 %v4493_v7, %v1203_v45  ;;  %vm6380_vm0 = vmor %vm1179_vm12, %vm1180_vm15  ;;  %v1211_v0 = vmul.f32 %v1203_v45, %v6129_v43  ;;  %vm9863_vm14 = vcmask 400384   ;;  %v1162_v20 = vsel %vm6369_vm11, %v6212_v28, %v1158_v30  ;;  %v4494_v45 = vld [vmem:[%s9545_s0 + $0xc8] sm:$0xff]  ;;  %v4495_v30 = vld [vmem:[%s9545_s0 + $0xd0] sm:$0xff] }
 0x1ae   :  { %v1167_v59 = vsub.f32 1.5, %v1166_v17  ;;  %v6333_v12 = vpop.xlane.xlu1 %1085  ;;  %v1186_v17 = vmul.f32 0.5, %v1185_v31  ;;  %v1178_v14 = vmul.f32 %v6254_v6, %v1177_v54  ;;  %v1569_v51 = vsel %vm9863_vm14, %v6357_v33, 0.0  ;;  %vm9866_vm15 = vmmov %vm9863_vm14  ;;  %v6403_v54 = vld [vmem:[%s9545_s0 + $0x168] sm:$0xff] }
 0x1af   :  { %v6336_v57 = vpop.xlane.xlu2 %1087  ;;  %v6338_v5 = vpop.eup %4315  ;;  %v1212_v32 = vmul.f32 %v1204_v50, %v6145_v34  ;;  %v1213_v31 = vmul.f32 %v1205_v9, %v6141_v52  ;;  %v1572_v43 = vsel %vm9866_vm15, %v6365_v56, 0.0  ;;  %vm1190_vm6 = vweird.f32 %v6257_v24  ;;  %vm9867_vm11 = vmmov %vm9863_vm14 }
 0x1b0   :  { %v1084_v47 = vpop.xlane.xlu0 %1083  ;;  %v1194_v18 = vmul.f32 %v6338_v5, %v6268_v27  ;;  %v1168_v39 = vmul.f32 %v6264_v38, %v1167_v59  ;;  %v1182_v34 = vsel %vm6380_vm0, %v6254_v6, %v1178_v14  ;;  %v1566_v14 = vsel %vm9867_vm11, %v6403_v54, 0.0  ;;  %vm9868_vm0 = vmmov %vm9867_vm11 }
 0x1b1   :  { %vm1200_vm10 = vweird.f32 %v6338_v5  ;;  %vm1189_vm12 = vweird.f32 %v6210_v49  ;;  %vm9871_vm15 = vmmov %vm9868_vm0  ;;  %v1576_v49 = vmul.f32 %v6252_v8, %v6252_v8 }
 0x1b2   :  { %v1195_v11 = vmul.f32 %v6338_v5, %v1194_v18  ;;  %v1172_v28 = vsel %vm6392_vm13, %v6264_v38, %v1168_v39  ;;  %v1228_v18 = vmul.f32 %v4494_v45, %v1204_v50  ;;  %vm6432_vm14 = vmor %vm1189_vm12, %vm1190_vm6  ;;  %vm1199_vm13 = vweird.f32 %v6268_v27 }
 0x1b3   :  { %1561 = vadd.xlane.f32.xlu1 %v1560_v1  ;;  %1564 = vadd.xlane.f32.xlu2 %v1563_v62  ;;  %v1187_v1 = vsub.f32 1.5, %v1186_v17  ;;  %v1206_v17 = vmul.f32 %v1162_v20, %v6260_v60  ;;  %v1207_v7 = vmul.f32 %v1172_v28, %v6262_v21  ;;  %v1577_v21 = vmul.f32 %v6315_v41, %v6315_v41  ;;  %vm6445_vm11 = vmor %vm1199_vm13, %vm1200_vm10 }
 0x1b4   :  { %v1196_v4 = vmul.f32 0.5, %v1195_v11  ;;  %1558 = vadd.xlane.f32.xlu0 %v1557_v19  ;;  %v1229_v11 = vmul.f32 %v4495_v30, %v1205_v9  ;;  %vm9874_vm6 = vmmov %vm9868_vm0  ;;  %v1582_v60 = vmul.f32 %v6365_v56, %v6365_v56 }
 0x1b5   :  { %v1188_v59 = vmul.f32 %v6257_v24, %v1187_v1  ;;  %v1215_v27 = vmul.f32 %v1207_v7, %v6172_v2  ;;  %v4496_v2 = vld [vmem:[%s9545_s0 + $0xe0] sm:$0xff]  ;;  %vm9875_vm10 = vmmov %vm9868_vm0 }
 0x1b6   :  { %v1197_v62 = vsub.f32 1.5, %v1196_v4  ;;  %v1102_v19 = vpop.xlane.xlu1 %1101  ;;  %v1208_v4 = vmul.f32 %v1182_v34, %v1084_v47  ;;  %vm9876_vm12 = vmmov %vm9868_vm0 }
 0x1b7   :  { %v1104_v52 = vpop.xlane.xlu2 %1103  ;;  %v1220_v13 = vsub.f32 %v1102_v19, %v1212_v32  ;;  %v1192_v8 = vsel %vm6432_vm14, %v6257_v24, %v1188_v59  ;;  %v1589_v19 = vsel %vm9876_vm12, %v1577_v21, 0.0  ;;  %vm9877_vm14 = vmmov %vm9868_vm0  ;;  %v1581_v21 = vmul.f32 %v6357_v33, %v6357_v33 }
 0x1b8   :  { %v1221_v38 = vsub.f32 %v1104_v52, %v1213_v31  ;;  %v1100_v39 = vpop.xlane.xlu0 %1099  ;;  %v1198_v9 = vmul.f32 %v6338_v5, %v1197_v62  ;;  %v1214_v31 = vmul.f32 %v1206_v17, %v6143_v63  ;;  %v1586_v63 = vsel %vm9875_vm10, %v1576_v49, 0.0  ;;  %vm9878_vm13 = vmmov %vm9868_vm0  ;;  %v6520_v49 = vld [vmem:[%s9546_s13 + $0x2] ss:$0 sm:$0xff] }
 0x1b9   :  { %v1219_v6 = vsub.f32 %v1100_v39, %v1211_v0  ;;  %v1236_v50 = vadd.f32 %v1228_v18, %v1220_v13  ;;  %v1575_v0 = vmul.f32 %v6247_v37, %v6247_v37  ;;  %v4497_v37 = vld [vmem:[%s9545_s0 + $0xe8] sm:$0xff]  ;;  %v1578_v39 = vmul.f32 %v6300_v40, %v6300_v40  ;;  %vm9882_vm10 = vmmov %vm9868_vm0 }
 0x1ba   :  { %v1237_v48 = vadd.f32 %v1229_v11, %v1221_v38  ;;  %v1202_v41 = vsel %vm6445_vm11, %v6338_v5, %v1198_v9  ;;  %v4498_v5 = vld [vmem:[%s9545_s0 + $0xd8] sm:$0xff]  ;;  %v1209_v11 = vmul.f32 %v1192_v8, %v6333_v12  ;;  %v1580_v12 = vmul.f32 %v6403_v54, %v6403_v54  ;;  %vm9880_vm11 = vmmov %vm9868_vm0 }
 0x1bb   :  { %v1235_v32 = vadd.f32 %v1227_v22, %v1219_v6  ;;  %1244 = vst.msk [vmem:[%s9547_s14 + $0xc8] sm:$0xff] %vm9868_vm0, %v1236_v50  ;;  %1570 = vadd.xlane.f32.xlu1 %v1569_v51  ;;  %1573 = vadd.xlane.f32.xlu2 %v1572_v43  ;;  %v1216_v22 = vmul.f32 %v1208_v4, %v6168_v26  ;;  %v1583_v30 = vsel %vm9868_vm0, %v1575_v0, 0.0  ;;  %v4500_v50 = vld [vmem:[%s9545_s0 + $0xf0] sm:$0xff]  ;;  %vm9883_vm12 = vmmov %vm9868_vm0 }
 0x1bc   :  { %1245 = vst.msk [vmem:[%s9547_s14 + $0xd0] sm:$0xff] %vm9871_vm15, %v1237_v48  ;;  %1567 = vadd.xlane.f32.xlu0 %v1566_v14  ;;  %v1231_v26 = vmul.f32 %v4496_v2, %v1207_v7  ;;  %v1232_v43 = vmul.f32 %v4497_v37, %v1208_v4  ;;  %v1230_v62 = vmul.f32 %v4498_v5, %v1206_v17  ;;  %vm9879_vm15 = vmmov %vm9868_vm0 }
 0x1bd   :  { %1243 = vst.msk [vmem:[%s9547_s14 + $0xc0] sm:$0xff] %vm9874_vm6, %v1235_v32  ;;  %v1210_v52 = vmul.f32 %v1202_v41, %v6336_v57  ;;  %v1579_v57 = vmul.f32 %v6310_v58, %v6310_v58  ;;  %v1217_v14 = vmul.f32 %v1209_v11, %v6170_v3  ;;  %v4499_v58 = vld [vmem:[%s9545_s0 + $0xf8] sm:$0xff]  ;;  %v1233_v48 = vmul.f32 %v4500_v50, %v1209_v11  ;;  %vm9881_vm6 = vmmov %vm9868_vm0 }
 0x1be   :  { %v1108_v51 = vpop.xlane.xlu1 %1107  ;;  %v1598_v40 = vsel %vm9881_vm6, %v1580_v12, 0.0  ;;  %v1592_v3 = vsel %vm9882_vm10, %v1578_v39, 0.0  ;;  %vm9888_vm6 = vnez %v9795_v10  ;;  %vm9889_vm10 = vnez %v9792_v16 }
 0x1bf   :  { %v1110_v20 = vpop.xlane.xlu2 %1109  ;;  %v1223_v28 = vsub.f32 %v1108_v51, %v1215_v27  ;;  %v1218_v38 = vmul.f32 %v1210_v52, %v6206_v42  ;;  %v1234_v7 = vmul.f32 %v4499_v58, %v1210_v52  ;;  %v1595_v59 = vsel %vm9880_vm11, %v1579_v57, 0.0  ;;  %v6560_v57 = vld [vmem:[%s9546_s13 + $0x9] ss:$0 sm:$0xff] }
 0x1c0   :  { %v1224_v24 = vsub.f32 %v1110_v20, %v1216_v22  ;;  %v1106_v1 = vpop.xlane.xlu0 %1105  ;;  %vm9887_vm11 = vnez %v9799_v61  ;;  %v1650_v2 = vsel %vm9889_vm10, %v6520_v49, 0.0 }
 0x1c1   :  { %v1222_v34 = vsub.f32 %v1106_v1, %v1214_v31  ;;  %v1239_v45 = vadd.f32 %v1231_v26, %v1223_v28  ;;  %v1651_v33 = vsel %vm9887_vm11, %v6520_v49, 0.0  ;;  %v1652_v31 = vsel %vm9888_vm6, %v6520_v49, 0.0 }
 0x1c2   :  { %v1240_v18 = vadd.f32 %v1232_v43, %v1224_v24 }
 0x1c3   :  { %v1238_v13 = vadd.f32 %v1230_v62, %v1222_v34  ;;  %1247 = vst.msk [vmem:[%s9547_s14 + $0xe0] sm:$0xff] %vm9877_vm14, %v1239_v45  ;;  %1587 = vadd.xlane.f32.xlu1 %v1586_v63  ;;  %1590 = vadd.xlane.f32.xlu2 %v1589_v19  ;;  %vm9884_vm14 = vmmov %vm9868_vm0  ;;  %v9891_v19 = vld [vmem:[#allocation16_spill] sm:$0xff] }
 0x1c4   :  { %1248 = vst.msk [vmem:[%s9547_s14 + $0xe8] sm:$0xff] %vm9878_vm13, %v1240_v18  ;;  %1584 = vadd.xlane.f32.xlu0 %v1583_v30  ;;  %v1604_v0 = vsel %vm9884_vm14, %v1582_v60, 0.0  ;;  %vm9885_vm13 = vnez %v9790_v23  ;;  %v9893_v30 = vld [vmem:[#allocation12_spill] sm:$0xff] }
 0x1c5   :  { %1246 = vst.msk [vmem:[%s9547_s14 + $0xd8] sm:$0xff] %vm9879_vm15, %v1238_v13  ;;  %v1649_v8 = vsel %vm9885_vm13, %v6520_v49, 0.0  ;;  %vm9886_vm15 = vmmov %vm9868_vm0  ;;  %vm9894_vm14 = vnez %v9893_v30 }
 0x1c6   :  { %v1114_v17 = vpop.xlane.xlu1 %1113  ;;  %v1601_v41 = vsel %vm9886_vm15, %v1581_v21, 0.0  ;;  %v1653_v11 = vsel %vm9894_vm14, %v6520_v49, 0.0  ;;  %v9895_v21 = vld [vmem:[#allocation15_spill] sm:$0xff] }
 0x1c7   :  { %v1261_v6 = vpop.xlane.xlu2 %1260  ;;  %v1226_v54 = vsub.f32 %v1114_v17, %v1218_v38  ;;  %vm9896_vm15 = vnez %v9895_v21 }
 0x1c8   :  { %v1112_v4 = vpop.xlane.xlu0 %1111  ;;  %v6538_v26 = vmul.f32 0.020408163, %v1261_v6 }
 0x1c9   :  { %v1225_v42 = vsub.f32 %v1112_v4, %v1217_v14  ;;  %v1242_v9 = vadd.f32 %v1234_v7, %v1226_v54  ;;  %v1675_v4 = vsel %vm9885_vm13, %v6560_v57, 0.0 }
 0x1ca   :  { %v1331_v24 = vmul.f32 %v6538_v26, %v6538_v26 }
 0x1cb   :  { %v1241_v32 = vadd.f32 %v1233_v48, %v1225_v42  ;;  %1250 = vst.msk [vmem:[%s9547_s14 + $0xf8] sm:$0xff] %vm9883_vm12, %v1242_v9  ;;  %1596 = vadd.xlane.f32.xlu1 %v1595_v59  ;;  %1599 = vadd.xlane.f32.xlu2 %v1598_v40  ;;  %vm9890_vm12 = vnez %v9805_v15 }
 0x1cc   :  { %1593 = vadd.xlane.f32.xlu0 %v1592_v3  ;;  %v1654_v63 = vsel %vm9890_vm12, %v6520_v49, 0.0  ;;  %v1676_v3 = vsel %vm9889_vm10, %v6560_v57, 0.0 }
 0x1cd   :  { %1249 = vst.msk [vmem:[%s9547_s14 + $0xf0] sm:$0xff] %vm9868_vm0, %v1241_v32  ;;  %vm9892_vm0 = vnez %v9891_v19 }
 0x1ce   :  { %v1267_v47 = vpop.xlane.xlu1 %1266  ;;  %v1655_v52 = vsel %vm9892_vm0, %v6520_v49, 0.0 }
 0x1cf   :  { %v1270_v27 = vpop.xlane.xlu2 %1269  ;;  %v6564_v17 = vmul.f32 0.020408163, %v1267_v47  ;;  %v1656_v47 = vsel %vm9896_vm15, %v6520_v49, 0.0  ;;  %v1678_v49 = vsel %vm9888_vm6, %v6560_v57, 0.0 }
 0x1d0   :  { %v1264_v22 = vpop.xlane.xlu0 %1263  ;;  %v6555_v13 = vmul.f32 0.020408163, %v1270_v27 }
 0x1d1   :  { %v6540_v37 = vmul.f32 0.020408163, %v1264_v22  ;;  %v1333_v40 = vmul.f32 %v6564_v17, %v6564_v17 }
 0x1d2   :  { %v1334_v58 = vmul.f32 %v6555_v13, %v6555_v13 }
 0x1d3   :  { %1605 = vadd.xlane.f32.xlu1 %v1604_v0  ;;  %1657 = vadd.xlane.f32.xlu2 %v1649_v8  ;;  %v1332_v1 = vmul.f32 %v6540_v37, %v6540_v37 }
 0x1d4   :  { %1602 = vadd.xlane.f32.xlu0 %v1601_v41 }
 0x1d6   :  { %v1276_v56 = vpop.xlane.xlu1 %1275 }
 0x1d7   :  { %v1279_v51 = vpop.xlane.xlu2 %1278 }
 0x1d8   :  { %v1273_v20 = vpop.xlane.xlu0 %1272  ;;  %v6587_v27 = vmul.f32 0.020408163, %v1279_v51 }
 0x1d9   :  { %v6562_v12 = vmul.f32 0.020408163, %v1273_v20  ;;  %v6591_v20 = vmul.f32 0.020408163, %v1276_v56 }
 0x1db   :  { %1661 = vadd.xlane.f32.xlu1 %v1651_v33  ;;  %1663 = vadd.xlane.f32.xlu2 %v1652_v31  ;;  %v1335_v50 = vmul.f32 %v6562_v12, %v6562_v12 }
 0x1dc   :  { %1659 = vadd.xlane.f32.xlu0 %v1650_v2 }
 0x1de   :  { %v1293_v43 = vpop.xlane.xlu1 %1292 }
 0x1df   :  { %v1296_v28 = vpop.xlane.xlu2 %1295  ;;  %v1323_v5 = vmul.f32 0.020408163, %v1293_v43 }
 0x1e0   :  { %v1324_v62 = vmul.f32 0.020408163, %v1296_v28  ;;  %v1282_v34 = vpop.xlane.xlu0 %1281  ;;  %v1337_v28 = vmul.f32 %v6587_v27, %v6587_v27 }
 0x1e1   :  { %v1339_v45 = vsub.f32 %v1323_v5, %v1331_v24  ;;  %v6589_v0 = vmul.f32 0.020408163, %v1282_v34 }
 0x1e2   :  { %v1340_v18 = vsub.f32 %v1324_v62, %v1332_v1  ;;  %v1679_v62 = vsel %vm9894_vm14, %v6560_v57, 0.0 }
 0x1e3   :  { %v1347_v38 = vmax.f32 %v1339_v45, 0.0  ;;  %1667 = vadd.xlane.f32.xlu1 %v1654_v63  ;;  %1669 = vadd.xlane.f32.xlu2 %v1655_v52  ;;  %v1338_v34 = vmul.f32 %v6589_v0, %v6589_v0 }
 0x1e4   :  { %v1348_v39 = vmax.f32 %v1340_v18, 0.0  ;;  %1665 = vadd.xlane.f32.xlu0 %v1653_v11  ;;  %v1336_v18 = vmul.f32 %v6591_v20, %v6591_v20 }
 0x1e5   :  { %v6566_v6 = vadd.f32 1e-05, %v1347_v38 }
 0x1e6   :  { %v6568_v14 = vadd.f32 1e-05, %v1348_v39  ;;  %v1302_v7 = vpop.xlane.xlu1 %1301 }
 0x1e7   :  { %v1305_v54 = vpop.xlane.xlu2 %1304  ;;  %4317 = vrsqrt.f32 %v6566_v6  ;;  %v1326_v48 = vmul.f32 0.020408163, %v1302_v7  ;;  %v1677_v7 = vsel %vm9887_vm11, %v6560_v57, 0.0 }
 0x1e8   :  { %v1327_v42 = vmul.f32 0.020408163, %v1305_v54  ;;  %v1299_v59 = vpop.xlane.xlu0 %1298  ;;  %4319 = vrsqrt.f32 %v6568_v14 }
 0x1e9   :  { %v1325_v9 = vmul.f32 0.020408163, %v1299_v59  ;;  %v1342_v32 = vsub.f32 %v1326_v48, %v1334_v58 }
 0x1ea   :  { %v1343_v60 = vsub.f32 %v1327_v42, %v1335_v50 }
 0x1eb   :  { %v1341_v22 = vsub.f32 %v1325_v9, %v1333_v40  ;;  %v1350_v8 = vmax.f32 %v1342_v32, 0.0  ;;  %1683 = vadd.xlane.f32.xlu1 %v1675_v4  ;;  %1685 = vadd.xlane.f32.xlu2 %v1676_v3 }
 0x1ec   :  { %v1351_v41 = vmax.f32 %v1343_v60, 0.0  ;;  %1671 = vadd.xlane.f32.xlu0 %v1656_v47 }
 0x1ed   :  { %v1349_v33 = vmax.f32 %v1341_v22, 0.0  ;;  %v6593_v31 = vpop.eup %4317  ;;  %v6595_v2 = vadd.f32 1e-05, %v1350_v8 }
 0x1ee   :  { %v6597_v43 = vadd.f32 1e-05, %v1351_v41  ;;  %v6602_v51 = vpop.eup %4319  ;;  %v1416_v56 = vmul.f32 %v6593_v31, %v6566_v6  ;;  %v1311_v1 = vpop.xlane.xlu1 %1310 }
 0x1ef   :  { %v6608_v24 = vadd.f32 1e-05, %v1349_v33  ;;  %v1314_v5 = vpop.xlane.xlu2 %1313  ;;  %4321 = vrsqrt.f32 %v6595_v2  ;;  %v1329_v63 = vmul.f32 0.020408163, %v1311_v1  ;;  %v1426_v11 = vmul.f32 %v6602_v51, %v6568_v14 }
 0x1f0   :  { %v1330_v52 = vmul.f32 0.020408163, %v1314_v5  ;;  %v1308_v45 = vpop.xlane.xlu0 %1307  ;;  %4323 = vrsqrt.f32 %v6597_v43  ;;  %v1417_v4 = vmul.f32 %v6593_v31, %v1416_v56  ;;  %v1681_v56 = vsel %vm9892_vm0, %v6560_v57, 0.0 }
 0x1f1   :  { %v1328_v38 = vmul.f32 0.020408163, %v1308_v45  ;;  %4325 = vrsqrt.f32 %v6608_v24  ;;  %v1345_v39 = vsub.f32 %v1329_v63, %v1337_v28  ;;  %v1427_v59 = vmul.f32 %v6602_v51, %v1426_v11 }
 0x1f2   :  { %v1346_v58 = vsub.f32 %v1330_v52, %v1338_v34  ;;  %v1418_v40 = vmul.f32 0.5, %v1417_v4  ;;  %v1680_v63 = vsel %vm9890_vm12, %v6560_v57, 0.0  ;;  %vm1422_vm0 = vweird.f32 %v6593_v31 }
 0x1f3   :  { %v1344_v54 = vsub.f32 %v1328_v38, %v1336_v18  ;;  %v1353_v50 = vmax.f32 %v1345_v39, 0.0  ;;  %1689 = vadd.xlane.f32.xlu1 %v1678_v49  ;;  %1691 = vadd.xlane.f32.xlu2 %v1679_v62  ;;  %v1428_v5 = vmul.f32 0.5, %v1427_v59  ;;  %v1682_v62 = vsel %vm9896_vm15, %v6560_v57, 0.0  ;;  %v6669_v57 = vld [vmem:[%s9545_s0 + $0x188] sm:$0xff] }
 0x1f4   :  { %v1354_v48 = vmax.f32 %v1346_v58, 0.0  ;;  %1687 = vadd.xlane.f32.xlu0 %v1677_v7  ;;  %v1419_v33 = vsub.f32 1.5, %v1418_v40  ;;  %vm1421_vm15 = vweird.f32 %v6566_v6  ;;  %v6674_v58 = vld [vmem:[%s9545_s0 + $0x190] sm:$0xff]  ;;  %v6679_v7 = vld [vmem:[%s9545_s0 + $0x180] sm:$0xff]  ;;  %vm1441_vm13 = vweird.f32 %v6608_v24 }
 0x1f5   :  { %v1352_v42 = vmax.f32 %v1344_v54, 0.0  ;;  %v6627_v9 = vpop.eup %4321  ;;  %v6629_v3 = vadd.f32 1e-05, %v1353_v50  ;;  %v1429_v11 = vsub.f32 1.5, %v1428_v5  ;;  %vm6683_vm6 = vmor %vm1421_vm15, %vm1422_vm0  ;;  %vm1431_vm0 = vweird.f32 %v6568_v14 }
 0x1f6   :  { %v6631_v32 = vadd.f32 1e-05, %v1354_v48  ;;  %v6633_v60 = vpop.eup %4323  ;;  %v1446_v47 = vmul.f32 %v6627_v9, %v6595_v2  ;;  %v6639_v8 = vpop.xlane.xlu1 %1367  ;;  %v1420_v45 = vmul.f32 %v6593_v31, %v1419_v33  ;;  %vm9899_vm15 = vcmask 400384  }
 0x1f7   :  { %v6637_v22 = vadd.f32 1e-05, %v1352_v42  ;;  %v6641_v41 = vpop.xlane.xlu2 %1369  ;;  %v6643_v49 = vpop.eup %4325  ;;  %4327 = vrsqrt.f32 %v6629_v3  ;;  %v1456_v34 = vmul.f32 %v6633_v60, %v6597_v43  ;;  %v1846_v5 = vsel %vm9899_vm15, %v6669_v57, 0.0  ;;  %vm9900_vm12 = vmmov %vm9899_vm15 }
 0x1f8   :  { %v1366_v28 = vpop.xlane.xlu0 %1365  ;;  %v1436_v1 = vmul.f32 %v6643_v49, %v6608_v24  ;;  %4329 = vrsqrt.f32 %v6631_v32  ;;  %v1447_v18 = vmul.f32 %v6627_v9, %v1446_v47  ;;  %v1424_v59 = vsel %vm6683_vm6, %v6593_v31, %v1420_v45  ;;  %vm9901_vm14 = vmmov %vm9900_vm12 }
 0x1f9   :  { %4331 = vrsqrt.f32 %v6637_v22  ;;  %v1457_v4 = vmul.f32 %v6633_v60, %v1456_v34  ;;  %v1843_v34 = vsel %vm9901_vm14, %v6679_v7, 0.0  ;;  %vm1432_vm6 = vweird.f32 %v6602_v51 }
 0x1fa   :  { %v1437_v52 = vmul.f32 %v6643_v49, %v1436_v1  ;;  %v1448_v39 = vmul.f32 0.5, %v1447_v18  ;;  %v1495_v45 = vmul.f32 %v1424_v59, %v1366_v28  ;;  %vm6727_vm14 = vmor %vm1431_vm0, %vm1432_vm6  ;;  %vm1451_vm15 = vweird.f32 %v6595_v2  ;;  %v6744_v2 = vld [vmem:[%s9545_s0 + $0x1a8] sm:$0xff] }
 0x1fb   :  { %1695 = vadd.xlane.f32.xlu1 %v1681_v56  ;;  %1697 = vadd.xlane.f32.xlu2 %v1682_v62  ;;  %v1849_v62 = vsel %vm9900_vm12, %v6674_v58, 0.0  ;;  %v1458_v18 = vmul.f32 0.5, %v1457_v4  ;;  %vm9904_vm12 = vweird.f32 %v6627_v9  ;;  %vm9907_vm0 = vcmask 400384  }
 0x1fc   :  { %v1438_v38 = vmul.f32 0.5, %v1437_v52  ;;  %1693 = vadd.xlane.f32.xlu0 %v1680_v63  ;;  %v1449_v33 = vsub.f32 1.5, %v1448_v39  ;;  %v1430_v63 = vmul.f32 %v6602_v51, %v1429_v11  ;;  %v6719_v39 = vld [vmem:[%s9545_s0 + $0x1a0] sm:$0xff]  ;;  %vm6735_vm11 = vmor %vm1451_vm15, %vm9904_vm12  ;;  %vm9908_vm6 = vweird.f32 %v6643_v49 }
 0x1fd   :  { %v6681_v54 = vpop.eup %4327  ;;  %v1855_v14 = vsel %vm9907_vm0, %v6719_v39, 0.0  ;;  %vm6751_vm10 = vmor %vm1441_vm13, %vm9908_vm6  ;;  %vm1461_vm13 = vweird.f32 %v6597_v43  ;;  %v1867_v43 = vmul.f32 %v6679_v7, %v6679_v7  ;;  %v6824_v7 = vld [vmem:[%s9545_s0 + $0x1b0] sm:$0xff] }
 0x1fe   :  { %v6688_v50 = vpop.eup %4329  ;;  %v1476_v48 = vmul.f32 %v6681_v54, %v6629_v3  ;;  %v1439_v42 = vsub.f32 1.5, %v1438_v38  ;;  %v6695_v40 = vpop.xlane.xlu1 %1373  ;;  %v1450_v19 = vmul.f32 %v6627_v9, %v1449_v33  ;;  %v1434_v24 = vsel %vm6727_vm14, %v6602_v51, %v1430_v63  ;;  %vm9912_vm14 = vmmov %vm9907_vm0 }
 0x1ff   :  { %v6697_v47 = vpop.xlane.xlu2 %1375  ;;  %v6699_v56 = vpop.eup %4331  ;;  %v1486_v52 = vmul.f32 %v6688_v50, %v6631_v32  ;;  %v1459_v33 = vsub.f32 1.5, %v1458_v18  ;;  %vm1482_vm12 = vweird.f32 %v6681_v54 }
 0x200   :  { %v1372_v1 = vpop.xlane.xlu0 %1371  ;;  %v1466_v31 = vmul.f32 %v6699_v56, %v6637_v22  ;;  %v1477_v38 = vmul.f32 %v6681_v54, %v1476_v48  ;;  %v1440_v6 = vmul.f32 %v6643_v49, %v1439_v42  ;;  %v1454_v63 = vsel %vm6735_vm11, %v6627_v9, %v1450_v19 }
 0x201   :  { %vm1462_vm11 = vweird.f32 %v6633_v60  ;;  %vm1472_vm15 = vweird.f32 %v6699_v56 }
 0x202   :  { %v1467_v11 = vmul.f32 %v6699_v56, %v1466_v31  ;;  %v1478_v4 = vmul.f32 0.5, %v1477_v38  ;;  %v1444_v51 = vsel %vm6751_vm10, %v6643_v49, %v1440_v6  ;;  %vm9911_vm10 = vmmov %vm9907_vm0  ;;  %v1496_v6 = vmul.f32 %v1434_v24, %v6639_v8 }
 0x203   :  { %1847 = vadd.xlane.f32.xlu1 %v1846_v5  ;;  %1850 = vadd.xlane.f32.xlu2 %v1849_v62  ;;  %v1487_v5 = vmul.f32 %v6688_v50, %v1486_v52  ;;  %v1503_v62 = vmul.f32 %v1495_v45, %v6538_v26  ;;  %v4501_v26 = vld [vmem:[%s9545_s0 + $0x100] sm:$0xff]  ;;  %v1858_v49 = vsel %vm9911_vm10, %v6744_v2, 0.0  ;;  %v1497_v9 = vmul.f32 %v1444_v51, %v6641_v41  ;;  %vm6788_vm0 = vmor %vm1461_vm13, %vm1462_vm11 }
 0x204   :  { %v1468_v48 = vmul.f32 0.5, %v1467_v11  ;;  %1844 = vadd.xlane.f32.xlu0 %v1843_v34  ;;  %v6760_v34 = vld [vmem:[%s9545_s0 + $0x198] sm:$0xff]  ;;  %v1479_v52 = vsub.f32 1.5, %v1478_v4  ;;  %v1519_v11 = vmul.f32 %v4501_v26, %v1495_v45  ;;  %v1460_v45 = vmul.f32 %v6633_v60, %v1459_v33  ;;  %vm9915_vm6 = vmmov %vm9911_vm10 }
 0x205   :  { %v1852_v19 = vsel %vm9912_vm14, %v6760_v34, 0.0  ;;  %v1498_v4 = vmul.f32 %v1454_v63, %v1372_v1  ;;  %v1488_v59 = vmul.f32 0.5, %v1487_v5  ;;  %vm1481_vm10 = vweird.f32 %v6629_v3  ;;  %v4502_v1 = vld [vmem:[%s9545_s0 + $0x108] sm:$0xff]  ;;  %vm9920_vm11 = vmmov %vm9915_vm6 }
 0x206   :  { %v1469_v31 = vsub.f32 1.5, %v1468_v48  ;;  %v6768_v38 = vpop.xlane.xlu1 %1379  ;;  %v1480_v8 = vmul.f32 %v6681_v54, %v1479_v52  ;;  %vm1471_vm14 = vweird.f32 %v6637_v22  ;;  %vm6800_vm8 = vmor %vm1481_vm10, %vm1482_vm12  ;;  %v1520_v33 = vmul.f32 %v4502_v1, %v1496_v6 }
 0x207   :  { %v1392_v18 = vpop.xlane.xlu2 %1391  ;;  %vm6809_vm13 = vmor %vm1471_vm14, %vm1472_vm15  ;;  %v1505_v22 = vmul.f32 %v1497_v9, %v6564_v17  ;;  %v1504_v5 = vmul.f32 %v1496_v6, %v6540_v37  ;;  %v1464_v51 = vsel %vm6788_vm0, %v6633_v60, %v1460_v45  ;;  %v1489_v17 = vsub.f32 1.5, %v1488_v59  ;;  %v4504_v60 = vld [vmem:[%s9545_s0 + $0x118] sm:$0xff] }
 0x208   :  { %v1511_v28 = vsub.f32 %v1392_v18, %v1503_v62  ;;  %v1378_v21 = vpop.xlane.xlu0 %1377  ;;  %v1470_v42 = vmul.f32 %v6699_v56, %v1469_v31  ;;  %v6819_v62 = vld [vmem:[%s9545_s0 + $0x1b8] sm:$0xff]  ;;  %v1484_v37 = vsel %vm6800_vm8, %v6681_v54, %v1480_v8  ;;  %v4503_v18 = vld [vmem:[%s9545_s0 + $0x110] sm:$0xff]  ;;  %v1522_v26 = vmul.f32 %v4504_v60, %v1498_v4  ;;  %vm9921_vm8 = vmmov %vm9915_vm6 }
 0x209   :  { %v1521_v52 = vmul.f32 %v4503_v18, %v1497_v9  ;;  %v1864_v6 = vsel %vm9920_vm11, %v6819_v62, 0.0  ;;  %v1875_v54 = vsel %vm9921_vm8, %v1867_v43, 0.0  ;;  %vm9922_vm12 = vmmov %vm9915_vm6  ;;  %v1501_v9 = vmul.f32 %v1484_v37, %v1378_v21 }
 0x20a   :  { %v1527_v48 = vadd.f32 %v1519_v11, %v1511_v28  ;;  %v1499_v59 = vmul.f32 %v1464_v51, %v6695_v40  ;;  %vm1492_vm15 = vweird.f32 %v6688_v50  ;;  %vm9923_vm0 = vmmov %vm9915_vm6  ;;  %v1869_v21 = vmul.f32 %v6674_v58, %v6674_v58 }
 0x20b   :  { %1856 = vadd.xlane.f32.xlu1 %v1855_v14  ;;  %1859 = vadd.xlane.f32.xlu2 %v1858_v49  ;;  %v1506_v14 = vmul.f32 %v1498_v4, %v6555_v13  ;;  %v1474_v13 = vsel %vm6809_vm13, %v6699_v56, %v1470_v42  ;;  %v1490_v4 = vmul.f32 %v6688_v50, %v1489_v17  ;;  %vm9924_vm10 = vmmov %vm9923_vm0 }
 0x20c   :  { %1535 = vst.msk [vmem:[%s9547_s14 + $0x100] sm:$0xff] %vm9915_vm6, %v1527_v48  ;;  %1853 = vadd.xlane.f32.xlu0 %v1852_v19  ;;  %v1861_v19 = vsel %vm9922_vm12, %v6824_v7, 0.0  ;;  %v1500_v45 = vmul.f32 %v1474_v13, %v6697_v47  ;;  %vm1491_vm6 = vweird.f32 %v6631_v32  ;;  %v1870_v40 = vmul.f32 %v6760_v34, %v6760_v34  ;;  %vm9927_vm13 = vmmov %vm9923_vm0 }
 0x20d   :  { %vm6863_vm14 = vmor %vm1491_vm6, %vm1492_vm15  ;;  %v1509_v24 = vmul.f32 %v1501_v9, %v6587_v27  ;;  %v1868_v41 = vmul.f32 %v6669_v57, %v6669_v57  ;;  %v1507_v1 = vmul.f32 %v1499_v59, %v6562_v12  ;;  %v4506_v27 = vld [vmem:[%s9545_s0 + $0x130] sm:$0xff]  ;;  %v1871_v60 = vmul.f32 %v6719_v39, %v6719_v39 }
 0x20e   :  { %v1396_v31 = vpop.xlane.xlu1 %1395  ;;  %v1508_v32 = vmul.f32 %v1500_v45, %v6591_v20  ;;  %v1494_v58 = vsel %vm6863_vm14, %v6688_v50, %v1490_v4  ;;  %v1525_v20 = vmul.f32 %v4506_v27, %v1501_v9  ;;  %v4507_v50 = vld [vmem:[%s9545_s0 + $0x120] sm:$0xff]  ;;  %vm9928_vm11 = vmmov %vm9923_vm0  ;;  %v1874_v39 = vmul.f32 %v6819_v62, %v6819_v62 }
 0x20f   :  { %v1398_v63 = vpop.xlane.xlu2 %1397  ;;  %v1513_v11 = vsub.f32 %v1396_v31, %v1505_v22  ;;  %v1881_v12 = vsel %vm9928_vm11, %v1869_v21, 0.0  ;;  %vm9929_vm8 = vmmov %vm9923_vm0 }
 0x210   :  { %v1514_v28 = vsub.f32 %v1398_v63, %v1506_v14  ;;  %v1394_v56 = vpop.xlane.xlu0 %1393  ;;  %v1884_v13 = vsel %vm9929_vm8, %v1870_v40, 0.0  ;;  %vm9930_vm12 = vmmov %vm9923_vm0  ;;  %v1502_v63 = vmul.f32 %v1494_v58, %v6768_v38  ;;  %v1873_v38 = vmul.f32 %v6824_v7, %v6824_v7 }
 0x211   :  { %v1512_v49 = vsub.f32 %v1394_v56, %v1504_v5  ;;  %v1529_v48 = vadd.f32 %v1521_v52, %v1513_v11  ;;  %v1523_v5 = vmul.f32 %v4507_v50, %v1499_v59  ;;  %v1878_v31 = vsel %vm9930_vm12, %v1868_v41, 0.0  ;;  %vm9931_vm15 = vmmov %vm9923_vm0 }
 0x212   :  { %v1530_v42 = vadd.f32 %v1522_v26, %v1514_v28  ;;  %v1872_v52 = vmul.f32 %v6744_v2, %v6744_v2  ;;  %vm9932_vm6 = vmmov %vm9923_vm0  ;;  %v1510_v28 = vmul.f32 %v1502_v63, %v6589_v0  ;;  %v4508_v2 = vld [vmem:[%s9545_s0 + $0x138] sm:$0xff]  ;;  %v4225_v0 = vld [vmem:[%s9546_s13 + $0x3] ss:$0 sm:$0xff]  ;;  %vm9938_vm12 = vnez %v9685_v55 }
 0x213   :  { %v1528_v8 = vadd.f32 %v1520_v33, %v1512_v49  ;;  %1537 = vst.msk [vmem:[%s9547_s14 + $0x110] sm:$0xff] %vm9923_vm0, %v1529_v48  ;;  %1865 = vadd.xlane.f32.xlu1 %v1864_v6  ;;  %1876 = vadd.xlane.f32.xlu2 %v1875_v54  ;;  %v4505_v33 = vld [vmem:[%s9545_s0 + $0x128] sm:$0xff]  ;;  %v1526_v49 = vmul.f32 %v4508_v2, %v1502_v63  ;;  %vm9934_vm14 = vmmov %vm9923_vm0  ;;  %v1941_v59 = vsel %vm4745_vm1, %v4225_v0, 0.0  ;;  %v1942_v4 = vsel %vm4751_vm2, %v4225_v0, 0.0 }
 0x214   :  { %1538 = vst.msk [vmem:[%s9547_s14 + $0x118] sm:$0xff] %vm9924_vm10, %v1530_v42  ;;  %1862 = vadd.xlane.f32.xlu0 %v1861_v19  ;;  %v1524_v3 = vmul.f32 %v4505_v33, %v1500_v45  ;;  %vm9933_vm10 = vmmov %vm9923_vm0  ;;  %v1893_v54 = vsel %vm9934_vm14, %v1873_v38, 0.0  ;;  %v1944_v62 = vsel %vm4773_vm3, %v4225_v0, 0.0  ;;  %v1947_v50 = vsel %vm9847_vm9, %v4225_v0, 0.0 }
 0x215   :  { %1536 = vst.msk [vmem:[%s9547_s14 + $0x108] sm:$0xff] %vm9927_vm13, %v1528_v8  ;;  %v1890_v7 = vsel %vm9933_vm10, %v1872_v52, 0.0  ;;  %vm9935_vm13 = vmmov %vm9923_vm0 }
 0x216   :  { %v1402_v34 = vpop.xlane.xlu1 %1401  ;;  %v1887_v19 = vsel %vm9935_vm13, %v1871_v60, 0.0  ;;  %vm9936_vm11 = vmmov %vm9923_vm0 }
 0x217   :  { %v1404_v43 = vpop.xlane.xlu2 %1403  ;;  %v1516_v22 = vsub.f32 %v1402_v34, %v1508_v32  ;;  %vm9937_vm8 = vmmov %vm9923_vm0  ;;  %v1945_v32 = vsel %vm4779_vm4, %v4225_v0, 0.0 }
 0x218   :  { %v1517_v57 = vsub.f32 %v1404_v43, %v1509_v24  ;;  %v1400_v14 = vpop.xlane.xlu0 %1399  ;;  %v1896_v8 = vsel %vm9937_vm8, %v1874_v39, 0.0  ;;  %v1943_v24 = vsel %vm4785_vm5, %v4225_v0, 0.0 }
 0x219   :  { %v1515_v51 = vsub.f32 %v1400_v14, %v1507_v1  ;;  %v1532_v17 = vadd.f32 %v1524_v3, %v1516_v22 }
 0x21a   :  { %v1533_v37 = vadd.f32 %v1525_v20, %v1517_v57 }
 0x21b   :  { %v1531_v18 = vadd.f32 %v1523_v5, %v1515_v51  ;;  %1540 = vst.msk [vmem:[%s9547_s14 + $0x128] sm:$0xff] %vm9931_vm15, %v1532_v17  ;;  %1882 = vadd.xlane.f32.xlu1 %v1881_v12  ;;  %1885 = vadd.xlane.f32.xlu2 %v1884_v13  ;;  %v1948_v5 = vsel %vm4812_vm7, %v4225_v0, 0.0  ;;  %v1946_v13 = vsel %vm9938_vm12, %v4225_v0, 0.0  ;;  %vm9939_vm15 = vmmov %vm9923_vm0 }
 0x21c   :  { %1541 = vst.msk [vmem:[%s9547_s14 + $0x130] sm:$0xff] %vm9923_vm0, %v1533_v37  ;;  %1879 = vadd.xlane.f32.xlu0 %v1878_v31  ;;  %v6960_v31 = vld [vmem:[%s9546_s13 + $0xa] ss:$0 sm:$0xff] }
 0x21d   :  { %1539 = vst.msk [vmem:[%s9547_s14 + $0x120] sm:$0xff] %vm9932_vm6, %v1531_v18  ;;  %v1973_v25 = vsel %vm9847_vm9, %v6960_v31, 0.0 }
 0x21e   :  { %v1553_v26 = vpop.xlane.xlu1 %1552 }
 0x21f   :  { %v1556_v11 = vpop.xlane.xlu2 %1555  ;;  %v6941_v34 = vmul.f32 0.020408163, %v1553_v26 }
 0x220   :  { %v1406_v56 = vpop.xlane.xlu0 %1405  ;;  %v6937_v41 = vmul.f32 0.020408163, %v1556_v11 }
 0x221   :  { %v1518_v6 = vsub.f32 %v1406_v56, %v1510_v28  ;;  %v1623_v57 = vmul.f32 %v6941_v34, %v6941_v34 }
 0x222   :  { %v1624_v33 = vmul.f32 %v6937_v41, %v6937_v41 }
 0x223   :  { %v1534_v45 = vadd.f32 %v1526_v49, %v1518_v6  ;;  %1891 = vadd.xlane.f32.xlu1 %v1890_v7  ;;  %1894 = vadd.xlane.f32.xlu2 %v1893_v54  ;;  %v1968_v6 = vsel %vm4751_vm2, %v6960_v31, 0.0 }
 0x224   :  { %1888 = vadd.xlane.f32.xlu0 %v1887_v19 }
 0x225   :  { %1542 = vst.msk [vmem:[%s9547_s14 + $0x138] sm:$0xff] %vm9936_vm11, %v1534_v45  ;;  %vm9944_vm11 = vmmov %vm9937_vm8 }
 0x226   :  { %v1562_v9 = vpop.xlane.xlu1 %1561 }
 0x227   :  { %v1565_v48 = vpop.xlane.xlu2 %1564  ;;  %v6964_v38 = vmul.f32 0.020408163, %v1562_v9  ;;  %v1969_v9 = vsel %vm4785_vm5, %v6960_v31, 0.0 }
 0x228   :  { %v1559_v42 = vpop.xlane.xlu0 %1558  ;;  %v6955_v17 = vmul.f32 0.020408163, %v1565_v48 }
 0x229   :  { %v6939_v58 = vmul.f32 0.020408163, %v1559_v42  ;;  %v1626_v0 = vmul.f32 %v6964_v38, %v6964_v38 }
 0x22a   :  { %v1627_v28 = vmul.f32 %v6955_v17, %v6955_v17 }
 0x22b   :  { %1949 = vadd.xlane.f32.xlu1 %v1941_v59  ;;  %1951 = vadd.xlane.f32.xlu2 %v1942_v4  ;;  %v1625_v3 = vmul.f32 %v6939_v58, %v6939_v58  ;;  %v1967_v59 = vsel %vm4745_vm1, %v6960_v31, 0.0 }
 0x22c   :  { %1897 = vadd.xlane.f32.xlu0 %v1896_v8 }
 0x22e   :  { %v1571_v21 = vpop.xlane.xlu1 %1570 }
 0x22f   :  { %v1574_v40 = vpop.xlane.xlu2 %1573  ;;  %v6990_v8 = vmul.f32 0.020408163, %v1571_v21 }
 0x230   :  { %v1568_v47 = vpop.xlane.xlu0 %1567 }
 0x231   :  { %v6962_v63 = vmul.f32 0.020408163, %v1568_v47  ;;  %v6992_v47 = vmul.f32 0.020408163, %v1574_v40 }
 0x233   :  { %1955 = vadd.xlane.f32.xlu1 %v1944_v62  ;;  %1957 = vadd.xlane.f32.xlu2 %v1945_v32  ;;  %v1628_v7 = vmul.f32 %v6962_v63, %v6962_v63 }
 0x234   :  { %1953 = vadd.xlane.f32.xlu0 %v1943_v24 }
 0x236   :  { %v1588_v43 = vpop.xlane.xlu1 %1587 }
 0x237   :  { %v1591_v1 = vpop.xlane.xlu2 %1590  ;;  %v1616_v27 = vmul.f32 0.020408163, %v1588_v43 }
 0x238   :  { %v1617_v20 = vmul.f32 0.020408163, %v1591_v1  ;;  %v1585_v22 = vpop.xlane.xlu0 %1584 }
 0x239   :  { %v1615_v14 = vmul.f32 0.020408163, %v1585_v22  ;;  %v1632_v51 = vsub.f32 %v1616_v27, %v1624_v33  ;;  %v1971_v22 = vsel %vm4779_vm4, %v6960_v31, 0.0 }
 0x23a   :  { %v1633_v12 = vsub.f32 %v1617_v20, %v1625_v3 }
 0x23b   :  { %v1631_v37 = vsub.f32 %v1615_v14, %v1623_v57  ;;  %v1640_v18 = vmax.f32 %v1632_v51, 0.0  ;;  %1961 = vadd.xlane.f32.xlu1 %v1947_v50  ;;  %1963 = vadd.xlane.f32.xlu2 %v1948_v5  ;;  %v1972_v57 = vsel %vm9938_vm12, %v6960_v31, 0.0  ;;  %v1629_v50 = vmul.f32 %v6990_v8, %v6990_v8  ;;  %vm9945_vm12 = vmmov %vm9937_vm8 }
 0x23c   :  { %v1641_v52 = vmax.f32 %v1633_v12, 0.0  ;;  %1959 = vadd.xlane.f32.xlu0 %v1946_v13  ;;  %v1630_v5 = vmul.f32 %v6992_v47, %v6992_v47 }
 0x23d   :  { %v1639_v60 = vmax.f32 %v1631_v37, 0.0  ;;  %v6966_v26 = vadd.f32 1e-05, %v1640_v18 }
 0x23e   :  { %v6968_v11 = vadd.f32 1e-05, %v1641_v52  ;;  %v1597_v2 = vpop.xlane.xlu1 %1596  ;;  %v1970_v52 = vsel %vm4773_vm3, %v6960_v31, 0.0 }
 0x23f   :  { %v6972_v56 = vadd.f32 1e-05, %v1639_v60  ;;  %v1600_v49 = vpop.xlane.xlu2 %1599  ;;  %4333 = vrsqrt.f32 %v6966_v26  ;;  %v1619_v54 = vmul.f32 0.020408163, %v1597_v2  ;;  %vm1723_vm9 = vweird.f32 %v6966_v26 }
 0x240   :  { %v1620_v19 = vmul.f32 0.020408163, %v1600_v49  ;;  %v1594_v45 = vpop.xlane.xlu0 %1593  ;;  %4335 = vrsqrt.f32 %v6968_v11  ;;  %vm1733_vm14 = vweird.f32 %v6968_v11 }
 0x241   :  { %v1618_v39 = vmul.f32 0.020408163, %v1594_v45  ;;  %4337 = vrsqrt.f32 %v6972_v56  ;;  %v1635_v48 = vsub.f32 %v1619_v54, %v1627_v28  ;;  %vm1713_vm6 = vweird.f32 %v6972_v56 }
 0x242   :  { %v1636_v42 = vsub.f32 %v1620_v19, %v1628_v7 }
 0x243   :  { %v1634_v4 = vsub.f32 %v1618_v39, %v1626_v0  ;;  %v1643_v62 = vmax.f32 %v1635_v48, 0.0  ;;  %1977 = vadd.xlane.f32.xlu1 %v1968_v6  ;;  %1979 = vadd.xlane.f32.xlu2 %v1969_v9  ;;  %v7040_v39 = vld [vmem:[%s9545_s0 + $0x1c0] sm:$0xff] }
 0x244   :  { %v1644_v32 = vmax.f32 %v1636_v42, 0.0  ;;  %1975 = vadd.xlane.f32.xlu0 %v1967_v59 }
 0x245   :  { %v1642_v24 = vmax.f32 %v1634_v4, 0.0  ;;  %v6994_v43 = vpop.eup %4333  ;;  %v6996_v1 = vadd.f32 1e-05, %v1643_v62 }
 0x246   :  { %v6998_v33 = vadd.f32 1e-05, %v1644_v32  ;;  %v7000_v3 = vpop.eup %4335  ;;  %v1718_v21 = vmul.f32 %v6994_v43, %v6966_v26  ;;  %v1606_v40 = vpop.xlane.xlu1 %1605 }
 0x247   :  { %v7004_v27 = vadd.f32 1e-05, %v1642_v24  ;;  %v7006_v20 = vpop.xlane.xlu2 %1657  ;;  %v7014_v14 = vpop.eup %4337  ;;  %4339 = vrsqrt.f32 %v6996_v1  ;;  %v1622_v51 = vmul.f32 0.020408163, %v1606_v40  ;;  %v1728_v13 = vmul.f32 %v7000_v3, %v6968_v11 }
 0x248   :  { %v1603_v12 = vpop.xlane.xlu0 %1602  ;;  %v1708_v37 = vmul.f32 %v7014_v14, %v6972_v56  ;;  %4341 = vrsqrt.f32 %v6998_v33  ;;  %v1719_v2 = vmul.f32 %v6994_v43, %v1718_v21  ;;  %v1974_v40 = vsel %vm4812_vm7, %v6960_v31, 0.0  ;;  %v7088_v56 = vld [vmem:[%s9545_s0 + $0x1d8] sm:$0xff] }
 0x249   :  { %v1621_v55 = vmul.f32 0.020408163, %v1603_v12  ;;  %4343 = vrsqrt.f32 %v7004_v27  ;;  %v1638_v18 = vsub.f32 %v1622_v51, %v1630_v5  ;;  %v1729_v54 = vmul.f32 %v7000_v3, %v1728_v13 }
 0x24a   :  { %v1709_v60 = vmul.f32 %v7014_v14, %v1708_v37  ;;  %v1720_v19 = vmul.f32 0.5, %v1719_v2  ;;  %vm1714_vm0 = vweird.f32 %v7014_v14  ;;  %vm1724_vm7 = vweird.f32 %v6994_v43 }
 0x24b   :  { %v1637_v28 = vsub.f32 %v1621_v55, %v1629_v50  ;;  %v1646_v49 = vmax.f32 %v1638_v18, 0.0  ;;  %1983 = vadd.xlane.f32.xlu1 %v1971_v22  ;;  %1985 = vadd.xlane.f32.xlu2 %v1972_v57  ;;  %v1730_v57 = vmul.f32 0.5, %v1729_v54  ;;  %v2135_v50 = vsel %vm9939_vm15, %v7040_v39, 0.0  ;;  %v7078_v55 = vld [vmem:[%s9545_s0 + $0x1d0] sm:$0xff]  ;;  %vm7080_vm10 = vmor %vm1713_vm6, %vm1714_vm0 }
 0x24c   :  { %v1710_v6 = vmul.f32 0.5, %v1709_v60  ;;  %1981 = vadd.xlane.f32.xlu0 %v1970_v52  ;;  %v1721_v32 = vsub.f32 1.5, %v1720_v19  ;;  %v7093_v60 = vld [vmem:[%s9545_s0 + $0x1c8] sm:$0xff]  ;;  %vm7103_vm13 = vmor %vm1723_vm9, %vm1724_vm7  ;;  %vm1734_vm15 = vweird.f32 %v7000_v3 }
 0x24d   :  { %v1645_v7 = vmax.f32 %v1637_v28, 0.0  ;;  %v7033_v45 = vpop.eup %4339  ;;  %v7035_v0 = vadd.f32 1e-05, %v1646_v49  ;;  %v1731_v31 = vsub.f32 1.5, %v1730_v57  ;;  %v2144_v57 = vsel %vm9937_vm8, %v7088_v56, 0.0  ;;  %vm7153_vm6 = vmor %vm1733_vm14, %vm1734_vm15 }
 0x24e   :  { %v7042_v9 = vpop.eup %4341  ;;  %v1748_v48 = vmul.f32 %v7033_v45, %v6996_v1  ;;  %v1711_v42 = vsub.f32 1.5, %v1710_v6  ;;  %v7048_v4 = vpop.xlane.xlu1 %1661  ;;  %v1722_v13 = vmul.f32 %v6994_v43, %v1721_v32  ;;  %vm1754_vm7 = vweird.f32 %v7033_v45  ;;  %vm9951_vm14 = vmmov %vm9937_vm8 }
 0x24f   :  { %v7046_v59 = vadd.f32 1e-05, %v1645_v7  ;;  %v7050_v62 = vpop.xlane.xlu2 %1663  ;;  %v7052_v24 = vpop.eup %4343  ;;  %4345 = vrsqrt.f32 %v7035_v0  ;;  %v1758_v5 = vmul.f32 %v7042_v9, %v6998_v33  ;;  %vm1763_vm15 = vweird.f32 %v6998_v33 }
 0x250   :  { %v1660_v21 = vpop.xlane.xlu0 %1659  ;;  %v1738_v22 = vmul.f32 %v7052_v24, %v7004_v27  ;;  %v1712_v51 = vmul.f32 %v7014_v14, %v1711_v42  ;;  %v1749_v37 = vmul.f32 %v7033_v45, %v1748_v48  ;;  %vm1744_vm0 = vweird.f32 %v7052_v24 }
 0x251   :  { %4347 = vrsqrt.f32 %v7046_v59  ;;  %v1759_v49 = vmul.f32 %v7042_v9, %v1758_v5 }
 0x252   :  { %v1739_v12 = vmul.f32 %v7052_v24, %v1738_v22  ;;  %v1750_v52 = vmul.f32 0.5, %v1749_v37  ;;  %v1716_v2 = vsel %vm7080_vm10, %v7014_v14, %v1712_v51  ;;  %v1726_v14 = vsel %vm7103_vm13, %v6994_v43, %v1722_v13  ;;  %v7136_v37 = vld [vmem:[%s9545_s0 + $0x1e8] sm:$0xff] }
 0x253   :  { %1989 = vadd.xlane.f32.xlu1 %v1974_v40  ;;  %2136 = vadd.xlane.f32.xlu2 %v2135_v50  ;;  %v2141_v22 = vsel %vm9944_vm11, %v7078_v55, 0.0  ;;  %v2138_v50 = vsel %vm9945_vm12, %v7093_v60, 0.0  ;;  %v1732_v43 = vmul.f32 %v7000_v3, %v1731_v31  ;;  %v1787_v51 = vmul.f32 %v1716_v2, %v7006_v20  ;;  %v7146_v31 = vld [vmem:[%s9545_s0 + $0x1e0] sm:$0xff]  ;;  %vm9950_vm11 = vmmov %vm9937_vm8 }
 0x254   :  { %v1740_v18 = vmul.f32 0.5, %v1739_v12  ;;  %1987 = vadd.xlane.f32.xlu0 %v1973_v25  ;;  %v1751_v42 = vsub.f32 1.5, %v1750_v52  ;;  %v1788_v25 = vmul.f32 %v1726_v14, %v1660_v21  ;;  %v1760_v12 = vmul.f32 0.5, %v1759_v49 }
 0x255   :  { %v7095_v28 = vpop.eup %4345  ;;  %vm1743_vm10 = vweird.f32 %v7004_v27  ;;  %vm1753_vm13 = vweird.f32 %v6996_v1  ;;  %v2150_v11 = vsel %vm9950_vm11, %v7136_v37, 0.0  ;;  %v2153_v49 = vsel %vm9951_vm14, %v7141_v53, 0.0  ;;  %vm9959_vm14 = vmmov %vm9937_vm8 }
 0x256   :  { %v1778_v7 = vmul.f32 %v7095_v28, %v7035_v0  ;;  %v1741_v54 = vsub.f32 1.5, %v1740_v18  ;;  %v7115_v19 = vpop.xlane.xlu1 %1667  ;;  %v1752_v21 = vmul.f32 %v7033_v45, %v1751_v42  ;;  %vm7160_vm9 = vmor %vm1743_vm10, %vm1744_vm0  ;;  %v2147_v27 = vsel %vm9937_vm8, %v7146_v31, 0.0 }
 0x257   :  { %v7108_v6 = vpop.eup %4347  ;;  %v7117_v48 = vpop.xlane.xlu2 %1669  ;;  %vm7176_vm12 = vmor %vm1753_vm13, %vm1754_vm7  ;;  %v1795_v1 = vmul.f32 %v1787_v51, %v6941_v34  ;;  %v1796_v42 = vmul.f32 %v1788_v25, %v6937_v41  ;;  %v4510_v41 = vld [vmem:[%s9545_s0 + $0x148] sm:$0xff]  ;;  %vm1764_vm0 = vweird.f32 %v7042_v9 }
 0x258   :  { %v1768_v32 = vmul.f32 %v7108_v6, %v7046_v59  ;;  %v1666_v40 = vpop.xlane.xlu0 %1665  ;;  %v1779_v5 = vmul.f32 %v7095_v28, %v1778_v7  ;;  %v1742_v20 = vmul.f32 %v7052_v24, %v1741_v54  ;;  %v1736_v7 = vsel %vm7153_vm6, %v7000_v3, %v1732_v43  ;;  %vm7203_vm10 = vmor %vm1763_vm15, %vm1764_vm0 }
 0x259   :  { %v1761_v54 = vsub.f32 1.5, %v1760_v12  ;;  %v1756_v3 = vsel %vm7176_vm12, %v7033_v45, %v1752_v21  ;;  %v1812_v34 = vmul.f32 %v4510_v41, %v1788_v25  ;;  %v1789_v52 = vmul.f32 %v1736_v7, %v7048_v4  ;;  %vm9956_vm13 = vmmov %vm9937_vm8 }
 0x25a   :  { %v1769_v13 = vmul.f32 %v7108_v6, %v1768_v32  ;;  %v1780_v18 = vmul.f32 0.5, %v1779_v5  ;;  %v1746_v32 = vsel %vm7160_vm9, %v7052_v24, %v1742_v20  ;;  %v4509_v5 = vld [vmem:[%s9545_s0 + $0x140] sm:$0xff]  ;;  %vm1774_vm7 = vweird.f32 %v7108_v6  ;;  %vm9962_vm15 = vmmov %vm9956_vm13 }
 0x25b   :  { %2142 = vadd.xlane.f32.xlu1 %v2141_v22  ;;  %2145 = vadd.xlane.f32.xlu2 %v2144_v57  ;;  %v1811_v12 = vmul.f32 %v4509_v5, %v1787_v51  ;;  %v1790_v45 = vmul.f32 %v1746_v32, %v7050_v62  ;;  %v1791_v21 = vmul.f32 %v1756_v3, %v1666_v40  ;;  %vm1784_vm6 = vweird.f32 %v7095_v28  ;;  %v4511_v40 = vld [vmem:[%s9545_s0 + $0x150] sm:$0xff]  ;;  %vm9963_vm0 = vmmov %vm9956_vm13 }
 0x25c   :  { %v1770_v2 = vmul.f32 0.5, %v1769_v13  ;;  %2139 = vadd.xlane.f32.xlu0 %v2138_v50  ;;  %v1781_v43 = vsub.f32 1.5, %v1780_v18  ;;  %vm1773_vm9 = vweird.f32 %v7046_v59  ;;  %vm1783_vm8 = vweird.f32 %v7035_v0 }
 0x25d   :  { %vm7212_vm11 = vmor %vm1773_vm9, %vm1774_vm7  ;;  %v2159_v59 = vmul.f32 %v7040_v39, %v7040_v39  ;;  %v2160_v62 = vmul.f32 %v7093_v60, %v7093_v60  ;;  %v1798_v7 = vmul.f32 %v1790_v45, %v6964_v38  ;;  %v1799_v0 = vmul.f32 %v1791_v21, %v6955_v17  ;;  %v2134_v39 = vld [vmem:[%s9545_s0 + $0x1f8] sm:$0xff] }
 0x25e   :  { %v1771_v22 = vsub.f32 1.5, %v1770_v2  ;;  %v1684_v57 = vpop.xlane.xlu1 %1683  ;;  %v1762_v2 = vmul.f32 %v7042_v9, %v1761_v54  ;;  %v1782_v26 = vmul.f32 %v7095_v28, %v1781_v43  ;;  %vm7228_vm12 = vmor %vm1783_vm8, %vm1784_vm6  ;;  %v1797_v17 = vmul.f32 %v1789_v52, %v6939_v58 }
 0x25f   :  { %v1686_v50 = vpop.xlane.xlu2 %1685  ;;  %v1803_v13 = vsub.f32 %v1684_v57, %v1795_v1  ;;  %v4512_v1 = vld [vmem:[%s9545_s0 + $0x158] sm:$0xff]  ;;  %vm9964_vm7 = vmmov %vm9963_vm0 }
 0x260   :  { %v1804_v24 = vsub.f32 %v1686_v50, %v1796_v42  ;;  %v1672_v20 = vpop.xlane.xlu0 %1671  ;;  %v1772_v25 = vmul.f32 %v7108_v6, %v1771_v22  ;;  %v1766_v60 = vsel %vm7203_vm10, %v7042_v9, %v1762_v2  ;;  %v1786_v54 = vsel %vm7228_vm12, %v7095_v28, %v1782_v26  ;;  %v4513_v9 = vld [vmem:[%s9545_s0 + $0x160] sm:$0xff]  ;;  %vm9965_vm6 = vmmov %vm9963_vm0 }
 0x261   :  { %v1819_v51 = vadd.f32 %v1811_v12, %v1803_v13  ;;  %v1814_v42 = vmul.f32 %v4512_v1, %v1790_v45  ;;  %v1815_v32 = vmul.f32 %v4513_v9, %v1791_v21  ;;  %v2167_v28 = vsel %vm9962_vm15, %v2159_v59, 0.0  ;;  %vm9966_vm10 = vmmov %vm9963_vm0 }
 0x262   :  { %v1820_v18 = vadd.f32 %v1812_v34, %v1804_v24  ;;  %v2170_v50 = vsel %vm9963_vm0, %v2160_v62, 0.0  ;;  %v2156_v58 = vsel %vm9964_vm7, %v2134_v39, 0.0  ;;  %v1794_v5 = vmul.f32 %v1786_v54, %v1672_v20  ;;  %vm9967_vm9 = vmmov %vm9963_vm0 }
 0x263   :  { %1827 = vst.msk [vmem:[%s9547_s14 + $0x140] sm:$0xff] %vm9956_vm13, %v1819_v51  ;;  %2151 = vadd.xlane.f32.xlu1 %v2150_v11  ;;  %2154 = vadd.xlane.f32.xlu2 %v2153_v49  ;;  %v1813_v11 = vmul.f32 %v4511_v40, %v1789_v52  ;;  %v1792_v34 = vmul.f32 %v1766_v60, %v7115_v19  ;;  %vm9968_vm13 = vmmov %vm9963_vm0 }
 0x264   :  { %1828 = vst.msk [vmem:[%s9547_s14 + $0x148] sm:$0xff] %vm9959_vm14, %v1820_v18  ;;  %2148 = vadd.xlane.f32.xlu0 %v2147_v27  ;;  %v1776_v27 = vsel %vm7212_vm11, %v7108_v6, %v1772_v25  ;;  %v2163_v19 = vmul.f32 %v7146_v31, %v7146_v31  ;;  %v1802_v20 = vmul.f32 %v1794_v5, %v6992_v47  ;;  %v4515_v18 = vld [vmem:[%s9545_s0 + $0x178] sm:$0xff]  ;;  %vm9969_vm11 = vmmov %vm9963_vm0 }
 0x265   :  { %v1793_v43 = vmul.f32 %v1776_v27, %v7117_v48  ;;  %v2162_v48 = vmul.f32 %v7088_v56, %v7088_v56  ;;  %v2161_v52 = vmul.f32 %v7078_v55, %v7078_v55  ;;  %v1800_v51 = vmul.f32 %v1792_v34, %v6962_v63  ;;  %v4514_v56 = vld [vmem:[%s9545_s0 + $0x170] sm:$0xff]  ;;  %v4516_v55 = vld [vmem:[%s9545_s0 + $0x168] sm:$0xff]  ;;  %vm9970_vm14 = vmmov %vm9963_vm0 }
 0x266   :  { %v1690_v14 = vpop.xlane.xlu1 %1689  ;;  %v1818_v2 = vmul.f32 %v4515_v18, %v1794_v5  ;;  %v1816_v26 = vmul.f32 %v4516_v55, %v1792_v34  ;;  %v2179_v33 = vsel %vm9969_vm11, %v2163_v19, 0.0  ;;  %vm9971_vm8 = vmmov %vm9963_vm0  ;;  %v2165_v49 = vmul.f32 %v7141_v53, %v7141_v53  ;;  %v4227_v53 = vld [vmem:[%s9546_s13 + $0x3] ss:$0 sm:$0xff]  ;;  %v7340_v19 = vld [vmem:[%s9546_s13 + $0xa] ss:$0 sm:$0xff] }
 0x267   :  { %v1692_v38 = vpop.xlane.xlu2 %1691  ;;  %v1806_v22 = vsub.f32 %v1690_v14, %v1798_v7  ;;  %v1801_v24 = vmul.f32 %v1793_v43, %v6990_v8  ;;  %v1817_v31 = vmul.f32 %v4514_v56, %v1793_v43  ;;  %v2176_v63 = vsel %vm9968_vm13, %v2162_v48, 0.0  ;;  %vm9972_vm12 = vmmov %vm9963_vm0 }
 0x268   :  { %v1807_v6 = vsub.f32 %v1692_v38, %v1799_v0  ;;  %v1688_v3 = vpop.xlane.xlu0 %1687  ;;  %v2173_v40 = vsel %vm9970_vm14, %v2161_v52, 0.0  ;;  %v2166_v7 = vmul.f32 %v2134_v39, %v2134_v39  ;;  %vm9973_vm15 = vmmov %vm9963_vm0  ;;  %v2164_v0 = vmul.f32 %v7136_v37, %v7136_v37 }
 0x269   :  { %v1805_v57 = vsub.f32 %v1688_v3, %v1797_v17  ;;  %v1822_v12 = vadd.f32 %v1814_v42, %v1806_v22  ;;  %v2185_v14 = vsel %vm9963_vm0, %v2165_v49, 0.0  ;;  %vm9974_vm7 = vmmov %vm9963_vm0  ;;  %vm9978_vm13 = vnez %v9790_v23 }
 0x26a   :  { %v1823_v41 = vadd.f32 %v1815_v32, %v1807_v6  ;;  %v2188_v38 = vsel %vm9974_vm7, %v2166_v7, 0.0  ;;  %v2233_v32 = vsel %vm9978_vm13, %v4227_v53, 0.0  ;;  %vm9979_vm11 = vnez %v9893_v30  ;;  %v2419_v30 = vld [vmem:[%s9548_s1] sm:$0xff] }
 0x26b   :  { %v1821_v13 = vadd.f32 %v1813_v11, %v1805_v57  ;;  %1830 = vst.msk [vmem:[%s9547_s14 + $0x158] sm:$0xff] %vm9965_vm6, %v1822_v12  ;;  %2168 = vadd.xlane.f32.xlu1 %v2167_v28  ;;  %2171 = vadd.xlane.f32.xlu2 %v2170_v50  ;;  %vm9975_vm6 = vmmov %vm9963_vm0  ;;  %vm9980_vm14 = vnez %v9805_v15 }
 0x26c   :  { %1831 = vst.msk [vmem:[%s9547_s14 + $0x160] sm:$0xff] %vm9966_vm10, %v1823_v41  ;;  %2157 = vadd.xlane.f32.xlu0 %v2156_v58  ;;  %v2182_v17 = vsel %vm9975_vm6, %v2164_v0, 0.0  ;;  %vm9976_vm10 = vnez %v9792_v16  ;;  %v2237_v58 = vsel %vm9979_vm11, %v4227_v53, 0.0  ;;  %v2238_v43 = vsel %vm9980_vm14, %v4227_v53, 0.0  ;;  %vm9986_vm7 = vmmov %vm9975_vm6 }
 0x26d   :  { %1829 = vst.msk [vmem:[%s9547_s14 + $0x150] sm:$0xff] %vm9967_vm9, %v1821_v13  ;;  %v2234_v37 = vsel %vm9976_vm10, %v4227_v53, 0.0  ;;  %vm9977_vm9 = vnez %v9799_v61 }
 0x26e   :  { %v1696_v45 = vpop.xlane.xlu1 %1695  ;;  %v2235_v9 = vsel %vm9977_vm9, %v4227_v53, 0.0 }
 0x26f   :  { %v1698_v21 = vpop.xlane.xlu2 %1697  ;;  %v1809_v8 = vsub.f32 %v1696_v45, %v1801_v24 }
 0x270   :  { %v1810_v25 = vsub.f32 %v1698_v21, %v1802_v20  ;;  %v1694_v47 = vpop.xlane.xlu0 %1693 }
 0x271   :  { %v1808_v4 = vsub.f32 %v1694_v47, %v1800_v51  ;;  %v1825_v59 = vadd.f32 %v1817_v31, %v1809_v8  ;;  %v9982_v8 = vld [vmem:[#allocation15_spill] sm:$0xff]  ;;  %v2259_v47 = vsel %vm9978_vm13, %v7340_v19, 0.0 }
 0x272   :  { %v1826_v62 = vadd.f32 %v1818_v2, %v1810_v25 }
 0x273   :  { %v1824_v11 = vadd.f32 %v1816_v26, %v1808_v4  ;;  %1833 = vst.msk [vmem:[%s9547_s14 + $0x170] sm:$0xff] %vm9971_vm8, %v1825_v59  ;;  %2177 = vadd.xlane.f32.xlu1 %v2176_v63  ;;  %2180 = vadd.xlane.f32.xlu2 %v2179_v33  ;;  %vm9981_vm8 = vnez %v9795_v10  ;;  %v9984_v4 = vld [vmem:[#allocation16_spill] sm:$0xff] }
 0x274   :  { %1834 = vst.msk [vmem:[%s9547_s14 + $0x178] sm:$0xff] %vm9972_vm12, %v1826_v62  ;;  %2174 = vadd.xlane.f32.xlu0 %v2173_v40  ;;  %v2236_v12 = vsel %vm9981_vm8, %v4227_v53, 0.0  ;;  %vm9983_vm12 = vnez %v9982_v8 }
 0x275   :  { %1832 = vst.msk [vmem:[%s9547_s14 + $0x168] sm:$0xff] %vm9973_vm15, %v1824_v11  ;;  %v2240_v25 = vsel %vm9983_vm12, %v4227_v53, 0.0  ;;  %vm9985_vm15 = vnez %v9984_v4 }
 0x276   :  { %v1848_v60 = vpop.xlane.xlu1 %1847  ;;  %v2239_v63 = vsel %vm9985_vm15, %v4227_v53, 0.0  ;;  %v2261_v53 = vsel %vm9977_vm9, %v7340_v19, 0.0 }
 0x277   :  { %v1851_v27 = vpop.xlane.xlu2 %1850  ;;  %v7335_v48 = vmul.f32 0.020408163, %v1848_v60 }
 0x278   :  { %v1845_v54 = vpop.xlane.xlu0 %1844  ;;  %v7331_v41 = vmul.f32 0.020408163, %v1851_v27 }
 0x279   :  { %v7319_v22 = vmul.f32 0.020408163, %v1845_v54  ;;  %v1916_v18 = vmul.f32 %v7335_v48, %v7335_v48 }
 0x27a   :  { %v1917_v20 = vmul.f32 %v7331_v41, %v7331_v41 }
 0x27b   :  { %2186 = vadd.xlane.f32.xlu1 %v2185_v14  ;;  %2189 = vadd.xlane.f32.xlu2 %v2188_v38  ;;  %v1915_v57 = vmul.f32 %v7319_v22, %v7319_v22 }
 0x27c   :  { %2183 = vadd.xlane.f32.xlu0 %v2182_v17 }
 0x27e   :  { %v1857_v39 = vpop.xlane.xlu1 %1856 }
 0x27f   :  { %v1860_v1 = vpop.xlane.xlu2 %1859  ;;  %v7362_v49 = vmul.f32 0.020408163, %v1857_v39  ;;  %v2262_v39 = vsel %vm9981_vm8, %v7340_v19, 0.0 }
 0x280   :  { %v1854_v42 = vpop.xlane.xlu0 %1853  ;;  %v7358_v33 = vmul.f32 0.020408163, %v1860_v1 }
 0x281   :  { %v7333_v34 = vmul.f32 0.020408163, %v1854_v42 }
 0x282   :  { %v1920_v54 = vmul.f32 %v7358_v33, %v7358_v33 }
 0x283   :  { %2243 = vadd.xlane.f32.xlu1 %v2234_v37  ;;  %2245 = vadd.xlane.f32.xlu2 %v2235_v9  ;;  %v1918_v21 = vmul.f32 %v7333_v34, %v7333_v34 }
 0x284   :  { %2241 = vadd.xlane.f32.xlu0 %v2233_v32  ;;  %v1919_v32 = vmul.f32 %v7362_v49, %v7362_v49 }
 0x286   :  { %v7321_v6 = vpop.xlane.xlu1 %1865 }
 0x287   :  { %v1877_v3 = vpop.xlane.xlu2 %1876 }
 0x288   :  { %v1907_v28 = vmul.f32 0.020408163, %v1877_v3  ;;  %v1863_v50 = vpop.xlane.xlu0 %1862 }
 0x289   :  { %v7360_v62 = vmul.f32 0.020408163, %v1863_v50 }
 0x28a   :  { %v1923_v5 = vsub.f32 %v1907_v28, %v1915_v57 }
 0x28b   :  { %2249 = vadd.xlane.f32.xlu1 %v2237_v58  ;;  %2251 = vadd.xlane.f32.xlu2 %v2238_v43  ;;  %v1921_v1 = vmul.f32 %v7360_v62, %v7360_v62  ;;  %v2260_v58 = vsel %vm9976_vm10, %v7340_v19, 0.0 }
 0x28c   :  { %v1931_v13 = vmax.f32 %v1923_v5, 0.0  ;;  %2247 = vadd.xlane.f32.xlu0 %v2236_v12 }
 0x28e   :  { %v7342_v24 = vadd.f32 1e-05, %v1931_v13  ;;  %v1883_v52 = vpop.xlane.xlu1 %1882 }
 0x28f   :  { %v1886_v45 = vpop.xlane.xlu2 %1885  ;;  %v1909_v51 = vmul.f32 0.020408163, %v1883_v52 }
 0x290   :  { %4349 = vrsqrt.f32 %v7342_v24  ;;  %v1910_v56 = vmul.f32 0.020408163, %v1886_v45  ;;  %v1880_v31 = vpop.xlane.xlu0 %1879  ;;  %v7396_v45 = vmul.f32 0.020408163, %v7321_v6  ;;  %vm2005_vm0 = vweird.f32 %v7342_v24 }
 0x291   :  { %v1908_v2 = vmul.f32 0.020408163, %v1880_v31  ;;  %v1925_v55 = vsub.f32 %v1909_v51, %v1917_v20 }
 0x292   :  { %v1926_v26 = vsub.f32 %v1910_v56, %v1918_v21 }
 0x293   :  { %v1924_v59 = vsub.f32 %v1908_v2, %v1916_v18  ;;  %v1933_v40 = vmax.f32 %v1925_v55, 0.0  ;;  %2255 = vadd.xlane.f32.xlu1 %v2240_v25  ;;  %2267 = vadd.xlane.f32.xlu2 %v2259_v47  ;;  %v2264_v55 = vsel %vm9980_vm14, %v7340_v19, 0.0 }
 0x294   :  { %v1934_v11 = vmax.f32 %v1926_v26, 0.0  ;;  %2253 = vadd.xlane.f32.xlu0 %v2239_v63  ;;  %v2265_v26 = vsel %vm9985_vm15, %v7340_v19, 0.0 }
 0x295   :  { %v1932_v7 = vmax.f32 %v1924_v59, 0.0  ;;  %v7366_v60 = vadd.f32 1e-05, %v1933_v40  ;;  %v2263_v40 = vsel %vm9979_vm11, %v7340_v19, 0.0 }
 0x296   :  { %v7364_v0 = vpop.eup %4349  ;;  %v7368_v27 = vadd.f32 1e-05, %v1934_v11  ;;  %v1892_v38 = vpop.xlane.xlu1 %1891  ;;  %v1922_v11 = vmul.f32 %v7396_v45, %v7396_v45 }
 0x297   :  { %v7372_v14 = vadd.f32 1e-05, %v1932_v7  ;;  %v1895_v17 = vpop.xlane.xlu2 %1894  ;;  %4351 = vrsqrt.f32 %v7366_v60  ;;  %v1912_v42 = vmul.f32 0.020408163, %v1892_v38  ;;  %v2000_v3 = vmul.f32 %v7364_v0, %v7342_v24 }
 0x298   :  { %v1913_v37 = vmul.f32 0.020408163, %v1895_v17  ;;  %v1889_v9 = vpop.xlane.xlu0 %1888  ;;  %4353 = vrsqrt.f32 %v7368_v27  ;;  %vm2006_vm11 = vweird.f32 %v7364_v0 }
 0x299   :  { %v1911_v57 = vmul.f32 0.020408163, %v1889_v9  ;;  %4355 = vrsqrt.f32 %v7372_v14  ;;  %v1928_v28 = vsub.f32 %v1912_v42, %v1920_v54  ;;  %v2001_v20 = vmul.f32 %v7364_v0, %v2000_v3 }
 0x29a   :  { %v1929_v50 = vsub.f32 %v1913_v37, %v1921_v1  ;;  %v7440_v1 = vld [vmem:[%s9548_s1 + $0x8] sm:$0xff] }
 0x29b   :  { %v1927_v43 = vsub.f32 %v1911_v57, %v1919_v32  ;;  %v1936_v5 = vmax.f32 %v1928_v28, 0.0  ;;  %2271 = vadd.xlane.f32.xlu1 %v2261_v53  ;;  %2273 = vadd.xlane.f32.xlu2 %v2262_v39  ;;  %v2002_v59 = vmul.f32 0.5, %v2001_v20  ;;  %v2426_v20 = vsel %vm9975_vm6, %v7440_v1, 0.0 }
 0x29c   :  { %v1937_v12 = vmax.f32 %v1929_v50, 0.0  ;;  %2269 = vadd.xlane.f32.xlu0 %v2260_v58  ;;  %v2423_v58 = vsel %vm9986_vm7, %v2419_v30, 0.0  ;;  %vm2025_vm7 = vweird.f32 %v7366_v60  ;;  %vm2015_vm6 = vweird.f32 %v7372_v14 }
 0x29d   :  { %v1935_v13 = vmax.f32 %v1927_v43, 0.0  ;;  %v7393_v52 = vpop.eup %4351  ;;  %v7398_v21 = vadd.f32 1e-05, %v1936_v5  ;;  %v2003_v17 = vsub.f32 1.5, %v2002_v59 }
 0x29e   :  { %v7400_v51 = vadd.f32 1e-05, %v1937_v12  ;;  %v7402_v56 = vpop.eup %4353  ;;  %v2020_v31 = vmul.f32 %v7393_v52, %v7366_v60  ;;  %v7408_v2 = vpop.xlane.xlu1 %1949  ;;  %vm2026_vm15 = vweird.f32 %v7393_v52  ;;  %v2421_v60 = vld [vmem:[%s9548_s1 + $0x10] sm:$0xff] }
 0x29f   :  { %v7406_v18 = vadd.f32 1e-05, %v1935_v13  ;;  %v7410_v25 = vpop.xlane.xlu2 %1951  ;;  %v7412_v47 = vpop.eup %4355  ;;  %4357 = vrsqrt.f32 %v7398_v21  ;;  %v2030_v15 = vmul.f32 %v7402_v56, %v7368_v27 }
 0x2a0   :  { %v1898_v6 = vpop.xlane.xlu0 %1897  ;;  %v2010_v63 = vmul.f32 %v7412_v47, %v7372_v14  ;;  %4359 = vrsqrt.f32 %v7400_v51  ;;  %v2021_v54 = vmul.f32 %v7393_v52, %v2020_v31  ;;  %v2266_v31 = vsel %vm9983_vm12, %v7340_v19, 0.0  ;;  %vm7481_vm12 = vmor %vm2005_vm0, %vm2006_vm11 }
 0x2a1   :  { %4361 = vrsqrt.f32 %v7406_v18  ;;  %v1914_v4 = vmul.f32 0.020408163, %v1898_v6  ;;  %v2031_v9 = vmul.f32 %v7402_v56, %v2030_v15  ;;  %vm7494_vm0 = vmor %vm2025_vm7, %vm2026_vm15  ;;  %vm9991_vm11 = vweird.f32 %v7412_v47  ;;  %v4517_v15 = vld [vmem:[%s9545_s0 + $0x180] sm:$0xff] }
 0x2a2   :  { %v2011_v7 = vmul.f32 %v7412_v47, %v2010_v63  ;;  %v2022_v39 = vmul.f32 0.5, %v2021_v54  ;;  %vm7503_vm10 = vmor %vm2015_vm6, %vm9991_vm11  ;;  %vm9997_vm6 = vweird.f32 %v7368_v27  ;;  %vm2045_vm11 = vweird.f32 %v7406_v18 }
 0x2a3   :  { %v1930_v38 = vsub.f32 %v1914_v4, %v1922_v11  ;;  %2277 = vadd.xlane.f32.xlu1 %v2264_v55  ;;  %2279 = vadd.xlane.f32.xlu2 %v2265_v26  ;;  %v2004_v55 = vmul.f32 %v7364_v0, %v2003_v17  ;;  %v2435_v26 = vmul.f32 %v2419_v30, %v2419_v30  ;;  %v2032_v63 = vmul.f32 0.5, %v2031_v9  ;;  %v2422_v11 = vld [vmem:[%s9548_s1 + $0x18] sm:$0xff] }
 0x2a4   :  { %v2012_v53 = vmul.f32 0.5, %v2011_v7  ;;  %2275 = vadd.xlane.f32.xlu0 %v2263_v40  ;;  %v2023_v50 = vsub.f32 1.5, %v2022_v39 }
 0x2a5   :  { %v7442_v42 = vpop.eup %4357  ;;  %v1938_v37 = vmax.f32 %v1930_v38, 0.0  ;;  %v2008_v7 = vsel %vm7481_vm12, %v7364_v0, %v2004_v55  ;;  %v2033_v14 = vsub.f32 1.5, %v2032_v63  ;;  %vm9994_vm12 = vcmask 400384  }
 0x2a6   :  { %v7445_v32 = vpop.eup %4359  ;;  %v2013_v3 = vsub.f32 1.5, %v2012_v53  ;;  %v7448_v57 = vpop.xlane.xlu1 %1955  ;;  %v2050_v5 = vmul.f32 %v7442_v42, %v7398_v21  ;;  %v2024_v40 = vmul.f32 %v7393_v52, %v2023_v50  ;;  %v2432_v30 = vsel %vm9994_vm12, %v2422_v11, 0.0  ;;  %vm9995_vm14 = vmmov %vm9994_vm12 }
 0x2a7   :  { %v7450_v28 = vpop.xlane.xlu2 %1957  ;;  %v7453_v43 = vpop.eup %4361  ;;  %v7457_v12 = vadd.f32 1e-05, %v1938_v37  ;;  %v2060_v59 = vmul.f32 %v7445_v32, %v7400_v51  ;;  %v2439_v17 = vsel %vm9995_vm14, %v2435_v26, 0.0  ;;  %vm9996_vm14 = vmmov %vm9994_vm12  ;;  %vm2056_vm15 = vweird.f32 %v7442_v42 }
 0x2a8   :  { %v1954_v13 = vpop.xlane.xlu0 %1953  ;;  %v2040_v6 = vmul.f32 %v7453_v43, %v7406_v18  ;;  %v2014_v19 = vmul.f32 %v7412_v47, %v2013_v3  ;;  %v2051_v4 = vmul.f32 %v7442_v42, %v2050_v5  ;;  %v2028_v37 = vsel %vm7494_vm0, %v7393_v52, %v2024_v40 }
 0x2a9   :  { %4363 = vrsqrt.f32 %v7457_v12  ;;  %v2061_v3 = vmul.f32 %v7445_v32, %v2060_v59  ;;  %v2079_v5 = vmul.f32 %v2008_v7, %v7408_v2  ;;  %v2438_v52 = vmul.f32 %v2422_v11, %v2422_v11 }
 0x2aa   :  { %v2041_v8 = vmul.f32 %v7453_v43, %v2040_v6  ;;  %v2052_v38 = vmul.f32 0.5, %v2051_v4  ;;  %v2018_v53 = vsel %vm7503_vm10, %v7412_v47, %v2014_v19  ;;  %v2429_v6 = vsel %vm9996_vm14, %v2421_v60, 0.0 }
 0x2ab   :  { %2424 = vadd.xlane.f32.xlu1 %v2423_v58  ;;  %2427 = vadd.xlane.f32.xlu2 %v2426_v20  ;;  %v2437_v47 = vmul.f32 %v2421_v60, %v2421_v60  ;;  %vm2036_vm10 = vweird.f32 %v7402_v56  ;;  %v2080_v26 = vmul.f32 %v2018_v53, %v7410_v25  ;;  %v2034_v63 = vmul.f32 %v7402_v56, %v2033_v14 }
 0x2ac   :  { %v2042_v54 = vmul.f32 0.5, %v2041_v8  ;;  %2281 = vadd.xlane.f32.xlu0 %v2266_v31  ;;  %v2053_v20 = vsub.f32 1.5, %v2052_v38  ;;  %vm2046_vm7 = vweird.f32 %v7453_v43  ;;  %v2081_v2 = vmul.f32 %v2028_v37, %v1954_v13  ;;  %vm7539_vm0 = vmor %vm9997_vm6, %vm2036_vm10 }
 0x2ad   :  { %v2062_v19 = vmul.f32 0.5, %v2061_v3  ;;  %v2103_v4 = vmul.f32 %v4517_v15, %v2079_v5  ;;  %vm2055_vm12 = vweird.f32 %v7398_v21  ;;  %v2087_v27 = vmul.f32 %v2079_v5, %v7319_v22  ;;  %vm7560_vm6 = vmor %vm2045_vm11, %vm2046_vm7  ;;  %v4520_v15 = vld [vmem:[%s9545_s0 + $0x1a0] sm:$0xff] }
 0x2ae   :  { %v2043_v39 = vsub.f32 1.5, %v2042_v54  ;;  %v7515_v9 = vpop.xlane.xlu1 %1961  ;;  %v2054_v40 = vmul.f32 %v7442_v42, %v2053_v20  ;;  %vm7547_vm14 = vmor %vm2055_vm12, %vm2056_vm15  ;;  %vm10002_vm10 = vcmask 400384   ;;  %v2436_v54 = vmul.f32 %v7440_v1, %v7440_v1 }
 0x2af   :  { %v7518_v50 = vpop.xlane.xlu2 %1963  ;;  %v7520_v58 = vpop.eup %4363  ;;  %v2445_v7 = vsel %vm10002_vm10, %v2437_v47, 0.0  ;;  %v2038_v21 = vsel %vm7539_vm0, %v7402_v56, %v2034_v63  ;;  %v2088_v24 = vmul.f32 %v2080_v26, %v7335_v48  ;;  %v2089_v60 = vmul.f32 %v2081_v2, %v7331_v41  ;;  %vm10005_vm15 = vmmov %vm10002_vm10  ;;  %v4518_v48 = vld [vmem:[%s9545_s0 + $0x188] sm:$0xff]  ;;  %v4519_v41 = vld [vmem:[%s9545_s0 + $0x190] sm:$0xff] }
 0x2b0   :  { %v1960_v31 = vpop.xlane.xlu0 %1959  ;;  %v2070_v55 = vmul.f32 %v7520_v58, %v7457_v12  ;;  %v2044_v59 = vmul.f32 %v7453_v43, %v2043_v39  ;;  %v2448_v22 = vsel %vm10005_vm15, %v2438_v52, 0.0  ;;  %v2063_v0 = vsub.f32 1.5, %v2062_v19  ;;  %vm10006_vm0 = vmmov %vm10002_vm10 }
 0x2b1   :  { %v2058_v56 = vsel %vm7547_vm14, %v7442_v42, %v2054_v40  ;;  %v2105_v53 = vmul.f32 %v4519_v41, %v2081_v2  ;;  %v2082_v3 = vmul.f32 %v2038_v21, %v7448_v57  ;;  %vm2066_vm7 = vweird.f32 %v7445_v32  ;;  %vm10007_vm14 = vmmov %vm10006_vm0 }
 0x2b2   :  { %v2071_v8 = vmul.f32 %v7520_v58, %v2070_v55  ;;  %v2048_v1 = vsel %vm7560_vm6, %v7453_v43, %v2044_v59  ;;  %v2442_v5 = vsel %vm10006_vm0, %v2436_v54, 0.0  ;;  %v2064_v52 = vmul.f32 %v7445_v32, %v2063_v0  ;;  %vm10010_vm15 = vmmov %vm10006_vm0 }
 0x2b3   :  { %2433 = vadd.xlane.f32.xlu1 %v2432_v30  ;;  %2440 = vadd.xlane.f32.xlu2 %v2439_v17  ;;  %v2104_v17 = vmul.f32 %v4518_v48, %v2080_v26  ;;  %v2083_v20 = vmul.f32 %v2048_v1, %v7450_v28  ;;  %vm2076_vm11 = vweird.f32 %v7520_v58  ;;  %vm2065_vm12 = vweird.f32 %v7400_v51  ;;  %v4229_v51 = vld [vmem:[%s9546_s13 + $0x4] ss:$0 sm:$0xff] }
 0x2b4   :  { %v2072_v13 = vmul.f32 0.5, %v2071_v8  ;;  %2430 = vadd.xlane.f32.xlu0 %v2429_v6  ;;  %v2084_v6 = vmul.f32 %v2058_v56, %v1960_v31  ;;  %vm7593_vm10 = vmor %vm2065_vm12, %vm2066_vm7  ;;  %vm2075_vm6 = vweird.f32 %v7457_v12  ;;  %v2090_v40 = vmul.f32 %v2082_v3, %v7333_v34  ;;  %v4523_v56 = vld [vmem:[%s9545_s0 + $0x1b8] sm:$0xff] }
 0x2b5   :  { %vm7605_vm0 = vmor %vm2075_vm6, %vm2076_vm11  ;;  %v2091_v12 = vmul.f32 %v2083_v20, %v7362_v49  ;;  %v2068_v2 = vsel %vm7593_vm10, %v7445_v32, %v2064_v52  ;;  %v2474_v34 = vsel %vm4751_vm2, %v4229_v51, 0.0  ;;  %v2569_v52 = vld [vmem:[%s9549_s2 + $0x10] sm:$0xff] }
 0x2b6   :  { %v2073_v14 = vsub.f32 1.5, %v2072_v13  ;;  %v1978_v38 = vpop.xlane.xlu1 %1977  ;;  %vm10013_vm7 = vmmov %vm10007_vm14  ;;  %v2092_v31 = vmul.f32 %v2084_v6, %v7358_v33  ;;  %v4521_v33 = vld [vmem:[%s9545_s0 + $0x1a8] sm:$0xff] }
 0x2b7   :  { %v1980_v30 = vpop.xlane.xlu2 %1979  ;;  %v2096_v39 = vsub.f32 %v1978_v38, %v2088_v24  ;;  %v2108_v49 = vmul.f32 %v4521_v33, %v2084_v6  ;;  %v2473_v24 = vsel %vm4745_vm1, %v4229_v51, 0.0  ;;  %vm10014_vm11 = vmmov %vm10013_vm7 }
 0x2b8   :  { %v2097_v43 = vsub.f32 %v1980_v30, %v2089_v60  ;;  %v1976_v37 = vpop.xlane.xlu0 %1975  ;;  %v2074_v26 = vmul.f32 %v7520_v58, %v2073_v14  ;;  %v2085_v60 = vmul.f32 %v2068_v2, %v7515_v9  ;;  %vm10015_vm12 = vmmov %vm10013_vm7 }
 0x2b9   :  { %v2095_v42 = vsub.f32 %v1976_v37, %v2087_v27  ;;  %v2112_v47 = vadd.f32 %v2104_v17, %v2096_v39  ;;  %v4524_v17 = vld [vmem:[%s9545_s0 + $0x1b0] sm:$0xff]  ;;  %vm10017_vm10 = vmmov %vm10013_vm7 }
 0x2ba   :  { %v2113_v55 = vadd.f32 %v2105_v53, %v2097_v43  ;;  %v2078_v59 = vsel %vm7605_vm0, %v7520_v58, %v2074_v26  ;;  %v4522_v58 = vld [vmem:[%s9545_s0 + $0x198] sm:$0xff]  ;;  %v2093_v14 = vmul.f32 %v2085_v60, %v7360_v62  ;;  %v2109_v41 = vmul.f32 %v4524_v17, %v2085_v60  ;;  %vm10018_vm6 = vmmov %vm10013_vm7  ;;  %v7715_v60 = vld [vmem:[%s9546_s13 + $0x4] ss:$0 sm:$0xff] }
 0x2bb   :  { %v2111_v63 = vadd.f32 %v2103_v4, %v2095_v42  ;;  %2120 = vst.msk [vmem:[%s9547_s14 + $0x188] sm:$0xff] %vm10007_vm14, %v2112_v47  ;;  %2446 = vadd.xlane.f32.xlu1 %v2445_v7  ;;  %2449 = vadd.xlane.f32.xlu2 %v2448_v22  ;;  %v2107_v4 = vmul.f32 %v4520_v15, %v2083_v20  ;;  %v2475_v7 = vsel %vm4785_vm5, %v4229_v51, 0.0  ;;  %vm10016_vm14 = vmmov %vm10013_vm7  ;;  %v2476_v43 = vsel %vm4773_vm3, %v4229_v51, 0.0  ;;  %v2570_v26 = vld [vmem:[%s9549_s2 + $0x18] sm:$0xff]  ;;  %v2568_v51 = vld [vmem:[%s9549_s2 + $0x8] sm:$0xff] }
 0x2bc   :  { %2121 = vst.msk [vmem:[%s9547_s14 + $0x190] sm:$0xff] %vm10010_vm15, %v2113_v55  ;;  %2443 = vadd.xlane.f32.xlu0 %v2442_v5  ;;  %v2106_v11 = vmul.f32 %v4522_v58, %v2082_v3  ;;  %v2086_v54 = vmul.f32 %v2078_v59, %v7518_v50  ;;  %v4230_v50 = vld [vmem:[%s9546_s13 + $0xb] ss:$0 sm:$0xff]  ;;  %v2567_v3 = vld [vmem:[%s9549_s2] sm:$0xff]  ;;  %vm10019_vm15 = vmmov %vm10018_vm6 }
 0x2bd   :  { %2119 = vst.msk [vmem:[%s9547_s14 + $0x180] sm:$0xff] %vm10013_vm7, %v2111_v63  ;;  %v2488_v39 = vsel %vm4751_vm2, %v4230_v50, 0.0  ;;  %v2490_v6 = vsel %vm4773_vm3, %v4230_v50, 0.0  ;;  %v2571_v47 = vsel %vm10019_vm15, %v2567_v3, 0.0  ;;  %v2489_v55 = vsel %vm4785_vm5, %v4230_v50, 0.0  ;;  %vm10020_vm0 = vmmov %vm10018_vm6 }
 0x2be   :  { %v1984_v19 = vpop.xlane.xlu1 %1983  ;;  %v2094_v9 = vmul.f32 %v2086_v54, %v7396_v45  ;;  %v2110_v38 = vmul.f32 %v4523_v56, %v2086_v54  ;;  %v2487_v45 = vsel %vm4745_vm1, %v4230_v50, 0.0  ;;  %vm10021_vm7 = vmmov %vm10020_vm0  ;;  %v2583_v15 = vmul.f32 %v2567_v3, %v2567_v3  ;;  %v10027_v56 = vld [vmem:[#allocation3_spill] sm:$0xff] }
 0x2bf   :  { %v1986_v8 = vpop.xlane.xlu2 %1985  ;;  %v2099_v25 = vsub.f32 %v1984_v19, %v2091_v12  ;;  %v2577_v12 = vsel %vm10020_vm0, %v2569_v52, 0.0  ;;  %vm10032_vm15 = vmmov %vm10020_vm0 }
 0x2c0   :  { %v2100_v32 = vsub.f32 %v1986_v8, %v2092_v31  ;;  %v1982_v13 = vpop.xlane.xlu0 %1981  ;;  %v2580_v31 = vsel %vm10021_vm7, %v2570_v26, 0.0  ;;  %v2584_v8 = vmul.f32 %v2568_v51, %v2568_v51 }
 0x2c1   :  { %v2098_v27 = vsub.f32 %v1982_v13, %v2090_v40  ;;  %v2115_v21 = vadd.f32 %v2107_v4, %v2099_v25  ;;  %v2585_v40 = vmul.f32 %v2569_v52, %v2569_v52  ;;  %v10033_v52 = vld [vmem:[#allocation6_spill] sm:$0xff] }
 0x2c2   :  { %v2116_v18 = vadd.f32 %v2108_v49, %v2100_v32 }
 0x2c3   :  { %v2114_v22 = vadd.f32 %v2106_v11, %v2098_v27  ;;  %2123 = vst.msk [vmem:[%s9547_s14 + $0x1a0] sm:$0xff] %vm10014_vm11, %v2115_v21  ;;  %2479 = vadd.xlane.f32.xlu1 %v2474_v34  ;;  %2481 = vadd.xlane.f32.xlu2 %v2475_v7  ;;  %vm10022_vm11 = vmmov %vm10020_vm0  ;;  %v10026_v21 = vld [vmem:[#allocation4_spill] sm:$0xff] }
 0x2c4   :  { %2124 = vst.msk [vmem:[%s9547_s14 + $0x1a8] sm:$0xff] %vm10015_vm12, %v2116_v18  ;;  %2477 = vadd.xlane.f32.xlu0 %v2473_v24  ;;  %v2574_v2 = vsel %vm10022_vm11, %v2568_v51, 0.0  ;;  %vm10023_vm12 = vmmov %vm10020_vm0  ;;  %v2620_v18 = vadd.s32 32, %v10026_v21 }
 0x2c5   :  { %2122 = vst.msk [vmem:[%s9547_s14 + $0x198] sm:$0xff] %vm10016_vm14, %v2114_v22  ;;  %v2590_v11 = vsel %vm10023_vm12, %v2584_v8, 0.0  ;;  %vm10024_vm14 = vmmov %vm10020_vm0 }
 0x2c6   :  { %v1990_v1 = vpop.xlane.xlu1 %1989  ;;  %v2593_v27 = vsel %vm10024_vm14, %v2585_v40, 0.0 }
 0x2c7   :  { %v2137_v0 = vpop.xlane.xlu2 %2136  ;;  %v2102_v30 = vsub.f32 %v1990_v1, %v2094_v9 }
 0x2c8   :  { %v1988_v48 = vpop.xlane.xlu0 %1987  ;;  %v7698_v59 = vmul.f32 0.020408163, %v2137_v0 }
 0x2c9   :  { %v2101_v53 = vsub.f32 %v1988_v48, %v2093_v14  ;;  %v2118_v62 = vadd.f32 %v2110_v38, %v2102_v30  ;;  %v10028_v38 = vmov 0  ;;  %v2586_v30 = vmul.f32 %v2570_v26, %v2570_v26 }
 0x2ca   :  { %v2207_v49 = vmul.f32 %v7698_v59, %v7698_v59  ;;  %v2621_v26 = vadd.s32 32, %v10033_v52 }
 0x2cb   :  { %v2117_v37 = vadd.f32 %v2109_v41, %v2101_v53  ;;  %2126 = vst.msk [vmem:[%s9547_s14 + $0x1b8] sm:$0xff] %vm10017_vm10, %v2118_v62  ;;  %2491 = vadd.xlane.f32.xlu1 %v2487_v45  ;;  %2493 = vadd.xlane.f32.xlu2 %v2488_v39  ;;  %vm10025_vm10 = vmmov %vm10020_vm0  ;;  %v2627_v53 = vsel %vm4779_vm4, %v7715_v60, 0.0  ;;  %v10031_v45 = vld [vmem:[#allocation5_spill] sm:$0xff] }
 0x2cc   :  { %2483 = vadd.xlane.f32.xlu0 %v2476_v43  ;;  %v2587_v54 = vsel %vm10025_vm10, %v2583_v15, 0.0  ;;  %v2622_v39 = vadd.s32 32, %v10031_v45  ;;  %vm7774_vm7 = vcmp.eq.s32.totalorder %v10027_v56, %v2621_v26 }
 0x2cd   :  { %2125 = vst.msk [vmem:[%s9547_s14 + $0x1b0] sm:$0xff] %vm10018_vm6, %v2117_v37  ;;  %vm7726_vm6 = vcmp.eq.s32.totalorder %v10027_v56, %v2620_v18 }
 0x2ce   :  { %v2143_v42 = vpop.xlane.xlu1 %2142  ;;  %v10029_v38 = vsel %vm7726_vm6, 4294967295, %v10028_v38  ;;  %vm7750_vm0 = vcmp.eq.s32.totalorder %v10027_v56, %v2622_v39  ;;  %v2629_v39 = vsel %vm7774_vm7, %v7715_v60, 0.0 }
 0x2cf   :  { %v2146_v5 = vpop.xlane.xlu2 %2145  ;;  %v7719_v1 = vmul.f32 0.020408163, %v2143_v42  ;;  %10030 = vst [vmem:[#allocation7_spill] sm:$0xff] %v10029_v38 }
 0x2d0   :  { %v2140_v20 = vpop.xlane.xlu0 %2139  ;;  %v7710_v24 = vmul.f32 0.020408163, %v2146_v5 }
 0x2d1   :  { %v7700_v19 = vmul.f32 0.020408163, %v2140_v20  ;;  %v2209_v42 = vmul.f32 %v7719_v1, %v7719_v1  ;;  %v2628_v20 = vsel %vm7726_vm6, %v7715_v60, 0.0 }
 0x2d2   :  { %v2210_v48 = vmul.f32 %v7710_v24, %v7710_v24 }
 0x2d3   :  { %2497 = vadd.xlane.f32.xlu1 %v2490_v6  ;;  %2572 = vadd.xlane.f32.xlu2 %v2571_v47  ;;  %v2208_v25 = vmul.f32 %v7700_v19, %v7700_v19 }
 0x2d4   :  { %2495 = vadd.xlane.f32.xlu0 %v2489_v55  ;;  %v2596_v55 = vsel %vm10032_vm15, %v2586_v30, 0.0 }
 0x2d6   :  { %v7690_v63 = vpop.xlane.xlu1 %2151 }
 0x2d7   :  { %v2155_v57 = vpop.xlane.xlu2 %2154 }
 0x2d8   :  { %v2149_v28 = vpop.xlane.xlu0 %2148  ;;  %v7747_v51 = vmul.f32 0.020408163, %v2155_v57  ;;  %v7762_v57 = vmul.f32 0.020408163, %v7690_v63 }
 0x2d9   :  { %v7717_v22 = vmul.f32 0.020408163, %v2149_v28 }
 0x2da   :  { %v2213_v63 = vmul.f32 %v7747_v51, %v7747_v51  ;;  %v2212_v30 = vmul.f32 %v7762_v57, %v7762_v57 }
 0x2db   :  { %2578 = vadd.xlane.f32.xlu1 %v2577_v12  ;;  %2581 = vadd.xlane.f32.xlu2 %v2580_v31  ;;  %v2211_v62 = vmul.f32 %v7717_v22, %v7717_v22  ;;  %v10034_v12 = vmov 0  ;;  %v7757_v31 = vld [vmem:[%s9546_s13 + $0xb] ss:$0 sm:$0xff] }
 0x2dc   :  { %2575 = vadd.xlane.f32.xlu0 %v2574_v2  ;;  %v10035_v12 = vsel %vm7750_vm0, 4294967295, %v10034_v12 }
 0x2dd   :  { %10036 = vst [vmem:[#allocation8_spill] sm:$0xff] %v10035_v12 }
 0x2de   :  { %v2169_v4 = vpop.xlane.xlu1 %2168 }
 0x2df   :  { %v2172_v33 = vpop.xlane.xlu2 %2171  ;;  %v2199_v32 = vmul.f32 0.020408163, %v2169_v4 }
 0x2e0   :  { %v2200_v13 = vmul.f32 0.020408163, %v2172_v33  ;;  %v2158_v58 = vpop.xlane.xlu0 %2157 }
 0x2e1   :  { %v2215_v34 = vsub.f32 %v2199_v32, %v2207_v49  ;;  %v7759_v2 = vmul.f32 0.020408163, %v2158_v58  ;;  %v10037_v32 = vmov 0 }
 0x2e2   :  { %v2216_v7 = vsub.f32 %v2200_v13, %v2208_v25  ;;  %v2630_v25 = vsel %vm7750_vm0, %v7715_v60, 0.0  ;;  %v10038_v32 = vsel %vm7774_vm7, 4294967295, %v10037_v32 }
 0x2e3   :  { %v2223_v50 = vmax.f32 %v2215_v34, 0.0  ;;  %2591 = vadd.xlane.f32.xlu1 %v2590_v11  ;;  %2594 = vadd.xlane.f32.xlu2 %v2593_v27 }
 0x2e4   :  { %v2224_v9 = vmax.f32 %v2216_v7, 0.0  ;;  %2588 = vadd.xlane.f32.xlu0 %v2587_v54  ;;  %v2641_v7 = vsel %vm4779_vm4, %v7757_v31, 0.0  ;;  %v2214_v54 = vmul.f32 %v7759_v2, %v7759_v2  ;;  %vm10093_vm4 = vcmask 400384  }
 0x2e5   :  { %v7721_v0 = vadd.f32 1e-05, %v2223_v50 }
 0x2e6   :  { %v7723_v14 = vadd.f32 1e-05, %v2224_v9  ;;  %v2178_v17 = vpop.xlane.xlu1 %2177 }
 0x2e7   :  { %v2181_v41 = vpop.xlane.xlu2 %2180  ;;  %4365 = vrsqrt.f32 %v7721_v0  ;;  %v2202_v43 = vmul.f32 0.020408163, %v2178_v17  ;;  %vm2297_vm12 = vweird.f32 %v7721_v0 }
 0x2e8   :  { %v2203_v37 = vmul.f32 0.020408163, %v2181_v41  ;;  %v2175_v3 = vpop.xlane.xlu0 %2174  ;;  %4367 = vrsqrt.f32 %v7723_v14  ;;  %vm2307_vm10 = vweird.f32 %v7723_v14 }
 0x2e9   :  { %v2201_v5 = vmul.f32 0.020408163, %v2175_v3  ;;  %v2218_v6 = vsub.f32 %v2202_v43, %v2210_v48 }
 0x2ea   :  { %v2219_v47 = vsub.f32 %v2203_v37, %v2211_v62 }
 0x2eb   :  { %v2217_v28 = vsub.f32 %v2201_v5, %v2209_v42  ;;  %v2226_v8 = vmax.f32 %v2218_v6, 0.0  ;;  %2631 = vadd.xlane.f32.xlu1 %v2627_v53  ;;  %2633 = vadd.xlane.f32.xlu2 %v2628_v20 }
 0x2ec   :  { %v2227_v40 = vmax.f32 %v2219_v47, 0.0  ;;  %2597 = vadd.xlane.f32.xlu0 %v2596_v55 }
 0x2ed   :  { %v2225_v15 = vmax.f32 %v2217_v28, 0.0  ;;  %v7764_v4 = vpop.eup %4365  ;;  %v7766_v33 = vadd.f32 1e-05, %v2226_v8 }
 0x2ee   :  { %v7768_v49 = vadd.f32 1e-05, %v2227_v40  ;;  %v7778_v13 = vpop.eup %4367  ;;  %v2292_v58 = vmul.f32 %v7764_v4, %v7721_v0  ;;  %v2187_v27 = vpop.xlane.xlu1 %2186  ;;  %vm2298_vm11 = vweird.f32 %v7764_v4 }
 0x2ef   :  { %v7784_v11 = vadd.f32 1e-05, %v2225_v15  ;;  %v2190_v34 = vpop.xlane.xlu2 %2189  ;;  %4369 = vrsqrt.f32 %v7766_v33  ;;  %v2205_v18 = vmul.f32 0.020408163, %v2187_v27  ;;  %v2302_v48 = vmul.f32 %v7778_v13, %v7723_v14  ;;  %vm7855_vm14 = vmor %vm2297_vm12, %vm2298_vm11 }
 0x2f0   :  { %v2206_v50 = vmul.f32 0.020408163, %v2190_v34  ;;  %v2184_v9 = vpop.xlane.xlu0 %2183  ;;  %4371 = vrsqrt.f32 %v7768_v49  ;;  %v2293_v43 = vmul.f32 %v7764_v4, %v2292_v58  ;;  %v2643_v58 = vsel %vm7774_vm7, %v7757_v31, 0.0  ;;  %vm10041_vm11 = vmmov %vm10032_vm15 }
 0x2f1   :  { %v2204_v17 = vmul.f32 0.020408163, %v2184_v9  ;;  %4373 = vrsqrt.f32 %v7784_v11  ;;  %v2221_v41 = vsub.f32 %v2205_v18, %v2213_v63  ;;  %v2303_v5 = vmul.f32 %v7778_v13, %v2302_v48  ;;  %vm10042_vm12 = vmmov %vm10041_vm11 }
 0x2f2   :  { %v2222_v53 = vsub.f32 %v2206_v50, %v2214_v54  ;;  %v2294_v20 = vmul.f32 0.5, %v2293_v43  ;;  %v2642_v18 = vsel %vm7726_vm6, %v7757_v31, 0.0  ;;  %vm2317_vm6 = vweird.f32 %v7784_v11 }
 0x2f3   :  { %v2220_v62 = vsub.f32 %v2204_v17, %v2212_v30  ;;  %v2229_v37 = vmax.f32 %v2221_v41, 0.0  ;;  %2637 = vadd.xlane.f32.xlu1 %v2630_v25  ;;  %2645 = vadd.xlane.f32.xlu2 %v2641_v7  ;;  %v2304_v34 = vmul.f32 0.5, %v2303_v5  ;;  %v2644_v7 = vsel %vm7750_vm0, %v7757_v31, 0.0  ;;  %v2722_v31 = vld [vmem:[%s9550_s3 + $0x8] sm:$0xff] }
 0x2f4   :  { %v2230_v3 = vmax.f32 %v2222_v53, 0.0  ;;  %2635 = vadd.xlane.f32.xlu0 %v2629_v39  ;;  %v2295_v15 = vsub.f32 1.5, %v2294_v20  ;;  %v7848_v53 = vld [vmem:[%s9550_s3 + $0x10] sm:$0xff]  ;;  %v2721_v39 = vld [vmem:[%s9550_s3] sm:$0xff]  ;;  %v2738_v14 = vmul.f32 %v2722_v31, %v2722_v31 }
 0x2f5   :  { %v2228_v42 = vmax.f32 %v2220_v62, 0.0  ;;  %v7803_v6 = vpop.eup %4369  ;;  %v7805_v47 = vadd.f32 1e-05, %v2229_v37  ;;  %v2305_v48 = vsub.f32 1.5, %v2304_v34  ;;  %v2728_v34 = vsel %vm10032_vm15, %v2722_v31, 0.0 }
 0x2f6   :  { %v7807_v55 = vadd.f32 1e-05, %v2230_v3  ;;  %v7809_v26 = vpop.eup %4371  ;;  %v2322_v60 = vmul.f32 %v7803_v6, %v7766_v33  ;;  %v7815_v8 = vpop.xlane.xlu1 %2243  ;;  %v2296_v9 = vmul.f32 %v7764_v4, %v2295_v15  ;;  %vm10045_vm15 = vweird.f32 %v7803_v6 }
 0x2f7   :  { %v7813_v28 = vadd.f32 1e-05, %v2228_v42  ;;  %v7817_v40 = vpop.xlane.xlu2 %2245  ;;  %v7819_v25 = vpop.eup %4373  ;;  %4375 = vrsqrt.f32 %v7805_v47  ;;  %v2332_v54 = vmul.f32 %v7809_v26, %v7768_v49 }
 0x2f8   :  { %v2242_v63 = vpop.xlane.xlu0 %2241  ;;  %v2312_v27 = vmul.f32 %v7819_v25, %v7784_v11  ;;  %4377 = vrsqrt.f32 %v7807_v55  ;;  %v2323_v30 = vmul.f32 %v7803_v6, %v2322_v60  ;;  %v2300_v5 = vsel %vm7855_vm14, %v7764_v4, %v2296_v9 }
 0x2f9   :  { %4379 = vrsqrt.f32 %v7813_v28  ;;  %v2333_v0 = vmul.f32 %v7809_v26, %v2332_v54  ;;  %v2725_v54 = vsel %vm10042_vm12, %v2721_v39, 0.0  ;;  %vm2308_vm14 = vweird.f32 %v7778_v13 }
 0x2fa   :  { %v2313_v50 = vmul.f32 %v7819_v25, %v2312_v27  ;;  %v2324_v41 = vmul.f32 0.5, %v2323_v30  ;;  %v2371_v9 = vmul.f32 %v2300_v5, %v2242_v63  ;;  %vm2327_vm12 = vweird.f32 %v7766_v33 }
 0x2fb   :  { %2649 = vadd.xlane.f32.xlu1 %v2643_v58  ;;  %2651 = vadd.xlane.f32.xlu2 %v2644_v7  ;;  %v2731_v7 = vsel %vm10041_vm11, %v7848_v53, 0.0  ;;  %v2334_v30 = vmul.f32 0.5, %v2333_v0  ;;  %vm7895_vm11 = vmor %vm2307_vm10, %vm2308_vm14  ;;  %v2737_v0 = vmul.f32 %v2721_v39, %v2721_v39  ;;  %vm10048_vm10 = vcmask 400384  }
 0x2fc   :  { %v2314_v17 = vmul.f32 0.5, %v2313_v50  ;;  %2647 = vadd.xlane.f32.xlu0 %v2642_v18  ;;  %v2325_v15 = vsub.f32 1.5, %v2324_v41  ;;  %v2306_v18 = vmul.f32 %v7778_v13, %v2305_v48  ;;  %v2724_v41 = vld [vmem:[%s9550_s3 + $0x18] sm:$0xff]  ;;  %vm7903_vm0 = vmor %vm2327_vm12, %vm10045_vm15  ;;  %vm10049_vm14 = vweird.f32 %v7819_v25 }
 0x2fd   :  { %v7853_v62 = vpop.eup %4375  ;;  %v2734_v5 = vsel %vm10048_vm10, %v2724_v41, 0.0  ;;  %vm7913_vm7 = vmor %vm2317_vm6, %vm10049_vm14  ;;  %v2335_v11 = vsub.f32 1.5, %v2334_v30  ;;  %vm2337_vm6 = vweird.f32 %v7768_v49  ;;  %v2740_v49 = vmul.f32 %v2724_v41, %v2724_v41 }
 0x2fe   :  { %v7860_v37 = vpop.eup %4377  ;;  %v2352_v3 = vmul.f32 %v7853_v62, %v7805_v47  ;;  %v2315_v42 = vsub.f32 1.5, %v2314_v17  ;;  %v7867_v20 = vpop.xlane.xlu1 %2249  ;;  %v2326_v38 = vmul.f32 %v7803_v6, %v2325_v15  ;;  %v2310_v33 = vsel %vm7895_vm11, %v7778_v13, %v2306_v18  ;;  %v4525_v18 = vld [vmem:[%s9545_s0 + $0x1c0] sm:$0xff]  ;;  %vm10052_vm15 = vmmov %vm10048_vm10 }
 0x2ff   :  { %v7869_v60 = vpop.xlane.xlu2 %2251  ;;  %v7871_v58 = vpop.eup %4379  ;;  %v2362_v50 = vmul.f32 %v7860_v37, %v7807_v55  ;;  %vm10053_vm11 = vmmov %vm10048_vm10 }
 0x300   :  { %v2248_v27 = vpop.xlane.xlu0 %2247  ;;  %v2342_v4 = vmul.f32 %v7871_v58, %v7813_v28  ;;  %v2353_v17 = vmul.f32 %v7853_v62, %v2352_v3  ;;  %v2316_v43 = vmul.f32 %v7819_v25, %v2315_v42  ;;  %v2330_v12 = vsel %vm7903_vm0, %v7803_v6, %v2326_v38  ;;  %vm10056_vm14 = vmmov %vm10053_vm11 }
 0x301   :  { %v2363_v15 = vmul.f32 %v7860_v37, %v2362_v50  ;;  %v2395_v50 = vmul.f32 %v4525_v18, %v2371_v9  ;;  %vm2358_vm0 = vweird.f32 %v7853_v62  ;;  %v2744_v38 = vsel %vm10053_vm11, %v2738_v14, 0.0 }
 0x302   :  { %v2343_v48 = vmul.f32 %v7871_v58, %v2342_v4  ;;  %v2354_v63 = vmul.f32 0.5, %v2353_v17  ;;  %v2320_v31 = vsel %vm7913_vm7, %v7819_v25, %v2316_v43  ;;  %v2741_v25 = vsel %vm10052_vm15, %v2737_v0, 0.0 }
 0x303   :  { %2729 = vadd.xlane.f32.xlu1 %v2728_v34  ;;  %2732 = vadd.xlane.f32.xlu2 %v2731_v7  ;;  %v2379_v34 = vmul.f32 %v2371_v9, %v7698_v59  ;;  %v2372_v17 = vmul.f32 %v2310_v33, %v7815_v8  ;;  %vm2338_vm7 = vweird.f32 %v7809_v26  ;;  %v2373_v6 = vmul.f32 %v2320_v31, %v7817_v40  ;;  %v4530_v8 = vld [vmem:[%s9545_s0 + $0x1f0] sm:$0xff] }
 0x304   :  { %v2344_v3 = vmul.f32 0.5, %v2343_v48  ;;  %2726 = vadd.xlane.f32.xlu0 %v2725_v54  ;;  %v2355_v4 = vsub.f32 1.5, %v2354_v63  ;;  %v2336_v43 = vmul.f32 %v7809_v26, %v2335_v11  ;;  %v2374_v48 = vmul.f32 %v2330_v12, %v2248_v27  ;;  %vm7943_vm10 = vmor %vm2337_vm6, %vm2338_vm7  ;;  %v7962_v27 = vld [vmem:[%s9546_s13 + $0x4] ss:$0 sm:$0xff] }
 0x305   :  { %vm2357_vm15 = vweird.f32 %v7805_v47  ;;  %vm2347_vm11 = vweird.f32 %v7813_v28  ;;  %v2739_v47 = vmul.f32 %v7848_v53, %v7848_v53  ;;  %v4526_v28 = vld [vmem:[%s9545_s0 + $0x1c8] sm:$0xff]  ;;  %vm10059_vm6 = vweird.f32 %v7871_v58 }
 0x306   :  { %v2345_v7 = vsub.f32 1.5, %v2344_v3  ;;  %v7925_v13 = vpop.xlane.xlu1 %2255  ;;  %v2364_v3 = vmul.f32 0.5, %v2363_v15  ;;  %v2356_v0 = vmul.f32 %v7853_v62, %v2355_v4  ;;  %vm7955_vm12 = vmor %vm2357_vm15, %vm2358_vm0  ;;  %v2396_v42 = vmul.f32 %v4526_v28, %v2372_v17 }
 0x307   :  { %v2268_v54 = vpop.xlane.xlu2 %2267  ;;  %vm7971_vm7 = vmor %vm2347_vm11, %vm10059_vm6  ;;  %v2381_v41 = vmul.f32 %v2373_v6, %v7719_v1  ;;  %v2380_v33 = vmul.f32 %v2372_v17, %v7700_v19  ;;  %v2340_v53 = vsel %vm7943_vm10, %v7809_v26, %v2336_v43  ;;  %v4528_v1 = vld [vmem:[%s9545_s0 + $0x1d8] sm:$0xff]  ;;  %vm2368_vm10 = vweird.f32 %v7860_v37 }
 0x308   :  { %v2387_v59 = vsub.f32 %v2268_v54, %v2379_v34  ;;  %v2254_v30 = vpop.xlane.xlu0 %2253  ;;  %v2346_v63 = vmul.f32 %v7871_v58, %v2345_v7  ;;  %v2365_v11 = vsub.f32 1.5, %v2364_v3  ;;  %v2360_v15 = vsel %vm7955_vm12, %v7853_v62, %v2356_v0  ;;  %vm10062_vm0 = vmmov %vm10056_vm14  ;;  %v4529_v3 = vld [vmem:[%s9545_s0 + $0x1e8] sm:$0xff] }
 0x309   :  { %v2398_v26 = vmul.f32 %v4528_v1, %v2374_v48  ;;  %v2750_v4 = vsel %vm10062_vm0, %v2740_v49, 0.0  ;;  %v2775_v62 = vsel %vm9978_vm13, %v7962_v27, 0.0  ;;  %vm10063_vm12 = vmmov %vm10062_vm0  ;;  %vm2367_vm15 = vweird.f32 %v7807_v55 }
 0x30a   :  { %v2403_v9 = vadd.f32 %v2395_v50, %v2387_v59  ;;  %v2350_v39 = vsel %vm7971_vm7, %v7871_v58, %v2346_v63  ;;  %v2747_v18 = vsel %vm10063_vm12, %v2739_v47, 0.0  ;;  %v2377_v59 = vmul.f32 %v2360_v15, %v2254_v30  ;;  %vm10065_vm11 = vmmov %vm10062_vm0 }
 0x30b   :  { %2742 = vadd.xlane.f32.xlu1 %v2741_v25  ;;  %2745 = vadd.xlane.f32.xlu2 %v2744_v38  ;;  %v2376_v50 = vmul.f32 %v2350_v39, %v7869_v60  ;;  %v2375_v38 = vmul.f32 %v2340_v53, %v7867_v20  ;;  %vm8011_vm6 = vmor %vm2367_vm15, %vm2368_vm10 }
 0x30c   :  { %2411 = vst.msk [vmem:[%s9547_s14 + $0x1c0] sm:$0xff] %vm10056_vm14, %v2403_v9  ;;  %2735 = vadd.xlane.f32.xlu0 %v2734_v5  ;;  %v2382_v5 = vmul.f32 %v2374_v48, %v7710_v24  ;;  %v4527_v24 = vld [vmem:[%s9545_s0 + $0x1d0] sm:$0xff]  ;;  %vm10064_vm14 = vmmov %vm10062_vm0  ;;  %v2385_v30 = vmul.f32 %v2377_v59, %v7747_v51 }
 0x30d   :  { %v2397_v19 = vmul.f32 %v4527_v24, %v2373_v6  ;;  %v2366_v6 = vmul.f32 %v7860_v37, %v2365_v11  ;;  %vm10068_vm7 = vmmov %vm10062_vm0  ;;  %v2384_v60 = vmul.f32 %v2376_v50, %v7762_v57  ;;  %v2383_v63 = vmul.f32 %v2375_v38, %v7717_v22 }
 0x30e   :  { %v2272_v34 = vpop.xlane.xlu1 %2271  ;;  %v2400_v0 = vmul.f32 %v4529_v3, %v2376_v50  ;;  %v2401_v57 = vmul.f32 %v4530_v8, %v2377_v59  ;;  %v2777_v22 = vsel %vm9977_vm9, %v7962_v27, 0.0  ;;  %vm10069_vm0 = vnez %v9792_v16  ;;  %vm10070_vm12 = vmmov %vm10068_vm7 }
 0x30f   :  { %v2274_v31 = vpop.xlane.xlu2 %2273  ;;  %v2389_v7 = vsub.f32 %v2272_v34, %v2381_v41  ;;  %v2370_v55 = vsel %vm8011_vm6, %v7860_v37, %v2366_v6  ;;  %v4531_v37 = vld [vmem:[%s9545_s0 + $0x1e0] sm:$0xff]  ;;  %vm10071_vm10 = vmmov %vm10068_vm7  ;;  %v4532_v34 = vld [vmem:[%s9545_s0 + $0x1f8] sm:$0xff] }
 0x310   :  { %v2390_v12 = vsub.f32 %v2274_v31, %v2382_v5  ;;  %v2270_v58 = vpop.xlane.xlu0 %2269  ;;  %v2399_v47 = vmul.f32 %v4531_v37, %v2375_v38  ;;  %v2776_v5 = vsel %vm10069_vm0, %v7962_v27, 0.0  ;;  %vm10073_vm15 = vmmov %vm10068_vm7 }
 0x311   :  { %v2388_v54 = vsub.f32 %v2270_v58, %v2380_v33  ;;  %v2405_v25 = vadd.f32 %v2397_v19, %v2389_v7  ;;  %v2378_v33 = vmul.f32 %v2370_v55, %v7925_v13  ;;  %v2869_v58 = vld [vmem:[%s9551_s4] sm:$0xff]  ;;  %vm10075_vm6 = vmmov %vm10068_vm7 }
 0x312   :  { %v2406_v17 = vadd.f32 %v2398_v26, %v2390_v12 }
 0x313   :  { %v2404_v43 = vadd.f32 %v2396_v42, %v2388_v54  ;;  %2413 = vst.msk [vmem:[%s9547_s14 + $0x1d0] sm:$0xff] %vm10064_vm14, %v2405_v25  ;;  %2751 = vadd.xlane.f32.xlu1 %v2750_v4  ;;  %2779 = vadd.xlane.f32.xlu2 %v2775_v62  ;;  %v2778_v42 = vsel %vm9981_vm8, %v7962_v27, 0.0  ;;  %v4234_v27 = vld [vmem:[%s9546_s13 + $0xb] ss:$0 sm:$0xff]  ;;  %vm10072_vm14 = vmmov %vm10068_vm7  ;;  %v2386_v11 = vmul.f32 %v2378_v33, %v7759_v2 }
 0x314   :  { %2414 = vst.msk [vmem:[%s9547_s14 + $0x1d8] sm:$0xff] %vm10065_vm11, %v2406_v17  ;;  %2748 = vadd.xlane.f32.xlu0 %v2747_v18  ;;  %v2402_v31 = vmul.f32 %v4532_v34, %v2378_v33  ;;  %v2790_v19 = vsel %vm10069_vm0, %v4234_v27, 0.0  ;;  %v2791_v1 = vsel %vm9977_vm9, %v4234_v27, 0.0  ;;  %v2789_v7 = vsel %vm9978_vm13, %v4234_v27, 0.0  ;;  %v2870_v54 = vld [vmem:[%s9551_s4 + $0x8] sm:$0xff]  ;;  %vm10074_vm11 = vmmov %vm10068_vm7 }
 0x315   :  { %2412 = vst.msk [vmem:[%s9547_s14 + $0x1c8] sm:$0xff] %vm10068_vm7, %v2404_v43  ;;  %v2873_v59 = vsel %vm10074_vm11, %v2869_v58, 0.0  ;;  %v2876_v25 = vsel %vm10075_vm6, %v2870_v54, 0.0  ;;  %v2792_v6 = vsel %vm9981_vm8, %v4234_v27, 0.0  ;;  %vm10076_vm7 = vmmov %vm10075_vm6  ;;  %v2886_v34 = vmul.f32 %v2870_v54, %v2870_v54 }
 0x316   :  { %v2278_v48 = vpop.xlane.xlu1 %2277  ;;  %v2923_v54 = vadd.s32 96, %v10026_v21  ;;  %vm10081_vm11 = vmmov %vm10075_vm6 }
 0x317   :  { %v2280_v9 = vpop.xlane.xlu2 %2279  ;;  %v2392_v40 = vsub.f32 %v2278_v48, %v2384_v60 }
 0x318   :  { %v2393_v51 = vsub.f32 %v2280_v9, %v2385_v30  ;;  %v2276_v49 = vpop.xlane.xlu0 %2275  ;;  %v2885_v30 = vmul.f32 %v2869_v58, %v2869_v58  ;;  %v2872_v9 = vld [vmem:[%s9551_s4 + $0x18] sm:$0xff] }
 0x319   :  { %v2391_v28 = vsub.f32 %v2276_v49, %v2383_v63  ;;  %v2408_v14 = vadd.f32 %v2400_v0, %v2392_v40  ;;  %v2871_v0 = vld [vmem:[%s9551_s4 + $0x10] sm:$0xff]  ;;  %v2888_v27 = vmul.f32 %v2872_v9, %v2872_v9 }
 0x31a   :  { %v2409_v41 = vadd.f32 %v2401_v57, %v2393_v51 }
 0x31b   :  { %v2407_v53 = vadd.f32 %v2399_v47, %v2391_v28  ;;  %2416 = vst.msk [vmem:[%s9547_s14 + $0x1e8] sm:$0xff] %vm10070_vm12, %v2408_v14  ;;  %2783 = vadd.xlane.f32.xlu1 %v2777_v22  ;;  %2785 = vadd.xlane.f32.xlu2 %v2778_v42  ;;  %v2882_v47 = vsel %vm10076_vm7, %v2872_v9, 0.0  ;;  %vm10077_vm12 = vmmov %vm10075_vm6  ;;  %vm8137_vm7 = vcmp.eq.s32.totalorder %v10027_v56, %v2923_v54 }
 0x31c   :  { %2417 = vst.msk [vmem:[%s9547_s14 + $0x1f0] sm:$0xff] %vm10071_vm10, %v2409_v41  ;;  %2781 = vadd.xlane.f32.xlu0 %v2776_v5  ;;  %v2889_v28 = vsel %vm10077_vm12, %v2885_v30, 0.0  ;;  %vm10078_vm10 = vmmov %vm10075_vm6 }
 0x31d   :  { %2415 = vst.msk [vmem:[%s9547_s14 + $0x1e0] sm:$0xff] %vm10072_vm14, %v2407_v53  ;;  %v2879_v14 = vsel %vm10078_vm10, %v2871_v0, 0.0  ;;  %v2887_v53 = vmul.f32 %v2871_v0, %v2871_v0  ;;  %vm10079_vm14 = vmmov %vm10075_vm6 }
 0x31e   :  { %v2425_v13 = vpop.xlane.xlu1 %2424 }
 0x31f   :  { %v2428_v39 = vpop.xlane.xlu2 %2427  ;;  %v8067_v26 = vmul.f32 0.020408163, %v2425_v13 }
 0x320   :  { %v2282_v15 = vpop.xlane.xlu0 %2281  ;;  %v8091_v60 = vmul.f32 0.020408163, %v2428_v39 }
 0x321   :  { %v2394_v24 = vsub.f32 %v2282_v15, %v2386_v11  ;;  %v2459_v2 = vmul.f32 %v8067_v26, %v8067_v26 }
 0x322   :  { %v2460_v49 = vmul.f32 %v8091_v60, %v8091_v60 }
 0x323   :  { %v2410_v12 = vadd.f32 %v2402_v31, %v2394_v24  ;;  %2795 = vadd.xlane.f32.xlu1 %v2790_v19  ;;  %2797 = vadd.xlane.f32.xlu2 %v2791_v1 }
 0x324   :  { %2793 = vadd.xlane.f32.xlu0 %v2789_v7 }
 0x325   :  { %2418 = vst.msk [vmem:[%s9547_s14 + $0x1f8] sm:$0xff] %vm10073_vm15, %v2410_v12  ;;  %v2895_v12 = vsel %vm10079_vm14, %v2887_v53, 0.0  ;;  %vm10080_vm15 = vmmov %vm10075_vm6  ;;  %v8171_v53 = vld [vmem:[%s9546_s13 + $0xb] ss:$0 sm:$0xff] }
 0x326   :  { %v2434_v4 = vpop.xlane.xlu1 %2433 }
 0x327   :  { %v2441_v62 = vpop.xlane.xlu2 %2440  ;;  %v8085_v17 = vmul.f32 0.020408163, %v2434_v4  ;;  %v2924_v4 = vadd.s32 96, %v10033_v52  ;;  %v10085_v52 = vmov 0 }
 0x328   :  { %v2455_v18 = vmul.f32 0.020408163, %v2441_v62  ;;  %v2431_v50 = vpop.xlane.xlu0 %2430  ;;  %v2892_v62 = vsel %vm10081_vm11, %v2886_v34, 0.0 }
 0x329   :  { %v8089_v20 = vmul.f32 0.020408163, %v2431_v50  ;;  %v2462_v55 = vmul.f32 %v8085_v17, %v8085_v17  ;;  %v10082_v50 = vld [vmem:[#allocation2_spill] sm:$0xff]  ;;  %vm8142_vm12 = vcmp.eq.s32.totalorder %v10027_v56, %v2924_v4 }
 0x32a   :  { %v2463_v38 = vsub.f32 %v2455_v18, %v2459_v2  ;;  %v2898_v2 = vsel %vm10080_vm15, %v2888_v27, 0.0  ;;  %v10086_v52 = vsel %vm8142_vm12, 4294967295, %v10085_v52 }
 0x32b   :  { %2874 = vadd.xlane.f32.xlu1 %v2873_v59  ;;  %2877 = vadd.xlane.f32.xlu2 %v2876_v25  ;;  %v2461_v8 = vmul.f32 %v8089_v20, %v8089_v20  ;;  %v2922_v59 = vadd.s32 96, %v10082_v50  ;;  %v8134_v25 = vld [vmem:[%s9546_s13 + $0x4] ss:$0 sm:$0xff] }
 0x32c   :  { %v2467_v43 = vmax.f32 %v2463_v38, 0.0  ;;  %2799 = vadd.xlane.f32.xlu0 %v2792_v6 }
 0x32d   :  { %vm8151_vm14 = vcmp.eq.s32.totalorder %v10027_v56, %v2922_v59 }
 0x32e   :  { %v8095_v48 = vadd.f32 1e-05, %v2467_v43  ;;  %v2447_v63 = vpop.xlane.xlu1 %2446 }
 0x32f   :  { %v2450_v3 = vpop.xlane.xlu2 %2449  ;;  %v2457_v57 = vmul.f32 0.020408163, %v2447_v63 }
 0x330   :  { %4381 = vrsqrt.f32 %v8095_v48  ;;  %v2458_v40 = vmul.f32 0.020408163, %v2450_v3  ;;  %v2444_v51 = vpop.xlane.xlu0 %2443  ;;  %vm2509_vm10 = vweird.f32 %v8095_v48 }
 0x331   :  { %v2456_v37 = vmul.f32 0.020408163, %v2444_v51  ;;  %v2465_v22 = vsub.f32 %v2457_v57, %v2461_v8 }
 0x332   :  { %v2466_v42 = vsub.f32 %v2458_v40, %v2462_v55  ;;  %v2932_v40 = vsel %vm8137_vm7, %v8134_v25, 0.0 }
 0x333   :  { %v2464_v41 = vsub.f32 %v2456_v37, %v2460_v49  ;;  %v2469_v5 = vmax.f32 %v2465_v22, 0.0  ;;  %2883 = vadd.xlane.f32.xlu1 %v2882_v47  ;;  %2890 = vadd.xlane.f32.xlu2 %v2889_v28  ;;  %v2925_v47 = vadd.s32 96, %v10031_v45 }
 0x334   :  { %v2470_v33 = vmax.f32 %v2466_v42, 0.0  ;;  %2880 = vadd.xlane.f32.xlu0 %v2879_v14  ;;  %v2931_v42 = vsel %vm8151_vm14, %v8134_v25, 0.0 }
 0x335   :  { %v2468_v13 = vmax.f32 %v2464_v41, 0.0  ;;  %v8111_v11 = vadd.f32 1e-05, %v2469_v5 }
 0x336   :  { %v4382_v39 = vpop.eup %4381  ;;  %v8113_v15 = vadd.f32 1e-05, %v2470_v33  ;;  %v8118_v19 = vpop.xlane.xlu1 %2479 }
 0x337   :  { %v2504_v31 = vmul.f32 %v4382_v39, %v8095_v48  ;;  %v8116_v24 = vadd.f32 1e-05, %v2468_v13  ;;  %v8120_v1 = vpop.xlane.xlu2 %2481  ;;  %4383 = vrsqrt.f32 %v8111_v11  ;;  %vm2510_vm6 = vweird.f32 %v4382_v39 }
 0x338   :  { %v2478_v7 = vpop.xlane.xlu0 %2477  ;;  %4385 = vrsqrt.f32 %v8113_v15  ;;  %vm2511_vm15 = vmor %vm2509_vm10, %vm2510_vm6  ;;  %v2933_v48 = vsel %vm8142_vm12, %v8134_v25, 0.0  ;;  %vm8174_vm6 = vcmp.eq.s32.totalorder %v10027_v56, %v2925_v47  ;;  %v10089_v13 = vmov 0 }
 0x339   :  { %v2505_v58 = vmul.f32 %v4382_v39, %v2504_v31  ;;  %4387 = vrsqrt.f32 %v8116_v24  ;;  %v10090_v13 = vsel %vm8174_vm6, 4294967295, %v10089_v13  ;;  %vm2529_vm8 = vweird.f32 %v8111_v11 }
 0x33a   :  { %vm2539_vm9 = vweird.f32 %v8113_v15  ;;  %vm2519_vm10 = vweird.f32 %v8116_v24 }
 0x33b   :  { %v2506_v18 = vmul.f32 0.5, %v2505_v58  ;;  %2896 = vadd.xlane.f32.xlu1 %v2895_v12  ;;  %2899 = vadd.xlane.f32.xlu2 %v2898_v2 }
 0x33c   :  { %2893 = vadd.xlane.f32.xlu0 %v2892_v62  ;;  %v2945_v62 = vsel %vm8151_vm14, %v8171_v53, 0.0 }
 0x33d   :  { %v2507_v38 = vsub.f32 1.5, %v2506_v18  ;;  %v4384_v6 = vpop.eup %4383 }
 0x33e   :  { %v4386_v43 = vpop.eup %4385  ;;  %v2524_v30 = vmul.f32 %v4384_v6, %v8111_v11  ;;  %v2492_v9 = vpop.xlane.xlu1 %2491  ;;  %vm2530_vm11 = vweird.f32 %v4384_v6  ;;  %v2946_v11 = vsel %vm8137_vm7, %v8171_v53, 0.0 }
 0x33f   :  { %v2508_v55 = vmul.f32 %v4382_v39, %v2507_v38  ;;  %v8148_v63 = vpop.xlane.xlu2 %2493  ;;  %v4388_v0 = vpop.eup %4387  ;;  %v2534_v8 = vmul.f32 %v4386_v43, %v8113_v15  ;;  %vm2531_vm13 = vmor %vm2529_vm8, %vm2530_vm11 }
 0x340   :  { %v2484_v57 = vpop.xlane.xlu0 %2483  ;;  %v2514_v51 = vmul.f32 %v4388_v0, %v8116_v24  ;;  %v2525_v49 = vmul.f32 %v4384_v6, %v2524_v30  ;;  %vm10092_vm8 = vweird.f32 %v4388_v0  ;;  %v2934_v24 = vsel %vm8174_vm6, %v8134_v25, 0.0  ;;  %v3025_v25 = vld [vmem:[%s9552_s5] sm:$0xff] }
 0x341   :  { %v2512_v37 = vsel %vm2511_vm15, %v4382_v39, %v2508_v55  ;;  %v2535_v22 = vmul.f32 %v4386_v43, %v2534_v8  ;;  %vm10091_vm15 = vweird.f32 %v4386_v43  ;;  %vm2521_vm11 = vmor %vm2519_vm10, %vm10092_vm8 }
 0x342   :  { %v2543_v28 = vmul.f32 %v2512_v37, %v2478_v7  ;;  %v2515_v14 = vmul.f32 %v4388_v0, %v2514_v51  ;;  %v2526_v41 = vmul.f32 0.5, %v2525_v49  ;;  %vm2541_vm0 = vmor %vm2539_vm9, %vm10091_vm15 }
 0x343   :  { %v2536_v33 = vmul.f32 0.5, %v2535_v22  ;;  %2937 = vadd.xlane.f32.xlu1 %v2932_v40  ;;  %2939 = vadd.xlane.f32.xlu2 %v2933_v48  ;;  %v4536_v48 = vld [vmem:[%s9548_s1 + $0x8] sm:$0xff]  ;;  %v3029_v22 = vsel %vm10093_vm4, %v3025_v25, 0.0  ;;  %vm10094_vm9 = vmmov %vm10093_vm4 }
 0x344   :  { %v2547_v5 = vmul.f32 %v2543_v28, %v8067_v26  ;;  %v2516_v27 = vmul.f32 0.5, %v2515_v14  ;;  %v2527_v45 = vsub.f32 1.5, %v2526_v41  ;;  %2935 = vadd.xlane.f32.xlu0 %v2931_v42  ;;  %v4533_v26 = vld [vmem:[%s9548_s1] sm:$0xff] }
 0x345   :  { %v2555_v39 = vmul.f32 %v4533_v26, %v2543_v28  ;;  %v2537_v31 = vsub.f32 1.5, %v2536_v33  ;;  %v2948_v28 = vsel %vm8174_vm6, %v8171_v53, 0.0 }
 0x346   :  { %v2551_v34 = vsub.f32 %v2492_v9, %v2547_v5  ;;  %v2517_v7 = vsub.f32 1.5, %v2516_v27  ;;  %v2528_v12 = vmul.f32 %v4384_v6, %v2527_v45  ;;  %v2498_v2 = vpop.xlane.xlu1 %2497  ;;  %v4534_v9 = vld [vmem:[%s9548_s1 + $0x10] sm:$0xff]  ;;  %v3028_v27 = vld [vmem:[%s9552_s5 + $0x18] sm:$0xff] }
 0x347   :  { %v2573_v58 = vpop.xlane.xlu2 %2572  ;;  %v2538_v54 = vmul.f32 %v4386_v43, %v2537_v31 }
 0x348   :  { %v2559_v56 = vadd.f32 %v2555_v39, %v2551_v34  ;;  %v2496_v4 = vpop.xlane.xlu0 %2495  ;;  %v2518_v18 = vmul.f32 %v4388_v0, %v2517_v7  ;;  %v2532_v50 = vsel %vm2531_vm13, %v4384_v6, %v2528_v12  ;;  %vm10095_vm13 = vmmov %vm10093_vm4  ;;  %v8240_v5 = vmul.f32 0.020408163, %v2573_v58  ;;  %v3026_v39 = vld [vmem:[%s9552_s5 + $0x8] sm:$0xff] }
 0x349   :  { %v2545_v59 = vmul.f32 %v2532_v50, %v8120_v1  ;;  %v2542_v15 = vsel %vm2541_vm0, %v4386_v43, %v2538_v54  ;;  %vm10096_vm0 = vmmov %vm10093_vm4 }
 0x34a   :  { %2563 = vst.msk [vmem:[%s9547_s14 + $0x200] sm:$0xff] %vm10093_vm4, %v2559_v56  ;;  %v2522_v38 = vsel %vm2521_vm11, %v4388_v0, %v2518_v18  ;;  %v2546_v6 = vmul.f32 %v2542_v15, %v2484_v57  ;;  %vm10097_vm10 = vmmov %vm10096_vm0  ;;  %v3042_v15 = vmul.f32 %v3026_v39, %v3026_v39 }
 0x34b   :  { %v2544_v30 = vmul.f32 %v2522_v38, %v8118_v19  ;;  %v2549_v55 = vmul.f32 %v2545_v59, %v8089_v20  ;;  %2949 = vadd.xlane.f32.xlu1 %v2945_v62  ;;  %2951 = vadd.xlane.f32.xlu2 %v2946_v11  ;;  %v2557_v43 = vmul.f32 %v4534_v9, %v2545_v59  ;;  %v4535_v20 = vld [vmem:[%s9548_s1 + $0x18] sm:$0xff]  ;;  %vm10098_vm15 = vmmov %vm10096_vm0 }
 0x34c   :  { %v2550_v1 = vmul.f32 %v2546_v6, %v8085_v17  ;;  %2941 = vadd.xlane.f32.xlu0 %v2934_v24  ;;  %v2558_v19 = vmul.f32 %v4535_v20, %v2546_v6  ;;  %v3038_v54 = vsel %vm10098_vm15, %v3028_v27, 0.0  ;;  %vm10099_vm8 = vmmov %vm10096_vm0 }
 0x34d   :  { %v2548_v8 = vmul.f32 %v2544_v30, %v8091_v60  ;;  %v2553_v40 = vsub.f32 %v2496_v4, %v2549_v55  ;;  %v2556_v51 = vmul.f32 %v4536_v48, %v2544_v30  ;;  %v3032_v18 = vsel %vm10099_vm8, %v3026_v39, 0.0  ;;  %vm10100_vm11 = vmmov %vm10096_vm0  ;;  %v8280_v48 = vld [vmem:[%s9546_s13 + $0x5] ss:$0 sm:$0xff] }
 0x34e   :  { %v2554_v0 = vsub.f32 %v2498_v2, %v2550_v1  ;;  %v2579_v17 = vpop.xlane.xlu1 %2578  ;;  %v2607_v2 = vmul.f32 %v8240_v5, %v8240_v5  ;;  %v3041_v1 = vmul.f32 %v3025_v25, %v3025_v25  ;;  %v3048_v20 = vsel %vm10100_vm11, %v3042_v15, 0.0  ;;  %vm10101_vm4 = vmmov %vm10096_vm0 }
 0x34f   :  { %v2582_v57 = vpop.xlane.xlu2 %2581  ;;  %v2552_v60 = vsub.f32 %v8148_v63, %v2548_v8  ;;  %v2561_v49 = vadd.f32 %v2557_v43, %v2553_v40  ;;  %v8225_v14 = vmul.f32 0.020408163, %v2579_v17  ;;  %v2947_v63 = vsel %vm8142_vm12, %v8171_v53, 0.0  ;;  %v3027_v53 = vld [vmem:[%s9552_s5 + $0x10] sm:$0xff] }
 0x350   :  { %v2576_v37 = vpop.xlane.xlu0 %2575  ;;  %v2562_v47 = vadd.f32 %v2558_v19, %v2554_v0  ;;  %v3035_v56 = vsel %vm10097_vm10, %v3027_v53, 0.0  ;;  %v8260_v24 = vmul.f32 0.020408163, %v2582_v57  ;;  %v3043_v6 = vmul.f32 %v3027_v53, %v3027_v53 }
 0x351   :  { %v2560_v42 = vadd.f32 %v2556_v51, %v2552_v60  ;;  %2565 = vst.msk [vmem:[%s9547_s14 + $0x210] sm:$0xff] %vm10094_vm9, %v2561_v49  ;;  %v8238_v41 = vmul.f32 0.020408163, %v2576_v37  ;;  %v2609_v33 = vmul.f32 %v8225_v14, %v8225_v14  ;;  %vm10102_vm9 = vmmov %vm10096_vm0  ;;  %v3044_v49 = vmul.f32 %v3028_v27, %v3028_v27 }
 0x352   :  { %2566 = vst.msk [vmem:[%s9547_s14 + $0x218] sm:$0xff] %vm10095_vm13, %v2562_v47  ;;  %v2610_v19 = vmul.f32 %v8260_v24, %v8260_v24  ;;  %v3051_v17 = vsel %vm10101_vm4, %v3043_v6, 0.0  ;;  %v3045_v25 = vsel %vm10102_vm9, %v3041_v1, 0.0  ;;  %v3080_v27 = vsel %vm4751_vm2, %v8280_v48, 0.0  ;;  %vm10103_vm13 = vmmov %vm10096_vm0 }
 0x353   :  { %2564 = vst.msk [vmem:[%s9547_s14 + $0x208] sm:$0xff] %vm10096_vm0, %v2560_v42  ;;  %2955 = vadd.xlane.f32.xlu1 %v2948_v28  ;;  %3030 = vadd.xlane.f32.xlu2 %v3029_v22  ;;  %v2608_v34 = vmul.f32 %v8238_v41, %v8238_v41  ;;  %v3082_v1 = vsel %vm4773_vm3, %v8280_v48, 0.0 }
 0x354   :  { %2953 = vadd.xlane.f32.xlu0 %v2947_v63 }
 0x356   :  { %v2592_v45 = vpop.xlane.xlu1 %2591 }
 0x357   :  { %v2595_v26 = vpop.xlane.xlu2 %2594  ;;  %v2604_v31 = vmul.f32 0.020408163, %v2592_v45  ;;  %v3079_v45 = vsel %vm4745_vm1, %v8280_v48, 0.0 }
 0x358   :  { %v2605_v7 = vmul.f32 0.020408163, %v2595_v26  ;;  %v2589_v12 = vpop.xlane.xlu0 %2588 }
 0x359   :  { %v2603_v58 = vmul.f32 0.020408163, %v2589_v12  ;;  %v2612_v4 = vsub.f32 %v2604_v31, %v2608_v34  ;;  %v3054_v31 = vsel %vm10103_vm13, %v3044_v49, 0.0 }
 0x35a   :  { %v2613_v62 = vsub.f32 %v2605_v7, %v2609_v33 }
 0x35b   :  { %v2611_v50 = vsub.f32 %v2603_v58, %v2607_v2  ;;  %v2616_v11 = vmax.f32 %v2612_v4, 0.0  ;;  %3036 = vadd.xlane.f32.xlu1 %v3035_v56  ;;  %3039 = vadd.xlane.f32.xlu2 %v3038_v54  ;;  %v8301_v54 = vld [vmem:[%s9546_s13 + $0xc] ss:$0 sm:$0xff] }
 0x35c   :  { %v2617_v59 = vmax.f32 %v2613_v62, 0.0  ;;  %3033 = vadd.xlane.f32.xlu0 %v3032_v18 }
 0x35d   :  { %v2615_v38 = vmax.f32 %v2611_v50, 0.0  ;;  %v2654_v30 = vadd.f32 1e-05, %v2616_v11 }
 0x35e   :  { %v8262_v55 = vadd.f32 1e-05, %v2617_v59  ;;  %v8266_v43 = vpop.xlane.xlu1 %2631 }
 0x35f   :  { %v8264_v9 = vadd.f32 1e-05, %v2615_v38  ;;  %v8268_v8 = vpop.xlane.xlu2 %2633  ;;  %4389 = vrsqrt.f32 %v2654_v30  ;;  %vm2673_vm8 = vweird.f32 %v2654_v30 }
 0x360   :  { %v2598_v40 = vpop.xlane.xlu0 %2597  ;;  %4391 = vrsqrt.f32 %v8262_v55  ;;  %vm2683_vm4 = vweird.f32 %v8262_v55 }
 0x361   :  { %v2606_v0 = vmul.f32 0.020408163, %v2598_v40  ;;  %4393 = vrsqrt.f32 %v8264_v9  ;;  %vm2663_vm9 = vweird.f32 %v8264_v9 }
 0x363   :  { %v2614_v57 = vsub.f32 %v2606_v0, %v2610_v19  ;;  %3049 = vadd.xlane.f32.xlu1 %v3048_v20  ;;  %3052 = vadd.xlane.f32.xlu2 %v3051_v17  ;;  %v3081_v17 = vsel %vm4785_vm5, %v8280_v48, 0.0 }
 0x364   :  { %3046 = vadd.xlane.f32.xlu0 %v3045_v25 }
 0x365   :  { %v2618_v51 = vmax.f32 %v2614_v57, 0.0  ;;  %v4390_v60 = vpop.eup %4389 }
 0x366   :  { %v4392_v37 = vpop.eup %4391  ;;  %v2668_v47 = vmul.f32 %v4390_v60, %v2654_v30  ;;  %v8284_v22 = vpop.xlane.xlu1 %2637  ;;  %vm2674_vm0 = vweird.f32 %v4390_v60  ;;  %v3093_v30 = vsel %vm4745_vm1, %v8301_v54, 0.0 }
 0x367   :  { %v8282_v28 = vadd.f32 1e-05, %v2618_v51  ;;  %v8286_v42 = vpop.xlane.xlu2 %2645  ;;  %v4394_v63 = vpop.eup %4393  ;;  %v2678_v33 = vmul.f32 %v4392_v37, %v8262_v55  ;;  %vm2684_vm10 = vweird.f32 %v4392_v37  ;;  %vm2675_vm11 = vmor %vm2673_vm8, %vm2674_vm0 }
 0x368   :  { %v2636_v53 = vpop.xlane.xlu0 %2635  ;;  %v2658_v26 = vmul.f32 %v4394_v63, %v8264_v9  ;;  %v2669_v39 = vmul.f32 %v4390_v60, %v2668_v47  ;;  %vm2664_vm15 = vweird.f32 %v4394_v63  ;;  %vm2685_vm13 = vmor %vm2683_vm4, %vm2684_vm10 }
 0x369   :  { %4395 = vrsqrt.f32 %v8282_v28  ;;  %v2679_v34 = vmul.f32 %v4392_v37, %v2678_v33  ;;  %vm2665_vm0 = vmor %vm2663_vm9, %vm2664_vm15  ;;  %vm2693_vm15 = vweird.f32 %v8282_v28 }
 0x36a   :  { %v2659_v7 = vmul.f32 %v4394_v63, %v2658_v26  ;;  %v2670_v12 = vmul.f32 0.5, %v2669_v39 }
 0x36b   :  { %v2680_v2 = vmul.f32 0.5, %v2679_v34  ;;  %3083 = vadd.xlane.f32.xlu1 %v3079_v45  ;;  %3085 = vadd.xlane.f32.xlu2 %v3080_v27  ;;  %v4539_v45 = vld [vmem:[%s9549_s2] sm:$0xff] }
 0x36c   :  { %v2660_v58 = vmul.f32 0.5, %v2659_v7  ;;  %v2671_v56 = vsub.f32 1.5, %v2670_v12  ;;  %3055 = vadd.xlane.f32.xlu0 %v3054_v31  ;;  %v3095_v31 = vsel %vm4785_vm5, %v8301_v54, 0.0  ;;  %v3096_v7 = vsel %vm4773_vm3, %v8301_v54, 0.0 }
 0x36d   :  { %v2681_v4 = vsub.f32 1.5, %v2680_v2  ;;  %vm10121_vm5 = vcmask 400384  }
 0x36e   :  { %v2661_v18 = vsub.f32 1.5, %v2660_v58  ;;  %v2672_v50 = vmul.f32 %v4390_v60, %v2671_v56  ;;  %v2650_v11 = vpop.xlane.xlu1 %2649  ;;  %v3094_v58 = vsel %vm4751_vm2, %v8301_v54, 0.0  ;;  %v3174_v54 = vld [vmem:[%s9553_s6 + $0x8] sm:$0xff] }
 0x36f   :  { %v4396_v62 = vpop.eup %4395  ;;  %v8303_v59 = vpop.xlane.xlu2 %2651  ;;  %v2682_v38 = vmul.f32 %v4392_v37, %v2681_v4 }
 0x370   :  { %v2688_v15 = vmul.f32 %v4396_v62, %v8282_v28  ;;  %v2648_v6 = vpop.xlane.xlu0 %2647  ;;  %v2662_v40 = vmul.f32 %v4394_v63, %v2661_v18  ;;  %v2676_v20 = vsel %vm2675_vm11, %v4390_v60, %v2672_v50  ;;  %vm2694_vm10 = vweird.f32 %v4396_v62  ;;  %v3175_v18 = vld [vmem:[%s9553_s6 + $0x10] sm:$0xff]  ;;  %v4540_v50 = vld [vmem:[%s9549_s2 + $0x18] sm:$0xff] }
 0x371   :  { %v2698_v19 = vmul.f32 %v2676_v20, %v8268_v8  ;;  %v2686_v0 = vsel %vm2685_vm13, %v4392_v37, %v2682_v38  ;;  %v4537_v8 = vld [vmem:[%s9549_s2 + $0x8] sm:$0xff]  ;;  %vm2695_vm8 = vmor %vm2693_vm15, %vm2694_vm10  ;;  %vm10104_vm11 = vcmask 400384  }
 0x372   :  { %v2689_v55 = vmul.f32 %v4396_v62, %v2688_v15  ;;  %v2666_v25 = vsel %vm2665_vm0, %v4394_v63, %v2662_v40  ;;  %v2699_v57 = vmul.f32 %v2686_v0, %v2636_v53  ;;  %vm10105_vm4 = vmmov %vm10104_vm11 }
 0x373   :  { %v2697_v9 = vmul.f32 %v2666_v25, %v8266_v43  ;;  %v2702_v60 = vmul.f32 %v2698_v19, %v8238_v41  ;;  %3089 = vadd.xlane.f32.xlu1 %v3082_v1  ;;  %3097 = vadd.xlane.f32.xlu2 %v3093_v30  ;;  %v2710_v37 = vmul.f32 %v4537_v8, %v2698_v19  ;;  %v4538_v41 = vld [vmem:[%s9549_s2 + $0x10] sm:$0xff]  ;;  %vm10106_vm9 = vmmov %vm10105_vm4 }
 0x374   :  { %v2690_v51 = vmul.f32 0.5, %v2689_v55  ;;  %v2703_v49 = vmul.f32 %v2699_v57, %v8225_v14  ;;  %3087 = vadd.xlane.f32.xlu0 %v3081_v17  ;;  %v2711_v43 = vmul.f32 %v4538_v41, %v2699_v57  ;;  %vm10107_vm13 = vmmov %vm10105_vm4  ;;  %v3190_v8 = vmul.f32 %v3174_v54, %v3174_v54  ;;  %v3176_v41 = vld [vmem:[%s9553_s6 + $0x18] sm:$0xff] }
 0x375   :  { %v2701_v48 = vmul.f32 %v2697_v9, %v8240_v5  ;;  %v2706_v63 = vsub.f32 %v2648_v6, %v2702_v60  ;;  %v2709_v26 = vmul.f32 %v4539_v45, %v2697_v9  ;;  %v3173_v6 = vld [vmem:[%s9553_s6] sm:$0xff]  ;;  %v3180_v55 = vsel %vm10107_vm13, %v3174_v54, 0.0  ;;  %vm10108_vm0 = vmmov %vm10105_vm4 }
 0x376   :  { %v2691_v47 = vsub.f32 1.5, %v2690_v51  ;;  %v2707_v33 = vsub.f32 %v2650_v11, %v2703_v49  ;;  %v2730_v53 = vpop.xlane.xlu1 %2729  ;;  %v3183_v0 = vsel %vm10108_vm0, %v3175_v18, 0.0  ;;  %vm10109_vm10 = vmmov %vm10108_vm0  ;;  %v3189_v60 = vmul.f32 %v3173_v6, %v3173_v6 }
 0x377   :  { %v2733_v14 = vpop.xlane.xlu2 %2732  ;;  %v2705_v27 = vsub.f32 %v8286_v42, %v2701_v48  ;;  %v2714_v5 = vadd.f32 %v2710_v37, %v2706_v63  ;;  %v8346_v42 = vmul.f32 0.020408163, %v2730_v53  ;;  %vm10110_vm15 = vmmov %vm10108_vm0  ;;  %vm10115_vm13 = vnez %v9750_v29 }
 0x378   :  { %v2692_v39 = vmul.f32 %v4396_v62, %v2691_v47  ;;  %v2727_v34 = vpop.xlane.xlu0 %2726  ;;  %v2715_v28 = vadd.f32 %v2711_v43, %v2707_v33  ;;  %v8389_v49 = vmul.f32 0.020408163, %v2733_v14 }
 0x379   :  { %v2713_v2 = vadd.f32 %v2709_v26, %v2705_v27  ;;  %2718 = vst.msk [vmem:[%s9547_s14 + $0x228] sm:$0xff] %vm10104_vm11, %v2714_v5  ;;  %v8360_v4 = vmul.f32 0.020408163, %v2727_v34  ;;  %vm10112_vm11 = vmmov %vm10108_vm0 }
 0x37a   :  { %v2696_v12 = vsel %vm2695_vm8, %v4396_v62, %v2692_v39  ;;  %2719 = vst.msk [vmem:[%s9547_s14 + $0x230] sm:$0xff] %vm10105_vm4, %v2715_v28  ;;  %vm10111_vm8 = vmmov %vm10108_vm0  ;;  %v2763_v45 = vmul.f32 %v8389_v49, %v8389_v49  ;;  %v3196_v39 = vsel %vm10112_vm11, %v3190_v8, 0.0 }
 0x37b   :  { %v2700_v56 = vmul.f32 %v2696_v12, %v8284_v22  ;;  %2717 = vst.msk [vmem:[%s9547_s14 + $0x220] sm:$0xff] %vm10106_vm9, %v2713_v2  ;;  %3101 = vadd.xlane.f32.xlu1 %v3095_v31  ;;  %3103 = vadd.xlane.f32.xlu2 %v3096_v7  ;;  %v2762_v22 = vmul.f32 %v8346_v42, %v8346_v42  ;;  %v3193_v14 = vsel %vm10111_vm8, %v3189_v60, 0.0  ;;  %vm10113_vm4 = vmmov %vm10108_vm0  ;;  %v4239_v12 = vld [vmem:[%s9546_s13 + $0x5] ss:$0 sm:$0xff] }
 0x37c   :  { %3099 = vadd.xlane.f32.xlu0 %v3094_v58  ;;  %v2761_v1 = vmul.f32 %v8360_v4, %v8360_v4  ;;  %v3186_v5 = vsel %vm10113_vm4, %v3176_v41, 0.0  ;;  %v3192_v7 = vmul.f32 %v3176_v41, %v3176_v41  ;;  %vm10114_vm9 = vmmov %vm10108_vm0 }
 0x37d   :  { %v2704_v62 = vmul.f32 %v2700_v56, %v8260_v24  ;;  %v2712_v11 = vmul.f32 %v4540_v50, %v2700_v56  ;;  %v3191_v56 = vmul.f32 %v3175_v18, %v3175_v18  ;;  %v3227_v18 = vsel %vm10115_vm13, %v4239_v12, 0.0 }
 0x37e   :  { %v2743_v24 = vpop.xlane.xlu1 %2742 }
 0x37f   :  { %v2708_v15 = vsub.f32 %v8303_v59, %v2704_v62  ;;  %v2746_v38 = vpop.xlane.xlu2 %2745  ;;  %v2757_v40 = vmul.f32 0.020408163, %v2743_v24  ;;  %v3177_v59 = vsel %vm10109_vm10, %v3173_v6, 0.0  ;;  %v3202_v6 = vsel %vm10114_vm9, %v3192_v7, 0.0 }
 0x380   :  { %v2758_v20 = vmul.f32 0.020408163, %v2746_v38  ;;  %v2736_v30 = vpop.xlane.xlu0 %2735 }
 0x381   :  { %v2716_v19 = vadd.f32 %v2712_v11, %v2708_v15  ;;  %v2765_v17 = vsub.f32 %v2757_v40, %v2761_v1  ;;  %v8387_v51 = vmul.f32 0.020408163, %v2736_v30  ;;  %v3199_v40 = vsel %vm10108_vm0, %v3191_v56, 0.0 }
 0x382   :  { %v2766_v25 = vsub.f32 %v2758_v20, %v2762_v22  ;;  %vm10116_vm0 = vnez %v10038_v32 }
 0x383   :  { %2720 = vst.msk [vmem:[%s9547_s14 + $0x238] sm:$0xff] %vm10110_vm15, %v2716_v19  ;;  %v2769_v57 = vmax.f32 %v2765_v17, 0.0  ;;  %3181 = vadd.xlane.f32.xlu1 %v3180_v55  ;;  %3184 = vadd.xlane.f32.xlu2 %v3183_v0  ;;  %v2764_v43 = vmul.f32 %v8387_v51, %v8387_v51 }
 0x384   :  { %v2770_v9 = vmax.f32 %v2766_v25, 0.0  ;;  %3178 = vadd.xlane.f32.xlu0 %v3177_v59 }
 0x385   :  { %v2801_v37 = vadd.f32 1e-05, %v2769_v57 }
 0x386   :  { %v8391_v47 = vadd.f32 1e-05, %v2770_v9  ;;  %v2752_v48 = vpop.xlane.xlu1 %2751 }
 0x387   :  { %v8393_v63 = vpop.xlane.xlu2 %2779  ;;  %4397 = vrsqrt.f32 %v2801_v37  ;;  %v2760_v33 = vmul.f32 0.020408163, %v2752_v48  ;;  %vm2811_vm8 = vweird.f32 %v2801_v37 }
 0x388   :  { %v2749_v53 = vpop.xlane.xlu0 %2748  ;;  %4399 = vrsqrt.f32 %v8391_v47  ;;  %vm2821_vm4 = vweird.f32 %v8391_v47 }
 0x389   :  { %v2759_v26 = vmul.f32 0.020408163, %v2749_v53  ;;  %v2768_v27 = vsub.f32 %v2760_v33, %v2764_v43  ;;  %v3229_v33 = vsel %vm10116_vm0, %v4239_v12, 0.0  ;;  %v10117_v53 = vld [vmem:[#allocation8_spill] sm:$0xff] }
 0x38a   :  { %vm10118_vm2 = vnez %v10117_v53 }
 0x38b   :  { %v2767_v34 = vsub.f32 %v2759_v26, %v2763_v45  ;;  %v2772_v28 = vmax.f32 %v2768_v27, 0.0  ;;  %3194 = vadd.xlane.f32.xlu1 %v3193_v14  ;;  %3197 = vadd.xlane.f32.xlu2 %v3196_v39  ;;  %v3230_v14 = vsel %vm10118_vm2, %v4239_v12, 0.0  ;;  %v10119_v39 = vld [vmem:[#allocation7_spill] sm:$0xff] }
 0x38c   :  { %3187 = vadd.xlane.f32.xlu0 %v3186_v5 }
 0x38d   :  { %v2771_v31 = vmax.f32 %v2767_v34, 0.0  ;;  %v4398_v2 = vpop.eup %4397  ;;  %v8409_v58 = vadd.f32 1e-05, %v2772_v28 }
 0x38e   :  { %v4400_v62 = vpop.eup %4399  ;;  %v2806_v22 = vmul.f32 %v4398_v2, %v2801_v37  ;;  %v8413_v50 = vpop.xlane.xlu1 %2783  ;;  %vm2812_vm10 = vweird.f32 %v4398_v2 }
 0x38f   :  { %v8411_v54 = vadd.f32 1e-05, %v2771_v31  ;;  %v8415_v11 = vpop.xlane.xlu2 %2785  ;;  %v2816_v15 = vmul.f32 %v4400_v62, %v8391_v47  ;;  %4401 = vrsqrt.f32 %v8409_v58  ;;  %vm2822_vm15 = vweird.f32 %v4400_v62  ;;  %vm2813_vm11 = vmor %vm2811_vm8, %vm2812_vm10 }
 0x390   :  { %v2782_v24 = vpop.xlane.xlu0 %2781  ;;  %v2807_v38 = vmul.f32 %v4398_v2, %v2806_v22  ;;  %vm2823_vm9 = vmor %vm2821_vm4, %vm2822_vm15  ;;  %vm10120_vm10 = vnez %v10119_v39 }
 0x391   :  { %4403 = vrsqrt.f32 %v8411_v54  ;;  %v2817_v1 = vmul.f32 %v4400_v62, %v2816_v15  ;;  %v3228_v27 = vsel %vm10120_vm10, %v4239_v12, 0.0  ;;  %v4541_v12 = vld [vmem:[%s9550_s3] sm:$0xff]  ;;  %vm2831_vm4 = vweird.f32 %v8411_v54 }
 0x392   :  { %v2808_v20 = vmul.f32 0.5, %v2807_v38 }
 0x393   :  { %v2818_v30 = vmul.f32 0.5, %v2817_v1  ;;  %3203 = vadd.xlane.f32.xlu1 %v3202_v6  ;;  %3231 = vadd.xlane.f32.xlu2 %v3227_v18 }
 0x394   :  { %v2809_v19 = vsub.f32 1.5, %v2808_v20  ;;  %3200 = vadd.xlane.f32.xlu0 %v3199_v40 }
 0x395   :  { %v4402_v55 = vpop.eup %4401  ;;  %v2819_v0 = vsub.f32 1.5, %v2818_v30 }
 0x396   :  { %v2836_v25 = vmul.f32 %v4402_v55, %v8409_v58  ;;  %v2810_v59 = vmul.f32 %v4398_v2, %v2809_v19  ;;  %v2796_v57 = vpop.xlane.xlu1 %2795  ;;  %vm2842_vm15 = vweird.f32 %v4402_v55 }
 0x397   :  { %v4404_v17 = vpop.eup %4403  ;;  %v8425_v9 = vpop.xlane.xlu2 %2797  ;;  %v2820_v8 = vmul.f32 %v4400_v62, %v2819_v0 }
 0x398   :  { %v2826_v60 = vmul.f32 %v4404_v17, %v8411_v54  ;;  %v2794_v48 = vpop.xlane.xlu0 %2793  ;;  %v2814_v41 = vsel %vm2813_vm11, %v4398_v2, %v2810_v59  ;;  %v2837_v43 = vmul.f32 %v4402_v55, %v2836_v25  ;;  %vm2832_vm8 = vweird.f32 %v4404_v17  ;;  %v4543_v59 = vld [vmem:[%s9550_s3 + $0x18] sm:$0xff] }
 0x399   :  { %v2845_v37 = vmul.f32 %v2814_v41, %v8393_v63  ;;  %v2824_v26 = vsel %vm2823_vm9, %v4400_v62, %v2820_v8  ;;  %v8441_v63 = vld [vmem:[%s9546_s13 + $0xc] ss:$0 sm:$0xff]  ;;  %vm2841_vm11 = vweird.f32 %v8409_v58  ;;  %vm2833_vm3 = vmor %vm2831_vm4, %vm2832_vm8  ;;  %v3321_v8 = vld [vmem:[%s9554_s7] sm:$0xff] }
 0x39a   :  { %v2827_v45 = vmul.f32 %v4404_v17, %v2826_v60  ;;  %v2838_v5 = vmul.f32 0.5, %v2837_v43  ;;  %v2846_v34 = vmul.f32 %v2824_v26, %v2782_v24  ;;  %vm2843_vm9 = vmor %vm2841_vm11, %vm2842_vm15  ;;  %v3242_v58 = vsel %vm10120_vm10, %v8441_v63, 0.0 }
 0x39b   :  { %v2849_v28 = vmul.f32 %v2845_v37, %v8360_v4  ;;  %3235 = vadd.xlane.f32.xlu1 %v3229_v33  ;;  %3237 = vadd.xlane.f32.xlu2 %v3230_v14  ;;  %v2857_v2 = vmul.f32 %v4541_v12, %v2845_v37  ;;  %v3243_v30 = vsel %vm10116_vm0, %v8441_v63, 0.0  ;;  %vm10122_vm15 = vmmov %vm10121_vm5  ;;  %v3337_v12 = vmul.f32 %v3321_v8, %v3321_v8 }
 0x39c   :  { %v2828_v47 = vmul.f32 0.5, %v2827_v45  ;;  %v2839_v31 = vsub.f32 1.5, %v2838_v5  ;;  %v2850_v7 = vmul.f32 %v2846_v34, %v8346_v42  ;;  %3233 = vadd.xlane.f32.xlu0 %v3228_v27  ;;  %v4542_v42 = vld [vmem:[%s9550_s3 + $0x8] sm:$0xff]  ;;  %vm10137_vm10 = vcmask 400384  }
 0x39d   :  { %v2853_v4 = vsub.f32 %v2794_v48, %v2849_v28  ;;  %v2858_v22 = vmul.f32 %v4542_v42, %v2846_v34  ;;  %v3323_v42 = vld [vmem:[%s9554_s7 + $0x10] sm:$0xff] }
 0x39e   :  { %v2829_v56 = vsub.f32 1.5, %v2828_v47  ;;  %v2840_v62 = vmul.f32 %v4402_v55, %v2839_v31  ;;  %v2854_v15 = vsub.f32 %v2796_v57, %v2850_v7  ;;  %v2875_v24 = vpop.xlane.xlu1 %2874 }
 0x39f   :  { %v2878_v38 = vpop.xlane.xlu2 %2877  ;;  %v2861_v18 = vadd.f32 %v2857_v2, %v2853_v4  ;;  %v8463_v54 = vmul.f32 0.020408163, %v2875_v24 }
 0x3a0   :  { %v2830_v6 = vmul.f32 %v4404_v17, %v2829_v56  ;;  %v2800_v1 = vpop.xlane.xlu0 %2799  ;;  %v2844_v40 = vsel %vm2843_vm9, %v4402_v55, %v2840_v62  ;;  %v2862_v20 = vadd.f32 %v2858_v22, %v2854_v15  ;;  %v3241_v55 = vsel %vm10115_vm13, %v8441_v63, 0.0 }
 0x3a1   :  { %v2848_v0 = vmul.f32 %v2844_v40, %v8415_v11  ;;  %2865 = vst.msk [vmem:[%s9547_s14 + $0x240] sm:$0xff] %vm10121_vm5, %v2861_v18  ;;  %v8507_v7 = vmul.f32 0.020408163, %v2878_v38 }
 0x3a2   :  { %v2834_v19 = vsel %vm2833_vm3, %v4404_v17, %v2830_v6  ;;  %2866 = vst.msk [vmem:[%s9547_s14 + $0x248] sm:$0xff] %vm10122_vm15, %v2862_v20  ;;  %vm10123_vm3 = vmmov %vm10121_vm5 }
 0x3a3   :  { %v2847_v25 = vmul.f32 %v2834_v19, %v8413_v50  ;;  %v2852_v11 = vmul.f32 %v2848_v0, %v8387_v51  ;;  %3247 = vadd.xlane.f32.xlu1 %v3242_v58  ;;  %3249 = vadd.xlane.f32.xlu2 %v3243_v30  ;;  %v2860_v57 = vmul.f32 %v4543_v59, %v2848_v0  ;;  %v3322_v51 = vld [vmem:[%s9554_s7 + $0x8] sm:$0xff]  ;;  %v3325_v27 = vsel %vm10123_vm3, %v3321_v8, 0.0  ;;  %vm10124_vm5 = vmmov %vm10123_vm3 }
 0x3a4   :  { %3245 = vadd.xlane.f32.xlu0 %v3241_v55  ;;  %v2909_v50 = vmul.f32 %v8463_v54, %v8463_v54  ;;  %v3328_v5 = vsel %vm10124_vm5, %v3322_v51, 0.0  ;;  %vm10125_vm8 = vmmov %vm10123_vm3  ;;  %v2910_v6 = vmul.f32 %v8507_v7, %v8507_v7 }
 0x3a5   :  { %v2851_v17 = vmul.f32 %v2847_v25, %v8389_v49  ;;  %v2856_v60 = vsub.f32 %v2800_v1, %v2852_v11  ;;  %v4544_v49 = vld [vmem:[%s9550_s3 + $0x10] sm:$0xff]  ;;  %vm10126_vm11 = vmmov %vm10123_vm3  ;;  %v3339_v11 = vmul.f32 %v3323_v42, %v3323_v42 }
 0x3a6   :  { %v2859_v48 = vmul.f32 %v4544_v49, %v2847_v25  ;;  %v2884_v43 = vpop.xlane.xlu1 %2883  ;;  %vm10127_vm4 = vmmov %vm10123_vm3 }
 0x3a7   :  { %v2855_v41 = vsub.f32 %v8425_v9, %v2851_v17  ;;  %v2891_v33 = vpop.xlane.xlu2 %2890  ;;  %v2864_v14 = vadd.f32 %v2860_v57, %v2856_v60  ;;  %v8496_v34 = vmul.f32 0.020408163, %v2884_v43  ;;  %v3244_v9 = vsel %vm10118_vm2, %v8441_v63, 0.0  ;;  %v3324_v63 = vld [vmem:[%s9554_s7 + $0x18] sm:$0xff]  ;;  %vm10128_vm9 = vmmov %vm10123_vm3 }
 0x3a8   :  { %v2905_v37 = vmul.f32 0.020408163, %v2891_v33  ;;  %v2881_v45 = vpop.xlane.xlu0 %2880  ;;  %v3334_v1 = vsel %vm10127_vm4, %v3324_v63, 0.0  ;;  %v3341_v40 = vsel %vm10128_vm9, %v3337_v12, 0.0  ;;  %vm10129_vm15 = vmmov %vm10123_vm3  ;;  %v3340_v17 = vmul.f32 %v3324_v63, %v3324_v63 }
 0x3a9   :  { %v2863_v26 = vadd.f32 %v2859_v48, %v2855_v41  ;;  %2868 = vst.msk [vmem:[%s9547_s14 + $0x258] sm:$0xff] %vm10125_vm8, %v2864_v14  ;;  %v8505_v31 = vmul.f32 0.020408163, %v2881_v45  ;;  %v2912_v2 = vmul.f32 %v8496_v34, %v8496_v34  ;;  %v3331_v30 = vsel %vm10129_vm15, %v3323_v42, 0.0  ;;  %vm10130_vm5 = vmmov %vm10123_vm3 }
 0x3aa   :  { %v2913_v47 = vsub.f32 %v2905_v37, %v2909_v50  ;;  %v3338_v60 = vmul.f32 %v3322_v51, %v3322_v51  ;;  %v3347_v14 = vsel %vm10123_vm3, %v3339_v11, 0.0  ;;  %v3350_v37 = vsel %vm10130_vm5, %v3340_v17, 0.0  ;;  %vm10131_vm8 = vmmov %vm10123_vm3 }
 0x3ab   :  { %2867 = vst.msk [vmem:[%s9547_s14 + $0x250] sm:$0xff] %vm10126_vm11, %v2863_v26  ;;  %3326 = vadd.xlane.f32.xlu1 %v3325_v27  ;;  %3329 = vadd.xlane.f32.xlu2 %v3328_v5  ;;  %v2911_v22 = vmul.f32 %v8505_v31, %v8505_v31  ;;  %v8543_v26 = vld [vmem:[%s9546_s13 + $0x5] ss:$0 sm:$0xff]  ;;  %vm10132_vm15 = vnez %v9792_v16  ;;  %vm10133_vm3 = vnez %v9799_v61  ;;  %vm10134_vm5 = vnez %v9790_v23 }
 0x3ac   :  { %v2917_v28 = vmax.f32 %v2913_v47, 0.0  ;;  %3251 = vadd.xlane.f32.xlu0 %v3244_v9  ;;  %v3344_v51 = vsel %vm10131_vm8, %v3338_v60, 0.0  ;;  %v3376_v42 = vsel %vm10132_vm15, %v8543_v26, 0.0  ;;  %v4565_v16 = vld [vmem:[%s9556_s9] sm:$0xff] }
 0x3ae   :  { %v2957_v56 = vadd.f32 1e-05, %v2917_v28  ;;  %v2897_v4 = vpop.xlane.xlu1 %2896 }
 0x3af   :  { %v2900_v62 = vpop.xlane.xlu2 %2899  ;;  %v2907_v15 = vmul.f32 0.020408163, %v2897_v4 }
 0x3b0   :  { %4405 = vrsqrt.f32 %v2957_v56  ;;  %v2908_v24 = vmul.f32 0.020408163, %v2900_v62  ;;  %v2894_v38 = vpop.xlane.xlu0 %2893  ;;  %vm2967_vm4 = vweird.f32 %v2957_v56 }
 0x3b1   :  { %v2906_v18 = vmul.f32 0.020408163, %v2894_v38  ;;  %v2915_v20 = vsub.f32 %v2907_v15, %v2911_v22 }
 0x3b2   :  { %v2916_v58 = vsub.f32 %v2908_v24, %v2912_v2 }
 0x3b3   :  { %v2914_v19 = vsub.f32 %v2906_v18, %v2910_v6  ;;  %v2919_v0 = vmax.f32 %v2915_v20, 0.0  ;;  %3335 = vadd.xlane.f32.xlu1 %v3334_v1  ;;  %3342 = vadd.xlane.f32.xlu2 %v3341_v40  ;;  %v3375_v18 = vsel %vm10134_vm5, %v8543_v26, 0.0 }
 0x3b4   :  { %v2920_v55 = vmax.f32 %v2916_v58, 0.0  ;;  %3332 = vadd.xlane.f32.xlu0 %v3331_v30  ;;  %v8563_v30 = vld [vmem:[%s9546_s13 + $0xc] ss:$0 sm:$0xff] }
 0x3b5   :  { %v2918_v25 = vmax.f32 %v2914_v19, 0.0  ;;  %v8524_v57 = vadd.f32 1e-05, %v2919_v0 }
 0x3b6   :  { %v4406_v59 = vpop.eup %4405  ;;  %v8526_v50 = vadd.f32 1e-05, %v2920_v55  ;;  %v8530_v48 = vpop.xlane.xlu1 %2937  ;;  %v4545_v55 = vld [vmem:[%s9551_s4] sm:$0xff] }
 0x3b7   :  { %v2962_v8 = vmul.f32 %v4406_v59, %v2957_v56  ;;  %v8528_v49 = vadd.f32 1e-05, %v2918_v25  ;;  %v8532_v41 = vpop.xlane.xlu2 %2939  ;;  %4407 = vrsqrt.f32 %v8524_v57  ;;  %vm2968_vm11 = vweird.f32 %v4406_v59 }
 0x3b8   :  { %v2936_v43 = vpop.xlane.xlu0 %2935  ;;  %4409 = vrsqrt.f32 %v8526_v50  ;;  %vm2969_vm9 = vmor %vm2967_vm4, %vm2968_vm11  ;;  %v3377_v56 = vsel %vm10133_vm3, %v8543_v26, 0.0  ;;  %vm2997_vm13 = vweird.f32 %v8526_v50 }
 0x3b9   :  { %v2963_v33 = vmul.f32 %v4406_v59, %v2962_v8  ;;  %4411 = vrsqrt.f32 %v8528_v49  ;;  %vm2977_vm11 = vweird.f32 %v8528_v49 }
 0x3bb   :  { %v2964_v45 = vmul.f32 0.5, %v2963_v33  ;;  %3348 = vadd.xlane.f32.xlu1 %v3347_v14  ;;  %3351 = vadd.xlane.f32.xlu2 %v3350_v37  ;;  %v3389_v37 = vsel %vm10134_vm5, %v8563_v30, 0.0  ;;  %vm10138_vm5 = vnez %v9795_v10  ;;  %v4252_v10 = vld [vmem:[%s9546_s13 + $0xd] ss:$0 sm:$0xff] }
 0x3bc   :  { %3345 = vadd.xlane.f32.xlu0 %v3344_v51 }
 0x3bd   :  { %v2965_v27 = vsub.f32 1.5, %v2964_v45  ;;  %v4408_v5 = vpop.eup %4407 }
 0x3be   :  { %v4410_v47 = vpop.eup %4409  ;;  %v2982_v9 = vmul.f32 %v4408_v5, %v8524_v57  ;;  %v2950_v12 = vpop.xlane.xlu1 %2949  ;;  %vm2988_vm8 = vweird.f32 %v4408_v5 }
 0x3bf   :  { %v2966_v28 = vmul.f32 %v4406_v59, %v2965_v27  ;;  %v8546_v2 = vpop.xlane.xlu2 %2951  ;;  %v4412_v63 = vpop.eup %4411  ;;  %v2992_v4 = vmul.f32 %v4410_v47, %v8526_v50  ;;  %vm10135_vm4 = vweird.f32 %v4410_v47 }
 0x3c0   :  { %v2942_v62 = vpop.xlane.xlu0 %2941  ;;  %v2972_v22 = vmul.f32 %v4412_v63, %v8528_v49  ;;  %v2983_v15 = vmul.f32 %v4408_v5, %v2982_v9  ;;  %vm2999_vm0 = vmor %vm2997_vm13, %vm10135_vm4  ;;  %v3378_v49 = vsel %vm10138_vm5, %v8543_v26, 0.0  ;;  %v3469_v26 = vld [vmem:[%s9555_s8] sm:$0xff] }
 0x3c1   :  { %v2970_v24 = vsel %vm2969_vm9, %v4406_v59, %v2966_v28  ;;  %v2993_v6 = vmul.f32 %v4410_v47, %v2992_v4  ;;  %vm2987_vm9 = vweird.f32 %v8524_v57  ;;  %v3390_v57 = vsel %vm10132_vm15, %v8563_v30, 0.0  ;;  %v4546_v4 = vld [vmem:[%s9551_s4 + $0x10] sm:$0xff] }
 0x3c2   :  { %v3001_v38 = vmul.f32 %v2970_v24, %v2936_v43  ;;  %v2973_v1 = vmul.f32 %v4412_v63, %v2972_v22  ;;  %v2984_v40 = vmul.f32 0.5, %v2983_v15  ;;  %vm2989_vm2 = vmor %vm2987_vm9, %vm2988_vm8  ;;  %vm10136_vm8 = vweird.f32 %v4412_v63  ;;  %v4548_v15 = vld [vmem:[%s9551_s4 + $0x8] sm:$0xff] }
 0x3c3   :  { %v2994_v58 = vmul.f32 0.5, %v2993_v6  ;;  %3381 = vadd.xlane.f32.xlu1 %v3376_v42  ;;  %3383 = vadd.xlane.f32.xlu2 %v3377_v56  ;;  %vm2979_vm9 = vmor %vm2977_vm11, %vm10136_vm8 }
 0x3c4   :  { %v3005_v20 = vmul.f32 %v3001_v38, %v8463_v54  ;;  %v2974_v19 = vmul.f32 0.5, %v2973_v1  ;;  %v2985_v0 = vsub.f32 1.5, %v2984_v40  ;;  %3379 = vadd.xlane.f32.xlu0 %v3375_v18  ;;  %v3013_v25 = vmul.f32 %v4545_v55, %v3001_v38  ;;  %v3472_v55 = vld [vmem:[%s9555_s8 + $0x18] sm:$0xff] }
 0x3c5   :  { %v2995_v17 = vsub.f32 1.5, %v2994_v58  ;;  %v3392_v18 = vsel %vm10138_vm5, %v8563_v30, 0.0 }
 0x3c6   :  { %v3009_v11 = vsub.f32 %v2950_v12, %v3005_v20  ;;  %v2975_v54 = vsub.f32 1.5, %v2974_v19  ;;  %v2986_v59 = vmul.f32 %v4408_v5, %v2985_v0  ;;  %v2956_v60 = vpop.xlane.xlu1 %2955  ;;  %v3471_v0 = vld [vmem:[%s9555_s8 + $0x10] sm:$0xff] }
 0x3c7   :  { %v3031_v8 = vpop.xlane.xlu2 %3030  ;;  %v2996_v33 = vmul.f32 %v4410_v47, %v2995_v17  ;;  %v3470_v17 = vld [vmem:[%s9555_s8 + $0x8] sm:$0xff] }
 0x3c8   :  { %v3017_v43 = vadd.f32 %v3013_v25, %v3009_v11  ;;  %v2954_v14 = vpop.xlane.xlu0 %2953  ;;  %v2976_v51 = vmul.f32 %v4412_v63, %v2975_v54  ;;  %v2990_v45 = vsel %vm2989_vm2, %v4408_v5, %v2986_v59  ;;  %vm10139_vm2 = vmmov %vm10137_vm10  ;;  %v8627_v19 = vmul.f32 0.020408163, %v3031_v8 }
 0x3c9   :  { %v3003_v27 = vmul.f32 %v2990_v45, %v8532_v41  ;;  %v3000_v50 = vsel %vm2999_vm0, %v4410_v47, %v2996_v33  ;;  %v3473_v1 = vsel %vm10139_vm2, %v3469_v26, 0.0  ;;  %vm10140_vm13 = vmmov %vm10139_vm2 }
 0x3ca   :  { %3021 = vst.msk [vmem:[%s9547_s14 + $0x260] sm:$0xff] %vm10137_vm10, %v3017_v43  ;;  %v2980_v5 = vsel %vm2979_vm9, %v4412_v63, %v2976_v51  ;;  %v3004_v9 = vmul.f32 %v3000_v50, %v2942_v62  ;;  %vm10141_vm0 = vmmov %vm10139_vm2  ;;  %v3065_v43 = vmul.f32 %v8627_v19, %v8627_v19 }
 0x3cb   :  { %v3002_v28 = vmul.f32 %v2980_v5, %v8530_v48  ;;  %v3007_v12 = vmul.f32 %v3003_v27, %v8505_v31  ;;  %3393 = vadd.xlane.f32.xlu1 %v3389_v37  ;;  %3395 = vadd.xlane.f32.xlu2 %v3390_v57  ;;  %v3015_v47 = vmul.f32 %v4546_v4, %v3003_v27  ;;  %v4547_v31 = vld [vmem:[%s9551_s4 + $0x18] sm:$0xff]  ;;  %vm10142_vm10 = vmmov %vm10141_vm0 }
 0x3cc   :  { %v3008_v41 = vmul.f32 %v3004_v9, %v8496_v34  ;;  %3385 = vadd.xlane.f32.xlu0 %v3378_v49  ;;  %v3016_v48 = vmul.f32 %v4547_v31, %v3004_v9  ;;  %vm10143_vm11 = vmmov %vm10141_vm0  ;;  %v3486_v5 = vmul.f32 %v3470_v17, %v3470_v17 }
 0x3cd   :  { %v3006_v42 = vmul.f32 %v3002_v28, %v8507_v7  ;;  %v3011_v22 = vsub.f32 %v2954_v14, %v3007_v12  ;;  %v3014_v24 = vmul.f32 %v4548_v15, %v3002_v28  ;;  %v3479_v14 = vsel %vm10143_vm11, %v3471_v0, 0.0  ;;  %vm10144_vm4 = vmmov %vm10141_vm0 }
 0x3ce   :  { %v3012_v63 = vsub.f32 %v2956_v60, %v3008_v41  ;;  %v3037_v34 = vpop.xlane.xlu1 %3036  ;;  %v3482_v37 = vsel %vm10144_vm4, %v3472_v55, 0.0  ;;  %vm10145_vm8 = vmmov %vm10141_vm0  ;;  %v3487_v12 = vmul.f32 %v3471_v0, %v3471_v0 }
 0x3cf   :  { %v3040_v62 = vpop.xlane.xlu2 %3039  ;;  %v3010_v7 = vsub.f32 %v8546_v2, %v3006_v42  ;;  %v3019_v56 = vadd.f32 %v3015_v47, %v3011_v22  ;;  %v8612_v20 = vmul.f32 0.020408163, %v3037_v34  ;;  %v3391_v2 = vsel %vm10133_vm3, %v8563_v30, 0.0  ;;  %vm10146_vm9 = vmmov %vm10141_vm0 }
 0x3d0   :  { %v3034_v38 = vpop.xlane.xlu0 %3033  ;;  %v3020_v6 = vadd.f32 %v3016_v48, %v3012_v63  ;;  %v3476_v57 = vsel %vm10145_vm8, %v3470_v17, 0.0  ;;  %v8647_v9 = vmul.f32 0.020408163, %v3040_v62  ;;  %v3485_v47 = vmul.f32 %v3469_v26, %v3469_v26  ;;  %vm10147_vm2 = vmmov %vm10141_vm0 }
 0x3d1   :  { %v3018_v40 = vadd.f32 %v3014_v24, %v3010_v7  ;;  %3023 = vst.msk [vmem:[%s9547_s14 + $0x270] sm:$0xff] %vm10140_vm13, %v3019_v56  ;;  %v8625_v58 = vmul.f32 0.020408163, %v3034_v38  ;;  %v3067_v30 = vmul.f32 %v8612_v20, %v8612_v20  ;;  %v3492_v63 = vsel %vm10146_vm9, %v3486_v5, 0.0  ;;  %vm10148_vm13 = vmmov %vm10141_vm0  ;;  %v8667_v7 = vld [vmem:[%s9546_s13 + $0x5] ss:$0 sm:$0xff] }
 0x3d2   :  { %3024 = vst.msk [vmem:[%s9547_s14 + $0x278] sm:$0xff] %vm10141_vm0, %v3020_v6  ;;  %v3068_v34 = vmul.f32 %v8647_v9, %v8647_v9  ;;  %v3495_v15 = vsel %vm10147_vm2, %v3487_v12, 0.0  ;;  %v3489_v26 = vsel %vm10148_vm13, %v3485_v47, 0.0  ;;  %v3488_v6 = vmul.f32 %v3472_v55, %v3472_v55 }
 0x3d3   :  { %3022 = vst.msk [vmem:[%s9547_s14 + $0x268] sm:$0xff] %vm10142_vm10, %v3018_v40  ;;  %3399 = vadd.xlane.f32.xlu1 %v3392_v18  ;;  %3474 = vadd.xlane.f32.xlu2 %v3473_v1  ;;  %v3066_v54 = vmul.f32 %v8625_v58, %v8625_v58  ;;  %v3523_v17 = vsel %vm8151_vm14, %v8667_v7, 0.0  ;;  %v3524_v55 = vsel %vm8137_vm7, %v8667_v7, 0.0 }
 0x3d4   :  { %3397 = vadd.xlane.f32.xlu0 %v3391_v2 }
 0x3d6   :  { %v3050_v25 = vpop.xlane.xlu1 %3049 }
 0x3d7   :  { %v3053_v11 = vpop.xlane.xlu2 %3052  ;;  %v3062_v59 = vmul.f32 0.020408163, %v3050_v25 }
 0x3d8   :  { %v3063_v60 = vmul.f32 0.020408163, %v3053_v11  ;;  %v3047_v8 = vpop.xlane.xlu0 %3046 }
 0x3d9   :  { %v3061_v33 = vmul.f32 0.020408163, %v3047_v8  ;;  %v3070_v51 = vsub.f32 %v3062_v59, %v3066_v54  ;;  %v3498_v8 = vsel %vm10141_vm0, %v3488_v6, 0.0 }
 0x3da   :  { %v3071_v45 = vsub.f32 %v3063_v60, %v3067_v30 }
 0x3db   :  { %v3069_v27 = vsub.f32 %v3061_v33, %v3065_v43  ;;  %v3074_v50 = vmax.f32 %v3070_v51, 0.0  ;;  %3480 = vadd.xlane.f32.xlu1 %v3479_v14  ;;  %3483 = vadd.xlane.f32.xlu2 %v3482_v37 }
 0x3dc   :  { %v3075_v49 = vmax.f32 %v3071_v45, 0.0  ;;  %3477 = vadd.xlane.f32.xlu0 %v3476_v57  ;;  %v8688_v45 = vld [vmem:[%s9546_s13 + $0xc] ss:$0 sm:$0xff] }
 0x3dd   :  { %v3073_v28 = vmax.f32 %v3069_v27, 0.0  ;;  %v3106_v41 = vadd.f32 1e-05, %v3074_v50 }
 0x3de   :  { %v8649_v4 = vadd.f32 1e-05, %v3075_v49  ;;  %v8653_v22 = vpop.xlane.xlu1 %3083 }
 0x3df   :  { %v8651_v42 = vadd.f32 1e-05, %v3073_v28  ;;  %v8655_v31 = vpop.xlane.xlu2 %3085  ;;  %4413 = vrsqrt.f32 %v3106_v41  ;;  %vm3125_vm8 = vweird.f32 %v3106_v41 }
 0x3e0   :  { %v3056_v48 = vpop.xlane.xlu0 %3055  ;;  %4415 = vrsqrt.f32 %v8649_v4  ;;  %vm3135_vm2 = vweird.f32 %v8649_v4 }
 0x3e1   :  { %v3064_v62 = vmul.f32 0.020408163, %v3056_v48  ;;  %4417 = vrsqrt.f32 %v8651_v42  ;;  %vm3115_vm13 = vweird.f32 %v8651_v42 }
 0x3e3   :  { %v3072_v24 = vsub.f32 %v3064_v62, %v3068_v34  ;;  %3493 = vadd.xlane.f32.xlu1 %v3492_v63  ;;  %3496 = vadd.xlane.f32.xlu2 %v3495_v15  ;;  %v3526_v63 = vsel %vm8174_vm6, %v8667_v7, 0.0 }
 0x3e4   :  { %3490 = vadd.xlane.f32.xlu0 %v3489_v26 }
 0x3e5   :  { %v3076_v56 = vmax.f32 %v3072_v24, 0.0  ;;  %v4414_v38 = vpop.eup %4413  ;;  %v3525_v24 = vsel %vm8142_vm12, %v8667_v7, 0.0 }
 0x3e6   :  { %v4416_v18 = vpop.eup %4415  ;;  %v3120_v1 = vmul.f32 %v4414_v38, %v3106_v41  ;;  %v8671_v2 = vpop.xlane.xlu1 %3089  ;;  %vm3126_vm10 = vweird.f32 %v4414_v38  ;;  %v3537_v41 = vsel %vm8151_vm14, %v8688_v45, 0.0 }
 0x3e7   :  { %v8669_v40 = vadd.f32 1e-05, %v3076_v56  ;;  %v8673_v30 = vpop.xlane.xlu2 %3097  ;;  %v4418_v0 = vpop.eup %4417  ;;  %v3130_v25 = vmul.f32 %v4416_v18, %v8649_v4  ;;  %vm3136_vm11 = vweird.f32 %v4416_v18  ;;  %vm3127_vm9 = vmor %vm3125_vm8, %vm3126_vm10 }
 0x3e8   :  { %v3088_v11 = vpop.xlane.xlu0 %3087  ;;  %v3110_v54 = vmul.f32 %v4418_v0, %v8651_v42  ;;  %v3121_v59 = vmul.f32 %v4414_v38, %v3120_v1  ;;  %vm3116_vm4 = vweird.f32 %v4418_v0  ;;  %vm3137_vm0 = vmor %vm3135_vm2, %vm3136_vm11 }
 0x3e9   :  { %4419 = vrsqrt.f32 %v8669_v40  ;;  %v3131_v60 = vmul.f32 %v4416_v18, %v3130_v25  ;;  %vm3117_vm10 = vmor %vm3115_vm13, %vm3116_vm4  ;;  %vm3145_vm4 = vweird.f32 %v8669_v40 }
 0x3ea   :  { %v3111_v43 = vmul.f32 %v4418_v0, %v3110_v54  ;;  %v3122_v33 = vmul.f32 0.5, %v3121_v59  ;;  %v4551_v59 = vld [vmem:[%s9552_s5] sm:$0xff] }
 0x3eb   :  { %v3132_v14 = vmul.f32 0.5, %v3131_v60  ;;  %3527 = vadd.xlane.f32.xlu1 %v3523_v17  ;;  %3529 = vadd.xlane.f32.xlu2 %v3524_v55 }
 0x3ec   :  { %v3112_v37 = vmul.f32 0.5, %v3111_v43  ;;  %v3123_v51 = vsub.f32 1.5, %v3122_v33  ;;  %3499 = vadd.xlane.f32.xlu0 %v3498_v8  ;;  %v3539_v33 = vsel %vm8142_vm12, %v8688_v45, 0.0 }
 0x3ed   :  { %v3133_v57 = vsub.f32 1.5, %v3132_v14  ;;  %v3540_v14 = vsel %vm8174_vm6, %v8688_v45, 0.0  ;;  %vm10163_vm6 = vcmask 400384  }
 0x3ee   :  { %v3113_v50 = vsub.f32 1.5, %v3112_v37  ;;  %v3124_v49 = vmul.f32 %v4414_v38, %v3123_v51  ;;  %v3102_v5 = vpop.xlane.xlu1 %3101 }
 0x3ef   :  { %v4420_v27 = vpop.eup %4419  ;;  %v8690_v28 = vpop.xlane.xlu2 %3103  ;;  %v3134_v47 = vmul.f32 %v4416_v18, %v3133_v57  ;;  %v3538_v57 = vsel %vm8137_vm7, %v8688_v45, 0.0  ;;  %v3618_v45 = vld [vmem:[%s9556_s9 + $0x8] sm:$0xff] }
 0x3f0   :  { %v3140_v12 = vmul.f32 %v4420_v27, %v8669_v40  ;;  %v3100_v48 = vpop.xlane.xlu0 %3099  ;;  %v3114_v34 = vmul.f32 %v4418_v0, %v3113_v50  ;;  %v3128_v62 = vsel %vm3127_vm9, %v4414_v38, %v3124_v49  ;;  %vm3146_vm11 = vweird.f32 %v4420_v27 }
 0x3f1   :  { %v3150_v15 = vmul.f32 %v3128_v62, %v8655_v31  ;;  %v3138_v26 = vsel %vm3137_vm0, %v4416_v18, %v3134_v47  ;;  %v4549_v31 = vld [vmem:[%s9552_s5 + $0x8] sm:$0xff]  ;;  %vm3147_vm8 = vmor %vm3145_vm4, %vm3146_vm11  ;;  %vm10149_vm9 = vcmask 400384  }
 0x3f2   :  { %v3141_v4 = vmul.f32 %v4420_v27, %v3140_v12  ;;  %v3118_v56 = vsel %vm3117_vm10, %v4418_v0, %v3114_v34  ;;  %v3151_v6 = vmul.f32 %v3138_v26, %v3088_v11  ;;  %vm10150_vm2 = vmmov %vm10149_vm9  ;;  %v4552_v12 = vld [vmem:[%s9552_s5 + $0x18] sm:$0xff]  ;;  %v3617_v34 = vld [vmem:[%s9556_s9] sm:$0xff] }
 0x3f3   :  { %v3149_v42 = vmul.f32 %v3118_v56, %v8653_v22  ;;  %v3154_v1 = vmul.f32 %v3150_v15, %v8625_v58  ;;  %3533 = vadd.xlane.f32.xlu1 %v3526_v63  ;;  %3541 = vadd.xlane.f32.xlu2 %v3537_v41  ;;  %v3162_v18 = vmul.f32 %v4549_v31, %v3150_v15  ;;  %v4550_v58 = vld [vmem:[%s9552_s5 + $0x10] sm:$0xff]  ;;  %vm10151_vm13 = vmmov %vm10150_vm2 }
 0x3f4   :  { %v3142_v38 = vmul.f32 0.5, %v3141_v4  ;;  %v3155_v25 = vmul.f32 %v3151_v6, %v8612_v20  ;;  %3531 = vadd.xlane.f32.xlu0 %v3525_v24  ;;  %v3163_v22 = vmul.f32 %v4550_v58, %v3151_v6  ;;  %vm10152_vm0 = vmmov %vm10150_vm2  ;;  %v3633_v31 = vmul.f32 %v3617_v34, %v3617_v34 }
 0x3f5   :  { %v3153_v7 = vmul.f32 %v3149_v42, %v8627_v19  ;;  %v3158_v0 = vsub.f32 %v3100_v48, %v3154_v1  ;;  %v3161_v55 = vmul.f32 %v4551_v59, %v3149_v42  ;;  %v3624_v24 = vsel %vm10152_vm0, %v3618_v45, 0.0  ;;  %vm10153_vm10 = vmmov %vm10152_vm0 }
 0x3f6   :  { %v3143_v17 = vsub.f32 1.5, %v3142_v38  ;;  %v3159_v11 = vsub.f32 %v3102_v5, %v3155_v25  ;;  %v3182_v54 = vpop.xlane.xlu1 %3181  ;;  %v3619_v5 = vld [vmem:[%s9556_s9 + $0x10] sm:$0xff]  ;;  %vm10154_vm11 = vmmov %vm10152_vm0 }
 0x3f7   :  { %v3185_v20 = vpop.xlane.xlu2 %3184  ;;  %v3157_v8 = vsub.f32 %v8673_v30, %v3153_v7  ;;  %v3166_v19 = vadd.f32 %v3162_v18, %v3158_v0  ;;  %v8733_v30 = vmul.f32 0.020408163, %v3182_v54  ;;  %v3627_v56 = vsel %vm10153_vm10, %v3619_v5, 0.0  ;;  %vm10155_vm4 = vmmov %vm10152_vm0 }
 0x3f8   :  { %v3144_v60 = vmul.f32 %v4420_v27, %v3143_v17  ;;  %v3179_v43 = vpop.xlane.xlu0 %3178  ;;  %v3167_v40 = vadd.f32 %v3163_v22, %v3159_v11  ;;  %v8776_v18 = vmul.f32 0.020408163, %v3185_v20  ;;  %v3634_v17 = vmul.f32 %v3618_v45, %v3618_v45  ;;  %v3620_v11 = vld [vmem:[%s9556_s9 + $0x18] sm:$0xff] }
 0x3f9   :  { %v3165_v51 = vadd.f32 %v3161_v55, %v3157_v8  ;;  %3170 = vst.msk [vmem:[%s9547_s14 + $0x288] sm:$0xff] %vm10149_vm9, %v3166_v19  ;;  %vm10157_vm9 = vmmov %vm10152_vm0 }
 0x3fa   :  { %v3148_v37 = vsel %vm3147_vm8, %v4420_v27, %v3144_v60  ;;  %3171 = vst.msk [vmem:[%s9547_s14 + $0x290] sm:$0xff] %vm10150_vm2, %v3167_v40  ;;  %v8747_v27 = vmul.f32 0.020408163, %v3179_v43  ;;  %vm10156_vm8 = vmmov %vm10152_vm0  ;;  %v3215_v60 = vmul.f32 %v8776_v18, %v8776_v18  ;;  %v3640_v19 = vsel %vm10157_vm9, %v3634_v17, 0.0 }
 0x3fb   :  { %v3152_v50 = vmul.f32 %v3148_v37, %v8671_v2  ;;  %3169 = vst.msk [vmem:[%s9547_s14 + $0x280] sm:$0xff] %vm10151_vm13, %v3165_v51  ;;  %3545 = vadd.xlane.f32.xlu1 %v3539_v33  ;;  %3547 = vadd.xlane.f32.xlu2 %v3540_v14  ;;  %v3214_v2 = vmul.f32 %v8733_v30, %v8733_v30  ;;  %v3637_v20 = vsel %vm10156_vm8, %v3633_v31, 0.0  ;;  %vm10158_vm2 = vmmov %vm10152_vm0 }
 0x3fc   :  { %3543 = vadd.xlane.f32.xlu0 %v3538_v57  ;;  %v3213_v62 = vmul.f32 %v8747_v27, %v8747_v27  ;;  %v3630_v40 = vsel %vm10158_vm2, %v3620_v11, 0.0  ;;  %v3636_v51 = vmul.f32 %v3620_v11, %v3620_v11  ;;  %v4245_v57 = vld [vmem:[%s9546_s13 + $0x6] ss:$0 sm:$0xff]  ;;  %vm10159_vm13 = vmmov %vm10152_vm0 }
 0x3fd   :  { %v3156_v49 = vmul.f32 %v3152_v50, %v8647_v9  ;;  %v3164_v47 = vmul.f32 %v4552_v12, %v3152_v50 }
 0x3fe   :  { %v3195_v9 = vpop.xlane.xlu1 %3194 }
 0x3ff   :  { %v3160_v48 = vsub.f32 %v8690_v28, %v3156_v49  ;;  %v3198_v63 = vpop.xlane.xlu2 %3197  ;;  %v3209_v41 = vmul.f32 0.020408163, %v3195_v9  ;;  %v3621_v28 = vsel %vm10154_vm11, %v3617_v34, 0.0 }
 0x400   :  { %v3210_v15 = vmul.f32 0.020408163, %v3198_v63  ;;  %v3188_v4 = vpop.xlane.xlu0 %3187 }
 0x401   :  { %v3168_v26 = vadd.f32 %v3164_v47, %v3160_v48  ;;  %v3217_v6 = vsub.f32 %v3209_v41, %v3213_v62  ;;  %v8774_v25 = vmul.f32 0.020408163, %v3188_v4  ;;  %v3646_v41 = vsel %vm10159_vm13, %v3636_v51, 0.0 }
 0x402   :  { %v3218_v42 = vsub.f32 %v3210_v15, %v3214_v2  ;;  %v3635_v2 = vmul.f32 %v3619_v5, %v3619_v5  ;;  %v3671_v5 = vsel %vm4745_vm1, %v4245_v57, 0.0  ;;  %vm10160_vm13 = vnez %v9678_v46 }
 0x403   :  { %3172 = vst.msk [vmem:[%s9547_s14 + $0x298] sm:$0xff] %vm10155_vm4, %v3168_v26  ;;  %v3221_v38 = vmax.f32 %v3217_v6, 0.0  ;;  %3625 = vadd.xlane.f32.xlu1 %v3624_v24  ;;  %3628 = vadd.xlane.f32.xlu2 %v3627_v56  ;;  %v3216_v54 = vmul.f32 %v8774_v25, %v8774_v25 }
 0x404   :  { %v3222_v1 = vmax.f32 %v3218_v42, 0.0  ;;  %3622 = vadd.xlane.f32.xlu0 %v3621_v28  ;;  %v3643_v4 = vsel %vm10152_vm0, %v3635_v2, 0.0  ;;  %vm10161_vm0 = vnez %v9673_v44  ;;  %v3768_v44 = vld [vmem:[%s9557_s10 + $0x18] sm:$0xff] }
 0x405   :  { %v3253_v7 = vadd.f32 1e-05, %v3221_v38 }
 0x406   :  { %v8778_v0 = vadd.f32 1e-05, %v3222_v1  ;;  %v3204_v58 = vpop.xlane.xlu1 %3203 }
 0x407   :  { %v8780_v22 = vpop.xlane.xlu2 %3231  ;;  %4421 = vrsqrt.f32 %v3253_v7  ;;  %v3212_v59 = vmul.f32 0.020408163, %v3204_v58  ;;  %vm3263_vm4 = vweird.f32 %v3253_v7 }
 0x408   :  { %v3201_v55 = vpop.xlane.xlu0 %3200  ;;  %4423 = vrsqrt.f32 %v8778_v0  ;;  %vm3273_vm9 = vweird.f32 %v8778_v0 }
 0x409   :  { %v3211_v8 = vmul.f32 0.020408163, %v3201_v55  ;;  %v3220_v43 = vsub.f32 %v3212_v59, %v3216_v54 }
 0x40b   :  { %v3219_v33 = vsub.f32 %v3211_v8, %v3215_v60  ;;  %v3224_v14 = vmax.f32 %v3220_v43, 0.0  ;;  %3638 = vadd.xlane.f32.xlu1 %v3637_v20  ;;  %3641 = vadd.xlane.f32.xlu2 %v3640_v19  ;;  %v3673_v20 = vsel %vm10160_vm13, %v4245_v57, 0.0  ;;  %v3674_v60 = vsel %vm10161_vm0, %v4245_v57, 0.0 }
 0x40c   :  { %3631 = vadd.xlane.f32.xlu0 %v3630_v40 }
 0x40d   :  { %v3223_v37 = vmax.f32 %v3219_v33, 0.0  ;;  %v4422_v50 = vpop.eup %4421  ;;  %v8796_v49 = vadd.f32 1e-05, %v3224_v14 }
 0x40e   :  { %v4424_v45 = vpop.eup %4423  ;;  %v3258_v12 = vmul.f32 %v4422_v50, %v3253_v7  ;;  %v8800_v48 = vpop.xlane.xlu1 %3235  ;;  %vm3264_vm10 = vweird.f32 %v4422_v50 }
 0x40f   :  { %v8798_v47 = vadd.f32 1e-05, %v3223_v37  ;;  %v8802_v9 = vpop.xlane.xlu2 %3237  ;;  %v3268_v63 = vmul.f32 %v4424_v45, %v8778_v0  ;;  %4425 = vrsqrt.f32 %v8796_v49  ;;  %vm3274_vm11 = vweird.f32 %v4424_v45  ;;  %vm3265_vm8 = vmor %vm3263_vm4, %vm3264_vm10 }
 0x410   :  { %v3234_v34 = vpop.xlane.xlu0 %3233  ;;  %v3259_v62 = vmul.f32 %v4422_v50, %v3258_v12  ;;  %vm3275_vm2 = vmor %vm3273_vm9, %vm3274_vm11  ;;  %vm10162_vm10 = vnez %v9669_v36 }
 0x411   :  { %4427 = vrsqrt.f32 %v8798_v47  ;;  %v3269_v15 = vmul.f32 %v4424_v45, %v3268_v63  ;;  %v3672_v43 = vsel %vm10162_vm10, %v4245_v57, 0.0  ;;  %v4553_v57 = vld [vmem:[%s9553_s6] sm:$0xff]  ;;  %vm3283_vm9 = vweird.f32 %v8798_v47 }
 0x412   :  { %v3260_v26 = vmul.f32 0.5, %v3259_v62 }
 0x413   :  { %v3270_v24 = vmul.f32 0.5, %v3269_v15  ;;  %3647 = vadd.xlane.f32.xlu1 %v3646_v41  ;;  %3675 = vadd.xlane.f32.xlu2 %v3671_v5 }
 0x414   :  { %v3261_v56 = vsub.f32 1.5, %v3260_v26  ;;  %3644 = vadd.xlane.f32.xlu0 %v3643_v4 }
 0x415   :  { %v4426_v6 = vpop.eup %4425  ;;  %v3271_v42 = vsub.f32 1.5, %v3270_v24 }
 0x416   :  { %v3288_v38 = vmul.f32 %v4426_v6, %v8796_v49  ;;  %v3262_v1 = vmul.f32 %v4422_v50, %v3261_v56  ;;  %v3248_v31 = vpop.xlane.xlu1 %3247  ;;  %vm3294_vm11 = vweird.f32 %v4426_v6 }
 0x417   :  { %v4428_v28 = vpop.eup %4427  ;;  %v8812_v17 = vpop.xlane.xlu2 %3249  ;;  %v3272_v11 = vmul.f32 %v4424_v45, %v3271_v42 }
 0x418   :  { %v3278_v58 = vmul.f32 %v4428_v28, %v8798_v47  ;;  %v3246_v54 = vpop.xlane.xlu0 %3245  ;;  %v3266_v59 = vsel %vm3265_vm8, %v4422_v50, %v3262_v1  ;;  %v3289_v55 = vmul.f32 %v4426_v6, %v3288_v38  ;;  %vm3284_vm4 = vweird.f32 %v4428_v28  ;;  %v3765_v1 = vld [vmem:[%s9557_s10] sm:$0xff] }
 0x419   :  { %v3297_v7 = vmul.f32 %v3266_v59, %v8780_v22  ;;  %v3276_v19 = vsel %vm3275_vm2, %v4424_v45, %v3272_v11  ;;  %v8828_v22 = vld [vmem:[%s9546_s13 + $0xd] ss:$0 sm:$0xff]  ;;  %vm3293_vm8 = vweird.f32 %v8796_v49  ;;  %vm3285_vm12 = vmor %vm3283_vm9, %vm3284_vm4 }
 0x41a   :  { %v3279_v8 = vmul.f32 %v4428_v28, %v3278_v58  ;;  %v3290_v40 = vmul.f32 0.5, %v3289_v55  ;;  %v3298_v33 = vmul.f32 %v3276_v19, %v3234_v34  ;;  %vm3295_vm2 = vmor %vm3293_vm8, %vm3294_vm11  ;;  %v3686_v49 = vsel %vm10162_vm10, %v8828_v22, 0.0 }
 0x41b   :  { %v3301_v14 = vmul.f32 %v3297_v7, %v8747_v27  ;;  %3679 = vadd.xlane.f32.xlu1 %v3673_v20  ;;  %3681 = vadd.xlane.f32.xlu2 %v3674_v60  ;;  %v3309_v50 = vmul.f32 %v4553_v57, %v3297_v7  ;;  %v3687_v24 = vsel %vm10160_vm13, %v8828_v22, 0.0  ;;  %vm10164_vm10 = vmmov %vm10163_vm6 }
 0x41c   :  { %v3280_v0 = vmul.f32 0.5, %v3279_v8  ;;  %v3291_v37 = vsub.f32 1.5, %v3290_v40  ;;  %v3302_v51 = vmul.f32 %v3298_v33, %v8733_v30  ;;  %3677 = vadd.xlane.f32.xlu0 %v3672_v43  ;;  %v4554_v30 = vld [vmem:[%s9553_s6 + $0x8] sm:$0xff] }
 0x41d   :  { %v3305_v27 = vsub.f32 %v3246_v54, %v3301_v14  ;;  %v3310_v12 = vmul.f32 %v4554_v30, %v3298_v33  ;;  %v3781_v14 = vmul.f32 %v3765_v1, %v3765_v1 }
 0x41e   :  { %v3281_v2 = vsub.f32 1.5, %v3280_v0  ;;  %v3292_v45 = vmul.f32 %v4426_v6, %v3291_v37  ;;  %v3306_v63 = vsub.f32 %v3248_v31, %v3302_v51  ;;  %v3327_v34 = vpop.xlane.xlu1 %3326 }
 0x41f   :  { %v3330_v62 = vpop.xlane.xlu2 %3329  ;;  %v3313_v5 = vadd.f32 %v3309_v50, %v3305_v27  ;;  %v8850_v47 = vmul.f32 0.020408163, %v3327_v34  ;;  %v3767_v50 = vld [vmem:[%s9557_s10 + $0x10] sm:$0xff] }
 0x420   :  { %v3282_v41 = vmul.f32 %v4428_v28, %v3281_v2  ;;  %v3252_v15 = vpop.xlane.xlu0 %3251  ;;  %v3296_v4 = vsel %vm3295_vm2, %v4426_v6, %v3292_v45  ;;  %v3314_v26 = vadd.f32 %v3310_v12, %v3306_v63  ;;  %v3685_v6 = vsel %vm4745_vm1, %v8828_v22, 0.0  ;;  %vm10165_vm1 = vmmov %vm10163_vm6 }
 0x421   :  { %v3300_v42 = vmul.f32 %v3296_v4, %v8802_v9  ;;  %3317 = vst.msk [vmem:[%s9547_s14 + $0x2a0] sm:$0xff] %vm10163_vm6, %v3313_v5  ;;  %v3769_v7 = vsel %vm10165_vm1, %v3765_v1, 0.0  ;;  %vm10167_vm6 = vmmov %vm10165_vm1  ;;  %v8894_v0 = vmul.f32 0.020408163, %v3330_v62 }
 0x422   :  { %v3286_v56 = vsel %vm3285_vm12, %v4428_v28, %v3282_v41  ;;  %3318 = vst.msk [vmem:[%s9547_s14 + $0x2a8] sm:$0xff] %vm10164_vm10, %v3314_v26  ;;  %v4555_v28 = vld [vmem:[%s9553_s6 + $0x18] sm:$0xff]  ;;  %vm10166_vm12 = vmmov %vm10165_vm1 }
 0x423   :  { %v3299_v36 = vmul.f32 %v3286_v56, %v8800_v48  ;;  %v3304_v46 = vmul.f32 %v3300_v42, %v8774_v25  ;;  %3691 = vadd.xlane.f32.xlu1 %v3686_v49  ;;  %3693 = vadd.xlane.f32.xlu2 %v3687_v24  ;;  %v3312_v35 = vmul.f32 %v4555_v28, %v3300_v42  ;;  %v3766_v25 = vld [vmem:[%s9557_s10 + $0x8] sm:$0xff]  ;;  %vm10168_vm13 = vmmov %vm10165_vm1 }
 0x424   :  { %3689 = vadd.xlane.f32.xlu0 %v3685_v6  ;;  %v3361_v48 = vmul.f32 %v8850_v47, %v8850_v47  ;;  %v3772_v8 = vsel %vm10166_vm12, %v3766_v25, 0.0  ;;  %v3362_v12 = vmul.f32 %v8894_v0, %v8894_v0  ;;  %v3783_v56 = vmul.f32 %v3767_v50, %v3767_v50 }
 0x425   :  { %v3303_v9 = vmul.f32 %v3299_v36, %v8776_v18  ;;  %v3308_v38 = vsub.f32 %v3252_v15, %v3304_v46  ;;  %v4556_v18 = vld [vmem:[%s9553_s6 + $0x10] sm:$0xff]  ;;  %v3784_v42 = vmul.f32 %v3768_v44, %v3768_v44 }
 0x426   :  { %v3311_v31 = vmul.f32 %v4556_v18, %v3299_v36  ;;  %v3336_v11 = vpop.xlane.xlu1 %3335 }
 0x427   :  { %v3307_v58 = vsub.f32 %v8812_v17, %v3303_v9  ;;  %v3343_v54 = vpop.xlane.xlu2 %3342  ;;  %v3316_v59 = vadd.f32 %v3312_v35, %v3308_v38  ;;  %v8883_v19 = vmul.f32 0.020408163, %v3336_v11  ;;  %v3688_v17 = vsel %vm10161_vm0, %v8828_v22, 0.0  ;;  %vm10169_vm0 = vmmov %vm10165_vm1 }
 0x428   :  { %v3357_v55 = vmul.f32 0.020408163, %v3343_v54  ;;  %v3333_v20 = vpop.xlane.xlu0 %3332  ;;  %v3778_v34 = vsel %vm10169_vm0, %v3768_v44, 0.0  ;;  %vm10170_vm11 = vmmov %vm10169_vm0  ;;  %v3782_v9 = vmul.f32 %v3766_v25, %v3766_v25  ;;  %v8930_v54 = vld [vmem:[%s9546_s13 + $0x6] ss:$0 sm:$0xff] }
 0x429   :  { %v3315_v60 = vadd.f32 %v3311_v31, %v3307_v58  ;;  %3320 = vst.msk [vmem:[%s9547_s14 + $0x2b8] sm:$0xff] %vm10167_vm6, %v3316_v59  ;;  %v8892_v33 = vmul.f32 0.020408163, %v3333_v20  ;;  %v3364_v37 = vmul.f32 %v8883_v19, %v8883_v19  ;;  %v3785_v62 = vsel %vm10170_vm11, %v3781_v14, 0.0  ;;  %vm10171_vm4 = vmmov %vm10169_vm0 }
 0x42a   :  { %v3365_v43 = vsub.f32 %v3357_v55, %v3361_v48  ;;  %v3775_v15 = vsel %vm10171_vm4, %v3767_v50, 0.0  ;;  %vm10172_vm8 = vmmov %vm10169_vm0  ;;  %vm10175_vm6 = vnez %v10119_v39 }
 0x42b   :  { %3319 = vst.msk [vmem:[%s9547_s14 + $0x2b0] sm:$0xff] %vm10168_vm13, %v3315_v60  ;;  %3770 = vadd.xlane.f32.xlu1 %v3769_v7  ;;  %3773 = vadd.xlane.f32.xlu2 %v3772_v8  ;;  %v3363_v2 = vmul.f32 %v8892_v33, %v8892_v33  ;;  %v3791_v31 = vsel %vm10172_vm8, %v3783_v56, 0.0  ;;  %vm10173_vm9 = vmmov %vm10169_vm0  ;;  %vm10176_vm13 = vnez %v10038_v32 }
 0x42c   :  { %v3369_v40 = vmax.f32 %v3365_v43, 0.0  ;;  %3695 = vadd.xlane.f32.xlu0 %v3688_v17  ;;  %v3794_v58 = vsel %vm10173_vm9, %v3784_v42, 0.0  ;;  %vm10174_vm2 = vmmov %vm10169_vm0  ;;  %vm10177_vm0 = vnez %v9750_v29 }
 0x42d   :  { %v3788_v25 = vsel %vm10174_vm2, %v3782_v9, 0.0 }
 0x42e   :  { %v3401_v51 = vadd.f32 1e-05, %v3369_v40  ;;  %v3349_v22 = vpop.xlane.xlu1 %3348 }
 0x42f   :  { %v3352_v57 = vpop.xlane.xlu2 %3351  ;;  %v3359_v27 = vmul.f32 0.020408163, %v3349_v22 }
 0x430   :  { %4429 = vrsqrt.f32 %v3401_v51  ;;  %v3360_v45 = vmul.f32 0.020408163, %v3352_v57  ;;  %v3346_v30 = vpop.xlane.xlu0 %3345  ;;  %vm3411_vm1 = vweird.f32 %v3401_v51 }
 0x431   :  { %v3358_v63 = vmul.f32 0.020408163, %v3346_v30  ;;  %v3367_v41 = vsub.f32 %v3359_v27, %v3363_v2  ;;  %v3819_v27 = vsel %vm10177_vm0, %v8930_v54, 0.0 }
 0x432   :  { %v3368_v5 = vsub.f32 %v3360_v45, %v3364_v37  ;;  %v3820_v37 = vsel %vm10175_vm6, %v8930_v54, 0.0 }
 0x433   :  { %v3366_v4 = vsub.f32 %v3358_v63, %v3362_v12  ;;  %v3371_v26 = vmax.f32 %v3367_v41, 0.0  ;;  %3779 = vadd.xlane.f32.xlu1 %v3778_v34  ;;  %3786 = vadd.xlane.f32.xlu2 %v3785_v62  ;;  %v8950_v34 = vld [vmem:[%s9546_s13 + $0xd] ss:$0 sm:$0xff] }
 0x434   :  { %v3372_v49 = vmax.f32 %v3368_v5, 0.0  ;;  %3776 = vadd.xlane.f32.xlu0 %v3775_v15  ;;  %v4557_v5 = vld [vmem:[%s9554_s7] sm:$0xff] }
 0x435   :  { %v3370_v24 = vmax.f32 %v3366_v4, 0.0  ;;  %v8911_v36 = vadd.f32 1e-05, %v3371_v26 }
 0x436   :  { %v4430_v6 = vpop.eup %4429  ;;  %v8913_v46 = vadd.f32 1e-05, %v3372_v49  ;;  %v8917_v48 = vpop.xlane.xlu1 %3381 }
 0x437   :  { %v3406_v28 = vmul.f32 %v4430_v6, %v3401_v51  ;;  %v8915_v35 = vadd.f32 1e-05, %v3370_v24  ;;  %v8919_v38 = vpop.xlane.xlu2 %3383  ;;  %4431 = vrsqrt.f32 %v8911_v36  ;;  %vm3412_vm10 = vweird.f32 %v4430_v6 }
 0x438   :  { %v3380_v1 = vpop.xlane.xlu0 %3379  ;;  %4433 = vrsqrt.f32 %v8913_v46  ;;  %vm3413_vm12 = vmor %vm3411_vm1, %vm3412_vm10  ;;  %v3821_v51 = vsel %vm10176_vm13, %v8930_v54, 0.0  ;;  %vm3431_vm9 = vweird.f32 %v8911_v36  ;;  %vm3441_vm10 = vweird.f32 %v8913_v46 }
 0x439   :  { %v3407_v18 = vmul.f32 %v4430_v6, %v3406_v28  ;;  %4435 = vrsqrt.f32 %v8915_v35  ;;  %v3833_v28 = vsel %vm10177_vm0, %v8950_v34, 0.0  ;;  %vm3421_vm1 = vweird.f32 %v8915_v35 }
 0x43a   :  { %vm10179_vm0 = vnez %v10117_v53 }
 0x43b   :  { %v3408_v11 = vmul.f32 0.5, %v3407_v18  ;;  %3792 = vadd.xlane.f32.xlu1 %v3791_v31  ;;  %3795 = vadd.xlane.f32.xlu2 %v3794_v58 }
 0x43c   :  { %3789 = vadd.xlane.f32.xlu0 %v3788_v25 }
 0x43d   :  { %v3409_v59 = vsub.f32 1.5, %v3408_v11  ;;  %v4432_v55 = vpop.eup %4431  ;;  %v4558_v11 = vld [vmem:[%s9554_s7 + $0x10] sm:$0xff] }
 0x43e   :  { %v4434_v20 = vpop.eup %4433  ;;  %v3426_v60 = vmul.f32 %v4432_v55, %v8911_v36  ;;  %v3394_v8 = vpop.xlane.xlu1 %3393  ;;  %vm3432_vm11 = vweird.f32 %v4432_v55  ;;  %v3834_v36 = vsel %vm10175_vm6, %v8950_v34, 0.0 }
 0x43f   :  { %v3410_v7 = vmul.f32 %v4430_v6, %v3409_v59  ;;  %v8933_v43 = vpop.xlane.xlu2 %3395  ;;  %v4436_v17 = vpop.eup %4435  ;;  %v3436_v40 = vmul.f32 %v4434_v20, %v8913_v46  ;;  %vm3442_vm4 = vweird.f32 %v4434_v20  ;;  %vm3433_vm2 = vmor %vm3431_vm9, %vm3432_vm11  ;;  %vm10178_vm9 = vcmask 400384  }
 0x440   :  { %v3386_v14 = vpop.xlane.xlu0 %3385  ;;  %v3416_v44 = vmul.f32 %v4436_v17, %v8915_v35  ;;  %v3427_v22 = vmul.f32 %v4432_v55, %v3426_v60  ;;  %vm3422_vm8 = vweird.f32 %v4436_v17  ;;  %v3822_v46 = vsel %vm10179_vm0, %v8930_v54, 0.0  ;;  %v3913_v54 = vld [vmem:[%s9558_s11] sm:$0xff]  ;;  %vm10180_vm6 = vmmov %vm10178_vm9 }
 0x441   :  { %v3414_v57 = vsel %vm3413_vm12, %v4430_v6, %v3410_v7  ;;  %v3437_v2 = vmul.f32 %v4434_v20, %v3436_v40  ;;  %vm3443_vm12 = vmor %vm3441_vm10, %vm3442_vm4 }
 0x442   :  { %v3445_v50 = vmul.f32 %v3414_v57, %v3380_v1  ;;  %v3417_v45 = vmul.f32 %v4436_v17, %v3416_v44  ;;  %v3428_v30 = vmul.f32 0.5, %v3427_v22  ;;  %vm3423_vm11 = vmor %vm3421_vm1, %vm3422_vm8  ;;  %v3836_v44 = vsel %vm10179_vm0, %v8950_v34, 0.0 }
 0x443   :  { %v3438_v63 = vmul.f32 0.5, %v3437_v2  ;;  %3825 = vadd.xlane.f32.xlu1 %v3820_v37  ;;  %3827 = vadd.xlane.f32.xlu2 %v3821_v51  ;;  %v3917_v22 = vsel %vm10180_vm6, %v3913_v54, 0.0  ;;  %vm10181_vm4 = vmmov %vm10180_vm6  ;;  %v3915_v2 = vld [vmem:[%s9558_s11 + $0x10] sm:$0xff] }
 0x444   :  { %v3449_v12 = vmul.f32 %v3445_v50, %v8850_v47  ;;  %v3418_v62 = vmul.f32 0.5, %v3417_v45  ;;  %v3429_v41 = vsub.f32 1.5, %v3428_v30  ;;  %3823 = vadd.xlane.f32.xlu0 %v3819_v27  ;;  %v3457_v15 = vmul.f32 %v4557_v5, %v3445_v50  ;;  %vm10182_vm8 = vmmov %vm10181_vm4  ;;  %v9024_v27 = vld [vmem:[%s9558_s11 + $0x18] sm:$0xff] }
 0x445   :  { %v3439_v26 = vsub.f32 1.5, %v3438_v63 }
 0x446   :  { %v3453_v4 = vsub.f32 %v3394_v8, %v3449_v12  ;;  %v3419_v47 = vsub.f32 1.5, %v3418_v62  ;;  %v3430_v49 = vmul.f32 %v4432_v55, %v3429_v41  ;;  %v3400_v24 = vpop.xlane.xlu1 %3399  ;;  %v4560_v8 = vld [vmem:[%s9554_s7 + $0x8] sm:$0xff] }
 0x447   :  { %v3475_v56 = vpop.xlane.xlu2 %3474  ;;  %v3440_v6 = vmul.f32 %v4434_v20, %v3439_v26  ;;  %v3914_v12 = vld [vmem:[%s9558_s11 + $0x8] sm:$0xff] }
 0x448   :  { %v3461_v42 = vadd.f32 %v3457_v15, %v3453_v4  ;;  %v3398_v9 = vpop.xlane.xlu0 %3397  ;;  %v3420_v1 = vmul.f32 %v4436_v17, %v3419_v47  ;;  %v3434_v18 = vsel %vm3433_vm2, %v4432_v55, %v3430_v49  ;;  %vm10183_vm2 = vmmov %vm10181_vm4  ;;  %v9014_v50 = vmul.f32 0.020408163, %v3475_v56 }
 0x449   :  { %v3447_v31 = vmul.f32 %v3434_v18, %v8919_v38  ;;  %v3444_v29 = vsel %vm3443_vm12, %v4434_v20, %v3440_v6  ;;  %vm10185_vm10 = vmmov %vm10183_vm2  ;;  %v3931_v18 = vmul.f32 %v3915_v2, %v3915_v2 }
 0x44a   :  { %3465 = vst.msk [vmem:[%s9547_s14 + $0x2c0] sm:$0xff] %vm10178_vm9, %v3461_v42  ;;  %v3424_v35 = vsel %vm3423_vm11, %v4436_v17, %v3420_v1  ;;  %v3448_v58 = vmul.f32 %v3444_v29, %v3386_v14  ;;  %v3509_v5 = vmul.f32 %v9014_v50, %v9014_v50  ;;  %v3926_v26 = vsel %vm10185_vm10, %v9024_v27, 0.0  ;;  %vm10186_vm1 = vmmov %vm10183_vm2 }
 0x44b   :  { %v3446_v25 = vmul.f32 %v3424_v35, %v8917_v48  ;;  %v3451_v39 = vmul.f32 %v3447_v31, %v8892_v33  ;;  %3837 = vadd.xlane.f32.xlu1 %v3833_v28  ;;  %3839 = vadd.xlane.f32.xlu2 %v3834_v36  ;;  %v3459_v59 = vmul.f32 %v4558_v11, %v3447_v31  ;;  %v4559_v33 = vld [vmem:[%s9554_s7 + $0x18] sm:$0xff]  ;;  %vm10187_vm12 = vmmov %vm10186_vm1 }
 0x44c   :  { %v3452_v38 = vmul.f32 %v3448_v58, %v8883_v19  ;;  %3829 = vadd.xlane.f32.xlu0 %v3822_v46  ;;  %v3460_v48 = vmul.f32 %v4559_v33, %v3448_v58  ;;  %v3929_v29 = vmul.f32 %v3913_v54, %v3913_v54  ;;  %vm10188_vm11 = vmmov %vm10186_vm1  ;;  %v9057_v33 = vld [vmem:[%s9559_s12 + $0x8] sm:$0xff] }
 0x44d   :  { %v3450_v55 = vmul.f32 %v3446_v25, %v8894_v0  ;;  %v3455_v20 = vsub.f32 %v3398_v9, %v3451_v39  ;;  %v3458_v17 = vmul.f32 %v4560_v8, %v3446_v25  ;;  %v3930_v9 = vmul.f32 %v3914_v12, %v3914_v12  ;;  %vm10189_vm9 = vmmov %vm10186_vm1 }
 0x44e   :  { %v3456_v60 = vsub.f32 %v3400_v24, %v3452_v38  ;;  %v3481_v19 = vpop.xlane.xlu1 %3480  ;;  %v3920_v24 = vsel %vm10186_vm1, %v3914_v12, 0.0  ;;  %vm10190_vm0 = vmmov %vm10186_vm1 }
 0x44f   :  { %v3484_v7 = vpop.xlane.xlu2 %3483  ;;  %v3454_v0 = vsub.f32 %v8933_v43, %v3450_v55  ;;  %v3463_v40 = vadd.f32 %v3459_v59, %v3455_v20  ;;  %v8999_v51 = vmul.f32 0.020408163, %v3481_v19  ;;  %v3835_v43 = vsel %vm10176_vm13, %v8950_v34, 0.0  ;;  %vm10184_vm13 = vmmov %vm10183_vm2 }
 0x450   :  { %v3478_v14 = vpop.xlane.xlu0 %3477  ;;  %v3464_v37 = vadd.f32 %v3460_v48, %v3456_v60  ;;  %v3923_v4 = vsel %vm10184_vm13, %v3915_v2, 0.0  ;;  %v9037_v28 = vmul.f32 0.020408163, %v3484_v7  ;;  %v3936_v39 = vsel %vm10187_vm12, %v3930_v9, 0.0  ;;  %v4063_v60 = vld [vmem:[%s9559_s12 + $0x10] sm:$0xff]  ;;  %vm10191_vm6 = vmmov %vm10190_vm0 }
 0x451   :  { %v3462_v57 = vadd.f32 %v3458_v17, %v3454_v0  ;;  %3467 = vst.msk [vmem:[%s9547_s14 + $0x2d0] sm:$0xff] %vm10181_vm4, %v3463_v40  ;;  %v9012_v53 = vmul.f32 0.020408163, %v3478_v14  ;;  %v3511_v32 = vmul.f32 %v8999_v51, %v8999_v51  ;;  %v3939_v59 = vsel %vm10188_vm11, %v3931_v18, 0.0  ;;  %v4061_v40 = vld [vmem:[%s9559_s12] sm:$0xff]  ;;  %vm10192_vm4 = vmmov %vm10190_vm0 }
 0x452   :  { %3468 = vst.msk [vmem:[%s9547_s14 + $0x2d8] sm:$0xff] %vm10182_vm8, %v3464_v37  ;;  %v3512_v38 = vmul.f32 %v9037_v28, %v9037_v28  ;;  %v3933_v55 = vsel %vm10189_vm9, %v3929_v29, 0.0  ;;  %vm10193_vm11 = vmmov %vm10190_vm0 }
 0x453   :  { %3466 = vst.msk [vmem:[%s9547_s14 + $0x2c8] sm:$0xff] %vm10183_vm2, %v3462_v57  ;;  %3843 = vadd.xlane.f32.xlu1 %v3836_v44  ;;  %3918 = vadd.xlane.f32.xlu2 %v3917_v22  ;;  %v3510_v63 = vmul.f32 %v9012_v53, %v9012_v53  ;;  %v4068_v22 = vsel %vm10190_vm0, %v9057_v33, 0.0 }
 0x454   :  { %3841 = vadd.xlane.f32.xlu0 %v3835_v43 }
 0x456   :  { %v3494_v45 = vpop.xlane.xlu1 %3493 }
 0x457   :  { %v3497_v30 = vpop.xlane.xlu2 %3496  ;;  %v3506_v34 = vmul.f32 0.020408163, %v3494_v45  ;;  %v4065_v45 = vsel %vm10192_vm4, %v4061_v40, 0.0 }
 0x458   :  { %v3507_v62 = vmul.f32 0.020408163, %v3497_v30  ;;  %v3491_v41 = vpop.xlane.xlu0 %3490 }
 0x459   :  { %v3505_v15 = vmul.f32 0.020408163, %v3491_v41  ;;  %v3514_v47 = vsub.f32 %v3506_v34, %v3510_v63  ;;  %v3932_v34 = vmul.f32 %v9024_v27, %v9024_v27  ;;  %v4064_v27 = vld [vmem:[%s9559_s12 + $0x18] sm:$0xff] }
 0x45a   :  { %v3515_v49 = vsub.f32 %v3507_v62, %v3511_v32  ;;  %v4071_v32 = vsel %vm10191_vm6, %v4063_v60, 0.0  ;;  %vm10194_vm6 = vmmov %vm10192_vm4 }
 0x45b   :  { %v3513_v56 = vsub.f32 %v3505_v15, %v3509_v5  ;;  %v3518_v42 = vmax.f32 %v3514_v47, 0.0  ;;  %3924 = vadd.xlane.f32.xlu1 %v3923_v4  ;;  %3927 = vadd.xlane.f32.xlu2 %v3926_v26  ;;  %v4077_v5 = vmul.f32 %v4061_v40, %v4061_v40  ;;  %v3942_v9 = vsel %vm10193_vm11, %v3932_v34, 0.0 }
 0x45c   :  { %v3519_v6 = vmax.f32 %v3515_v49, 0.0  ;;  %3921 = vadd.xlane.f32.xlu0 %v3920_v24 }
 0x45d   :  { %v3517_v1 = vmax.f32 %v3513_v56, 0.0  ;;  %v3550_v36 = vadd.f32 1e-05, %v3518_v42 }
 0x45e   :  { %v9039_v31 = vadd.f32 1e-05, %v3519_v6  ;;  %v9043_v35 = vpop.xlane.xlu1 %3527 }
 0x45f   :  { %v9041_v46 = vadd.f32 1e-05, %v3517_v1  ;;  %v9045_v58 = vpop.xlane.xlu2 %3529  ;;  %4437 = vrsqrt.f32 %v3550_v36  ;;  %vm3569_vm10 = vweird.f32 %v3550_v36 }
 0x460   :  { %v3500_v25 = vpop.xlane.xlu0 %3499  ;;  %4439 = vrsqrt.f32 %v9039_v31  ;;  %vm3579_vm12 = vweird.f32 %v9039_v31 }
 0x461   :  { %v3508_v11 = vmul.f32 0.020408163, %v3500_v25  ;;  %4441 = vrsqrt.f32 %v9041_v46  ;;  %vm3559_vm9 = vweird.f32 %v9041_v46 }
 0x463   :  { %v3516_v20 = vsub.f32 %v3508_v11, %v3512_v38  ;;  %3937 = vadd.xlane.f32.xlu1 %v3936_v39  ;;  %3940 = vadd.xlane.f32.xlu2 %v3939_v59 }
 0x464   :  { %3934 = vadd.xlane.f32.xlu0 %v3933_v55 }
 0x465   :  { %v3520_v54 = vmax.f32 %v3516_v20, 0.0  ;;  %v4438_v48 = vpop.eup %4437  ;;  %v4079_v20 = vmul.f32 %v4063_v60, %v4063_v60 }
 0x466   :  { %v4440_v19 = vpop.eup %4439  ;;  %v3564_v7 = vmul.f32 %v4438_v48, %v3550_v36  ;;  %v9064_v17 = vpop.xlane.xlu1 %3533  ;;  %vm3570_vm8 = vweird.f32 %v4438_v48  ;;  %v4081_v36 = vsel %vm10194_vm6, %v4077_v5, 0.0 }
 0x467   :  { %v9062_v8 = vadd.f32 1e-05, %v3520_v54  ;;  %v9066_v0 = vpop.xlane.xlu2 %3541  ;;  %v4442_v14 = vpop.eup %4441  ;;  %v3574_v37 = vmul.f32 %v4440_v19, %v9039_v31  ;;  %vm3580_vm2 = vweird.f32 %v4440_v19  ;;  %vm3571_vm1 = vmor %vm3569_vm10, %vm3570_vm8 }
 0x468   :  { %v3532_v44 = vpop.xlane.xlu0 %3531  ;;  %v3554_v57 = vmul.f32 %v4442_v14, %v9041_v46  ;;  %v3565_v43 = vmul.f32 %v4438_v48, %v3564_v7  ;;  %vm3560_vm13 = vweird.f32 %v4442_v14  ;;  %vm3581_vm0 = vmor %vm3579_vm12, %vm3580_vm2 }
 0x469   :  { %4443 = vrsqrt.f32 %v9062_v8  ;;  %v3575_v2 = vmul.f32 %v4440_v19, %v3574_v37  ;;  %vm3561_vm4 = vmor %vm3559_vm9, %vm3560_vm13  ;;  %vm3589_vm13 = vweird.f32 %v9062_v8 }
 0x46a   :  { %v3555_v30 = vmul.f32 %v4442_v14, %v3554_v57  ;;  %v3566_v12 = vmul.f32 0.5, %v3565_v43  ;;  %vm10195_vm8 = vmmov %vm10194_vm6 }
 0x46b   :  { %v3576_v63 = vmul.f32 0.5, %v3575_v2  ;;  %4069 = vadd.xlane.f32.xlu1 %v4068_v22  ;;  %4072 = vadd.xlane.f32.xlu2 %v4071_v32  ;;  %v4074_v31 = vsel %vm10195_vm8, %v4064_v27, 0.0 }
 0x46c   :  { %v3556_v62 = vmul.f32 0.5, %v3555_v30  ;;  %v3567_v41 = vsub.f32 1.5, %v3566_v12  ;;  %4066 = vadd.xlane.f32.xlu0 %v4065_v45 }
 0x46d   :  { %v3577_v15 = vsub.f32 1.5, %v3576_v63 }
 0x46e   :  { %v3557_v26 = vsub.f32 1.5, %v3556_v62  ;;  %v3568_v47 = vmul.f32 %v4438_v48, %v3567_v41  ;;  %v3546_v49 = vpop.xlane.xlu1 %3545 }
 0x46f   :  { %v9080_v4 = vpop.eup %4443  ;;  %v9082_v24 = vpop.xlane.xlu2 %3547  ;;  %v3578_v42 = vmul.f32 %v4440_v19, %v3577_v15  ;;  %v4564_v15 = vld [vmem:[%s9555_s8 + $0x18] sm:$0xff] }
 0x470   :  { %v3584_v56 = vmul.f32 %v9080_v4, %v9062_v8  ;;  %v3544_v6 = vpop.xlane.xlu0 %3543  ;;  %v3558_v1 = vmul.f32 %v4442_v14, %v3557_v26  ;;  %v3572_v18 = vsel %vm3571_vm1, %v4438_v48, %v3568_v47  ;;  %vm3590_vm2 = vweird.f32 %v9080_v4  ;;  %vm10196_vm1 = vmmov %vm10194_vm6 }
 0x471   :  { %v3594_v29 = vmul.f32 %v3572_v18, %v9045_v58  ;;  %v3582_v39 = vsel %vm3581_vm0, %v4440_v19, %v3578_v42  ;;  %v4080_v58 = vmul.f32 %v4064_v27, %v4064_v27  ;;  %v4078_v48 = vmul.f32 %v9057_v33, %v9057_v33  ;;  %v4561_v19 = vld [vmem:[%s9555_s8 + $0x8] sm:$0xff]  ;;  %v4563_v33 = vld [vmem:[%s9555_s8] sm:$0xff]  ;;  %vm3591_vm10 = vmor %vm3589_vm13, %vm3590_vm2 }
 0x472   :  { %v3585_v25 = vmul.f32 %v9080_v4, %v3584_v56  ;;  %v3562_v38 = vsel %vm3561_vm4, %v4442_v14, %v3558_v1  ;;  %v3595_v11 = vmul.f32 %v3582_v39, %v3532_v44  ;;  %v4087_v2 = vsel %vm10196_vm1, %v4079_v20, 0.0  ;;  %vm10197_vm12 = vmmov %vm10196_vm1 }
 0x473   :  { %v3593_v59 = vmul.f32 %v3562_v38, %v9043_v35  ;;  %v3598_v46 = vmul.f32 %v3594_v29, %v9012_v53  ;;  %3943 = vadd.xlane.f32.xlu1 %v3942_v9  ;;  %4082 = vadd.xlane.f32.xlu2 %v4081_v36  ;;  %v3606_v35 = vmul.f32 %v4561_v19, %v3594_v29  ;;  %v4090_v45 = vsel %vm10197_vm12, %v4080_v58, 0.0  ;;  %vm10198_vm11 = vmmov %vm10196_vm1 }
 0x474   :  { %v3586_v55 = vmul.f32 0.5, %v3585_v25  ;;  %v3599_v54 = vmul.f32 %v3595_v11, %v8999_v51  ;;  %4075 = vadd.xlane.f32.xlu0 %v4074_v31  ;;  %v4562_v51 = vld [vmem:[%s9555_s8 + $0x10] sm:$0xff]  ;;  %vm10199_vm9 = vmmov %vm10196_vm1  ;;  %vm10202_vm4 = vnez %v9790_v23  ;;  %v4250_v31 = vld [vmem:[%s9546_s13 + $0x6] ss:$0 sm:$0xff]  ;;  %vm10204_vm2 = vnez %v10090_v13 }
 0x475   :  { %v3597_v53 = vmul.f32 %v3593_v59, %v9014_v50  ;;  %v3602_v40 = vsub.f32 %v3544_v6, %v3598_v46  ;;  %v3607_v60 = vmul.f32 %v4562_v51, %v3595_v11  ;;  %v3605_v22 = vmul.f32 %v4563_v33, %v3593_v59  ;;  %vm10200_vm0 = vmmov %vm10196_vm1 }
 0x476   :  { %v3587_v7 = vsub.f32 1.5, %v3586_v55  ;;  %v3603_v14 = vsub.f32 %v3546_v49, %v3599_v54  ;;  %v3626_v37 = vpop.xlane.xlu1 %3625  ;;  %vm10201_vm6 = vmmov %vm10200_vm0  ;;  %vm10205_vm13 = vnez %v10086_v52 }
 0x477   :  { %v3629_v44 = vpop.xlane.xlu2 %3628  ;;  %v3601_v50 = vsub.f32 %v9066_v0, %v3597_v53  ;;  %v3610_v43 = vadd.f32 %v3606_v35, %v3602_v40  ;;  %v9126_v63 = vmul.f32 0.020408163, %v3626_v37  ;;  %v4084_v0 = vsel %vm10199_vm9, %v4078_v48, 0.0  ;;  %vm10203_vm8 = vmmov %vm10200_vm0  ;;  %v4251_v37 = vld [vmem:[%s9546_s13 + $0xd] ss:$0 sm:$0xff] }
 0x478   :  { %v3588_v57 = vmul.f32 %v9080_v4, %v3587_v7  ;;  %v3623_v32 = vpop.xlane.xlu0 %3622  ;;  %v3611_v8 = vadd.f32 %v3607_v60, %v3603_v14  ;;  %v9167_v38 = vmul.f32 0.020408163, %v3629_v44  ;;  %v4115_v48 = vsel %vm8151_vm14, %v4250_v31, 0.0 }
 0x479   :  { %v3609_v12 = vadd.f32 %v3605_v22, %v3601_v50  ;;  %3614 = vst.msk [vmem:[%s9547_s14 + $0x2e8] sm:$0xff] %vm10198_vm11, %v3610_v43  ;;  %v9138_v62 = vmul.f32 0.020408163, %v3623_v32  ;;  %v3658_v5 = vmul.f32 %v9126_v63, %v9126_v63  ;;  %v4116_v7 = vsel %vm8137_vm7, %v4250_v31, 0.0 }
 0x47a   :  { %v3592_v30 = vsel %vm3591_vm10, %v9080_v4, %v3588_v57  ;;  %3615 = vst.msk [vmem:[%s9547_s14 + $0x2f0] sm:$0xff] %vm10200_vm0, %v3611_v8  ;;  %v3659_v19 = vmul.f32 %v9167_v38, %v9167_v38 }
 0x47b   :  { %v3596_v34 = vmul.f32 %v3592_v30, %v9064_v17  ;;  %3613 = vst.msk [vmem:[%s9547_s14 + $0x2e0] sm:$0xff] %vm10201_vm6, %v3609_v12  ;;  %4088 = vadd.xlane.f32.xlu1 %v4087_v2  ;;  %4091 = vadd.xlane.f32.xlu2 %v4090_v45  ;;  %v4249_v17 = vld [vmem:[%s9546_s13 + $0x6] ss:$0 sm:$0xff]  ;;  %v4118_v30 = vsel %vm10204_vm2, %v4250_v31, 0.0  ;;  %v3981_v12 = vsel %vm10202_vm4, %v4251_v37, 0.0 }
 0x47c   :  { %4085 = vadd.xlane.f32.xlu0 %v4084_v0  ;;  %v3968_v9 = vsel %vm10132_vm15, %v4249_v17, 0.0  ;;  %v3969_v1 = vsel %vm10133_vm3, %v4249_v17, 0.0  ;;  %v3970_v40 = vsel %vm10138_vm5, %v4249_v17, 0.0 }
 0x47d   :  { %v3600_v41 = vmul.f32 %v3596_v34, %v9037_v28  ;;  %v3608_v4 = vmul.f32 %v4564_v15, %v3596_v34  ;;  %v3657_v28 = vmul.f32 %v9138_v62, %v9138_v62  ;;  %v4117_v34 = vsel %vm10205_vm13, %v4250_v31, 0.0 }
 0x47e   :  { %v3639_v47 = vpop.xlane.xlu1 %3638 }
 0x47f   :  { %v3604_v26 = vsub.f32 %v9082_v24, %v3600_v41  ;;  %v3642_v49 = vpop.xlane.xlu2 %3641  ;;  %v3653_v27 = vmul.f32 0.020408163, %v3639_v47  ;;  %v3967_v24 = vsel %vm10202_vm4, %v4249_v17, 0.0 }
 0x480   :  { %v3654_v56 = vmul.f32 0.020408163, %v3642_v49  ;;  %v3632_v42 = vpop.xlane.xlu0 %3631 }
 0x481   :  { %v3612_v6 = vadd.f32 %v3608_v4, %v3604_v26  ;;  %v3661_v18 = vsub.f32 %v3653_v27, %v3657_v28  ;;  %v9162_v39 = vmul.f32 0.020408163, %v3632_v42 }
 0x482   :  { %v3662_v36 = vsub.f32 %v3654_v56, %v3658_v5 }
 0x483   :  { %3616 = vst.msk [vmem:[%s9547_s14 + $0x2f8] sm:$0xff] %vm10203_vm8, %v3612_v6  ;;  %v3665_v29 = vmax.f32 %v3661_v18, 0.0  ;;  %3973 = vadd.xlane.f32.xlu1 %v3968_v9  ;;  %3975 = vadd.xlane.f32.xlu2 %v3969_v1  ;;  %v3660_v20 = vmul.f32 %v9162_v39, %v9162_v39  ;;  %v3983_v1 = vsel %vm10133_vm3, %v4251_v37, 0.0  ;;  %v3984_v18 = vsel %vm10138_vm5, %v4251_v37, 0.0 }
 0x484   :  { %v3666_v25 = vmax.f32 %v3662_v36, 0.0  ;;  %3971 = vadd.xlane.f32.xlu0 %v3967_v24 }
 0x485   :  { %v3697_v11 = vadd.f32 1e-05, %v3665_v29 }
 0x486   :  { %v3698_v59 = vadd.f32 1e-05, %v3666_v25  ;;  %v3648_v55 = vpop.xlane.xlu1 %3647  ;;  %v3982_v25 = vsel %vm10132_vm15, %v4251_v37, 0.0  ;;  %v4130_v37 = vsel %vm8137_vm7, %v4252_v10, 0.0 }
 0x487   :  { %v3676_v46 = vpop.xlane.xlu2 %3675  ;;  %4445 = vrsqrt.f32 %v3697_v11  ;;  %v3656_v54 = vmul.f32 0.020408163, %v3648_v55  ;;  %vm3707_vm12 = vweird.f32 %v3697_v11 }
 0x488   :  { %v3645_v58 = vpop.xlane.xlu0 %3644  ;;  %4447 = vrsqrt.f32 %v3698_v59  ;;  %vm3717_vm9 = vweird.f32 %v3698_v59 }
 0x489   :  { %v3655_v35 = vmul.f32 0.020408163, %v3645_v58  ;;  %v3664_v53 = vsub.f32 %v3656_v54, %v3660_v20 }
 0x48b   :  { %v3663_v51 = vsub.f32 %v3655_v35, %v3659_v19  ;;  %v3668_v60 = vmax.f32 %v3664_v53, 0.0  ;;  %4119 = vadd.xlane.f32.xlu1 %v4115_v48  ;;  %4121 = vadd.xlane.f32.xlu2 %v4116_v7 }
 0x48c   :  { %3977 = vadd.xlane.f32.xlu0 %v3970_v40 }
 0x48d   :  { %v3667_v14 = vmax.f32 %v3663_v51, 0.0  ;;  %v4446_v44 = vpop.eup %4445  ;;  %v9182_v33 = vadd.f32 1e-05, %v3668_v60 }
 0x48e   :  { %v4448_v22 = vpop.eup %4447  ;;  %v3702_v57 = vmul.f32 %v4446_v44, %v3697_v11  ;;  %v9186_v43 = vpop.xlane.xlu1 %3679  ;;  %vm3708_vm10 = vweird.f32 %v4446_v44 }
 0x48f   :  { %v9184_v50 = vadd.f32 1e-05, %v3667_v14  ;;  %v9188_v32 = vpop.xlane.xlu2 %3681  ;;  %v3712_v8 = vmul.f32 %v4448_v22, %v3698_v59  ;;  %4449 = vrsqrt.f32 %v9182_v33  ;;  %vm3718_vm1 = vweird.f32 %v4448_v22  ;;  %vm3709_vm11 = vmor %vm3707_vm12, %vm3708_vm10 }
 0x490   :  { %v3678_v2 = vpop.xlane.xlu0 %3677  ;;  %v3703_v45 = vmul.f32 %v4446_v44, %v3702_v57  ;;  %vm3719_vm0 = vmor %vm3717_vm9, %vm3718_vm1  ;;  %vm3737_vm3 = vweird.f32 %v9182_v33  ;;  %vm10206_vm10 = vcmask 400384  }
 0x491   :  { %4451 = vrsqrt.f32 %v9184_v50  ;;  %v3713_v0 = vmul.f32 %v4448_v22, %v3712_v8  ;;  %vm3727_vm5 = vweird.f32 %v9184_v50  ;;  %vm10207_vm1 = vmmov %vm10206_vm10 }
 0x492   :  { %v3704_v41 = vmul.f32 0.5, %v3703_v45  ;;  %v4568_v45 = vld [vmem:[%s9556_s9 + $0x10] sm:$0xff]  ;;  %vm10208_vm7 = vmmov %vm10207_vm1 }
 0x493   :  { %v3714_v17 = vmul.f32 0.5, %v3713_v0  ;;  %4125 = vadd.xlane.f32.xlu1 %v4118_v30  ;;  %3985 = vadd.xlane.f32.xlu2 %v3981_v12 }
 0x494   :  { %v3705_v5 = vsub.f32 1.5, %v3704_v41  ;;  %4123 = vadd.xlane.f32.xlu0 %v4117_v34 }
 0x495   :  { %v4450_v15 = vpop.eup %4449  ;;  %v3715_v4 = vsub.f32 1.5, %v3714_v17 }
 0x496   :  { %v3732_v47 = vmul.f32 %v4450_v15, %v9182_v33  ;;  %v3706_v49 = vmul.f32 %v4446_v44, %v3705_v5  ;;  %v3692_v23 = vpop.xlane.xlu1 %3691  ;;  %vm3738_vm6 = vweird.f32 %v4450_v15 }
 0x497   :  { %v4452_v26 = vpop.eup %4451  ;;  %v9199_v28 = vpop.xlane.xlu2 %3693  ;;  %v3716_v56 = vmul.f32 %v4448_v22, %v3715_v4  ;;  %vm3739_vm4 = vmor %vm3737_vm3, %vm3738_vm6  ;;  %v4132_v4 = vsel %vm10204_vm2, %v4252_v10, 0.0 }
 0x498   :  { %v3722_v27 = vmul.f32 %v4452_v26, %v9184_v50  ;;  %v3690_v42 = vpop.xlane.xlu0 %3689  ;;  %v3710_v6 = vsel %vm3709_vm11, %v4446_v44, %v3706_v49  ;;  %v3733_v9 = vmul.f32 %v4450_v15, %v3732_v47  ;;  %vm3728_vm15 = vweird.f32 %v4452_v26 }
 0x499   :  { %v3741_v36 = vmul.f32 %v3710_v6, %v3676_v46  ;;  %v3720_v29 = vsel %vm3719_vm0, %v4448_v22, %v3716_v56  ;;  %vm3729_vm8 = vmor %vm3727_vm5, %vm3728_vm15  ;;  %v4131_v44 = vsel %vm10205_vm13, %v4252_v10, 0.0  ;;  %v4129_v50 = vsel %vm8151_vm14, %v4252_v10, 0.0 }
 0x49a   :  { %v3723_v24 = vmul.f32 %v4452_v26, %v3722_v27  ;;  %v3734_v31 = vmul.f32 0.5, %v3733_v9  ;;  %v3742_v11 = vmul.f32 %v3720_v29, %v3678_v2  ;;  %vm10209_vm14 = vmmov %vm10207_vm1 }
 0x49b   :  { %v3745_v59 = vmul.f32 %v3741_v36, %v9138_v62  ;;  %3989 = vadd.xlane.f32.xlu1 %v3983_v1  ;;  %3991 = vadd.xlane.f32.xlu2 %v3984_v18  ;;  %v3753_v46 = vmul.f32 %v4565_v16, %v3741_v36 }
 0x49c   :  { %v3724_v55 = vmul.f32 0.5, %v3723_v24  ;;  %v3735_v20 = vsub.f32 1.5, %v3734_v31  ;;  %v3746_v61 = vmul.f32 %v3742_v11, %v9126_v63  ;;  %3987 = vadd.xlane.f32.xlu0 %v3982_v25  ;;  %v4566_v63 = vld [vmem:[%s9556_s9 + $0x8] sm:$0xff] }
 0x49d   :  { %v3749_v58 = vsub.f32 %v3690_v42, %v3745_v59  ;;  %v3754_v48 = vmul.f32 %v4566_v63, %v3742_v11 }
 0x49e   :  { %v3725_v54 = vsub.f32 1.5, %v3724_v55  ;;  %v3736_v62 = vmul.f32 %v4450_v15, %v3735_v20  ;;  %v3750_v19 = vsub.f32 %v3692_v23, %v3746_v61  ;;  %v3771_v35 = vpop.xlane.xlu1 %3770 }
 0x49f   :  { %v3774_v7 = vpop.xlane.xlu2 %3773  ;;  %v3757_v40 = vadd.f32 %v3753_v46, %v3749_v58  ;;  %v9231_v57 = vmul.f32 0.020408163, %v3771_v35 }
 0x4a0   :  { %v3726_v53 = vmul.f32 %v4452_v26, %v3725_v54  ;;  %v3696_v51 = vpop.xlane.xlu0 %3695  ;;  %v3740_v60 = vsel %vm3739_vm4, %v4450_v15, %v3736_v62  ;;  %v3758_v14 = vadd.f32 %v3754_v48, %v3750_v19  ;;  %v9265_v49 = vmul.f32 0.020408163, %v3774_v7 }
 0x4a1   :  { %v3744_v22 = vmul.f32 %v3740_v60, %v9188_v32  ;;  %3761 = vst.msk [vmem:[%s9547_s14 + $0x300] sm:$0xff] %vm10206_vm10, %v3757_v40  ;;  %v4567_v32 = vld [vmem:[%s9556_s9 + $0x18] sm:$0xff]  ;;  %vm10210_vm10 = vmmov %vm10207_vm1 }
 0x4a2   :  { %v3730_v33 = vsel %vm3729_vm8, %v4452_v26, %v3726_v53  ;;  %3762 = vst.msk [vmem:[%s9547_s14 + $0x308] sm:$0xff] %vm10207_vm1, %v3758_v14  ;;  %v3806_v1 = vmul.f32 %v9265_v49, %v9265_v49 }
 0x4a3   :  { %v3743_v8 = vmul.f32 %v3730_v33, %v9186_v43  ;;  %v3748_v21 = vmul.f32 %v3744_v22, %v9162_v39  ;;  %4135 = vadd.xlane.f32.xlu1 %v4130_v37  ;;  %4137 = vadd.xlane.f32.xlu2 %v4131_v44  ;;  %v3756_v3 = vmul.f32 %v4567_v32, %v3744_v22 }
 0x4a4   :  { %4133 = vadd.xlane.f32.xlu0 %v4129_v50  ;;  %v3805_v43 = vmul.f32 %v9231_v57, %v9231_v57 }
 0x4a5   :  { %v3747_v52 = vmul.f32 %v3743_v8, %v9167_v38  ;;  %v3752_v2 = vsub.f32 %v3696_v51, %v3748_v21  ;;  %v3755_v30 = vmul.f32 %v4568_v45, %v3743_v8 }
 0x4a6   :  { %v3780_v12 = vpop.xlane.xlu1 %3779 }
 0x4a7   :  { %v3751_v39 = vsub.f32 %v9199_v28, %v3747_v52  ;;  %v3787_v0 = vpop.xlane.xlu2 %3786  ;;  %v3760_v38 = vadd.f32 %v3756_v3, %v3752_v2  ;;  %v9255_v5 = vmul.f32 0.020408163, %v3780_v12  ;;  %v4569_v2 = vld [vmem:[%s9557_s10] sm:$0xff] }
 0x4a8   :  { %v3801_v34 = vmul.f32 0.020408163, %v3787_v0  ;;  %v3777_v41 = vpop.xlane.xlu0 %3776 }
 0x4a9   :  { %v3759_v17 = vadd.f32 %v3755_v30, %v3751_v39  ;;  %3764 = vst.msk [vmem:[%s9547_s14 + $0x318] sm:$0xff] %vm10208_vm7, %v3760_v38  ;;  %v9263_v47 = vmul.f32 0.020408163, %v3777_v41  ;;  %v3808_v23 = vmul.f32 %v9255_v5, %v9255_v5  ;;  %vm10211_vm7 = vmmov %vm10207_vm1 }
 0x4aa   :  { %v3809_v15 = vsub.f32 %v3801_v34, %v3805_v43 }
 0x4ab   :  { %3763 = vst.msk [vmem:[%s9547_s14 + $0x310] sm:$0xff] %vm10209_vm14, %v3759_v17  ;;  %v3807_v13 = vmul.f32 %v9263_v47, %v9263_v47  ;;  %vm10212_vm14 = vmmov %vm10207_vm1 }
 0x4ac   :  { %v3813_v26 = vmax.f32 %v3809_v15, 0.0  ;;  %4139 = vadd.xlane.f32.xlu0 %v4132_v4 }
 0x4ae   :  { %v3845_v28 = vadd.f32 1e-05, %v3813_v26  ;;  %v3793_v27 = vpop.xlane.xlu1 %3792 }
 0x4af   :  { %v3796_v56 = vpop.xlane.xlu2 %3795  ;;  %v3803_v42 = vmul.f32 0.020408163, %v3793_v27 }
 0x4b0   :  { %4453 = vrsqrt.f32 %v3845_v28  ;;  %v3804_v6 = vmul.f32 0.020408163, %v3796_v56  ;;  %v3790_v9 = vpop.xlane.xlu0 %3789  ;;  %vm3855_vm13 = vweird.f32 %v3845_v28 }
 0x4b1   :  { %v3802_v18 = vmul.f32 0.020408163, %v3790_v9  ;;  %v3811_v36 = vsub.f32 %v3803_v42, %v3807_v13 }
 0x4b2   :  { %v3812_v24 = vsub.f32 %v3804_v6, %v3808_v23  ;;  %v4570_v6 = vld [vmem:[%s9557_s10 + $0x10] sm:$0xff] }
 0x4b3   :  { %v3810_v29 = vsub.f32 %v3802_v18, %v3806_v1  ;;  %v3815_v25 = vmax.f32 %v3811_v36, 0.0  ;;  %v4571_v36 = vld [vmem:[%s9557_s10 + $0x18] sm:$0xff] }
 0x4b4   :  { %v3816_v31 = vmax.f32 %v3812_v24, 0.0 }
 0x4b5   :  { %v3814_v11 = vmax.f32 %v3810_v29, 0.0  ;;  %v3847_v59 = vadd.f32 1e-05, %v3815_v25 }
 0x4b6   :  { %v4454_v55 = vpop.eup %4453  ;;  %v3848_v20 = vadd.f32 1e-05, %v3816_v31  ;;  %v3826_v16 = vpop.xlane.xlu1 %3825 }
 0x4b7   :  { %v3850_v61 = vmul.f32 %v4454_v55, %v3845_v28  ;;  %v3846_v10 = vadd.f32 1e-05, %v3814_v11  ;;  %v3828_v46 = vpop.xlane.xlu2 %3827  ;;  %4455 = vrsqrt.f32 %v3847_v59  ;;  %vm3856_vm2 = vweird.f32 %v4454_v55 }
 0x4b8   :  { %v3824_v54 = vpop.xlane.xlu0 %3823  ;;  %4457 = vrsqrt.f32 %v3848_v20  ;;  %vm3857_vm12 = vmor %vm3855_vm13, %vm3856_vm2  ;;  %vm3875_vm6 = vweird.f32 %v3847_v59  ;;  %vm3885_vm3 = vweird.f32 %v3848_v20 }
 0x4b9   :  { %v3851_v58 = vmul.f32 %v4454_v55, %v3850_v61  ;;  %4459 = vrsqrt.f32 %v3846_v10  ;;  %vm3865_vm5 = vweird.f32 %v3846_v10 }
 0x4bb   :  { %v3852_v62 = vmul.f32 0.5, %v3851_v58 }
 0x4bd   :  { %v3853_v63 = vsub.f32 1.5, %v3852_v62  ;;  %v4456_v48 = vpop.eup %4455 }
 0x4be   :  { %v4458_v19 = vpop.eup %4457  ;;  %v3870_v35 = vmul.f32 %v4456_v48, %v3847_v59  ;;  %v3838_v53 = vpop.xlane.xlu1 %3837  ;;  %vm3876_vm11 = vweird.f32 %v4456_v48 }
 0x4bf   :  { %v3854_v7 = vmul.f32 %v4454_v55, %v3853_v63  ;;  %v3840_v40 = vpop.xlane.xlu2 %3839  ;;  %v4460_v51 = vpop.eup %4459  ;;  %v3880_v60 = vmul.f32 %v4458_v19, %v3848_v20  ;;  %vm3886_vm9 = vweird.f32 %v4458_v19  ;;  %vm3877_vm15 = vmor %vm3875_vm6, %vm3876_vm11 }
 0x4c0   :  { %v3830_v14 = vpop.xlane.xlu0 %3829  ;;  %v3860_v37 = vmul.f32 %v4460_v51, %v3846_v10  ;;  %v3871_v44 = vmul.f32 %v4456_v48, %v3870_v35  ;;  %vm3866_vm0 = vweird.f32 %v4460_v51  ;;  %vm3887_vm4 = vmor %vm3885_vm3, %vm3886_vm9 }
 0x4c1   :  { %v3858_v33 = vsel %vm3857_vm12, %v4454_v55, %v3854_v7  ;;  %v3881_v50 = vmul.f32 %v4458_v19, %v3880_v60  ;;  %vm3867_vm8 = vmor %vm3865_vm5, %vm3866_vm0 }
 0x4c2   :  { %v3889_v22 = vmul.f32 %v3858_v33, %v3824_v54  ;;  %v3861_v8 = vmul.f32 %v4460_v51, %v3860_v37  ;;  %v3872_v21 = vmul.f32 0.5, %v3871_v44 }
 0x4c3   :  { %v3882_v32 = vmul.f32 0.5, %v3881_v50 }
 0x4c4   :  { %v3893_v52 = vmul.f32 %v3889_v22, %v9231_v57  ;;  %v3862_v3 = vmul.f32 0.5, %v3861_v8  ;;  %v3873_v43 = vsub.f32 1.5, %v3872_v21  ;;  %v3901_v45 = vmul.f32 %v4569_v2, %v3889_v22 }
 0x4c5   :  { %v3883_v39 = vsub.f32 1.5, %v3882_v32 }
 0x4c6   :  { %v3897_v30 = vsub.f32 %v3838_v53, %v3893_v52  ;;  %v3863_v12 = vsub.f32 1.5, %v3862_v3  ;;  %v3874_v0 = vmul.f32 %v4456_v48, %v3873_v43  ;;  %v3844_v38 = vpop.xlane.xlu1 %3843 }
 0x4c7   :  { %v3919_v34 = vpop.xlane.xlu2 %3918  ;;  %v3884_v41 = vmul.f32 %v4458_v19, %v3883_v39 }
 0x4c8   :  { %v3905_v57 = vadd.f32 %v3901_v45, %v3897_v30  ;;  %v3842_v17 = vpop.xlane.xlu0 %3841  ;;  %v3864_v15 = vmul.f32 %v4460_v51, %v3863_v12  ;;  %v3878_v4 = vsel %vm3877_vm15, %v4456_v48, %v3874_v0 }
 0x4c9   :  { %v3891_v26 = vmul.f32 %v3878_v4, %v3828_v46  ;;  %v3888_v23 = vsel %vm3887_vm4, %v4458_v19, %v3884_v41 }
 0x4ca   :  { %3909 = vst.msk [vmem:[%s9547_s14 + $0x320] sm:$0xff] %vm10210_vm10, %v3905_v57  ;;  %v3868_v28 = vsel %vm3867_vm8, %v4460_v51, %v3864_v15  ;;  %v3892_v27 = vmul.f32 %v3888_v23, %v3830_v14 }
 0x4cb   :  { %v3890_v56 = vmul.f32 %v3868_v28, %v3826_v16  ;;  %v3895_v13 = vmul.f32 %v3891_v26, %v9263_v47  ;;  %v3903_v9 = vmul.f32 %v4570_v6, %v3891_v26 }
 0x4cc   :  { %v3896_v42 = vmul.f32 %v3892_v27, %v9255_v5  ;;  %v3904_v24 = vmul.f32 %v4571_v36, %v3892_v27  ;;  %v4572_v5 = vld [vmem:[%s9557_s10 + $0x8] sm:$0xff] }
 0x4cd   :  { %v3894_v1 = vmul.f32 %v3890_v56, %v9265_v49  ;;  %v3899_v18 = vsub.f32 %v3842_v17, %v3895_v13  ;;  %v3902_v47 = vmul.f32 %v4572_v5, %v3890_v56  ;;  %v9306_v49 = vmul.f32 0.020408163, %v3919_v34 }
 0x4ce   :  { %v3900_v29 = vsub.f32 %v3844_v38, %v3896_v42  ;;  %v3925_v25 = vpop.xlane.xlu1 %3924 }
 0x4cf   :  { %v3928_v31 = vpop.xlane.xlu2 %3927  ;;  %v3898_v11 = vsub.f32 %v3840_v40, %v3894_v1  ;;  %v3907_v55 = vadd.f32 %v3903_v9, %v3899_v18  ;;  %v9308_v46 = vmul.f32 0.020408163, %v3925_v25  ;;  %v3953_v58 = vmul.f32 %v9306_v49, %v9306_v49 }
 0x4d0   :  { %v3922_v59 = vpop.xlane.xlu0 %3921  ;;  %v3908_v20 = vadd.f32 %v3904_v24, %v3900_v29  ;;  %v9320_v22 = vmul.f32 0.020408163, %v3928_v31 }
 0x4d1   :  { %v3906_v61 = vadd.f32 %v3902_v47, %v3898_v11  ;;  %3911 = vst.msk [vmem:[%s9547_s14 + $0x330] sm:$0xff] %vm10207_vm1, %v3907_v55  ;;  %v9312_v62 = vmul.f32 0.020408163, %v3922_v59  ;;  %v3955_v35 = vmul.f32 %v9308_v46, %v9308_v46 }
 0x4d2   :  { %3912 = vst.msk [vmem:[%s9547_s14 + $0x338] sm:$0xff] %vm10211_vm7, %v3908_v20  ;;  %v3956_v52 = vmul.f32 %v9320_v22, %v9320_v22 }
 0x4d3   :  { %3910 = vst.msk [vmem:[%s9547_s14 + $0x328] sm:$0xff] %vm10212_vm14, %v3906_v61  ;;  %v3954_v53 = vmul.f32 %v9312_v62, %v9312_v62 }
 0x4d6   :  { %v3938_v10 = vpop.xlane.xlu1 %3937 }
 0x4d7   :  { %v3941_v16 = vpop.xlane.xlu2 %3940  ;;  %v3950_v48 = vmul.f32 0.020408163, %v3938_v10 }
 0x4d8   :  { %v3935_v54 = vpop.xlane.xlu0 %3934  ;;  %v3951_v7 = vmul.f32 0.020408163, %v3941_v16 }
 0x4d9   :  { %v3949_v63 = vmul.f32 0.020408163, %v3935_v54  ;;  %v3958_v51 = vsub.f32 %v3950_v48, %v3954_v53 }
 0x4da   :  { %v3959_v37 = vsub.f32 %v3951_v7, %v3955_v35 }
 0x4db   :  { %v3957_v19 = vsub.f32 %v3949_v63, %v3953_v58  ;;  %v3962_v50 = vmax.f32 %v3958_v51, 0.0 }
 0x4dc   :  { %v3963_v8 = vmax.f32 %v3959_v37, 0.0 }
 0x4dd   :  { %v3961_v40 = vmax.f32 %v3957_v19, 0.0  ;;  %v9327_v32 = vadd.f32 1e-05, %v3962_v50 }
 0x4de   :  { %v4070_v60 = vpop.xlane.xlu1 %4069  ;;  %v9329_v2 = vadd.f32 1e-05, %v3963_v8 }
 0x4df   :  { %v4073_v14 = vpop.xlane.xlu2 %4072  ;;  %v9318_v44 = vadd.f32 1e-05, %v3961_v40  ;;  %v9343_v26 = vmul.f32 0.020408163, %v4070_v60  ;;  %vm4013_vm15 = vweird.f32 %v9327_v32 }
 0x4e0   :  { %v4067_v33 = vpop.xlane.xlu0 %4066  ;;  %v9336_v57 = vmul.f32 0.020408163, %v4073_v14  ;;  %vm4023_vm3 = vweird.f32 %v9329_v2 }
 0x4e1   :  { %4461 = vrsqrt.f32 %v9318_v44  ;;  %v9323_v21 = vmul.f32 0.020408163, %v4067_v33  ;;  %v4102_v36 = vmul.f32 %v9343_v26, %v9343_v26  ;;  %vm4003_vm13 = vweird.f32 %v9318_v44 }
 0x4e2   :  { %4463 = vrsqrt.f32 %v9327_v32  ;;  %v4103_v28 = vmul.f32 %v9336_v57, %v9336_v57 }
 0x4e3   :  { %v4101_v45 = vmul.f32 %v9323_v21, %v9323_v21  ;;  %4465 = vrsqrt.f32 %v9329_v2 }
 0x4e6   :  { %v3944_v3 = vpop.xlane.xlu1 %3943 }
 0x4e7   :  { %v4083_v43 = vpop.xlane.xlu2 %4082  ;;  %v3952_v30 = vmul.f32 0.020408163, %v3944_v3  ;;  %v9333_v0 = vpop.eup %4461 }
 0x4e8   :  { %v4097_v39 = vmul.f32 0.020408163, %v4083_v43  ;;  %v4076_v12 = vpop.xlane.xlu0 %4075  ;;  %v3998_v4 = vmul.f32 %v9333_v0, %v9318_v44  ;;  %v9354_v18 = vpop.eup %4463  ;;  %vm4004_vm2 = vweird.f32 %v9333_v0 }
 0x4e9   :  { %v3960_v38 = vsub.f32 %v3952_v30, %v3956_v52  ;;  %v9339_v15 = vmul.f32 0.020408163, %v4076_v12  ;;  %v9359_v25 = vpop.eup %4465  ;;  %v4008_v11 = vmul.f32 %v9354_v18, %v9327_v32  ;;  %vm4005_vm12 = vmor %vm4003_vm13, %vm4004_vm2  ;;  %vm4014_vm9 = vweird.f32 %v9354_v18 }
 0x4ea   :  { %v4105_v34 = vsub.f32 %v4097_v39, %v4101_v45  ;;  %v3999_v29 = vmul.f32 %v9333_v0, %v3998_v4  ;;  %v4018_v20 = vmul.f32 %v9359_v25, %v9329_v2  ;;  %vm4024_vm0 = vweird.f32 %v9359_v25  ;;  %vm4015_vm4 = vmor %vm4013_vm15, %vm4014_vm9 }
 0x4eb   :  { %v3964_v41 = vmax.f32 %v3960_v38, 0.0  ;;  %v4104_v42 = vmul.f32 %v9339_v15, %v9339_v15  ;;  %v4009_v7 = vmul.f32 %v9354_v18, %v4008_v11  ;;  %vm4025_vm8 = vmor %vm4023_vm3, %vm4024_vm0 }
 0x4ec   :  { %v4109_v17 = vmax.f32 %v4105_v34, 0.0  ;;  %v4000_v10 = vmul.f32 0.5, %v3999_v29  ;;  %v4019_v51 = vmul.f32 %v9359_v25, %v4018_v20  ;;  %vm10221_vm15 = vmmov %vm10212_vm14 }
 0x4ed   :  { %v9345_v23 = vadd.f32 1e-05, %v3964_v41  ;;  %v4010_v33 = vmul.f32 0.5, %v4009_v7 }
 0x4ee   :  { %v9349_v27 = vadd.f32 1e-05, %v4109_v17  ;;  %v4089_v56 = vpop.xlane.xlu1 %4088  ;;  %v4001_v60 = vsub.f32 1.5, %v4000_v10  ;;  %v4020_v50 = vmul.f32 0.5, %v4019_v51 }
 0x4ef   :  { %v4092_v13 = vpop.xlane.xlu2 %4091  ;;  %4467 = vrsqrt.f32 %v9345_v23  ;;  %v4099_v6 = vmul.f32 0.020408163, %v4089_v56  ;;  %v4011_v34 = vsub.f32 1.5, %v4010_v33  ;;  %vm4033_vm6 = vweird.f32 %v9345_v23 }
 0x4f0   :  { %v4100_v9 = vmul.f32 0.020408163, %v4092_v13  ;;  %v4086_v1 = vpop.xlane.xlu0 %4085  ;;  %4469 = vrsqrt.f32 %v9349_v27  ;;  %v4002_v8 = vmul.f32 %v9333_v0, %v4001_v60 }
 0x4f1   :  { %v4098_v24 = vmul.f32 0.020408163, %v4086_v1  ;;  %v4107_v31 = vsub.f32 %v4099_v6, %v4103_v28  ;;  %v4021_v28 = vsub.f32 1.5, %v4020_v50 }
 0x4f2   :  { %v4108_v5 = vsub.f32 %v4100_v9, %v4104_v42  ;;  %v4006_v56 = vsel %vm4005_vm12, %v9333_v0, %v4002_v8 }
 0x4f3   :  { %v4106_v47 = vsub.f32 %v4098_v24, %v4102_v36  ;;  %v4111_v55 = vmax.f32 %v4107_v31, 0.0  ;;  %v4012_v36 = vmul.f32 %v9354_v18, %v4011_v34  ;;  %v4022_v0 = vmul.f32 %v9359_v25, %v4021_v28  ;;  %v4577_v31 = vld [vmem:[%s9559_s12 + $0x8] sm:$0xff] }
 0x4f4   :  { %v4112_v59 = vmax.f32 %v4108_v5, 0.0 }
 0x4f5   :  { %v4110_v61 = vmax.f32 %v4106_v47, 0.0  ;;  %v9366_v16 = vpop.eup %4467  ;;  %v9368_v54 = vadd.f32 1e-05, %v4111_v55  ;;  %v4016_v2 = vsel %vm4015_vm4, %v9354_v18, %v4012_v36  ;;  %v4026_v7 = vsel %vm4025_vm8, %v9359_v25, %v4022_v0 }
 0x4f6   :  { %v9370_v58 = vadd.f32 1e-05, %v4112_v59  ;;  %v4028_v63 = vmul.f32 %v9366_v16, %v9345_v23  ;;  %v9376_v19 = vpop.xlane.xlu1 %3973  ;;  %v9382_v40 = vpop.eup %4469  ;;  %vm4034_vm11 = vweird.f32 %v9366_v16 }
 0x4f7   :  { %v9374_v48 = vadd.f32 1e-05, %v4110_v61  ;;  %v9378_v35 = vpop.xlane.xlu2 %3975  ;;  %4471 = vrsqrt.f32 %v9368_v54  ;;  %v4146_v37 = vmul.f32 %v9382_v40, %v9349_v27  ;;  %vm9422_vm5 = vmor %vm4033_vm6, %vm4034_vm11  ;;  %vm4152_vm7 = vweird.f32 %v9382_v40 }
 0x4f8   :  { %v3972_v53 = vpop.xlane.xlu0 %3971  ;;  %4473 = vrsqrt.f32 %v9370_v58  ;;  %v4029_v14 = vmul.f32 %v9366_v16, %v4028_v63  ;;  %vm4171_vm2 = vweird.f32 %v9368_v54  ;;  %vm4151_vm11 = vweird.f32 %v9349_v27 }
 0x4f9   :  { %4475 = vrsqrt.f32 %v9374_v48  ;;  %v4147_v41 = vmul.f32 %v9382_v40, %v4146_v37  ;;  %v4037_v13 = vmul.f32 %v4006_v56, %v3972_v53  ;;  %v4039_v53 = vmul.f32 %v4026_v7, %v9378_v35  ;;  %vm9468_vm0 = vmor %vm4151_vm11, %vm4152_vm7 }
 0x4fa   :  { %v4030_v52 = vmul.f32 0.5, %v4029_v14  ;;  %vm4161_vm13 = vweird.f32 %v9374_v48  ;;  %vm4181_vm3 = vweird.f32 %v9370_v58 }
 0x4fb   :  { %v4148_v24 = vmul.f32 0.5, %v4147_v41  ;;  %v4041_v5 = vmul.f32 %v4037_v13, %v9306_v49  ;;  %v4573_v49 = vld [vmem:[%s9558_s11] sm:$0xff]  ;;  %v4043_v8 = vmul.f32 %v4039_v53, %v9308_v46 }
 0x4fc   :  { %v4031_v12 = vsub.f32 1.5, %v4030_v52  ;;  %v4049_v20 = vmul.f32 %v4573_v49, %v4037_v13 }
 0x4fd   :  { %v9392_v3 = vpop.eup %4471  ;;  %v4149_v61 = vsub.f32 1.5, %v4148_v24 }
 0x4fe   :  { %v9394_v43 = vpop.eup %4473  ;;  %v4166_v45 = vmul.f32 %v9392_v3, %v9368_v54  ;;  %v9399_v30 = vpop.xlane.xlu1 %4119  ;;  %v4032_v9 = vmul.f32 %v9366_v16, %v4031_v12  ;;  %vm4172_vm10 = vweird.f32 %v9392_v3 }
 0x4ff   :  { %v9401_v39 = vpop.xlane.xlu2 %4121  ;;  %v9403_v38 = vpop.eup %4475  ;;  %v4176_v42 = vmul.f32 %v9394_v43, %v9370_v58  ;;  %v4150_v33 = vmul.f32 %v9382_v40, %v4149_v61  ;;  %vm9454_vm12 = vmor %vm4171_vm2, %vm4172_vm10  ;;  %vm4182_vm6 = vweird.f32 %v9394_v43 }
 0x500   :  { %v3978_v17 = vpop.xlane.xlu0 %3977  ;;  %v4156_v4 = vmul.f32 %v9403_v38, %v9374_v48  ;;  %v4167_v44 = vmul.f32 %v9392_v3, %v4166_v45  ;;  %v4036_v11 = vsel %vm9422_vm5, %v9366_v16, %v4032_v9  ;;  %v4038_v16 = vmul.f32 %v4016_v2, %v9376_v19  ;;  %v4574_v19 = vld [vmem:[%s9558_s11 + $0x10] sm:$0xff]  ;;  %vm10222_vm5 = vmmov %vm10212_vm14 }
 0x501   :  { %v4177_v23 = vmul.f32 %v9394_v43, %v4176_v42  ;;  %v4040_v51 = vmul.f32 %v4036_v11, %v3978_v17  ;;  %vm4162_vm1 = vweird.f32 %v9403_v38  ;;  %v4051_v35 = vmul.f32 %v4574_v19, %v4039_v53  ;;  %vm9501_vm4 = vmor %vm4181_vm3, %vm4182_vm6 }
 0x502   :  { %v4157_v6 = vmul.f32 %v9403_v38, %v4156_v4  ;;  %v4168_v1 = vmul.f32 0.5, %v4167_v44  ;;  %vm9462_vm9 = vmor %vm4161_vm13, %vm4162_vm1  ;;  %v4042_v41 = vmul.f32 %v4038_v16, %v9312_v62  ;;  %v4154_v46 = vsel %vm9468_vm0, %v9382_v40, %v4150_v33 }
 0x503   :  { %v4178_v14 = vmul.f32 0.5, %v4177_v23  ;;  %v4044_v54 = vmul.f32 %v4040_v51, %v9320_v22  ;;  %v4575_v22 = vld [vmem:[%s9558_s11 + $0x18] sm:$0xff]  ;;  %v4185_v40 = vmul.f32 %v4154_v46, %v9399_v30  ;;  %vm10225_vm8 = vmmov %vm10222_vm5 }
 0x504   :  { %v4158_v29 = vmul.f32 0.5, %v4157_v6  ;;  %v4169_v32 = vsub.f32 1.5, %v4168_v1  ;;  %v4052_v17 = vmul.f32 %v4575_v22, %v4040_v51  ;;  %vm10226_vm10 = vmmov %vm10222_vm5 }
 0x505   :  { %v4179_v45 = vsub.f32 1.5, %v4178_v14  ;;  %vm10227_vm1 = vmmov %vm10222_vm5 }
 0x506   :  { %v4159_v47 = vsub.f32 1.5, %v4158_v29  ;;  %v9430_v55 = vpop.xlane.xlu1 %4125  ;;  %v4170_v37 = vmul.f32 %v9392_v3, %v4169_v32  ;;  %v4189_v29 = vmul.f32 %v4185_v40, %v9323_v21  ;;  %vm10228_vm7 = vmmov %vm10227_vm1 }
 0x507   :  { %v3986_v59 = vpop.xlane.xlu2 %3985  ;;  %v4180_v9 = vmul.f32 %v9394_v43, %v4179_v45 }
 0x508   :  { %v4045_v10 = vsub.f32 %v3986_v59, %v4041_v5  ;;  %v4124_v63 = vpop.xlane.xlu0 %4123  ;;  %v4160_v18 = vmul.f32 %v9403_v38, %v4159_v47  ;;  %v4174_v27 = vsel %vm9454_vm12, %v9392_v3, %v4170_v37  ;;  %v4576_v3 = vld [vmem:[%s9558_s11 + $0x8] sm:$0xff]  ;;  %v4578_v47 = vld [vmem:[%s9559_s12 + $0x10] sm:$0xff] }
 0x509   :  { %v4050_v56 = vmul.f32 %v4576_v3, %v4038_v16  ;;  %v4187_v13 = vmul.f32 %v4174_v27, %v4124_v63  ;;  %v4184_v58 = vsel %vm9501_vm4, %v9394_v43, %v4180_v9  ;;  %v4579_v43 = vld [vmem:[%s9559_s12] sm:$0xff] }
 0x50a   :  { %v4053_v60 = vadd.f32 %v4049_v20, %v4045_v10  ;;  %v4164_v52 = vsel %vm9462_vm9, %v9403_v38, %v4160_v18  ;;  %v4197_v59 = vmul.f32 %v4579_v43, %v4185_v40  ;;  %v4188_v49 = vmul.f32 %v4184_v58, %v9430_v55  ;;  %v4580_v55 = vld [vmem:[%s9559_s12 + $0x18] sm:$0xff] }
 0x50b   :  { %v4186_v62 = vmul.f32 %v4164_v52, %v9401_v39  ;;  %v4191_v36 = vmul.f32 %v4187_v13, %v9336_v57 }
 0x50c   :  { %4057 = vst.msk [vmem:[%s9547_s14 + $0x340] sm:$0xff] %vm10212_vm14, %v4053_v60  ;;  %v4192_v61 = vmul.f32 %v4188_v49, %v9339_v15  ;;  %v4200_v63 = vmul.f32 %v4580_v55, %v4188_v49  ;;  %vm10229_vm14 = vmmov %vm10227_vm1 }
 0x50d   :  { %v4190_v30 = vmul.f32 %v4186_v62, %v9343_v26  ;;  %v4198_v5 = vmul.f32 %v4577_v31, %v4186_v62  ;;  %v4199_v26 = vmul.f32 %v4578_v47, %v4187_v13 }
 0x50e   :  { %v3990_v12 = vpop.xlane.xlu1 %3989 }
 0x50f   :  { %v3992_v34 = vpop.xlane.xlu2 %3991  ;;  %v4047_v4 = vsub.f32 %v3990_v12, %v4043_v8 }
 0x510   :  { %v4048_v38 = vsub.f32 %v3992_v34, %v4044_v54  ;;  %v3988_v28 = vpop.xlane.xlu0 %3987 }
 0x511   :  { %v4046_v44 = vsub.f32 %v3988_v28, %v4042_v41  ;;  %v4055_v42 = vadd.f32 %v4051_v35, %v4047_v4 }
 0x512   :  { %v4056_v6 = vadd.f32 %v4052_v17, %v4048_v38 }
 0x513   :  { %v4054_v1 = vadd.f32 %v4050_v56, %v4046_v44  ;;  %4059 = vst.msk [vmem:[%s9547_s14 + $0x350] sm:$0xff] %vm10221_vm15, %v4055_v42 }
 0x514   :  { %4060 = vst.msk [vmem:[%s9547_s14 + $0x358] sm:$0xff] %vm10222_vm5, %v4056_v6 }
 0x515   :  { %4058 = vst.msk [vmem:[%s9547_s14 + $0x348] sm:$0xff] %vm10225_vm8, %v4054_v1 }
 0x516   :  { %v4136_v24 = vpop.xlane.xlu1 %4135 }
 0x517   :  { %v4138_v0 = vpop.xlane.xlu2 %4137  ;;  %v4194_v11 = vsub.f32 %v4136_v24, %v4190_v30 }
 0x518   :  { %v4195_v57 = vsub.f32 %v4138_v0, %v4191_v36  ;;  %v4134_v23 = vpop.xlane.xlu0 %4133 }
 0x519   :  { %v4193_v32 = vsub.f32 %v4134_v23, %v4189_v29  ;;  %v4202_v21 = vadd.f32 %v4198_v5, %v4194_v11 }
 0x51a   :  { %v4203_v2 = vadd.f32 %v4199_v26, %v4195_v57 }
 0x51b   :  { %v4201_v20 = vadd.f32 %v4197_v59, %v4193_v32  ;;  %4206 = vst.msk [vmem:[%s9547_s14 + $0x368] sm:$0xff] %vm10226_vm10, %v4202_v21 }
 0x51c   :  { %4207 = vst.msk [vmem:[%s9547_s14 + $0x370] sm:$0xff] %vm10227_vm1, %v4203_v2 }
 0x51d   :  { %4205 = vst.msk [vmem:[%s9547_s14 + $0x360] sm:$0xff] %vm10228_vm7, %v4201_v20 }
 0x520   :  { %v4140_v10 = vpop.xlane.xlu0 %4139 }
 0x521   :  { %v4196_v16 = vsub.f32 %v4140_v10, %v4192_v61 }
 0x523   :  { %v4204_v7 = vadd.f32 %v4200_v63, %v4196_v16 }
 0x525   :  { %4208 = vst.msk [vmem:[%s9547_s14 + $0x378] sm:$0xff] %vm10229_vm14, %v4204_v7 }

</bundles_post_ra>
